<compile_context>
chip_gen: v5e
topology: v5e:2x2
jax: 0.10.0
libtpu: 0.0.40
codegen_flags: <defaults>
</compile_context>

<pallas_src>
import functools

import jax
import jax.numpy as jnp
from jax.experimental import pallas as pl
from jax.experimental.pallas import tpu as pltpu

EPS = 1e-5
ACT_DTYPE = jnp.bfloat16
VMEM_LIMIT_BYTES = 64 * 1024 * 1024


# ------------------------------ Pallas kernels ------------------------------

def _mm_bn_kernel(x_ref, w_ref, s_ref, b_ref, *rest, relu, has_extra):
    # (TM, K) @ (K, Cout) on the MXU + folded-BN affine, optionally fused with a
    # second matmul branch ((TM, K2) @ (K2, Cout) + BN), then optional ReLU.
    if has_extra:
        x2_ref, w2_ref, s2_ref, b2_ref, o_ref = rest
    else:
        (o_ref,) = rest
    y = jnp.dot(x_ref[...], w_ref[...], preferred_element_type=jnp.float32)
    y = y * s_ref[...] + b_ref[...]
    if has_extra:
        y2 = jnp.dot(x2_ref[...], w2_ref[...], preferred_element_type=jnp.float32)
        y = y + y2 * s2_ref[...] + b2_ref[...]
    if relu:
        y = jnp.maximum(y, 0.0)
    o_ref[...] = y.astype(o_ref.dtype)


def _bottleneck_kernel(x_ref, w1_ref, s1_ref, b1_ref, w2_ref, s2_ref, b2_ref,
                       w3_ref, s3_ref, b3_ref, *rest, W, has_down):
    # Whole stride-1 Bottleneck for one image, intermediates never leave VMEM.
    #   x_ref : (1, H*W, Cin)  bf16
    #   w2_ref: (9, P, P)      tap order t = kh*3 + kw
    #   o_ref : (1, H*W, Co)
    #   apad  : ((H+2)*W + 2, P) scratch -- conv1 output written into a
    #           zero-padded, row-flattened layout (1 zero row top/bottom + one
    #           guard element each end) so every 3x3 tap is a contiguous slice.
    if has_down:
        wd_ref, sd_ref, bd_ref, o_ref, apad_ref = rest
    else:
        o_ref, apad_ref = rest
    M = o_ref.shape[1]
    P = w2_ref.shape[2]

    xm = x_ref[0]                                            # (M, Cin) bf16

    # --- conv1 (1x1) + bn1 + relu ---
    a = jnp.dot(xm, w1_ref[...], preferred_element_type=jnp.float32)
    a = jnp.maximum(a * s1_ref[...] + b1_ref[...], 0.0)

    # --- stage conv1 output into the padded flattened scratch ---
    pad_rows = W + 1
    apad_ref[0:pad_rows, :] = jnp.zeros((pad_rows, P), apad_ref.dtype)
    apad_ref[pad_rows + M:pad_rows + M + pad_rows, :] = jnp.zeros(
        (pad_rows, P), apad_ref.dtype)
    apad_ref[pad_rows:pad_rows + M, :] = a.astype(apad_ref.dtype)

    # --- conv2 (3x3, stride 1, pad 1) + bn2 + relu, direct from VMEM scratch ---
    col = jax.lax.broadcasted_iota(jnp.int32, (M, 1), 0) % W
    left_ok = col != 0            # kw==0 taps would read column -1 at ow==0
    right_ok = col != W - 1       # kw==2 taps would read column W  at ow==W-1
    acc = jnp.zeros((M, P), jnp.float32)
    for kh in range(3):
        for kw in range(3):
            off = kh * W + kw
            win = apad_ref[off:off + M, :]
            if kw == 0:
                win = jnp.where(left_ok, win, 0.0).astype(win.dtype)
            elif kw == 2:
                win = jnp.where(right_ok, win, 0.0).astype(win.dtype)
            acc = acc + jnp.dot(win, w2_ref[kh * 3 + kw],
                                preferred_element_type=jnp.float32)
    b = jnp.maximum(acc * s2_ref[...] + b2_ref[...], 0.0)

    # --- conv3 (1x1) + bn3 + residual (optionally downsampled) + relu ---
    y = jnp.dot(b.astype(ACT_DTYPE), w3_ref[...], preferred_element_type=jnp.float32)
    y = y * s3_ref[...] + b3_ref[...]
    if has_down:
        idn = jnp.dot(xm, wd_ref[...], preferred_element_type=jnp.float32)
        idn = idn * sd_ref[...] + bd_ref[...]
    else:
        idn = xm.astype(jnp.float32)
    o_ref[0] = jnp.maximum(y + idn, 0.0).astype(o_ref.dtype)


def _maxpool_kernel(p00_ref, p01_ref, p10_ref, p11_ref, o_ref):
    # 3x3 stride-2 pad-1 max pool (PyTorch semantics, even H/W) from the four
    # UNPADDED parity planes p_ab[i,j] = x[2i+a, 2j+b]; border windows are
    # clipped (equivalent to -inf padding), no padded copy in HBM.
    OH, OW = o_ref.shape[1], o_ref.shape[2]
    m = jnp.maximum(jnp.maximum(p00_ref[0], p01_ref[0]),
                    jnp.maximum(p10_ref[0], p11_ref[0]))
    o_ref[0] = m
    # left-neighbour taps (input col 2j-1), valid for j >= 1
    left = jnp.maximum(p01_ref[0, :, 0:OW - 1, :], p11_ref[0, :, 0:OW - 1, :])
    o_ref[0, :, 1:OW, :] = jnp.maximum(o_ref[0, :, 1:OW, :], left)
    # top-neighbour taps (input row 2i-1), valid for i >= 1
    top = jnp.maximum(p10_ref[0, 0:OH - 1, :, :], p11_ref[0, 0:OH - 1, :, :])
    o_ref[0, 1:OH, :, :] = jnp.maximum(o_ref[0, 1:OH, :, :], top)
    # top-left corner tap (input 2i-1, 2j-1)
    o_ref[0, 1:OH, 1:OW, :] = jnp.maximum(o_ref[0, 1:OH, 1:OW, :],
                                          p11_ref[0, 0:OH - 1, 0:OW - 1, :])


# ------------------------------ kernel wrappers ------------------------------

def _tile_m(M):
    # Bounded row tile (no divisor search): TM == M (allowed, full dim) for
    # small problems, else 512 with a pl.cdiv grid + masked boundary stores.
    return M if M <= 512 else 512


def matmul_bn(x, w_mat, scale, bias, *, relu, extra=None):
    """Row-tiled fused (M,K)@(K,Cout) + BN affine (+ optional second matmul
    branch for a fused downsample/residual) (+ReLU). bf16 in/out, f32 epilogue."""
    M, K = x.shape
    Cout = w_mat.shape[1]
    TM = _tile_m(M)
    has_extra = extra is not None
    args = [x.astype(ACT_DTYPE), w_mat.astype(ACT_DTYPE),
            scale.reshape(1, Cout).astype(jnp.float32),
            bias.reshape(1, Cout).astype(jnp.float32)]
    in_specs = [pl.BlockSpec((TM, K), lambda i: (i, 0)),
                pl.BlockSpec((K, Cout), lambda i: (0, 0)),
                pl.BlockSpec((1, Cout), lambda i: (0, 0)),
                pl.BlockSpec((1, Cout), lambda i: (0, 0))]
    flops = 2 * M * K * Cout
    bytes_accessed = 2 * (M * K + K * Cout + M * Cout) + 8 * Cout
    if has_extra:
        x2, w2_mat, s2, b2 = extra
        K2 = x2.shape[1]
        args += [x2.astype(ACT_DTYPE), w2_mat.astype(ACT_DTYPE),
                 s2.reshape(1, Cout).astype(jnp.float32),
                 b2.reshape(1, Cout).astype(jnp.float32)]
        in_specs += [pl.BlockSpec((TM, K2), lambda i: (i, 0)),
                     pl.BlockSpec((K2, Cout), lambda i: (0, 0)),
                     pl.BlockSpec((1, Cout), lambda i: (0, 0)),
                     pl.BlockSpec((1, Cout), lambda i: (0, 0))]
        flops += 2 * M * K2 * Cout
        bytes_accessed += 2 * (M * K2 + K2 * Cout)
    return pl.pallas_call(
        functools.partial(_mm_bn_kernel, relu=relu, has_extra=has_extra),
        grid=(pl.cdiv(M, TM),),
        in_specs=in_specs,
        out_specs=pl.BlockSpec((TM, Cout), lambda i: (i, 0)),
        out_shape=jax.ShapeDtypeStruct((M, Cout), ACT_DTYPE),
        compiler_params=pltpu.CompilerParams(
            dimension_semantics=("parallel",),
            vmem_limit_bytes=VMEM_LIMIT_BYTES),
        cost_estimate=pl.CostEstimate(flops=flops, transcendentals=0,
                                      bytes_accessed=bytes_accessed),
    )(*args)


def conv_im2col_bn(x, weight, scale, bias, *, stride, pad, relu):
    # Generic KxK conv via im2col + the tiled matmul kernel.  Only used for the
    # 7x7 stem (Cin=1, tiny) and the single 3x3 stride-2 conv in layer2 block0.
    N, H, W, Cin = x.shape
    Cout, _, KH, KW = weight.shape
    OH = (H + 2 * pad - KH) // stride + 1
    OW = (W + 2 * pad - KW) // stride + 1
    xp = jnp.pad(x.astype(ACT_DTYPE), ((0, 0), (pad, pad), (pad, pad), (0, 0)))
    patches = [xp[:, i:i + stride * OH:stride, j:j + stride * OW:stride, :]
               for i in range(KH) for j in range(KW)]
    p = jnp.concatenate(patches, axis=-1).reshape(N * OH * OW, KH * KW * Cin)
    w_mat = jnp.transpose(weight, (2, 3, 1, 0)).reshape(KH * KW * Cin, Cout)
    out = matmul_bn(p, w_mat, scale, bias, relu=relu)
    return out.reshape(N, OH, OW, Cout)


def maxpool_3x3_s2(x):
    # MaxPool2d(kernel_size=3, stride=2, padding=1) for even H, W.
    # TODO(synk): odd spatial sizes ((H+1)//2 outputs) are not handled.
    N, H, W, C = x.shape
    assert H % 2 == 0 and W % 2 == 0
    OH, OW = H // 2, W // 2
    planes = [x[:, a::2, b::2, :] for a in (0, 1) for b in (0, 1)]  # p00,p01,p10,p11
    spec = pl.BlockSpec((1, OH, OW, C), lambda n: (n, 0, 0, 0))
    return pl.pallas_call(
        _maxpool_kernel,
        grid=(N,),
        in_specs=[spec, spec, spec, spec],
        out_specs=spec,
        out_shape=jax.ShapeDtypeStruct((N, OH, OW, C), x.dtype),
        compiler_params=pltpu.CompilerParams(
            dimension_semantics=("parallel",),
            vmem_limit_bytes=VMEM_LIMIT_BYTES),
    )(*planes)


def bottleneck_fused(x, blk):
    """One stride-1 Bottleneck (optionally with a stride-1 1x1 downsample) as a
    single fused pallas_call per image."""
    N, H, W, Cin = x.shape
    P = blk['conv1_w'].shape[0]
    Co = blk['conv3_w'].shape[0]
    M = H * W
    has_down = 'down_w' in blk

    def f32row(v, C):
        return v.reshape(1, C).astype(jnp.float32)

    w1 = blk['conv1_w'].reshape(P, Cin).T.astype(ACT_DTYPE)
    w2 = jnp.transpose(blk['conv2_w'], (2, 3, 1, 0)).reshape(9, P, P).astype(ACT_DTYPE)
    w3 = blk['conv3_w'].reshape(Co, P).T.astype(ACT_DTYPE)
    s1, b1 = blk['bn1']
    s2, b2 = blk['bn2']
    s3, b3 = blk['bn3']

    args = [x.reshape(N, M, Cin).astype(ACT_DTYPE),
            w1, f32row(s1, P), f32row(b1, P),
            w2, f32row(s2, P), f32row(b2, P),
            w3, f32row(s3, Co), f32row(b3, Co)]
    in_specs = [pl.BlockSpec((1, M, Cin), lambda n: (n, 0, 0)),
                pl.BlockSpec((Cin, P), lambda n: (0, 0)),
                pl.BlockSpec((1, P), lambda n: (0, 0)),
                pl.BlockSpec((1, P), lambda n: (0, 0)),
                pl.BlockSpec((9, P, P), lambda n: (0, 0, 0)),
                pl.BlockSpec((1, P), lambda n: (0, 0)),
                pl.BlockSpec((1, P), lambda n: (0, 0)),
                pl.BlockSpec((P, Co), lambda n: (0, 0)),
                pl.BlockSpec((1, Co), lambda n: (0, 0)),
                pl.BlockSpec((1, Co), lambda n: (0, 0))]
    flops = 2 * N * M * (Cin * P + 9 * P * P + P * Co)
    if has_down:
        wd = blk['down_w'].reshape(Co, Cin).T.astype(ACT_DTYPE)
        sd, bd = blk['down_bn']
        args += [wd, f32row(sd, Co), f32row(bd, Co)]
        in_specs += [pl.BlockSpec((Cin, Co), lambda n: (0, 0)),
                     pl.BlockSpec((1, Co), lambda n: (0, 0)),
                     pl.BlockSpec((1, Co), lambda n: (0, 0))]
        flops += 2 * N * M * Cin * Co

    out = pl.pallas_call(
        functools.partial(_bottleneck_kernel, W=W, has_down=has_down),
        grid=(N,),
        in_specs=in_specs,
        out_specs=pl.BlockSpec((1, M, Co), lambda n: (n, 0, 0)),
        out_shape=jax.ShapeDtypeStruct((N, M, Co), ACT_DTYPE),
        scratch_shapes=[pltpu.VMEM(((H + 2) * W + 2, P), ACT_DTYPE)],
        compiler_params=pltpu.CompilerParams(
            dimension_semantics=("parallel",),
            vmem_limit_bytes=VMEM_LIMIT_BYTES),
        cost_estimate=pl.CostEstimate(
            flops=flops, transcendentals=0,
            bytes_accessed=2 * N * M * (Cin + Co)),
    )(*args)
    return out.reshape(N, H, W, Co)


def bottleneck_s2(x, blk):
    """layer2 block0: conv2 has stride 2, downsample is 1x1 stride 2.
    conv3 + bn3 + downsample + bn + add + relu are fused into one call."""
    N, H, W, Cin = x.shape
    P = blk['conv1_w'].shape[0]
    Co = blk['conv3_w'].shape[0]
    OH, OW = H // 2, W // 2
    # conv1 (1x1, stride 1) + bn + relu
    a = matmul_bn(x.reshape(N * H * W, Cin), blk['conv1_w'].reshape(P, Cin).T,
                  *blk['bn1'], relu=True).reshape(N, H, W, P)
    # conv2 (3x3, stride 2, pad 1) + bn + relu
    # TODO(synk): direct stride-2 3x3 kernel to avoid this block's im2col patch
    # tensor in HBM (single block in the network).
    b = conv_im2col_bn(a, blk['conv2_w'], *blk['bn2'], stride=2, pad=1, relu=True)
    # conv3 + bn3 + downsample(1x1 s2) + bn + residual add + relu, one call
    xs = x[:, ::2, ::2, :].reshape(N * OH * OW, Cin)
    y = matmul_bn(b.reshape(N * OH * OW, P), blk['conv3_w'].reshape(Co, P).T,
                  *blk['bn3'], relu=True,
                  extra=(xs, blk['down_w'].reshape(Co, Cin).T, *blk['down_bn']))
    return y.reshape(N, OH, OW, Co)


# ------------------------------ parameters ------------------------------

def _fold_bn(gamma, beta, mean, var):
    scale = gamma / jnp.sqrt(var + EPS)
    bias = beta - mean * scale
    return scale, bias


def _bn_params(key, C):
    k1, k2, k3, k4 = jax.random.split(key, 4)
    gamma = jax.random.uniform(k1, (C,), jnp.float32, 0.5, 1.5)
    beta = 0.1 * jax.random.normal(k2, (C,), jnp.float32)
    mean = 0.1 * jax.random.normal(k3, (C,), jnp.float32)
    var = jax.random.uniform(k4, (C,), jnp.float32, 0.5, 1.5)
    return _fold_bn(gamma, beta, mean, var)


def _conv_w(key, cout, cin, kh, kw):
    fan_in = cin * kh * kw
    return jax.random.normal(key, (cout, cin, kh, kw), jnp.float32) * jnp.sqrt(2.0 / fan_in)


def init_params(key):
    keys = iter(jax.random.split(key, 128))
    p = {}
    # ExtractorResnet152.__init__: conv1.weight = conv1.weight.sum(dim=1).unsqueeze(1)
    w_rgb = _conv_w(next(keys), 64, 3, 7, 7)
    p['conv1_w'] = jnp.sum(w_rgb, axis=1, keepdims=True)      # (64, 1, 7, 7)
    p['bn1'] = _bn_params(next(keys), 64)

    def bottleneck_params(cin, planes, downsample):
        blk = {
            'conv1_w': _conv_w(next(keys), planes, cin, 1, 1),
            'bn1': _bn_params(next(keys), planes),
            'conv2_w': _conv_w(next(keys), planes, planes, 3, 3),
            'bn2': _bn_params(next(keys), planes),
            'conv3_w': _conv_w(next(keys), 4 * planes, planes, 1, 1),
            'bn3': _bn_params(next(keys), 4 * planes),
        }
        if downsample:
            blk['down_w'] = _conv_w(next(keys), 4 * planes, cin, 1, 1)
            blk['down_bn'] = _bn_params(next(keys), 4 * planes)
        return blk

    # layer1: 3 Bottlenecks, planes=64 (block0: 1x1 downsample 64->256, stride 1)
    p['layer1'] = [bottleneck_params(64, 64, True)] + \
                  [bottleneck_params(256, 64, False) for _ in range(2)]
    # layer2: 8 Bottlenecks, planes=128 (block0: stride 2, downsample 256->512)
    p['layer2'] = [bottleneck_params(256, 128, True)] + \
                  [bottleneck_params(512, 128, False) for _ in range(7)]
    return p


# ------------------------------ forward pass ------------------------------

def extractor_resnet152_forward(x_nchw, p):
    # TODO(synk): BatchNorm is implemented in inference mode (folded running
    # stats); PyTorch-default training-mode batch statistics are not reproduced.
    x = jnp.transpose(x_nchw, (0, 2, 3, 1)).astype(ACT_DTYPE)   # NCHW -> NHWC, bf16
    # stem: conv 7x7 s2 + bn + relu, then maxpool 3x3 s2
    x = conv_im2col_bn(x, p['conv1_w'], *p['bn1'], stride=2, pad=3, relu=True)
    x = maxpool_3x3_s2(x)
    # layer1 (all stride 1) -- fully fused bottlenecks
    for blk in p['layer1']:
        x = bottleneck_fused(x, blk)
    # layer2: block0 has stride 2, rest are fully fused stride-1 bottlenecks
    x = bottleneck_s2(x, p['layer2'][0])
    for blk in p['layer2'][1:]:
        x = bottleneck_fused(x, blk)
    return jnp.transpose(x, (0, 3, 1, 2)).astype(jnp.float32)   # NHWC -> NCHW


if __name__ == "__main__":
    key = jax.random.PRNGKey(0)
    kx, kp = jax.random.split(key)
    # single-channel input (conv1 weight was summed over RGB -> 1 input channel)
    x = jax.random.normal(kx, (2, 1, 32, 32), jnp.float32)
    params = init_params(kp)

    fwd = jax.jit(extractor_resnet152_forward)
    y = fwd(x, params)
    jax.block_until_ready(y)
    assert y.shape == (2, 512, 4, 4), y.shape
    assert bool(jnp.all(jnp.isfinite(y)))
    print("KERNEL_OK")
</pallas_src>

<mosaic_0001>
module attributes {stable_mosaic.version = 11 : i64} {
  func.func @_mm_bn_kernel(%arg0: i32, %arg1: memref<512x49xbf16, #tpu.memory_space<vmem>>, %arg2: memref<49x64xbf16, #tpu.memory_space<vmem>>, %arg3: memref<1x64xf32, #tpu.memory_space<vmem>>, %arg4: memref<1x64xf32, #tpu.memory_space<vmem>>, %arg5: memref<512x64xbf16, #tpu.memory_space<vmem>>) attributes {dimension_semantics = [#tpu.dimension_semantics<parallel>], iteration_bounds = array<i64: 1>, scalar_prefetch = 0 : i64, scratch_operands = 0 : i64, tpu.core_type = #tpu.core_type<tc>, window_params = [{transform_indices = @transform_0, window_bounds = array<i64: 512, 49>}, {pipeline_mode = #tpu.pipeline_mode<synchronous>, transform_indices = @transform_1, window_bounds = array<i64: 49, 64>}, {pipeline_mode = #tpu.pipeline_mode<synchronous>, transform_indices = @transform_2, window_bounds = array<i64: 1, 64>}, {pipeline_mode = #tpu.pipeline_mode<synchronous>, transform_indices = @transform_3, window_bounds = array<i64: 1, 64>}, {transform_indices = @transform_4, window_bounds = array<i64: 512, 64>}]} {
    %c0 = arith.constant 0 : index
    %c0_0 = arith.constant 0 : index
    %0 = vector.load %arg1[%c0, %c0_0] : memref<512x49xbf16, #tpu.memory_space<vmem>>, vector<512x49xbf16>
    %c0_1 = arith.constant 0 : index
    %c0_2 = arith.constant 0 : index
    %1 = vector.load %arg2[%c0_1, %c0_2] : memref<49x64xbf16, #tpu.memory_space<vmem>>, vector<49x64xbf16>
    %cst = arith.constant dense<0.000000e+00> : vector<512x64xf32>
    %2 = tpu.matmul %0, %1, %cst {dimension_numbers = #tpu.dot_dimension_numbers<[1], [0], [0], [1], [0, 0, 1, 1], [], []>} : vector<512x49xbf16>, vector<49x64xbf16>, vector<512x64xf32> -> vector<512x64xf32>
    %c0_3 = arith.constant 0 : index
    %c0_4 = arith.constant 0 : index
    %3 = vector.load %arg3[%c0_3, %c0_4] : memref<1x64xf32, #tpu.memory_space<vmem>>, vector<1x64xf32>
    %4 = vector.broadcast %3 : vector<1x64xf32> to vector<512x64xf32>
    %5 = arith.mulf %2, %4 : vector<512x64xf32>
    %c0_5 = arith.constant 0 : index
    %c0_6 = arith.constant 0 : index
    %6 = vector.load %arg4[%c0_5, %c0_6] : memref<1x64xf32, #tpu.memory_space<vmem>>, vector<1x64xf32>
    %7 = vector.broadcast %6 : vector<1x64xf32> to vector<512x64xf32>
    %8 = arith.addf %5, %7 : vector<512x64xf32>
    %cst_7 = arith.constant 0.000000e+00 : f32
    %9 = vector.broadcast %cst_7 : f32 to vector<512x64xf32>
    %10 = arith.maximumf %8, %9 : vector<512x64xf32>
    %11 = arith.truncf %10 : vector<512x64xf32> to vector<512x64xbf16>
    %c0_8 = arith.constant 0 : index
    %c0_9 = arith.constant 0 : index
    %12 = vector.load %arg5[%c0_8, %c0_9] : memref<512x64xbf16, #tpu.memory_space<vmem>>, vector<512x64xbf16>
    tpu.vector_store %arg5[%c0_8, %c0_9], %11 {strides = array<i32>} : memref<512x64xbf16, #tpu.memory_space<vmem>>, vector<512x64xbf16>,
    return
  }
  func.func @transform_0(%arg0: i32) -> (i32, i32) {
    %c0_i32 = arith.constant 0 : i32
    %c0_i32_0 = arith.constant 0 : i32
    return %arg0, %c0_i32 : i32, i32
  }
  func.func @transform_1(%arg0: i32) -> (i32, i32) {
    %c0_i32 = arith.constant 0 : i32
    %c0_i32_0 = arith.constant 0 : i32
    %c0_i32_1 = arith.constant 0 : i32
    return %c0_i32, %c0_i32_0 : i32, i32
  }
  func.func @transform_2(%arg0: i32) -> (i32, i32) {
    %c0_i32 = arith.constant 0 : i32
    %c0_i32_0 = arith.constant 0 : i32
    %c0_i32_1 = arith.constant 0 : i32
    return %c0_i32, %c0_i32_0 : i32, i32
  }
  func.func @transform_3(%arg0: i32) -> (i32, i32) {
    %c0_i32 = arith.constant 0 : i32
    %c0_i32_0 = arith.constant 0 : i32
    %c0_i32_1 = arith.constant 0 : i32
    return %c0_i32, %c0_i32_0 : i32, i32
  }
  func.func @transform_4(%arg0: i32) -> (i32, i32) {
    %c0_i32 = arith.constant 0 : i32
    %c0_i32_0 = arith.constant 0 : i32
    return %arg0, %c0_i32 : i32, i32
  }
}

module attributes {stable_mosaic.version = 11 : i64} {
  func.func @_maxpool_kernel(%arg0: i32, %arg1: memref<1x8x8x64xbf16, #tpu.memory_space<vmem>>, %arg2: memref<1x8x8x64xbf16, #tpu.memory_space<vmem>>, %arg3: memref<1x8x8x64xbf16, #tpu.memory_space<vmem>>, %arg4: memref<1x8x8x64xbf16, #tpu.memory_space<vmem>>, %arg5: memref<1x8x8x64xbf16, #tpu.memory_space<vmem>>) attributes {dimension_semantics = [#tpu.dimension_semantics<parallel>], iteration_bounds = array<i64: 2>, scalar_prefetch = 0 : i64, scratch_operands = 0 : i64, tpu.core_type = #tpu.core_type<tc>, window_params = [{transform_indices = @transform_0, window_bounds = array<i64: 1, 8, 8, 64>}, {transform_indices = @transform_1, window_bounds = array<i64: 1, 8, 8, 64>}, {transform_indices = @transform_2, window_bounds = array<i64: 1, 8, 8, 64>}, {transform_indices = @transform_3, window_bounds = array<i64: 1, 8, 8, 64>}, {transform_indices = @transform_4, window_bounds = array<i64: 1, 8, 8, 64>}]} {
    %c0 = arith.constant 0 : index
    %c0_0 = arith.constant 0 : index
    %c0_1 = arith.constant 0 : index
    %c0_2 = arith.constant 0 : index
    %0 = vector.load %arg1[%c0, %c0_0, %c0_1, %c0_2] : memref<1x8x8x64xbf16, #tpu.memory_space<vmem>>, vector<1x8x8x64xbf16>
    %1 = vector.shape_cast %0 : vector<1x8x8x64xbf16> to vector<8x8x64xbf16>
    %c0_3 = arith.constant 0 : index
    %c0_4 = arith.constant 0 : index
    %c0_5 = arith.constant 0 : index
    %c0_6 = arith.constant 0 : index
    %2 = vector.load %arg2[%c0_3, %c0_4, %c0_5, %c0_6] : memref<1x8x8x64xbf16, #tpu.memory_space<vmem>>, vector<1x8x8x64xbf16>
    %3 = vector.shape_cast %2 : vector<1x8x8x64xbf16> to vector<8x8x64xbf16>
    %4 = arith.maximumf %1, %3 : vector<8x8x64xbf16>
    %c0_7 = arith.constant 0 : index
    %c0_8 = arith.constant 0 : index
    %c0_9 = arith.constant 0 : index
    %c0_10 = arith.constant 0 : index
    %5 = vector.load %arg3[%c0_7, %c0_8, %c0_9, %c0_10] : memref<1x8x8x64xbf16, #tpu.memory_space<vmem>>, vector<1x8x8x64xbf16>
    %6 = vector.shape_cast %5 : vector<1x8x8x64xbf16> to vector<8x8x64xbf16>
    %c0_11 = arith.constant 0 : index
    %c0_12 = arith.constant 0 : index
    %c0_13 = arith.constant 0 : index
    %c0_14 = arith.constant 0 : index
    %7 = vector.load %arg4[%c0_11, %c0_12, %c0_13, %c0_14] : memref<1x8x8x64xbf16, #tpu.memory_space<vmem>>, vector<1x8x8x64xbf16>
    %8 = vector.shape_cast %7 : vector<1x8x8x64xbf16> to vector<8x8x64xbf16>
    %9 = arith.maximumf %6, %8 : vector<8x8x64xbf16>
    %10 = arith.maximumf %4, %9 : vector<8x8x64xbf16>
    %c0_15 = arith.constant 0 : index
    %c0_16 = arith.constant 0 : index
    %c0_17 = arith.constant 0 : index
    %c0_18 = arith.constant 0 : index
    %11 = vector.load %arg5[%c0_15, %c0_16, %c0_17, %c0_18] : memref<1x8x8x64xbf16, #tpu.memory_space<vmem>>, vector<1x8x8x64xbf16>
    %12 = vector.shape_cast %11 : vector<1x8x8x64xbf16> to vector<8x8x64xbf16>
    %13 = vector.shape_cast %10 : vector<8x8x64xbf16> to vector<1x8x8x64xbf16>
    tpu.vector_store %arg5[%c0_15, %c0_16, %c0_17, %c0_18], %13 {strides = array<i32>} : memref<1x8x8x64xbf16, #tpu.memory_space<vmem>>, vector<1x8x8x64xbf16>,
    %c0_19 = arith.constant 0 : index
    %c0_20 = arith.constant 0 : index
    %c0_21 = arith.constant 0 : index
    %c0_22 = arith.constant 0 : index
    %14 = vector.load %arg2[%c0_19, %c0_20, %c0_21, %c0_22] : memref<1x8x8x64xbf16, #tpu.memory_space<vmem>>, vector<1x8x7x64xbf16>
    %15 = vector.shape_cast %14 : vector<1x8x7x64xbf16> to vector<8x7x64xbf16>
    %c0_23 = arith.constant 0 : index
    %c0_24 = arith.constant 0 : index
    %c0_25 = arith.constant 0 : index
    %c0_26 = arith.constant 0 : index
    %16 = vector.load %arg4[%c0_23, %c0_24, %c0_25, %c0_26] : memref<1x8x8x64xbf16, #tpu.memory_space<vmem>>, vector<1x8x7x64xbf16>
    %17 = vector.shape_cast %16 : vector<1x8x7x64xbf16> to vector<8x7x64xbf16>
    %18 = arith.maximumf %15, %17 : vector<8x7x64xbf16>
    %c0_27 = arith.constant 0 : index
    %c0_28 = arith.constant 0 : index
    %c1 = arith.constant 1 : index
    %c0_29 = arith.constant 0 : index
    %19 = vector.load %arg5[%c0_27, %c0_28, %c1, %c0_29] : memref<1x8x8x64xbf16, #tpu.memory_space<vmem>>, vector<1x8x7x64xbf16>
    %20 = vector.shape_cast %19 : vector<1x8x7x64xbf16> to vector<8x7x64xbf16>
    %21 = arith.maximumf %20, %18 : vector<8x7x64xbf16>
    %c0_30 = arith.constant 0 : index
    %c0_31 = arith.constant 0 : index
    %c1_32 = arith.constant 1 : index
    %c0_33 = arith.constant 0 : index
    %22 = vector.load %arg5[%c0_30, %c0_31, %c1_32, %c0_33] : memref<1x8x8x64xbf16, #tpu.memory_space<vmem>>, vector<1x8x7x64xbf16>
    %23 = vector.shape_cast %22 : vector<1x8x7x64xbf16> to vector<8x7x64xbf16>
    %24 = vector.shape_cast %21 : vector<8x7x64xbf16> to vector<1x8x7x64xbf16>
    tpu.vector_store %arg5[%c0_30, %c0_31, %c1_32, %c0_33], %24 {strides = array<i32>} : memref<1x8x8x64xbf16, #tpu.memory_space<vmem>>, vector<1x8x7x64xbf16>,
    %c0_34 = arith.constant 0 : index
    %c0_35 = arith.constant 0 : index
    %c0_36 = arith.constant 0 : index
    %c0_37 = arith.constant 0 : index
    %25 = vector.load %arg3[%c0_34, %c0_35, %c0_36, %c0_37] : memref<1x8x8x64xbf16, #tpu.memory_space<vmem>>, vector<1x7x8x64xbf16>
    %26 = vector.shape_cast %25 : vector<1x7x8x64xbf16> to vector<7x8x64xbf16>
    %c0_38 = arith.constant 0 : index
    %c0_39 = arith.constant 0 : index
    %c0_40 = arith.constant 0 : index
    %c0_41 = arith.constant 0 : index
    %27 = vector.load %arg4[%c0_38, %c0_39, %c0_40, %c0_41] : memref<1x8x8x64xbf16, #tpu.memory_space<vmem>>, vector<1x7x8x64xbf16>
    %28 = vector.shape_cast %27 : vector<1x7x8x64xbf16> to vector<7x8x64xbf16>
    %29 = arith.maximumf %26, %28 : vector<7x8x64xbf16>
    %c0_42 = arith.constant 0 : index
    %c1_43 = arith.constant 1 : index
    %c0_44 = arith.constant 0 : index
    %c0_45 = arith.constant 0 : index
    %30 = vector.load %arg5[%c0_42, %c1_43, %c0_44, %c0_45] : memref<1x8x8x64xbf16, #tpu.memory_space<vmem>>, vector<1x7x8x64xbf16>
    %31 = vector.shape_cast %30 : vector<1x7x8x64xbf16> to vector<7x8x64xbf16>
    %32 = arith.maximumf %31, %29 : vector<7x8x64xbf16>
    %c0_46 = arith.constant 0 : index
    %c1_47 = arith.constant 1 : index
    %c0_48 = arith.constant 0 : index
    %c0_49 = arith.constant 0 : index
    %33 = vector.load %arg5[%c0_46, %c1_47, %c0_48, %c0_49] : memref<1x8x8x64xbf16, #tpu.memory_space<vmem>>, vector<1x7x8x64xbf16>
    %34 = vector.shape_cast %33 : vector<1x7x8x64xbf16> to vector<7x8x64xbf16>
    %35 = vector.shape_cast %32 : vector<7x8x64xbf16> to vector<1x7x8x64xbf16>
    tpu.vector_store %arg5[%c0_46, %c1_47, %c0_48, %c0_49], %35 {strides = array<i32>} : memref<1x8x8x64xbf16, #tpu.memory_space<vmem>>, vector<1x7x8x64xbf16>,
    %c0_50 = arith.constant 0 : index
    %c1_51 = arith.constant 1 : index
    %c1_52 = arith.constant 1 : index
    %c0_53 = arith.constant 0 : index
    %36 = vector.load %arg5[%c0_50, %c1_51, %c1_52, %c0_53] : memref<1x8x8x64xbf16, #tpu.memory_space<vmem>>, vector<1x7x7x64xbf16>
    %37 = vector.shape_cast %36 : vector<1x7x7x64xbf16> to vector<7x7x64xbf16>
    %c0_54 = arith.constant 0 : index
    %c0_55 = arith.constant 0 : index
    %c0_56 = arith.constant 0 : index
    %c0_57 = arith.constant 0 : index
    %38 = vector.load %arg4[%c0_54, %c0_55, %c0_56, %c0_57] : memref<1x8x8x64xbf16, #tpu.memory_space<vmem>>, vector<1x7x7x64xbf16>
    %39 = vector.shape_cast %38 : vector<1x7x7x64xbf16> to vector<7x7x64xbf16>
    %40 = arith.maximumf %37, %39 : vector<7x7x64xbf16>
    %c0_58 = arith.constant 0 : index
    %c1_59 = arith.constant 1 : index
    %c1_60 = arith.constant 1 : index
    %c0_61 = arith.constant 0 : index
    %41 = vector.load %arg5[%c0_58, %c1_59, %c1_60, %c0_61] : memref<1x8x8x64xbf16, #tpu.memory_space<vmem>>, vector<1x7x7x64xbf16>
    %42 = vector.shape_cast %41 : vector<1x7x7x64xbf16> to vector<7x7x64xbf16>
    %43 = vector.shape_cast %40 : vector<7x7x64xbf16> to vector<1x7x7x64xbf16>
    tpu.vector_store %arg5[%c0_58, %c1_59, %c1_60, %c0_61], %43 {strides = array<i32>} : memref<1x8x8x64xbf16, #tpu.memory_space<vmem>>, vector<1x7x7x64xbf16>,
    return
  }
  func.func @transform_0(%arg0: i32) -> (i32, i32, i32, i32) {
    %c0_i32 = arith.constant 0 : i32
    %c0_i32_0 = arith.constant 0 : i32
    %c0_i32_1 = arith.constant 0 : i32
    %c0_i32_2 = arith.constant 0 : i32
    return %arg0, %c0_i32, %c0_i32_0, %c0_i32_1 : i32, i32, i32, i32
  }
  func.func @transform_1(%arg0: i32) -> (i32, i32, i32, i32) {
    %c0_i32 = arith.constant 0 : i32
    %c0_i32_0 = arith.constant 0 : i32
    %c0_i32_1 = arith.constant 0 : i32
    %c0_i32_2 = arith.constant 0 : i32
    return %arg0, %c0_i32, %c0_i32_0, %c0_i32_1 : i32, i32, i32, i32
  }
  func.func @transform_2(%arg0: i32) -> (i32, i32, i32, i32) {
    %c0_i32 = arith.constant 0 : i32
    %c0_i32_0 = arith.constant 0 : i32
    %c0_i32_1 = arith.constant 0 : i32
    %c0_i32_2 = arith.constant 0 : i32
    return %arg0, %c0_i32, %c0_i32_0, %c0_i32_1 : i32, i32, i32, i32
  }
  func.func @transform_3(%arg0: i32) -> (i32, i32, i32, i32) {
    %c0_i32 = arith.constant 0 : i32
    %c0_i32_0 = arith.constant 0 : i32
    %c0_i32_1 = arith.constant 0 : i32
    %c0_i32_2 = arith.constant 0 : i32
    return %arg0, %c0_i32, %c0_i32_0, %c0_i32_1 : i32, i32, i32, i32
  }
  func.func @transform_4(%arg0: i32) -> (i32, i32, i32, i32) {
    %c0_i32 = arith.constant 0 : i32
    %c0_i32_0 = arith.constant 0 : i32
    %c0_i32_1 = arith.constant 0 : i32
    %c0_i32_2 = arith.constant 0 : i32
    return %arg0, %c0_i32, %c0_i32_0, %c0_i32_1 : i32, i32, i32, i32
  }
}

module attributes {stable_mosaic.version = 11 : i64} {
  func.func @_bottleneck_kernel(%arg0: i32, %arg1: memref<1x64x64xbf16, #tpu.memory_space<vmem>>, %arg2: memref<64x64xbf16, #tpu.memory_space<vmem>>, %arg3: memref<1x64xf32, #tpu.memory_space<vmem>>, %arg4: memref<1x64xf32, #tpu.memory_space<vmem>>, %arg5: memref<9x64x64xbf16, #tpu.memory_space<vmem>>, %arg6: memref<1x64xf32, #tpu.memory_space<vmem>>, %arg7: memref<1x64xf32, #tpu.memory_space<vmem>>, %arg8: memref<64x256xbf16, #tpu.memory_space<vmem>>, %arg9: memref<1x256xf32, #tpu.memory_space<vmem>>, %arg10: memref<1x256xf32, #tpu.memory_space<vmem>>, %arg11: memref<64x256xbf16, #tpu.memory_space<vmem>>, %arg12: memref<1x256xf32, #tpu.memory_space<vmem>>, %arg13: memref<1x256xf32, #tpu.memory_space<vmem>>, %arg14: memref<1x64x256xbf16, #tpu.memory_space<vmem>>, %arg15: memref<82x64xbf16, #tpu.memory_space<vmem>>) attributes {dimension_semantics = [#tpu.dimension_semantics<parallel>], iteration_bounds = array<i64: 2>, scalar_prefetch = 0 : i64, scratch_operands = 1 : i64, tpu.core_type = #tpu.core_type<tc>, window_params = [{transform_indices = @transform_0, window_bounds = array<i64: 1, 64, 64>}, {pipeline_mode = #tpu.pipeline_mode<synchronous>, transform_indices = @transform_1, window_bounds = array<i64: 64, 64>}, {pipeline_mode = #tpu.pipeline_mode<synchronous>, transform_indices = @transform_2, window_bounds = array<i64: 1, 64>}, {pipeline_mode = #tpu.pipeline_mode<synchronous>, transform_indices = @transform_3, window_bounds = array<i64: 1, 64>}, {pipeline_mode = #tpu.pipeline_mode<synchronous>, transform_indices = @transform_4, window_bounds = array<i64: 9, 64, 64>}, {pipeline_mode = #tpu.pipeline_mode<synchronous>, transform_indices = @transform_5, window_bounds = array<i64: 1, 64>}, {pipeline_mode = #tpu.pipeline_mode<synchronous>, transform_indices = @transform_6, window_bounds = array<i64: 1, 64>}, {pipeline_mode = #tpu.pipeline_mode<synchronous>, transform_indices = @transform_7, window_bounds = array<i64: 64, 256>}, {pipeline_mode = #tpu.pipeline_mode<synchronous>, transform_indices = @transform_8, window_bounds = array<i64: 1, 256>}, {pipeline_mode = #tpu.pipeline_mode<synchronous>, transform_indices = @transform_9, window_bounds = array<i64: 1, 256>}, {pipeline_mode = #tpu.pipeline_mode<synchronous>, transform_indices = @transform_10, window_bounds = array<i64: 64, 256>}, {pipeline_mode = #tpu.pipeline_mode<synchronous>, transform_indices = @transform_11, window_bounds = array<i64: 1, 256>}, {pipeline_mode = #tpu.pipeline_mode<synchronous>, transform_indices = @transform_12, window_bounds = array<i64: 1, 256>}, {transform_indices = @transform_13, window_bounds = array<i64: 1, 64, 256>}]} {
    %c0 = arith.constant 0 : index
    %c0_0 = arith.constant 0 : index
    %c0_1 = arith.constant 0 : index
    %0 = vector.load %arg1[%c0, %c0_0, %c0_1] : memref<1x64x64xbf16, #tpu.memory_space<vmem>>, vector<1x64x64xbf16>
    %1 = vector.shape_cast %0 : vector<1x64x64xbf16> to vector<64x64xbf16>
    %c0_2 = arith.constant 0 : index
    %c0_3 = arith.constant 0 : index
    %2 = vector.load %arg2[%c0_2, %c0_3] : memref<64x64xbf16, #tpu.memory_space<vmem>>, vector<64x64xbf16>
    %cst = arith.constant dense<0.000000e+00> : vector<64x64xf32>
    %3 = tpu.matmul %1, %2, %cst {dimension_numbers = #tpu.dot_dimension_numbers<[1], [0], [0], [1], [0, 0, 1, 1], [], []>} : vector<64x64xbf16>, vector<64x64xbf16>, vector<64x64xf32> -> vector<64x64xf32>
    %c0_4 = arith.constant 0 : index
    %c0_5 = arith.constant 0 : index
    %4 = vector.load %arg3[%c0_4, %c0_5] : memref<1x64xf32, #tpu.memory_space<vmem>>, vector<1x64xf32>
    %5 = vector.broadcast %4 : vector<1x64xf32> to vector<64x64xf32>
    %6 = arith.mulf %3, %5 : vector<64x64xf32>
    %c0_6 = arith.constant 0 : index
    %c0_7 = arith.constant 0 : index
    %7 = vector.load %arg4[%c0_6, %c0_7] : memref<1x64xf32, #tpu.memory_space<vmem>>, vector<1x64xf32>
    %8 = vector.broadcast %7 : vector<1x64xf32> to vector<64x64xf32>
    %9 = arith.addf %6, %8 : vector<64x64xf32>
    %cst_8 = arith.constant 0.000000e+00 : f32
    %10 = vector.broadcast %cst_8 : f32 to vector<64x64xf32>
    %11 = arith.maximumf %9, %10 : vector<64x64xf32>
    %cst_9 = arith.constant 0.000000e+00 : bf16
    %12 = vector.broadcast %cst_9 : bf16 to vector<9x64xbf16>
    %c0_10 = arith.constant 0 : index
    %c0_11 = arith.constant 0 : index
    %13 = vector.load %arg15[%c0_10, %c0_11] : memref<82x64xbf16, #tpu.memory_space<vmem>>, vector<9x64xbf16>
    tpu.vector_store %arg15[%c0_10, %c0_11], %12 {strides = array<i32>} : memref<82x64xbf16, #tpu.memory_space<vmem>>, vector<9x64xbf16>,
    %cst_12 = arith.constant 0.000000e+00 : bf16
    %14 = vector.broadcast %cst_12 : bf16 to vector<9x64xbf16>
    %c73 = arith.constant 73 : index
    %c0_13 = arith.constant 0 : index
    %15 = vector.load %arg15[%c73, %c0_13] : memref<82x64xbf16, #tpu.memory_space<vmem>>, vector<9x64xbf16>
    tpu.vector_store %arg15[%c73, %c0_13], %14 {strides = array<i32>} : memref<82x64xbf16, #tpu.memory_space<vmem>>, vector<9x64xbf16>,
    %16 = arith.truncf %11 : vector<64x64xf32> to vector<64x64xbf16>
    %c9 = arith.constant 9 : index
    %c0_14 = arith.constant 0 : index
    %17 = vector.load %arg15[%c9, %c0_14] : memref<82x64xbf16, #tpu.memory_space<vmem>>, vector<64x64xbf16>
    tpu.vector_store %arg15[%c9, %c0_14], %16 {strides = array<i32>} : memref<82x64xbf16, #tpu.memory_space<vmem>>, vector<64x64xbf16>,
    %18 = tpu.iota {dimensions = array<i32: 0>} : vector<64x1xi32>
    %c8_i32 = arith.constant 8 : i32
    %c0_i32 = arith.constant 0 : i32
    %19 = arith.cmpi eq, %c8_i32, %c0_i32 : i32
    %c1_i32 = arith.constant 1 : i32
    %20 = arith.select %19, %c1_i32, %c8_i32 : i32
    %21 = vector.broadcast %20 : i32 to vector<64x1xi32>
    %22 = arith.remsi %18, %21 : vector<64x1xi32>
    %c0_i32_15 = arith.constant 0 : i32
    %23 = vector.broadcast %c0_i32_15 : i32 to vector<64x1xi32>
    %24 = arith.cmpi ne, %22, %23 : vector<64x1xi32>
    %c0_i32_16 = arith.constant 0 : i32
    %25 = vector.broadcast %c0_i32_16 : i32 to vector<64x1xi32>
    %26 = arith.cmpi slt, %22, %25 : vector<64x1xi32>
    %c0_i32_17 = arith.constant 0 : i32
    %27 = arith.cmpi slt, %20, %c0_i32_17 : i32
    %28 = vector.broadcast %27 : i1 to vector<64x1xi1>
    %29 = vector.broadcast %28 : vector<64x1xi1> to vector<64x1xi1>
    %30 = arith.xori %26, %29 : vector<64x1xi1>
    %31 = arith.andi %30, %24 : vector<64x1xi1>
    %32 = vector.broadcast %20 : i32 to vector<64x1xi32>
    %33 = arith.addi %22, %32 : vector<64x1xi32>
    %34 = arith.select %31, %33, %22 : vector<64x1xi1>, vector<64x1xi32>
    %c0_i32_18 = arith.constant 0 : i32
    %35 = vector.broadcast %c0_i32_18 : i32 to vector<64x1xi32>
    %36 = arith.cmpi ne, %34, %35 : vector<64x1xi32>
    %c7_i32 = arith.constant 7 : i32
    %37 = vector.broadcast %c7_i32 : i32 to vector<64x1xi32>
    %38 = arith.cmpi ne, %34, %37 : vector<64x1xi32>
    %cst_19 = arith.constant 0.000000e+00 : f32
    %39 = vector.broadcast %cst_19 : f32 to vector<64x64xf32>
    %c0_20 = arith.constant 0 : index
    %c0_21 = arith.constant 0 : index
    %40 = vector.load %arg15[%c0_20, %c0_21] : memref<82x64xbf16, #tpu.memory_space<vmem>>, vector<64x64xbf16>
    %cst_22 = arith.constant 0.000000e+00 : f32
    %41 = arith.truncf %cst_22 : f32 to bf16
    %42 = vector.shape_cast %36 : vector<64x1xi1> to vector<64x1xi1>
    %43 = vector.broadcast %42 : vector<64x1xi1> to vector<64x64xi1>
    %44 = vector.broadcast %41 : bf16 to vector<64x64xbf16>
    %45 = arith.select %43, %40, %44 : vector<64x64xi1>, vector<64x64xbf16>
    %c0_23 = arith.constant 0 : index
    %c0_24 = arith.constant 0 : index
    %c0_25 = arith.constant 0 : index
    %46 = vector.load %arg5[%c0_23, %c0_24, %c0_25] : memref<9x64x64xbf16, #tpu.memory_space<vmem>>, vector<1x64x64xbf16>
    %47 = vector.shape_cast %46 : vector<1x64x64xbf16> to vector<64x64xbf16>
    %cst_26 = arith.constant dense<0.000000e+00> : vector<64x64xf32>
    %48 = tpu.matmul %45, %47, %cst_26 {dimension_numbers = #tpu.dot_dimension_numbers<[1], [0], [0], [1], [0, 0, 1, 1], [], []>} : vector<64x64xbf16>, vector<64x64xbf16>, vector<64x64xf32> -> vector<64x64xf32>
    %49 = arith.addf %39, %48 : vector<64x64xf32>
    %c1 = arith.constant 1 : index
    %c0_27 = arith.constant 0 : index
    %50 = vector.load %arg15[%c1, %c0_27] : memref<82x64xbf16, #tpu.memory_space<vmem>>, vector<64x64xbf16>
    %c1_28 = arith.constant 1 : index
    %c0_29 = arith.constant 0 : index
    %c0_30 = arith.constant 0 : index
    %51 = vector.load %arg5[%c1_28, %c0_29, %c0_30] : memref<9x64x64xbf16, #tpu.memory_space<vmem>>, vector<1x64x64xbf16>
    %52 = vector.shape_cast %51 : vector<1x64x64xbf16> to vector<64x64xbf16>
    %cst_31 = arith.constant dense<0.000000e+00> : vector<64x64xf32>
    %53 = tpu.matmul %50, %52, %cst_31 {dimension_numbers = #tpu.dot_dimension_numbers<[1], [0], [0], [1], [0, 0, 1, 1], [], []>} : vector<64x64xbf16>, vector<64x64xbf16>, vector<64x64xf32> -> vector<64x64xf32>
    %54 = arith.addf %49, %53 : vector<64x64xf32>
    %c2 = arith.constant 2 : index
    %c0_32 = arith.constant 0 : index
    %55 = vector.load %arg15[%c2, %c0_32] : memref<82x64xbf16, #tpu.memory_space<vmem>>, vector<64x64xbf16>
    %cst_33 = arith.constant 0.000000e+00 : f32
    %56 = arith.truncf %cst_33 : f32 to bf16
    %57 = vector.shape_cast %38 : vector<64x1xi1> to vector<64x1xi1>
    %58 = vector.broadcast %57 : vector<64x1xi1> to vector<64x64xi1>
    %59 = vector.broadcast %56 : bf16 to vector<64x64xbf16>
    %60 = arith.select %58, %55, %59 : vector<64x64xi1>, vector<64x64xbf16>
    %c2_34 = arith.constant 2 : index
    %c0_35 = arith.constant 0 : index
    %c0_36 = arith.constant 0 : index
    %61 = vector.load %arg5[%c2_34, %c0_35, %c0_36] : memref<9x64x64xbf16, #tpu.memory_space<vmem>>, vector<1x64x64xbf16>
    %62 = vector.shape_cast %61 : vector<1x64x64xbf16> to vector<64x64xbf16>
    %cst_37 = arith.constant dense<0.000000e+00> : vector<64x64xf32>
    %63 = tpu.matmul %60, %62, %cst_37 {dimension_numbers = #tpu.dot_dimension_numbers<[1], [0], [0], [1], [0, 0, 1, 1], [], []>} : vector<64x64xbf16>, vector<64x64xbf16>, vector<64x64xf32> -> vector<64x64xf32>
    %64 = arith.addf %54, %63 : vector<64x64xf32>
    %c8 = arith.constant 8 : index
    %c0_38 = arith.constant 0 : index
    %65 = vector.load %arg15[%c8, %c0_38] : memref<82x64xbf16, #tpu.memory_space<vmem>>, vector<64x64xbf16>
    %cst_39 = arith.constant 0.000000e+00 : f32
    %66 = arith.truncf %cst_39 : f32 to bf16
    %67 = vector.shape_cast %36 : vector<64x1xi1> to vector<64x1xi1>
    %68 = vector.broadcast %67 : vector<64x1xi1> to vector<64x64xi1>
    %69 = vector.broadcast %66 : bf16 to vector<64x64xbf16>
    %70 = arith.select %68, %65, %69 : vector<64x64xi1>, vector<64x64xbf16>
    %c3 = arith.constant 3 : index
    %c0_40 = arith.constant 0 : index
    %c0_41 = arith.constant 0 : index
    %71 = vector.load %arg5[%c3, %c0_40, %c0_41] : memref<9x64x64xbf16, #tpu.memory_space<vmem>>, vector<1x64x64xbf16>
    %72 = vector.shape_cast %71 : vector<1x64x64xbf16> to vector<64x64xbf16>
    %cst_42 = arith.constant dense<0.000000e+00> : vector<64x64xf32>
    %73 = tpu.matmul %70, %72, %cst_42 {dimension_numbers = #tpu.dot_dimension_numbers<[1], [0], [0], [1], [0, 0, 1, 1], [], []>} : vector<64x64xbf16>, vector<64x64xbf16>, vector<64x64xf32> -> vector<64x64xf32>
    %74 = arith.addf %64, %73 : vector<64x64xf32>
    %c9_43 = arith.constant 9 : index
    %c0_44 = arith.constant 0 : index
    %75 = vector.load %arg15[%c9_43, %c0_44] : memref<82x64xbf16, #tpu.memory_space<vmem>>, vector<64x64xbf16>
    %c4 = arith.constant 4 : index
    %c0_45 = arith.constant 0 : index
    %c0_46 = arith.constant 0 : index
    %76 = vector.load %arg5[%c4, %c0_45, %c0_46] : memref<9x64x64xbf16, #tpu.memory_space<vmem>>, vector<1x64x64xbf16>
    %77 = vector.shape_cast %76 : vector<1x64x64xbf16> to vector<64x64xbf16>
    %cst_47 = arith.constant dense<0.000000e+00> : vector<64x64xf32>
    %78 = tpu.matmul %75, %77, %cst_47 {dimension_numbers = #tpu.dot_dimension_numbers<[1], [0], [0], [1], [0, 0, 1, 1], [], []>} : vector<64x64xbf16>, vector<64x64xbf16>, vector<64x64xf32> -> vector<64x64xf32>
    %79 = arith.addf %74, %78 : vector<64x64xf32>
    %c10 = arith.constant 10 : index
    %c0_48 = arith.constant 0 : index
    %80 = vector.load %arg15[%c10, %c0_48] : memref<82x64xbf16, #tpu.memory_space<vmem>>, vector<64x64xbf16>
    %cst_49 = arith.constant 0.000000e+00 : f32
    %81 = arith.truncf %cst_49 : f32 to bf16
    %82 = vector.shape_cast %38 : vector<64x1xi1> to vector<64x1xi1>
    %83 = vector.broadcast %82 : vector<64x1xi1> to vector<64x64xi1>
    %84 = vector.broadcast %81 : bf16 to vector<64x64xbf16>
    %85 = arith.select %83, %80, %84 : vector<64x64xi1>, vector<64x64xbf16>
    %c5 = arith.constant 5 : index
    %c0_50 = arith.constant 0 : index
    %c0_51 = arith.constant 0 : index
    %86 = vector.load %arg5[%c5, %c0_50, %c0_51] : memref<9x64x64xbf16, #tpu.memory_space<vmem>>, vector<1x64x64xbf16>
    %87 = vector.shape_cast %86 : vector<1x64x64xbf16> to vector<64x64xbf16>
    %cst_52 = arith.constant dense<0.000000e+00> : vector<64x64xf32>
    %88 = tpu.matmul %85, %87, %cst_52 {dimension_numbers = #tpu.dot_dimension_numbers<[1], [0], [0], [1], [0, 0, 1, 1], [], []>} : vector<64x64xbf16>, vector<64x64xbf16>, vector<64x64xf32> -> vector<64x64xf32>
    %89 = arith.addf %79, %88 : vector<64x64xf32>
    %c16 = arith.constant 16 : index
    %c0_53 = arith.constant 0 : index
    %90 = vector.load %arg15[%c16, %c0_53] : memref<82x64xbf16, #tpu.memory_space<vmem>>, vector<64x64xbf16>
    %cst_54 = arith.constant 0.000000e+00 : f32
    %91 = arith.truncf %cst_54 : f32 to bf16
    %92 = vector.shape_cast %36 : vector<64x1xi1> to vector<64x1xi1>
    %93 = vector.broadcast %92 : vector<64x1xi1> to vector<64x64xi1>
    %94 = vector.broadcast %91 : bf16 to vector<64x64xbf16>
    %95 = arith.select %93, %90, %94 : vector<64x64xi1>, vector<64x64xbf16>
    %c6 = arith.constant 6 : index
    %c0_55 = arith.constant 0 : index
    %c0_56 = arith.constant 0 : index
    %96 = vector.load %arg5[%c6, %c0_55, %c0_56] : memref<9x64x64xbf16, #tpu.memory_space<vmem>>, vector<1x64x64xbf16>
    %97 = vector.shape_cast %96 : vector<1x64x64xbf16> to vector<64x64xbf16>
    %cst_57 = arith.constant dense<0.000000e+00> : vector<64x64xf32>
    %98 = tpu.matmul %95, %97, %cst_57 {dimension_numbers = #tpu.dot_dimension_numbers<[1], [0], [0], [1], [0, 0, 1, 1], [], []>} : vector<64x64xbf16>, vector<64x64xbf16>, vector<64x64xf32> -> vector<64x64xf32>
    %99 = arith.addf %89, %98 : vector<64x64xf32>
    %c17 = arith.constant 17 : index
    %c0_58 = arith.constant 0 : index
    %100 = vector.load %arg15[%c17, %c0_58] : memref<82x64xbf16, #tpu.memory_space<vmem>>, vector<64x64xbf16>
    %c7 = arith.constant 7 : index
    %c0_59 = arith.constant 0 : index
    %c0_60 = arith.constant 0 : index
    %101 = vector.load %arg5[%c7, %c0_59, %c0_60] : memref<9x64x64xbf16, #tpu.memory_space<vmem>>, vector<1x64x64xbf16>
    %102 = vector.shape_cast %101 : vector<1x64x64xbf16> to vector<64x64xbf16>
    %cst_61 = arith.constant dense<0.000000e+00> : vector<64x64xf32>
    %103 = tpu.matmul %100, %102, %cst_61 {dimension_numbers = #tpu.dot_dimension_numbers<[1], [0], [0], [1], [0, 0, 1, 1], [], []>} : vector<64x64xbf16>, vector<64x64xbf16>, vector<64x64xf32> -> vector<64x64xf32>
    %104 = arith.addf %99, %103 : vector<64x64xf32>
    %c18 = arith.constant 18 : index
    %c0_62 = arith.constant 0 : index
    %105 = vector.load %arg15[%c18, %c0_62] : memref<82x64xbf16, #tpu.memory_space<vmem>>, vector<64x64xbf16>
    %cst_63 = arith.constant 0.000000e+00 : f32
    %106 = arith.truncf %cst_63 : f32 to bf16
    %107 = vector.shape_cast %38 : vector<64x1xi1> to vector<64x1xi1>
    %108 = vector.broadcast %107 : vector<64x1xi1> to vector<64x64xi1>
    %109 = vector.broadcast %106 : bf16 to vector<64x64xbf16>
    %110 = arith.select %108, %105, %109 : vector<64x64xi1>, vector<64x64xbf16>
    %c8_64 = arith.constant 8 : index
    %c0_65 = arith.constant 0 : index
    %c0_66 = arith.constant 0 : index
    %111 = vector.load %arg5[%c8_64, %c0_65, %c0_66] : memref<9x64x64xbf16, #tpu.memory_space<vmem>>, vector<1x64x64xbf16>
    %112 = vector.shape_cast %111 : vector<1x64x64xbf16> to vector<64x64xbf16>
    %cst_67 = arith.constant dense<0.000000e+00> : vector<64x64xf32>
    %113 = tpu.matmul %110, %112, %cst_67 {dimension_numbers = #tpu.dot_dimension_numbers<[1], [0], [0], [1], [0, 0, 1, 1], [], []>} : vector<64x64xbf16>, vector<64x64xbf16>, vector<64x64xf32> -> vector<64x64xf32>
    %114 = arith.addf %104, %113 : vector<64x64xf32>
    %c0_68 = arith.constant 0 : index
    %c0_69 = arith.constant 0 : index
    %115 = vector.load %arg6[%c0_68, %c0_69] : memref<1x64xf32, #tpu.memory_space<vmem>>, vector<1x64xf32>
    %116 = vector.broadcast %115 : vector<1x64xf32> to vector<64x64xf32>
    %117 = arith.mulf %114, %116 : vector<64x64xf32>
    %c0_70 = arith.constant 0 : index
    %c0_71 = arith.constant 0 : index
    %118 = vector.load %arg7[%c0_70, %c0_71] : memref<1x64xf32, #tpu.memory_space<vmem>>, vector<1x64xf32>
    %119 = vector.broadcast %118 : vector<1x64xf32> to vector<64x64xf32>
    %120 = arith.addf %117, %119 : vector<64x64xf32>
    %cst_72 = arith.constant 0.000000e+00 : f32
    %121 = vector.broadcast %cst_72 : f32 to vector<64x64xf32>
    %122 = arith.maximumf %120, %121 : vector<64x64xf32>
    %123 = arith.truncf %122 : vector<64x64xf32> to vector<64x64xbf16>
    %c0_73 = arith.constant 0 : index
    %c0_74 = arith.constant 0 : index
    %124 = vector.load %arg8[%c0_73, %c0_74] : memref<64x256xbf16, #tpu.memory_space<vmem>>, vector<64x256xbf16>
    %cst_75 = arith.constant dense<0.000000e+00> : vector<64x256xf32>
    %125 = tpu.matmul %123, %124, %cst_75 {dimension_numbers = #tpu.dot_dimension_numbers<[1], [0], [0], [1], [0, 0, 1, 1], [], []>} : vector<64x64xbf16>, vector<64x256xbf16>, vector<64x256xf32> -> vector<64x256xf32>
    %c0_76 = arith.constant 0 : index
    %c0_77 = arith.constant 0 : index
    %126 = vector.load %arg9[%c0_76, %c0_77] : memref<1x256xf32, #tpu.memory_space<vmem>>, vector<1x256xf32>
    %127 = vector.broadcast %126 : vector<1x256xf32> to vector<64x256xf32>
    %128 = arith.mulf %125, %127 : vector<64x256xf32>
    %c0_78 = arith.constant 0 : index
    %c0_79 = arith.constant 0 : index
    %129 = vector.load %arg10[%c0_78, %c0_79] : memref<1x256xf32, #tpu.memory_space<vmem>>, vector<1x256xf32>
    %130 = vector.broadcast %129 : vector<1x256xf32> to vector<64x256xf32>
    %131 = arith.addf %128, %130 : vector<64x256xf32>
    %c0_80 = arith.constant 0 : index
    %c0_81 = arith.constant 0 : index
    %132 = vector.load %arg11[%c0_80, %c0_81] : memref<64x256xbf16, #tpu.memory_space<vmem>>, vector<64x256xbf16>
    %cst_82 = arith.constant dense<0.000000e+00> : vector<64x256xf32>
    %133 = tpu.matmul %1, %132, %cst_82 {dimension_numbers = #tpu.dot_dimension_numbers<[1], [0], [0], [1], [0, 0, 1, 1], [], []>} : vector<64x64xbf16>, vector<64x256xbf16>, vector<64x256xf32> -> vector<64x256xf32>
    %c0_83 = arith.constant 0 : index
    %c0_84 = arith.constant 0 : index
    %134 = vector.load %arg12[%c0_83, %c0_84] : memref<1x256xf32, #tpu.memory_space<vmem>>, vector<1x256xf32>
    %135 = vector.broadcast %134 : vector<1x256xf32> to vector<64x256xf32>
    %136 = arith.mulf %133, %135 : vector<64x256xf32>
    %c0_85 = arith.constant 0 : index
    %c0_86 = arith.constant 0 : index
    %137 = vector.load %arg13[%c0_85, %c0_86] : memref<1x256xf32, #tpu.memory_space<vmem>>, vector<1x256xf32>
    %138 = vector.broadcast %137 : vector<1x256xf32> to vector<64x256xf32>
    %139 = arith.addf %136, %138 : vector<64x256xf32>
    %140 = arith.addf %131, %139 : vector<64x256xf32>
    %cst_87 = arith.constant 0.000000e+00 : f32
    %141 = vector.broadcast %cst_87 : f32 to vector<64x256xf32>
    %142 = arith.maximumf %140, %141 : vector<64x256xf32>
    %143 = arith.truncf %142 : vector<64x256xf32> to vector<64x256xbf16>
    %c0_88 = arith.constant 0 : index
    %c0_89 = arith.constant 0 : index
    %c0_90 = arith.constant 0 : index
    %144 = vector.load %arg14[%c0_88, %c0_89, %c0_90] : memref<1x64x256xbf16, #tpu.memory_space<vmem>>, vector<1x64x256xbf16>
    %145 = vector.shape_cast %144 : vector<1x64x256xbf16> to vector<64x256xbf16>
    %146 = vector.shape_cast %143 : vector<64x256xbf16> to vector<1x64x256xbf16>
    tpu.vector_store %arg14[%c0_88, %c0_89, %c0_90], %146 {strides = array<i32>} : memref<1x64x256xbf16, #tpu.memory_space<vmem>>, vector<1x64x256xbf16>,
    return
  }
  func.func @transform_0(%arg0: i32) -> (i32, i32, i32) {
    %c0_i32 = arith.constant 0 : i32
    %c0_i32_0 = arith.constant 0 : i32
    %c0_i32_1 = arith.constant 0 : i32
    return %arg0, %c0_i32, %c0_i32_0 : i32, i32, i32
  }
  func.func @transform_1(%arg0: i32) -> (i32, i32) {
    %c0_i32 = arith.constant 0 : i32
    %c0_i32_0 = arith.constant 0 : i32
    %c0_i32_1 = arith.constant 0 : i32
    return %c0_i32, %c0_i32_0 : i32, i32
  }
  func.func @transform_2(%arg0: i32) -> (i32, i32) {
    %c0_i32 = arith.constant 0 : i32
    %c0_i32_0 = arith.constant 0 : i32
    %c0_i32_1 = arith.constant 0 : i32
    return %c0_i32, %c0_i32_0 : i32, i32
  }
  func.func @transform_3(%arg0: i32) -> (i32, i32) {
    %c0_i32 = arith.constant 0 : i32
    %c0_i32_0 = arith.constant 0 : i32
    %c0_i32_1 = arith.constant 0 : i32
    return %c0_i32, %c0_i32_0 : i32, i32
  }
  func.func @transform_4(%arg0: i32) -> (i32, i32, i32) {
    %c0_i32 = arith.constant 0 : i32
    %c0_i32_0 = arith.constant 0 : i32
    %c0_i32_1 = arith.constant 0 : i32
    %c0_i32_2 = arith.constant 0 : i32
    return %c0_i32, %c0_i32_0, %c0_i32_1 : i32, i32, i32
  }
  func.func @transform_5(%arg0: i32) -> (i32, i32) {
    %c0_i32 = arith.constant 0 : i32
    %c0_i32_0 = arith.constant 0 : i32
    %c0_i32_1 = arith.constant 0 : i32
    return %c0_i32, %c0_i32_0 : i32, i32
  }
  func.func @transform_6(%arg0: i32) -> (i32, i32) {
    %c0_i32 = arith.constant 0 : i32
    %c0_i32_0 = arith.constant 0 : i32
    %c0_i32_1 = arith.constant 0 : i32
    return %c0_i32, %c0_i32_0 : i32, i32
  }
  func.func @transform_7(%arg0: i32) -> (i32, i32) {
    %c0_i32 = arith.constant 0 : i32
    %c0_i32_0 = arith.constant 0 : i32
    %c0_i32_1 = arith.constant 0 : i32
    return %c0_i32, %c0_i32_0 : i32, i32
  }
  func.func @transform_8(%arg0: i32) -> (i32, i32) {
    %c0_i32 = arith.constant 0 : i32
    %c0_i32_0 = arith.constant 0 : i32
    %c0_i32_1 = arith.constant 0 : i32
    return %c0_i32, %c0_i32_0 : i32, i32
  }
  func.func @transform_9(%arg0: i32) -> (i32, i32) {
    %c0_i32 = arith.constant 0 : i32
    %c0_i32_0 = arith.constant 0 : i32
    %c0_i32_1 = arith.constant 0 : i32
    return %c0_i32, %c0_i32_0 : i32, i32
  }
  func.func @transform_10(%arg0: i32) -> (i32, i32) {
    %c0_i32 = arith.constant 0 : i32
    %c0_i32_0 = arith.constant 0 : i32
    %c0_i32_1 = arith.constant 0 : i32
    return %c0_i32, %c0_i32_0 : i32, i32
  }
  func.func @transform_11(%arg0: i32) -> (i32, i32) {
    %c0_i32 = arith.constant 0 : i32
    %c0_i32_0 = arith.constant 0 : i32
    %c0_i32_1 = arith.constant 0 : i32
    return %c0_i32, %c0_i32_0 : i32, i32
  }
  func.func @transform_12(%arg0: i32) -> (i32, i32) {
    %c0_i32 = arith.constant 0 : i32
    %c0_i32_0 = arith.constant 0 : i32
    %c0_i32_1 = arith.constant 0 : i32
    return %c0_i32, %c0_i32_0 : i32, i32
  }
  func.func @transform_13(%arg0: i32) -> (i32, i32, i32) {
    %c0_i32 = arith.constant 0 : i32
    %c0_i32_0 = arith.constant 0 : i32
    %c0_i32_1 = arith.constant 0 : i32
    return %arg0, %c0_i32, %c0_i32_0 : i32, i32, i32
  }
}

module attributes {stable_mosaic.version = 11 : i64} {
  func.func @_bottleneck_kernel(%arg0: i32, %arg1: memref<1x64x256xbf16, #tpu.memory_space<vmem>>, %arg2: memref<256x64xbf16, #tpu.memory_space<vmem>>, %arg3: memref<1x64xf32, #tpu.memory_space<vmem>>, %arg4: memref<1x64xf32, #tpu.memory_space<vmem>>, %arg5: memref<9x64x64xbf16, #tpu.memory_space<vmem>>, %arg6: memref<1x64xf32, #tpu.memory_space<vmem>>, %arg7: memref<1x64xf32, #tpu.memory_space<vmem>>, %arg8: memref<64x256xbf16, #tpu.memory_space<vmem>>, %arg9: memref<1x256xf32, #tpu.memory_space<vmem>>, %arg10: memref<1x256xf32, #tpu.memory_space<vmem>>, %arg11: memref<1x64x256xbf16, #tpu.memory_space<vmem>>, %arg12: memref<82x64xbf16, #tpu.memory_space<vmem>>) attributes {dimension_semantics = [#tpu.dimension_semantics<parallel>], iteration_bounds = array<i64: 2>, scalar_prefetch = 0 : i64, scratch_operands = 1 : i64, tpu.core_type = #tpu.core_type<tc>, window_params = [{transform_indices = @transform_0, window_bounds = array<i64: 1, 64, 256>}, {pipeline_mode = #tpu.pipeline_mode<synchronous>, transform_indices = @transform_1, window_bounds = array<i64: 256, 64>}, {pipeline_mode = #tpu.pipeline_mode<synchronous>, transform_indices = @transform_2, window_bounds = array<i64: 1, 64>}, {pipeline_mode = #tpu.pipeline_mode<synchronous>, transform_indices = @transform_3, window_bounds = array<i64: 1, 64>}, {pipeline_mode = #tpu.pipeline_mode<synchronous>, transform_indices = @transform_4, window_bounds = array<i64: 9, 64, 64>}, {pipeline_mode = #tpu.pipeline_mode<synchronous>, transform_indices = @transform_5, window_bounds = array<i64: 1, 64>}, {pipeline_mode = #tpu.pipeline_mode<synchronous>, transform_indices = @transform_6, window_bounds = array<i64: 1, 64>}, {pipeline_mode = #tpu.pipeline_mode<synchronous>, transform_indices = @transform_7, window_bounds = array<i64: 64, 256>}, {pipeline_mode = #tpu.pipeline_mode<synchronous>, transform_indices = @transform_8, window_bounds = array<i64: 1, 256>}, {pipeline_mode = #tpu.pipeline_mode<synchronous>, transform_indices = @transform_9, window_bounds = array<i64: 1, 256>}, {transform_indices = @transform_10, window_bounds = array<i64: 1, 64, 256>}]} {
    %c0 = arith.constant 0 : index
    %c0_0 = arith.constant 0 : index
    %c0_1 = arith.constant 0 : index
    %0 = vector.load %arg1[%c0, %c0_0, %c0_1] : memref<1x64x256xbf16, #tpu.memory_space<vmem>>, vector<1x64x256xbf16>
    %1 = vector.shape_cast %0 : vector<1x64x256xbf16> to vector<64x256xbf16>
    %c0_2 = arith.constant 0 : index
    %c0_3 = arith.constant 0 : index
    %2 = vector.load %arg2[%c0_2, %c0_3] : memref<256x64xbf16, #tpu.memory_space<vmem>>, vector<256x64xbf16>
    %cst = arith.constant dense<0.000000e+00> : vector<64x64xf32>
    %3 = tpu.matmul %1, %2, %cst {dimension_numbers = #tpu.dot_dimension_numbers<[1], [0], [0], [1], [0, 0, 1, 1], [], []>} : vector<64x256xbf16>, vector<256x64xbf16>, vector<64x64xf32> -> vector<64x64xf32>
    %c0_4 = arith.constant 0 : index
    %c0_5 = arith.constant 0 : index
    %4 = vector.load %arg3[%c0_4, %c0_5] : memref<1x64xf32, #tpu.memory_space<vmem>>, vector<1x64xf32>
    %5 = vector.broadcast %4 : vector<1x64xf32> to vector<64x64xf32>
    %6 = arith.mulf %3, %5 : vector<64x64xf32>
    %c0_6 = arith.constant 0 : index
    %c0_7 = arith.constant 0 : index
    %7 = vector.load %arg4[%c0_6, %c0_7] : memref<1x64xf32, #tpu.memory_space<vmem>>, vector<1x64xf32>
    %8 = vector.broadcast %7 : vector<1x64xf32> to vector<64x64xf32>
    %9 = arith.addf %6, %8 : vector<64x64xf32>
    %cst_8 = arith.constant 0.000000e+00 : f32
    %10 = vector.broadcast %cst_8 : f32 to vector<64x64xf32>
    %11 = arith.maximumf %9, %10 : vector<64x64xf32>
    %cst_9 = arith.constant 0.000000e+00 : bf16
    %12 = vector.broadcast %cst_9 : bf16 to vector<9x64xbf16>
    %c0_10 = arith.constant 0 : index
    %c0_11 = arith.constant 0 : index
    %13 = vector.load %arg12[%c0_10, %c0_11] : memref<82x64xbf16, #tpu.memory_space<vmem>>, vector<9x64xbf16>
    tpu.vector_store %arg12[%c0_10, %c0_11], %12 {strides = array<i32>} : memref<82x64xbf16, #tpu.memory_space<vmem>>, vector<9x64xbf16>,
    %cst_12 = arith.constant 0.000000e+00 : bf16
    %14 = vector.broadcast %cst_12 : bf16 to vector<9x64xbf16>
    %c73 = arith.constant 73 : index
    %c0_13 = arith.constant 0 : index
    %15 = vector.load %arg12[%c73, %c0_13] : memref<82x64xbf16, #tpu.memory_space<vmem>>, vector<9x64xbf16>
    tpu.vector_store %arg12[%c73, %c0_13], %14 {strides = array<i32>} : memref<82x64xbf16, #tpu.memory_space<vmem>>, vector<9x64xbf16>,
    %16 = arith.truncf %11 : vector<64x64xf32> to vector<64x64xbf16>
    %c9 = arith.constant 9 : index
    %c0_14 = arith.constant 0 : index
    %17 = vector.load %arg12[%c9, %c0_14] : memref<82x64xbf16, #tpu.memory_space<vmem>>, vector<64x64xbf16>
    tpu.vector_store %arg12[%c9, %c0_14], %16 {strides = array<i32>} : memref<82x64xbf16, #tpu.memory_space<vmem>>, vector<64x64xbf16>,
    %18 = tpu.iota {dimensions = array<i32: 0>} : vector<64x1xi32>
    %c8_i32 = arith.constant 8 : i32
    %c0_i32 = arith.constant 0 : i32
    %19 = arith.cmpi eq, %c8_i32, %c0_i32 : i32
    %c1_i32 = arith.constant 1 : i32
    %20 = arith.select %19, %c1_i32, %c8_i32 : i32
    %21 = vector.broadcast %20 : i32 to vector<64x1xi32>
    %22 = arith.remsi %18, %21 : vector<64x1xi32>
    %c0_i32_15 = arith.constant 0 : i32
    %23 = vector.broadcast %c0_i32_15 : i32 to vector<64x1xi32>
    %24 = arith.cmpi ne, %22, %23 : vector<64x1xi32>
    %c0_i32_16 = arith.constant 0 : i32
    %25 = vector.broadcast %c0_i32_16 : i32 to vector<64x1xi32>
    %26 = arith.cmpi slt, %22, %25 : vector<64x1xi32>
    %c0_i32_17 = arith.constant 0 : i32
    %27 = arith.cmpi slt, %20, %c0_i32_17 : i32
    %28 = vector.broadcast %27 : i1 to vector<64x1xi1>
    %29 = vector.broadcast %28 : vector<64x1xi1> to vector<64x1xi1>
    %30 = arith.xori %26, %29 : vector<64x1xi1>
    %31 = arith.andi %30, %24 : vector<64x1xi1>
    %32 = vector.broadcast %20 : i32 to vector<64x1xi32>
    %33 = arith.addi %22, %32 : vector<64x1xi32>
    %34 = arith.select %31, %33, %22 : vector<64x1xi1>, vector<64x1xi32>
    %c0_i32_18 = arith.constant 0 : i32
    %35 = vector.broadcast %c0_i32_18 : i32 to vector<64x1xi32>
    %36 = arith.cmpi ne, %34, %35 : vector<64x1xi32>
    %c7_i32 = arith.constant 7 : i32
    %37 = vector.broadcast %c7_i32 : i32 to vector<64x1xi32>
    %38 = arith.cmpi ne, %34, %37 : vector<64x1xi32>
    %cst_19 = arith.constant 0.000000e+00 : f32
    %39 = vector.broadcast %cst_19 : f32 to vector<64x64xf32>
    %c0_20 = arith.constant 0 : index
    %c0_21 = arith.constant 0 : index
    %40 = vector.load %arg12[%c0_20, %c0_21] : memref<82x64xbf16, #tpu.memory_space<vmem>>, vector<64x64xbf16>
    %cst_22 = arith.constant 0.000000e+00 : f32
    %41 = arith.truncf %cst_22 : f32 to bf16
    %42 = vector.shape_cast %36 : vector<64x1xi1> to vector<64x1xi1>
    %43 = vector.broadcast %42 : vector<64x1xi1> to vector<64x64xi1>
    %44 = vector.broadcast %41 : bf16 to vector<64x64xbf16>
    %45 = arith.select %43, %40, %44 : vector<64x64xi1>, vector<64x64xbf16>
    %c0_23 = arith.constant 0 : index
    %c0_24 = arith.constant 0 : index
    %c0_25 = arith.constant 0 : index
    %46 = vector.load %arg5[%c0_23, %c0_24, %c0_25] : memref<9x64x64xbf16, #tpu.memory_space<vmem>>, vector<1x64x64xbf16>
    %47 = vector.shape_cast %46 : vector<1x64x64xbf16> to vector<64x64xbf16>
    %cst_26 = arith.constant dense<0.000000e+00> : vector<64x64xf32>
    %48 = tpu.matmul %45, %47, %cst_26 {dimension_numbers = #tpu.dot_dimension_numbers<[1], [0], [0], [1], [0, 0, 1, 1], [], []>} : vector<64x64xbf16>, vector<64x64xbf16>, vector<64x64xf32> -> vector<64x64xf32>
    %49 = arith.addf %39, %48 : vector<64x64xf32>
    %c1 = arith.constant 1 : index
    %c0_27 = arith.constant 0 : index
    %50 = vector.load %arg12[%c1, %c0_27] : memref<82x64xbf16, #tpu.memory_space<vmem>>, vector<64x64xbf16>
    %c1_28 = arith.constant 1 : index
    %c0_29 = arith.constant 0 : index
    %c0_30 = arith.constant 0 : index
    %51 = vector.load %arg5[%c1_28, %c0_29, %c0_30] : memref<9x64x64xbf16, #tpu.memory_space<vmem>>, vector<1x64x64xbf16>
    %52 = vector.shape_cast %51 : vector<1x64x64xbf16> to vector<64x64xbf16>
    %cst_31 = arith.constant dense<0.000000e+00> : vector<64x64xf32>
    %53 = tpu.matmul %50, %52, %cst_31 {dimension_numbers = #tpu.dot_dimension_numbers<[1], [0], [0], [1], [0, 0, 1, 1], [], []>} : vector<64x64xbf16>, vector<64x64xbf16>, vector<64x64xf32> -> vector<64x64xf32>
    %54 = arith.addf %49, %53 : vector<64x64xf32>
    %c2 = arith.constant 2 : index
    %c0_32 = arith.constant 0 : index
    %55 = vector.load %arg12[%c2, %c0_32] : memref<82x64xbf16, #tpu.memory_space<vmem>>, vector<64x64xbf16>
    %cst_33 = arith.constant 0.000000e+00 : f32
    %56 = arith.truncf %cst_33 : f32 to bf16
    %57 = vector.shape_cast %38 : vector<64x1xi1> to vector<64x1xi1>
    %58 = vector.broadcast %57 : vector<64x1xi1> to vector<64x64xi1>
    %59 = vector.broadcast %56 : bf16 to vector<64x64xbf16>
    %60 = arith.select %58, %55, %59 : vector<64x64xi1>, vector<64x64xbf16>
    %c2_34 = arith.constant 2 : index
    %c0_35 = arith.constant 0 : index
    %c0_36 = arith.constant 0 : index
    %61 = vector.load %arg5[%c2_34, %c0_35, %c0_36] : memref<9x64x64xbf16, #tpu.memory_space<vmem>>, vector<1x64x64xbf16>
    %62 = vector.shape_cast %61 : vector<1x64x64xbf16> to vector<64x64xbf16>
    %cst_37 = arith.constant dense<0.000000e+00> : vector<64x64xf32>
    %63 = tpu.matmul %60, %62, %cst_37 {dimension_numbers = #tpu.dot_dimension_numbers<[1], [0], [0], [1], [0, 0, 1, 1], [], []>} : vector<64x64xbf16>, vector<64x64xbf16>, vector<64x64xf32> -> vector<64x64xf32>
    %64 = arith.addf %54, %63 : vector<64x64xf32>
    %c8 = arith.constant 8 : index
    %c0_38 = arith.constant 0 : index
    %65 = vector.load %arg12[%c8, %c0_38] : memref<82x64xbf16, #tpu.memory_space<vmem>>, vector<64x64xbf16>
    %cst_39 = arith.constant 0.000000e+00 : f32
    %66 = arith.truncf %cst_39 : f32 to bf16
    %67 = vector.shape_cast %36 : vector<64x1xi1> to vector<64x1xi1>
    %68 = vector.broadcast %67 : vector<64x1xi1> to vector<64x64xi1>
    %69 = vector.broadcast %66 : bf16 to vector<64x64xbf16>
    %70 = arith.select %68, %65, %69 : vector<64x64xi1>, vector<64x64xbf16>
    %c3 = arith.constant 3 : index
    %c0_40 = arith.constant 0 : index
    %c0_41 = arith.constant 0 : index
    %71 = vector.load %arg5[%c3, %c0_40, %c0_41] : memref<9x64x64xbf16, #tpu.memory_space<vmem>>, vector<1x64x64xbf16>
    %72 = vector.shape_cast %71 : vector<1x64x64xbf16> to vector<64x64xbf16>
    %cst_42 = arith.constant dense<0.000000e+00> : vector<64x64xf32>
    %73 = tpu.matmul %70, %72, %cst_42 {dimension_numbers = #tpu.dot_dimension_numbers<[1], [0], [0], [1], [0, 0, 1, 1], [], []>} : vector<64x64xbf16>, vector<64x64xbf16>, vector<64x64xf32> -> vector<64x64xf32>
    %74 = arith.addf %64, %73 : vector<64x64xf32>
    %c9_43 = arith.constant 9 : index
    %c0_44 = arith.constant 0 : index
    %75 = vector.load %arg12[%c9_43, %c0_44] : memref<82x64xbf16, #tpu.memory_space<vmem>>, vector<64x64xbf16>
    %c4 = arith.constant 4 : index
    %c0_45 = arith.constant 0 : index
    %c0_46 = arith.constant 0 : index
    %76 = vector.load %arg5[%c4, %c0_45, %c0_46] : memref<9x64x64xbf16, #tpu.memory_space<vmem>>, vector<1x64x64xbf16>
    %77 = vector.shape_cast %76 : vector<1x64x64xbf16> to vector<64x64xbf16>
    %cst_47 = arith.constant dense<0.000000e+00> : vector<64x64xf32>
    %78 = tpu.matmul %75, %77, %cst_47 {dimension_numbers = #tpu.dot_dimension_numbers<[1], [0], [0], [1], [0, 0, 1, 1], [], []>} : vector<64x64xbf16>, vector<64x64xbf16>, vector<64x64xf32> -> vector<64x64xf32>
    %79 = arith.addf %74, %78 : vector<64x64xf32>
    %c10 = arith.constant 10 : index
    %c0_48 = arith.constant 0 : index
    %80 = vector.load %arg12[%c10, %c0_48] : memref<82x64xbf16, #tpu.memory_space<vmem>>, vector<64x64xbf16>
    %cst_49 = arith.constant 0.000000e+00 : f32
    %81 = arith.truncf %cst_49 : f32 to bf16
    %82 = vector.shape_cast %38 : vector<64x1xi1> to vector<64x1xi1>
    %83 = vector.broadcast %82 : vector<64x1xi1> to vector<64x64xi1>
    %84 = vector.broadcast %81 : bf16 to vector<64x64xbf16>
    %85 = arith.select %83, %80, %84 : vector<64x64xi1>, vector<64x64xbf16>
    %c5 = arith.constant 5 : index
    %c0_50 = arith.constant 0 : index
    %c0_51 = arith.constant 0 : index
    %86 = vector.load %arg5[%c5, %c0_50, %c0_51] : memref<9x64x64xbf16, #tpu.memory_space<vmem>>, vector<1x64x64xbf16>
    %87 = vector.shape_cast %86 : vector<1x64x64xbf16> to vector<64x64xbf16>
    %cst_52 = arith.constant dense<0.000000e+00> : vector<64x64xf32>
    %88 = tpu.matmul %85, %87, %cst_52 {dimension_numbers = #tpu.dot_dimension_numbers<[1], [0], [0], [1], [0, 0, 1, 1], [], []>} : vector<64x64xbf16>, vector<64x64xbf16>, vector<64x64xf32> -> vector<64x64xf32>
    %89 = arith.addf %79, %88 : vector<64x64xf32>
    %c16 = arith.constant 16 : index
    %c0_53 = arith.constant 0 : index
    %90 = vector.load %arg12[%c16, %c0_53] : memref<82x64xbf16, #tpu.memory_space<vmem>>, vector<64x64xbf16>
    %cst_54 = arith.constant 0.000000e+00 : f32
    %91 = arith.truncf %cst_54 : f32 to bf16
    %92 = vector.shape_cast %36 : vector<64x1xi1> to vector<64x1xi1>
    %93 = vector.broadcast %92 : vector<64x1xi1> to vector<64x64xi1>
    %94 = vector.broadcast %91 : bf16 to vector<64x64xbf16>
    %95 = arith.select %93, %90, %94 : vector<64x64xi1>, vector<64x64xbf16>
    %c6 = arith.constant 6 : index
    %c0_55 = arith.constant 0 : index
    %c0_56 = arith.constant 0 : index
    %96 = vector.load %arg5[%c6, %c0_55, %c0_56] : memref<9x64x64xbf16, #tpu.memory_space<vmem>>, vector<1x64x64xbf16>
    %97 = vector.shape_cast %96 : vector<1x64x64xbf16> to vector<64x64xbf16>
    %cst_57 = arith.constant dense<0.000000e+00> : vector<64x64xf32>
    %98 = tpu.matmul %95, %97, %cst_57 {dimension_numbers = #tpu.dot_dimension_numbers<[1], [0], [0], [1], [0, 0, 1, 1], [], []>} : vector<64x64xbf16>, vector<64x64xbf16>, vector<64x64xf32> -> vector<64x64xf32>
    %99 = arith.addf %89, %98 : vector<64x64xf32>
    %c17 = arith.constant 17 : index
    %c0_58 = arith.constant 0 : index
    %100 = vector.load %arg12[%c17, %c0_58] : memref<82x64xbf16, #tpu.memory_space<vmem>>, vector<64x64xbf16>
    %c7 = arith.constant 7 : index
    %c0_59 = arith.constant 0 : index
    %c0_60 = arith.constant 0 : index
    %101 = vector.load %arg5[%c7, %c0_59, %c0_60] : memref<9x64x64xbf16, #tpu.memory_space<vmem>>, vector<1x64x64xbf16>
    %102 = vector.shape_cast %101 : vector<1x64x64xbf16> to vector<64x64xbf16>
    %cst_61 = arith.constant dense<0.000000e+00> : vector<64x64xf32>
    %103 = tpu.matmul %100, %102, %cst_61 {dimension_numbers = #tpu.dot_dimension_numbers<[1], [0], [0], [1], [0, 0, 1, 1], [], []>} : vector<64x64xbf16>, vector<64x64xbf16>, vector<64x64xf32> -> vector<64x64xf32>
    %104 = arith.addf %99, %103 : vector<64x64xf32>
    %c18 = arith.constant 18 : index
    %c0_62 = arith.constant 0 : index
    %105 = vector.load %arg12[%c18, %c0_62] : memref<82x64xbf16, #tpu.memory_space<vmem>>, vector<64x64xbf16>
    %cst_63 = arith.constant 0.000000e+00 : f32
    %106 = arith.truncf %cst_63 : f32 to bf16
    %107 = vector.shape_cast %38 : vector<64x1xi1> to vector<64x1xi1>
    %108 = vector.broadcast %107 : vector<64x1xi1> to vector<64x64xi1>
    %109 = vector.broadcast %106 : bf16 to vector<64x64xbf16>
    %110 = arith.select %108, %105, %109 : vector<64x64xi1>, vector<64x64xbf16>
    %c8_64 = arith.constant 8 : index
    %c0_65 = arith.constant 0 : index
    %c0_66 = arith.constant 0 : index
    %111 = vector.load %arg5[%c8_64, %c0_65, %c0_66] : memref<9x64x64xbf16, #tpu.memory_space<vmem>>, vector<1x64x64xbf16>
    %112 = vector.shape_cast %111 : vector<1x64x64xbf16> to vector<64x64xbf16>
    %cst_67 = arith.constant dense<0.000000e+00> : vector<64x64xf32>
    %113 = tpu.matmul %110, %112, %cst_67 {dimension_numbers = #tpu.dot_dimension_numbers<[1], [0], [0], [1], [0, 0, 1, 1], [], []>} : vector<64x64xbf16>, vector<64x64xbf16>, vector<64x64xf32> -> vector<64x64xf32>
    %114 = arith.addf %104, %113 : vector<64x64xf32>
    %c0_68 = arith.constant 0 : index
    %c0_69 = arith.constant 0 : index
    %115 = vector.load %arg6[%c0_68, %c0_69] : memref<1x64xf32, #tpu.memory_space<vmem>>, vector<1x64xf32>
    %116 = vector.broadcast %115 : vector<1x64xf32> to vector<64x64xf32>
    %117 = arith.mulf %114, %116 : vector<64x64xf32>
    %c0_70 = arith.constant 0 : index
    %c0_71 = arith.constant 0 : index
    %118 = vector.load %arg7[%c0_70, %c0_71] : memref<1x64xf32, #tpu.memory_space<vmem>>, vector<1x64xf32>
    %119 = vector.broadcast %118 : vector<1x64xf32> to vector<64x64xf32>
    %120 = arith.addf %117, %119 : vector<64x64xf32>
    %cst_72 = arith.constant 0.000000e+00 : f32
    %121 = vector.broadcast %cst_72 : f32 to vector<64x64xf32>
    %122 = arith.maximumf %120, %121 : vector<64x64xf32>
    %123 = arith.truncf %122 : vector<64x64xf32> to vector<64x64xbf16>
    %c0_73 = arith.constant 0 : index
    %c0_74 = arith.constant 0 : index
    %124 = vector.load %arg8[%c0_73, %c0_74] : memref<64x256xbf16, #tpu.memory_space<vmem>>, vector<64x256xbf16>
    %cst_75 = arith.constant dense<0.000000e+00> : vector<64x256xf32>
    %125 = tpu.matmul %123, %124, %cst_75 {dimension_numbers = #tpu.dot_dimension_numbers<[1], [0], [0], [1], [0, 0, 1, 1], [], []>} : vector<64x64xbf16>, vector<64x256xbf16>, vector<64x256xf32> -> vector<64x256xf32>
    %c0_76 = arith.constant 0 : index
    %c0_77 = arith.constant 0 : index
    %126 = vector.load %arg9[%c0_76, %c0_77] : memref<1x256xf32, #tpu.memory_space<vmem>>, vector<1x256xf32>
    %127 = vector.broadcast %126 : vector<1x256xf32> to vector<64x256xf32>
    %128 = arith.mulf %125, %127 : vector<64x256xf32>
    %c0_78 = arith.constant 0 : index
    %c0_79 = arith.constant 0 : index
    %129 = vector.load %arg10[%c0_78, %c0_79] : memref<1x256xf32, #tpu.memory_space<vmem>>, vector<1x256xf32>
    %130 = vector.broadcast %129 : vector<1x256xf32> to vector<64x256xf32>
    %131 = arith.addf %128, %130 : vector<64x256xf32>
    %132 = arith.extf %1 : vector<64x256xbf16> to vector<64x256xf32>
    %133 = arith.addf %131, %132 : vector<64x256xf32>
    %cst_80 = arith.constant 0.000000e+00 : f32
    %134 = vector.broadcast %cst_80 : f32 to vector<64x256xf32>
    %135 = arith.maximumf %133, %134 : vector<64x256xf32>
    %136 = arith.truncf %135 : vector<64x256xf32> to vector<64x256xbf16>
    %c0_81 = arith.constant 0 : index
    %c0_82 = arith.constant 0 : index
    %c0_83 = arith.constant 0 : index
    %137 = vector.load %arg11[%c0_81, %c0_82, %c0_83] : memref<1x64x256xbf16, #tpu.memory_space<vmem>>, vector<1x64x256xbf16>
    %138 = vector.shape_cast %137 : vector<1x64x256xbf16> to vector<64x256xbf16>
    %139 = vector.shape_cast %136 : vector<64x256xbf16> to vector<1x64x256xbf16>
    tpu.vector_store %arg11[%c0_81, %c0_82, %c0_83], %139 {strides = array<i32>} : memref<1x64x256xbf16, #tpu.memory_space<vmem>>, vector<1x64x256xbf16>,
    return
  }
  func.func @transform_0(%arg0: i32) -> (i32, i32, i32) {
    %c0_i32 = arith.constant 0 : i32
    %c0_i32_0 = arith.constant 0 : i32
    %c0_i32_1 = arith.constant 0 : i32
    return %arg0, %c0_i32, %c0_i32_0 : i32, i32, i32
  }
  func.func @transform_1(%arg0: i32) -> (i32, i32) {
    %c0_i32 = arith.constant 0 : i32
    %c0_i32_0 = arith.constant 0 : i32
    %c0_i32_1 = arith.constant 0 : i32
    return %c0_i32, %c0_i32_0 : i32, i32
  }
  func.func @transform_2(%arg0: i32) -> (i32, i32) {
    %c0_i32 = arith.constant 0 : i32
    %c0_i32_0 = arith.constant 0 : i32
    %c0_i32_1 = arith.constant 0 : i32
    return %c0_i32, %c0_i32_0 : i32, i32
  }
  func.func @transform_3(%arg0: i32) -> (i32, i32) {
    %c0_i32 = arith.constant 0 : i32
    %c0_i32_0 = arith.constant 0 : i32
    %c0_i32_1 = arith.constant 0 : i32
    return %c0_i32, %c0_i32_0 : i32, i32
  }
  func.func @transform_4(%arg0: i32) -> (i32, i32, i32) {
    %c0_i32 = arith.constant 0 : i32
    %c0_i32_0 = arith.constant 0 : i32
    %c0_i32_1 = arith.constant 0 : i32
    %c0_i32_2 = arith.constant 0 : i32
    return %c0_i32, %c0_i32_0, %c0_i32_1 : i32, i32, i32
  }
  func.func @transform_5(%arg0: i32) -> (i32, i32) {
    %c0_i32 = arith.constant 0 : i32
    %c0_i32_0 = arith.constant 0 : i32
    %c0_i32_1 = arith.constant 0 : i32
    return %c0_i32, %c0_i32_0 : i32, i32
  }
  func.func @transform_6(%arg0: i32) -> (i32, i32) {
    %c0_i32 = arith.constant 0 : i32
    %c0_i32_0 = arith.constant 0 : i32
    %c0_i32_1 = arith.constant 0 : i32
    return %c0_i32, %c0_i32_0 : i32, i32
  }
  func.func @transform_7(%arg0: i32) -> (i32, i32) {
    %c0_i32 = arith.constant 0 : i32
    %c0_i32_0 = arith.constant 0 : i32
    %c0_i32_1 = arith.constant 0 : i32
    return %c0_i32, %c0_i32_0 : i32, i32
  }
  func.func @transform_8(%arg0: i32) -> (i32, i32) {
    %c0_i32 = arith.constant 0 : i32
    %c0_i32_0 = arith.constant 0 : i32
    %c0_i32_1 = arith.constant 0 : i32
    return %c0_i32, %c0_i32_0 : i32, i32
  }
  func.func @transform_9(%arg0: i32) -> (i32, i32) {
    %c0_i32 = arith.constant 0 : i32
    %c0_i32_0 = arith.constant 0 : i32
    %c0_i32_1 = arith.constant 0 : i32
    return %c0_i32, %c0_i32_0 : i32, i32
  }
  func.func @transform_10(%arg0: i32) -> (i32, i32, i32) {
    %c0_i32 = arith.constant 0 : i32
    %c0_i32_0 = arith.constant 0 : i32
    %c0_i32_1 = arith.constant 0 : i32
    return %arg0, %c0_i32, %c0_i32_0 : i32, i32, i32
  }
}

module attributes {stable_mosaic.version = 11 : i64} {
  func.func @_mm_bn_kernel(%arg0: i32, %arg1: memref<128x256xbf16, #tpu.memory_space<vmem>>, %arg2: memref<256x128xbf16, #tpu.memory_space<vmem>>, %arg3: memref<1x128xf32, #tpu.memory_space<vmem>>, %arg4: memref<1x128xf32, #tpu.memory_space<vmem>>, %arg5: memref<128x128xbf16, #tpu.memory_space<vmem>>) attributes {dimension_semantics = [#tpu.dimension_semantics<parallel>], iteration_bounds = array<i64: 1>, scalar_prefetch = 0 : i64, scratch_operands = 0 : i64, tpu.core_type = #tpu.core_type<tc>, window_params = [{transform_indices = @transform_0, window_bounds = array<i64: 128, 256>}, {pipeline_mode = #tpu.pipeline_mode<synchronous>, transform_indices = @transform_1, window_bounds = array<i64: 256, 128>}, {pipeline_mode = #tpu.pipeline_mode<synchronous>, transform_indices = @transform_2, window_bounds = array<i64: 1, 128>}, {pipeline_mode = #tpu.pipeline_mode<synchronous>, transform_indices = @transform_3, window_bounds = array<i64: 1, 128>}, {transform_indices = @transform_4, window_bounds = array<i64: 128, 128>}]} {
    %c0 = arith.constant 0 : index
    %c0_0 = arith.constant 0 : index
    %0 = vector.load %arg1[%c0, %c0_0] : memref<128x256xbf16, #tpu.memory_space<vmem>>, vector<128x256xbf16>
    %c0_1 = arith.constant 0 : index
    %c0_2 = arith.constant 0 : index
    %1 = vector.load %arg2[%c0_1, %c0_2] : memref<256x128xbf16, #tpu.memory_space<vmem>>, vector<256x128xbf16>
    %cst = arith.constant dense<0.000000e+00> : vector<128x128xf32>
    %2 = tpu.matmul %0, %1, %cst {dimension_numbers = #tpu.dot_dimension_numbers<[1], [0], [0], [1], [0, 0, 1, 1], [], []>} : vector<128x256xbf16>, vector<256x128xbf16>, vector<128x128xf32> -> vector<128x128xf32>
    %c0_3 = arith.constant 0 : index
    %c0_4 = arith.constant 0 : index
    %3 = vector.load %arg3[%c0_3, %c0_4] : memref<1x128xf32, #tpu.memory_space<vmem>>, vector<1x128xf32>
    %4 = vector.broadcast %3 : vector<1x128xf32> to vector<128x128xf32>
    %5 = arith.mulf %2, %4 : vector<128x128xf32>
    %c0_5 = arith.constant 0 : index
    %c0_6 = arith.constant 0 : index
    %6 = vector.load %arg4[%c0_5, %c0_6] : memref<1x128xf32, #tpu.memory_space<vmem>>, vector<1x128xf32>
    %7 = vector.broadcast %6 : vector<1x128xf32> to vector<128x128xf32>
    %8 = arith.addf %5, %7 : vector<128x128xf32>
    %cst_7 = arith.constant 0.000000e+00 : f32
    %9 = vector.broadcast %cst_7 : f32 to vector<128x128xf32>
    %10 = arith.maximumf %8, %9 : vector<128x128xf32>
    %11 = arith.truncf %10 : vector<128x128xf32> to vector<128x128xbf16>
    %c0_8 = arith.constant 0 : index
    %c0_9 = arith.constant 0 : index
    %12 = vector.load %arg5[%c0_8, %c0_9] : memref<128x128xbf16, #tpu.memory_space<vmem>>, vector<128x128xbf16>
    tpu.vector_store %arg5[%c0_8, %c0_9], %11 {strides = array<i32>} : memref<128x128xbf16, #tpu.memory_space<vmem>>, vector<128x128xbf16>,
    return
  }
  func.func @transform_0(%arg0: i32) -> (i32, i32) {
    %c0_i32 = arith.constant 0 : i32
    %c0_i32_0 = arith.constant 0 : i32
    return %arg0, %c0_i32 : i32, i32
  }
  func.func @transform_1(%arg0: i32) -> (i32, i32) {
    %c0_i32 = arith.constant 0 : i32
    %c0_i32_0 = arith.constant 0 : i32
    %c0_i32_1 = arith.constant 0 : i32
    return %c0_i32, %c0_i32_0 : i32, i32
  }
  func.func @transform_2(%arg0: i32) -> (i32, i32) {
    %c0_i32 = arith.constant 0 : i32
    %c0_i32_0 = arith.constant 0 : i32
    %c0_i32_1 = arith.constant 0 : i32
    return %c0_i32, %c0_i32_0 : i32, i32
  }
  func.func @transform_3(%arg0: i32) -> (i32, i32) {
    %c0_i32 = arith.constant 0 : i32
    %c0_i32_0 = arith.constant 0 : i32
    %c0_i32_1 = arith.constant 0 : i32
    return %c0_i32, %c0_i32_0 : i32, i32
  }
  func.func @transform_4(%arg0: i32) -> (i32, i32) {
    %c0_i32 = arith.constant 0 : i32
    %c0_i32_0 = arith.constant 0 : i32
    return %arg0, %c0_i32 : i32, i32
  }
}

module attributes {stable_mosaic.version = 11 : i64} {
  func.func @_mm_bn_kernel(%arg0: i32, %arg1: memref<32x1152xbf16, #tpu.memory_space<vmem>>, %arg2: memref<1152x128xbf16, #tpu.memory_space<vmem>>, %arg3: memref<1x128xf32, #tpu.memory_space<vmem>>, %arg4: memref<1x128xf32, #tpu.memory_space<vmem>>, %arg5: memref<32x128xbf16, #tpu.memory_space<vmem>>) attributes {dimension_semantics = [#tpu.dimension_semantics<parallel>], iteration_bounds = array<i64: 1>, scalar_prefetch = 0 : i64, scratch_operands = 0 : i64, tpu.core_type = #tpu.core_type<tc>, window_params = [{transform_indices = @transform_0, window_bounds = array<i64: 32, 1152>}, {pipeline_mode = #tpu.pipeline_mode<synchronous>, transform_indices = @transform_1, window_bounds = array<i64: 1152, 128>}, {pipeline_mode = #tpu.pipeline_mode<synchronous>, transform_indices = @transform_2, window_bounds = array<i64: 1, 128>}, {pipeline_mode = #tpu.pipeline_mode<synchronous>, transform_indices = @transform_3, window_bounds = array<i64: 1, 128>}, {transform_indices = @transform_4, window_bounds = array<i64: 32, 128>}]} {
    %c0 = arith.constant 0 : index
    %c0_0 = arith.constant 0 : index
    %0 = vector.load %arg1[%c0, %c0_0] : memref<32x1152xbf16, #tpu.memory_space<vmem>>, vector<32x1152xbf16>
    %c0_1 = arith.constant 0 : index
    %c0_2 = arith.constant 0 : index
    %1 = vector.load %arg2[%c0_1, %c0_2] : memref<1152x128xbf16, #tpu.memory_space<vmem>>, vector<1152x128xbf16>
    %cst = arith.constant dense<0.000000e+00> : vector<32x128xf32>
    %2 = tpu.matmul %0, %1, %cst {dimension_numbers = #tpu.dot_dimension_numbers<[1], [0], [0], [1], [0, 0, 1, 1], [], []>} : vector<32x1152xbf16>, vector<1152x128xbf16>, vector<32x128xf32> -> vector<32x128xf32>
    %c0_3 = arith.constant 0 : index
    %c0_4 = arith.constant 0 : index
    %3 = vector.load %arg3[%c0_3, %c0_4] : memref<1x128xf32, #tpu.memory_space<vmem>>, vector<1x128xf32>
    %4 = vector.broadcast %3 : vector<1x128xf32> to vector<32x128xf32>
    %5 = arith.mulf %2, %4 : vector<32x128xf32>
    %c0_5 = arith.constant 0 : index
    %c0_6 = arith.constant 0 : index
    %6 = vector.load %arg4[%c0_5, %c0_6] : memref<1x128xf32, #tpu.memory_space<vmem>>, vector<1x128xf32>
    %7 = vector.broadcast %6 : vector<1x128xf32> to vector<32x128xf32>
    %8 = arith.addf %5, %7 : vector<32x128xf32>
    %cst_7 = arith.constant 0.000000e+00 : f32
    %9 = vector.broadcast %cst_7 : f32 to vector<32x128xf32>
    %10 = arith.maximumf %8, %9 : vector<32x128xf32>
    %11 = arith.truncf %10 : vector<32x128xf32> to vector<32x128xbf16>
    %c0_8 = arith.constant 0 : index
    %c0_9 = arith.constant 0 : index
    %12 = vector.load %arg5[%c0_8, %c0_9] : memref<32x128xbf16, #tpu.memory_space<vmem>>, vector<32x128xbf16>
    tpu.vector_store %arg5[%c0_8, %c0_9], %11 {strides = array<i32>} : memref<32x128xbf16, #tpu.memory_space<vmem>>, vector<32x128xbf16>,
    return
  }
  func.func @transform_0(%arg0: i32) -> (i32, i32) {
    %c0_i32 = arith.constant 0 : i32
    %c0_i32_0 = arith.constant 0 : i32
    return %arg0, %c0_i32 : i32, i32
  }
  func.func @transform_1(%arg0: i32) -> (i32, i32) {
    %c0_i32 = arith.constant 0 : i32
    %c0_i32_0 = arith.constant 0 : i32
    %c0_i32_1 = arith.constant 0 : i32
    return %c0_i32, %c0_i32_0 : i32, i32
  }
  func.func @transform_2(%arg0: i32) -> (i32, i32) {
    %c0_i32 = arith.constant 0 : i32
    %c0_i32_0 = arith.constant 0 : i32
    %c0_i32_1 = arith.constant 0 : i32
    return %c0_i32, %c0_i32_0 : i32, i32
  }
  func.func @transform_3(%arg0: i32) -> (i32, i32) {
    %c0_i32 = arith.constant 0 : i32
    %c0_i32_0 = arith.constant 0 : i32
    %c0_i32_1 = arith.constant 0 : i32
    return %c0_i32, %c0_i32_0 : i32, i32
  }
  func.func @transform_4(%arg0: i32) -> (i32, i32) {
    %c0_i32 = arith.constant 0 : i32
    %c0_i32_0 = arith.constant 0 : i32
    return %arg0, %c0_i32 : i32, i32
  }
}

module attributes {stable_mosaic.version = 11 : i64} {
  func.func @_mm_bn_kernel(%arg0: i32, %arg1: memref<32x128xbf16, #tpu.memory_space<vmem>>, %arg2: memref<128x512xbf16, #tpu.memory_space<vmem>>, %arg3: memref<1x512xf32, #tpu.memory_space<vmem>>, %arg4: memref<1x512xf32, #tpu.memory_space<vmem>>, %arg5: memref<32x256xbf16, #tpu.memory_space<vmem>>, %arg6: memref<256x512xbf16, #tpu.memory_space<vmem>>, %arg7: memref<1x512xf32, #tpu.memory_space<vmem>>, %arg8: memref<1x512xf32, #tpu.memory_space<vmem>>, %arg9: memref<32x512xbf16, #tpu.memory_space<vmem>>) attributes {dimension_semantics = [#tpu.dimension_semantics<parallel>], iteration_bounds = array<i64: 1>, scalar_prefetch = 0 : i64, scratch_operands = 0 : i64, tpu.core_type = #tpu.core_type<tc>, window_params = [{transform_indices = @transform_0, window_bounds = array<i64: 32, 128>}, {pipeline_mode = #tpu.pipeline_mode<synchronous>, transform_indices = @transform_1, window_bounds = array<i64: 128, 512>}, {pipeline_mode = #tpu.pipeline_mode<synchronous>, transform_indices = @transform_2, window_bounds = array<i64: 1, 512>}, {pipeline_mode = #tpu.pipeline_mode<synchronous>, transform_indices = @transform_3, window_bounds = array<i64: 1, 512>}, {transform_indices = @transform_4, window_bounds = array<i64: 32, 256>}, {pipeline_mode = #tpu.pipeline_mode<synchronous>, transform_indices = @transform_5, window_bounds = array<i64: 256, 512>}, {pipeline_mode = #tpu.pipeline_mode<synchronous>, transform_indices = @transform_6, window_bounds = array<i64: 1, 512>}, {pipeline_mode = #tpu.pipeline_mode<synchronous>, transform_indices = @transform_7, window_bounds = array<i64: 1, 512>}, {transform_indices = @transform_8, window_bounds = array<i64: 32, 512>}]} {
    %c0 = arith.constant 0 : index
    %c0_0 = arith.constant 0 : index
    %0 = vector.load %arg1[%c0, %c0_0] : memref<32x128xbf16, #tpu.memory_space<vmem>>, vector<32x128xbf16>
    %c0_1 = arith.constant 0 : index
    %c0_2 = arith.constant 0 : index
    %1 = vector.load %arg2[%c0_1, %c0_2] : memref<128x512xbf16, #tpu.memory_space<vmem>>, vector<128x512xbf16>
    %cst = arith.constant dense<0.000000e+00> : vector<32x512xf32>
    %2 = tpu.matmul %0, %1, %cst {dimension_numbers = #tpu.dot_dimension_numbers<[1], [0], [0], [1], [0, 0, 1, 1], [], []>} : vector<32x128xbf16>, vector<128x512xbf16>, vector<32x512xf32> -> vector<32x512xf32>
    %c0_3 = arith.constant 0 : index
    %c0_4 = arith.constant 0 : index
    %3 = vector.load %arg3[%c0_3, %c0_4] : memref<1x512xf32, #tpu.memory_space<vmem>>, vector<1x512xf32>
    %4 = vector.broadcast %3 : vector<1x512xf32> to vector<32x512xf32>
    %5 = arith.mulf %2, %4 : vector<32x512xf32>
    %c0_5 = arith.constant 0 : index
    %c0_6 = arith.constant 0 : index
    %6 = vector.load %arg4[%c0_5, %c0_6] : memref<1x512xf32, #tpu.memory_space<vmem>>, vector<1x512xf32>
    %7 = vector.broadcast %6 : vector<1x512xf32> to vector<32x512xf32>
    %8 = arith.addf %5, %7 : vector<32x512xf32>
    %c0_7 = arith.constant 0 : index
    %c0_8 = arith.constant 0 : index
    %9 = vector.load %arg5[%c0_7, %c0_8] : memref<32x256xbf16, #tpu.memory_space<vmem>>, vector<32x256xbf16>
    %c0_9 = arith.constant 0 : index
    %c0_10 = arith.constant 0 : index
    %10 = vector.load %arg6[%c0_9, %c0_10] : memref<256x512xbf16, #tpu.memory_space<vmem>>, vector<256x512xbf16>
    %cst_11 = arith.constant dense<0.000000e+00> : vector<32x512xf32>
    %11 = tpu.matmul %9, %10, %cst_11 {dimension_numbers = #tpu.dot_dimension_numbers<[1], [0], [0], [1], [0, 0, 1, 1], [], []>} : vector<32x256xbf16>, vector<256x512xbf16>, vector<32x512xf32> -> vector<32x512xf32>
    %c0_12 = arith.constant 0 : index
    %c0_13 = arith.constant 0 : index
    %12 = vector.load %arg7[%c0_12, %c0_13] : memref<1x512xf32, #tpu.memory_space<vmem>>, vector<1x512xf32>
    %13 = vector.broadcast %12 : vector<1x512xf32> to vector<32x512xf32>
    %14 = arith.mulf %11, %13 : vector<32x512xf32>
    %15 = arith.addf %8, %14 : vector<32x512xf32>
    %c0_14 = arith.constant 0 : index
    %c0_15 = arith.constant 0 : index
    %16 = vector.load %arg8[%c0_14, %c0_15] : memref<1x512xf32, #tpu.memory_space<vmem>>, vector<1x512xf32>
    %17 = vector.broadcast %16 : vector<1x512xf32> to vector<32x512xf32>
    %18 = arith.addf %15, %17 : vector<32x512xf32>
    %cst_16 = arith.constant 0.000000e+00 : f32
    %19 = vector.broadcast %cst_16 : f32 to vector<32x512xf32>
    %20 = arith.maximumf %18, %19 : vector<32x512xf32>
    %21 = arith.truncf %20 : vector<32x512xf32> to vector<32x512xbf16>
    %c0_17 = arith.constant 0 : index
    %c0_18 = arith.constant 0 : index
    %22 = vector.load %arg9[%c0_17, %c0_18] : memref<32x512xbf16, #tpu.memory_space<vmem>>, vector<32x512xbf16>
    tpu.vector_store %arg9[%c0_17, %c0_18], %21 {strides = array<i32>} : memref<32x512xbf16, #tpu.memory_space<vmem>>, vector<32x512xbf16>,
    return
  }
  func.func @transform_0(%arg0: i32) -> (i32, i32) {
    %c0_i32 = arith.constant 0 : i32
    %c0_i32_0 = arith.constant 0 : i32
    return %arg0, %c0_i32 : i32, i32
  }
  func.func @transform_1(%arg0: i32) -> (i32, i32) {
    %c0_i32 = arith.constant 0 : i32
    %c0_i32_0 = arith.constant 0 : i32
    %c0_i32_1 = arith.constant 0 : i32
    return %c0_i32, %c0_i32_0 : i32, i32
  }
  func.func @transform_2(%arg0: i32) -> (i32, i32) {
    %c0_i32 = arith.constant 0 : i32
    %c0_i32_0 = arith.constant 0 : i32
    %c0_i32_1 = arith.constant 0 : i32
    return %c0_i32, %c0_i32_0 : i32, i32
  }
  func.func @transform_3(%arg0: i32) -> (i32, i32) {
    %c0_i32 = arith.constant 0 : i32
    %c0_i32_0 = arith.constant 0 : i32
    %c0_i32_1 = arith.constant 0 : i32
    return %c0_i32, %c0_i32_0 : i32, i32
  }
  func.func @transform_4(%arg0: i32) -> (i32, i32) {
    %c0_i32 = arith.constant 0 : i32
    %c0_i32_0 = arith.constant 0 : i32
    return %arg0, %c0_i32 : i32, i32
  }
  func.func @transform_5(%arg0: i32) -> (i32, i32) {
    %c0_i32 = arith.constant 0 : i32
    %c0_i32_0 = arith.constant 0 : i32
    %c0_i32_1 = arith.constant 0 : i32
    return %c0_i32, %c0_i32_0 : i32, i32
  }
  func.func @transform_6(%arg0: i32) -> (i32, i32) {
    %c0_i32 = arith.constant 0 : i32
    %c0_i32_0 = arith.constant 0 : i32
    %c0_i32_1 = arith.constant 0 : i32
    return %c0_i32, %c0_i32_0 : i32, i32
  }
  func.func @transform_7(%arg0: i32) -> (i32, i32) {
    %c0_i32 = arith.constant 0 : i32
    %c0_i32_0 = arith.constant 0 : i32
    %c0_i32_1 = arith.constant 0 : i32
    return %c0_i32, %c0_i32_0 : i32, i32
  }
  func.func @transform_8(%arg0: i32) -> (i32, i32) {
    %c0_i32 = arith.constant 0 : i32
    %c0_i32_0 = arith.constant 0 : i32
    return %arg0, %c0_i32 : i32, i32
  }
}

module attributes {stable_mosaic.version = 11 : i64} {
  func.func @_bottleneck_kernel(%arg0: i32, %arg1: memref<1x16x512xbf16, #tpu.memory_space<vmem>>, %arg2: memref<512x128xbf16, #tpu.memory_space<vmem>>, %arg3: memref<1x128xf32, #tpu.memory_space<vmem>>, %arg4: memref<1x128xf32, #tpu.memory_space<vmem>>, %arg5: memref<9x128x128xbf16, #tpu.memory_space<vmem>>, %arg6: memref<1x128xf32, #tpu.memory_space<vmem>>, %arg7: memref<1x128xf32, #tpu.memory_space<vmem>>, %arg8: memref<128x512xbf16, #tpu.memory_space<vmem>>, %arg9: memref<1x512xf32, #tpu.memory_space<vmem>>, %arg10: memref<1x512xf32, #tpu.memory_space<vmem>>, %arg11: memref<1x16x512xbf16, #tpu.memory_space<vmem>>, %arg12: memref<26x128xbf16, #tpu.memory_space<vmem>>) attributes {dimension_semantics = [#tpu.dimension_semantics<parallel>], iteration_bounds = array<i64: 2>, scalar_prefetch = 0 : i64, scratch_operands = 1 : i64, tpu.core_type = #tpu.core_type<tc>, window_params = [{transform_indices = @transform_0, window_bounds = array<i64: 1, 16, 512>}, {pipeline_mode = #tpu.pipeline_mode<synchronous>, transform_indices = @transform_1, window_bounds = array<i64: 512, 128>}, {pipeline_mode = #tpu.pipeline_mode<synchronous>, transform_indices = @transform_2, window_bounds = array<i64: 1, 128>}, {pipeline_mode = #tpu.pipeline_mode<synchronous>, transform_indices = @transform_3, window_bounds = array<i64: 1, 128>}, {pipeline_mode = #tpu.pipeline_mode<synchronous>, transform_indices = @transform_4, window_bounds = array<i64: 9, 128, 128>}, {pipeline_mode = #tpu.pipeline_mode<synchronous>, transform_indices = @transform_5, window_bounds = array<i64: 1, 128>}, {pipeline_mode = #tpu.pipeline_mode<synchronous>, transform_indices = @transform_6, window_bounds = array<i64: 1, 128>}, {pipeline_mode = #tpu.pipeline_mode<synchronous>, transform_indices = @transform_7, window_bounds = array<i64: 128, 512>}, {pipeline_mode = #tpu.pipeline_mode<synchronous>, transform_indices = @transform_8, window_bounds = array<i64: 1, 512>}, {pipeline_mode = #tpu.pipeline_mode<synchronous>, transform_indices = @transform_9, window_bounds = array<i64: 1, 512>}, {transform_indices = @transform_10, window_bounds = array<i64: 1, 16, 512>}]} {
    %c0 = arith.constant 0 : index
    %c0_0 = arith.constant 0 : index
    %c0_1 = arith.constant 0 : index
    %0 = vector.load %arg1[%c0, %c0_0, %c0_1] : memref<1x16x512xbf16, #tpu.memory_space<vmem>>, vector<1x16x512xbf16>
    %1 = vector.shape_cast %0 : vector<1x16x512xbf16> to vector<16x512xbf16>
    %c0_2 = arith.constant 0 : index
    %c0_3 = arith.constant 0 : index
    %2 = vector.load %arg2[%c0_2, %c0_3] : memref<512x128xbf16, #tpu.memory_space<vmem>>, vector<512x128xbf16>
    %cst = arith.constant dense<0.000000e+00> : vector<16x128xf32>
    %3 = tpu.matmul %1, %2, %cst {dimension_numbers = #tpu.dot_dimension_numbers<[1], [0], [0], [1], [0, 0, 1, 1], [], []>} : vector<16x512xbf16>, vector<512x128xbf16>, vector<16x128xf32> -> vector<16x128xf32>
    %c0_4 = arith.constant 0 : index
    %c0_5 = arith.constant 0 : index
    %4 = vector.load %arg3[%c0_4, %c0_5] : memref<1x128xf32, #tpu.memory_space<vmem>>, vector<1x128xf32>
    %5 = vector.broadcast %4 : vector<1x128xf32> to vector<16x128xf32>
    %6 = arith.mulf %3, %5 : vector<16x128xf32>
    %c0_6 = arith.constant 0 : index
    %c0_7 = arith.constant 0 : index
    %7 = vector.load %arg4[%c0_6, %c0_7] : memref<1x128xf32, #tpu.memory_space<vmem>>, vector<1x128xf32>
    %8 = vector.broadcast %7 : vector<1x128xf32> to vector<16x128xf32>
    %9 = arith.addf %6, %8 : vector<16x128xf32>
    %cst_8 = arith.constant 0.000000e+00 : f32
    %10 = vector.broadcast %cst_8 : f32 to vector<16x128xf32>
    %11 = arith.maximumf %9, %10 : vector<16x128xf32>
    %cst_9 = arith.constant 0.000000e+00 : bf16
    %12 = vector.broadcast %cst_9 : bf16 to vector<5x128xbf16>
    %c0_10 = arith.constant 0 : index
    %c0_11 = arith.constant 0 : index
    %13 = vector.load %arg12[%c0_10, %c0_11] : memref<26x128xbf16, #tpu.memory_space<vmem>>, vector<5x128xbf16>
    tpu.vector_store %arg12[%c0_10, %c0_11], %12 {strides = array<i32>} : memref<26x128xbf16, #tpu.memory_space<vmem>>, vector<5x128xbf16>,
    %cst_12 = arith.constant 0.000000e+00 : bf16
    %14 = vector.broadcast %cst_12 : bf16 to vector<5x128xbf16>
    %c21 = arith.constant 21 : index
    %c0_13 = arith.constant 0 : index
    %15 = vector.load %arg12[%c21, %c0_13] : memref<26x128xbf16, #tpu.memory_space<vmem>>, vector<5x128xbf16>
    tpu.vector_store %arg12[%c21, %c0_13], %14 {strides = array<i32>} : memref<26x128xbf16, #tpu.memory_space<vmem>>, vector<5x128xbf16>,
    %16 = arith.truncf %11 : vector<16x128xf32> to vector<16x128xbf16>
    %c5 = arith.constant 5 : index
    %c0_14 = arith.constant 0 : index
    %17 = vector.load %arg12[%c5, %c0_14] : memref<26x128xbf16, #tpu.memory_space<vmem>>, vector<16x128xbf16>
    tpu.vector_store %arg12[%c5, %c0_14], %16 {strides = array<i32>} : memref<26x128xbf16, #tpu.memory_space<vmem>>, vector<16x128xbf16>,
    %18 = tpu.iota {dimensions = array<i32: 0>} : vector<16x1xi32>
    %c4_i32 = arith.constant 4 : i32
    %c0_i32 = arith.constant 0 : i32
    %19 = arith.cmpi eq, %c4_i32, %c0_i32 : i32
    %c1_i32 = arith.constant 1 : i32
    %20 = arith.select %19, %c1_i32, %c4_i32 : i32
    %21 = vector.broadcast %20 : i32 to vector<16x1xi32>
    %22 = arith.remsi %18, %21 : vector<16x1xi32>
    %c0_i32_15 = arith.constant 0 : i32
    %23 = vector.broadcast %c0_i32_15 : i32 to vector<16x1xi32>
    %24 = arith.cmpi ne, %22, %23 : vector<16x1xi32>
    %c0_i32_16 = arith.constant 0 : i32
    %25 = vector.broadcast %c0_i32_16 : i32 to vector<16x1xi32>
    %26 = arith.cmpi slt, %22, %25 : vector<16x1xi32>
    %c0_i32_17 = arith.constant 0 : i32
    %27 = arith.cmpi slt, %20, %c0_i32_17 : i32
    %28 = vector.broadcast %27 : i1 to vector<16x1xi1>
    %29 = vector.broadcast %28 : vector<16x1xi1> to vector<16x1xi1>
    %30 = arith.xori %26, %29 : vector<16x1xi1>
    %31 = arith.andi %30, %24 : vector<16x1xi1>
    %32 = vector.broadcast %20 : i32 to vector<16x1xi32>
    %33 = arith.addi %22, %32 : vector<16x1xi32>
    %34 = arith.select %31, %33, %22 : vector<16x1xi1>, vector<16x1xi32>
    %c0_i32_18 = arith.constant 0 : i32
    %35 = vector.broadcast %c0_i32_18 : i32 to vector<16x1xi32>
    %36 = arith.cmpi ne, %34, %35 : vector<16x1xi32>
    %c3_i32 = arith.constant 3 : i32
    %37 = vector.broadcast %c3_i32 : i32 to vector<16x1xi32>
    %38 = arith.cmpi ne, %34, %37 : vector<16x1xi32>
    %cst_19 = arith.constant 0.000000e+00 : f32
    %39 = vector.broadcast %cst_19 : f32 to vector<16x128xf32>
    %c0_20 = arith.constant 0 : index
    %c0_21 = arith.constant 0 : index
    %40 = vector.load %arg12[%c0_20, %c0_21] : memref<26x128xbf16, #tpu.memory_space<vmem>>, vector<16x128xbf16>
    %cst_22 = arith.constant 0.000000e+00 : f32
    %41 = arith.truncf %cst_22 : f32 to bf16
    %42 = vector.shape_cast %36 : vector<16x1xi1> to vector<16x1xi1>
    %43 = vector.broadcast %42 : vector<16x1xi1> to vector<16x128xi1>
    %44 = vector.broadcast %41 : bf16 to vector<16x128xbf16>
    %45 = arith.select %43, %40, %44 : vector<16x128xi1>, vector<16x128xbf16>
    %c0_23 = arith.constant 0 : index
    %c0_24 = arith.constant 0 : index
    %c0_25 = arith.constant 0 : index
    %46 = vector.load %arg5[%c0_23, %c0_24, %c0_25] : memref<9x128x128xbf16, #tpu.memory_space<vmem>>, vector<1x128x128xbf16>
    %47 = vector.shape_cast %46 : vector<1x128x128xbf16> to vector<128x128xbf16>
    %cst_26 = arith.constant dense<0.000000e+00> : vector<16x128xf32>
    %48 = tpu.matmul %45, %47, %cst_26 {dimension_numbers = #tpu.dot_dimension_numbers<[1], [0], [0], [1], [0, 0, 1, 1], [], []>} : vector<16x128xbf16>, vector<128x128xbf16>, vector<16x128xf32> -> vector<16x128xf32>
    %49 = arith.addf %39, %48 : vector<16x128xf32>
    %c1 = arith.constant 1 : index
    %c0_27 = arith.constant 0 : index
    %50 = vector.load %arg12[%c1, %c0_27] : memref<26x128xbf16, #tpu.memory_space<vmem>>, vector<16x128xbf16>
    %c1_28 = arith.constant 1 : index
    %c0_29 = arith.constant 0 : index
    %c0_30 = arith.constant 0 : index
    %51 = vector.load %arg5[%c1_28, %c0_29, %c0_30] : memref<9x128x128xbf16, #tpu.memory_space<vmem>>, vector<1x128x128xbf16>
    %52 = vector.shape_cast %51 : vector<1x128x128xbf16> to vector<128x128xbf16>
    %cst_31 = arith.constant dense<0.000000e+00> : vector<16x128xf32>
    %53 = tpu.matmul %50, %52, %cst_31 {dimension_numbers = #tpu.dot_dimension_numbers<[1], [0], [0], [1], [0, 0, 1, 1], [], []>} : vector<16x128xbf16>, vector<128x128xbf16>, vector<16x128xf32> -> vector<16x128xf32>
    %54 = arith.addf %49, %53 : vector<16x128xf32>
    %c2 = arith.constant 2 : index
    %c0_32 = arith.constant 0 : index
    %55 = vector.load %arg12[%c2, %c0_32] : memref<26x128xbf16, #tpu.memory_space<vmem>>, vector<16x128xbf16>
    %cst_33 = arith.constant 0.000000e+00 : f32
    %56 = arith.truncf %cst_33 : f32 to bf16
    %57 = vector.shape_cast %38 : vector<16x1xi1> to vector<16x1xi1>
    %58 = vector.broadcast %57 : vector<16x1xi1> to vector<16x128xi1>
    %59 = vector.broadcast %56 : bf16 to vector<16x128xbf16>
    %60 = arith.select %58, %55, %59 : vector<16x128xi1>, vector<16x128xbf16>
    %c2_34 = arith.constant 2 : index
    %c0_35 = arith.constant 0 : index
    %c0_36 = arith.constant 0 : index
    %61 = vector.load %arg5[%c2_34, %c0_35, %c0_36] : memref<9x128x128xbf16, #tpu.memory_space<vmem>>, vector<1x128x128xbf16>
    %62 = vector.shape_cast %61 : vector<1x128x128xbf16> to vector<128x128xbf16>
    %cst_37 = arith.constant dense<0.000000e+00> : vector<16x128xf32>
    %63 = tpu.matmul %60, %62, %cst_37 {dimension_numbers = #tpu.dot_dimension_numbers<[1], [0], [0], [1], [0, 0, 1, 1], [], []>} : vector<16x128xbf16>, vector<128x128xbf16>, vector<16x128xf32> -> vector<16x128xf32>
    %64 = arith.addf %54, %63 : vector<16x128xf32>
    %c4 = arith.constant 4 : index
    %c0_38 = arith.constant 0 : index
    %65 = vector.load %arg12[%c4, %c0_38] : memref<26x128xbf16, #tpu.memory_space<vmem>>, vector<16x128xbf16>
    %cst_39 = arith.constant 0.000000e+00 : f32
    %66 = arith.truncf %cst_39 : f32 to bf16
    %67 = vector.shape_cast %36 : vector<16x1xi1> to vector<16x1xi1>
    %68 = vector.broadcast %67 : vector<16x1xi1> to vector<16x128xi1>
    %69 = vector.broadcast %66 : bf16 to vector<16x128xbf16>
    %70 = arith.select %68, %65, %69 : vector<16x128xi1>, vector<16x128xbf16>
    %c3 = arith.constant 3 : index
    %c0_40 = arith.constant 0 : index
    %c0_41 = arith.constant 0 : index
    %71 = vector.load %arg5[%c3, %c0_40, %c0_41] : memref<9x128x128xbf16, #tpu.memory_space<vmem>>, vector<1x128x128xbf16>
    %72 = vector.shape_cast %71 : vector<1x128x128xbf16> to vector<128x128xbf16>
    %cst_42 = arith.constant dense<0.000000e+00> : vector<16x128xf32>
    %73 = tpu.matmul %70, %72, %cst_42 {dimension_numbers = #tpu.dot_dimension_numbers<[1], [0], [0], [1], [0, 0, 1, 1], [], []>} : vector<16x128xbf16>, vector<128x128xbf16>, vector<16x128xf32> -> vector<16x128xf32>
    %74 = arith.addf %64, %73 : vector<16x128xf32>
    %c5_43 = arith.constant 5 : index
    %c0_44 = arith.constant 0 : index
    %75 = vector.load %arg12[%c5_43, %c0_44] : memref<26x128xbf16, #tpu.memory_space<vmem>>, vector<16x128xbf16>
    %c4_45 = arith.constant 4 : index
    %c0_46 = arith.constant 0 : index
    %c0_47 = arith.constant 0 : index
    %76 = vector.load %arg5[%c4_45, %c0_46, %c0_47] : memref<9x128x128xbf16, #tpu.memory_space<vmem>>, vector<1x128x128xbf16>
    %77 = vector.shape_cast %76 : vector<1x128x128xbf16> to vector<128x128xbf16>
    %cst_48 = arith.constant dense<0.000000e+00> : vector<16x128xf32>
    %78 = tpu.matmul %75, %77, %cst_48 {dimension_numbers = #tpu.dot_dimension_numbers<[1], [0], [0], [1], [0, 0, 1, 1], [], []>} : vector<16x128xbf16>, vector<128x128xbf16>, vector<16x128xf32> -> vector<16x128xf32>
    %79 = arith.addf %74, %78 : vector<16x128xf32>
    %c6 = arith.constant 6 : index
    %c0_49 = arith.constant 0 : index
    %80 = vector.load %arg12[%c6, %c0_49] : memref<26x128xbf16, #tpu.memory_space<vmem>>, vector<16x128xbf16>
    %cst_50 = arith.constant 0.000000e+00 : f32
    %81 = arith.truncf %cst_50 : f32 to bf16
    %82 = vector.shape_cast %38 : vector<16x1xi1> to vector<16x1xi1>
    %83 = vector.broadcast %82 : vector<16x1xi1> to vector<16x128xi1>
    %84 = vector.broadcast %81 : bf16 to vector<16x128xbf16>
    %85 = arith.select %83, %80, %84 : vector<16x128xi1>, vector<16x128xbf16>
    %c5_51 = arith.constant 5 : index
    %c0_52 = arith.constant 0 : index
    %c0_53 = arith.constant 0 : index
    %86 = vector.load %arg5[%c5_51, %c0_52, %c0_53] : memref<9x128x128xbf16, #tpu.memory_space<vmem>>, vector<1x128x128xbf16>
    %87 = vector.shape_cast %86 : vector<1x128x128xbf16> to vector<128x128xbf16>
    %cst_54 = arith.constant dense<0.000000e+00> : vector<16x128xf32>
    %88 = tpu.matmul %85, %87, %cst_54 {dimension_numbers = #tpu.dot_dimension_numbers<[1], [0], [0], [1], [0, 0, 1, 1], [], []>} : vector<16x128xbf16>, vector<128x128xbf16>, vector<16x128xf32> -> vector<16x128xf32>
    %89 = arith.addf %79, %88 : vector<16x128xf32>
    %c8 = arith.constant 8 : index
    %c0_55 = arith.constant 0 : index
    %90 = vector.load %arg12[%c8, %c0_55] : memref<26x128xbf16, #tpu.memory_space<vmem>>, vector<16x128xbf16>
    %cst_56 = arith.constant 0.000000e+00 : f32
    %91 = arith.truncf %cst_56 : f32 to bf16
    %92 = vector.shape_cast %36 : vector<16x1xi1> to vector<16x1xi1>
    %93 = vector.broadcast %92 : vector<16x1xi1> to vector<16x128xi1>
    %94 = vector.broadcast %91 : bf16 to vector<16x128xbf16>
    %95 = arith.select %93, %90, %94 : vector<16x128xi1>, vector<16x128xbf16>
    %c6_57 = arith.constant 6 : index
    %c0_58 = arith.constant 0 : index
    %c0_59 = arith.constant 0 : index
    %96 = vector.load %arg5[%c6_57, %c0_58, %c0_59] : memref<9x128x128xbf16, #tpu.memory_space<vmem>>, vector<1x128x128xbf16>
    %97 = vector.shape_cast %96 : vector<1x128x128xbf16> to vector<128x128xbf16>
    %cst_60 = arith.constant dense<0.000000e+00> : vector<16x128xf32>
    %98 = tpu.matmul %95, %97, %cst_60 {dimension_numbers = #tpu.dot_dimension_numbers<[1], [0], [0], [1], [0, 0, 1, 1], [], []>} : vector<16x128xbf16>, vector<128x128xbf16>, vector<16x128xf32> -> vector<16x128xf32>
    %99 = arith.addf %89, %98 : vector<16x128xf32>
    %c9 = arith.constant 9 : index
    %c0_61 = arith.constant 0 : index
    %100 = vector.load %arg12[%c9, %c0_61] : memref<26x128xbf16, #tpu.memory_space<vmem>>, vector<16x128xbf16>
    %c7 = arith.constant 7 : index
    %c0_62 = arith.constant 0 : index
    %c0_63 = arith.constant 0 : index
    %101 = vector.load %arg5[%c7, %c0_62, %c0_63] : memref<9x128x128xbf16, #tpu.memory_space<vmem>>, vector<1x128x128xbf16>
    %102 = vector.shape_cast %101 : vector<1x128x128xbf16> to vector<128x128xbf16>
    %cst_64 = arith.constant dense<0.000000e+00> : vector<16x128xf32>
    %103 = tpu.matmul %100, %102, %cst_64 {dimension_numbers = #tpu.dot_dimension_numbers<[1], [0], [0], [1], [0, 0, 1, 1], [], []>} : vector<16x128xbf16>, vector<128x128xbf16>, vector<16x128xf32> -> vector<16x128xf32>
    %104 = arith.addf %99, %103 : vector<16x128xf32>
    %c10 = arith.constant 10 : index
    %c0_65 = arith.constant 0 : index
    %105 = vector.load %arg12[%c10, %c0_65] : memref<26x128xbf16, #tpu.memory_space<vmem>>, vector<16x128xbf16>
    %cst_66 = arith.constant 0.000000e+00 : f32
    %106 = arith.truncf %cst_66 : f32 to bf16
    %107 = vector.shape_cast %38 : vector<16x1xi1> to vector<16x1xi1>
    %108 = vector.broadcast %107 : vector<16x1xi1> to vector<16x128xi1>
    %109 = vector.broadcast %106 : bf16 to vector<16x128xbf16>
    %110 = arith.select %108, %105, %109 : vector<16x128xi1>, vector<16x128xbf16>
    %c8_67 = arith.constant 8 : index
    %c0_68 = arith.constant 0 : index
    %c0_69 = arith.constant 0 : index
    %111 = vector.load %arg5[%c8_67, %c0_68, %c0_69] : memref<9x128x128xbf16, #tpu.memory_space<vmem>>, vector<1x128x128xbf16>
    %112 = vector.shape_cast %111 : vector<1x128x128xbf16> to vector<128x128xbf16>
    %cst_70 = arith.constant dense<0.000000e+00> : vector<16x128xf32>
    %113 = tpu.matmul %110, %112, %cst_70 {dimension_numbers = #tpu.dot_dimension_numbers<[1], [0], [0], [1], [0, 0, 1, 1], [], []>} : vector<16x128xbf16>, vector<128x128xbf16>, vector<16x128xf32> -> vector<16x128xf32>
    %114 = arith.addf %104, %113 : vector<16x128xf32>
    %c0_71 = arith.constant 0 : index
    %c0_72 = arith.constant 0 : index
    %115 = vector.load %arg6[%c0_71, %c0_72] : memref<1x128xf32, #tpu.memory_space<vmem>>, vector<1x128xf32>
    %116 = vector.broadcast %115 : vector<1x128xf32> to vector<16x128xf32>
    %117 = arith.mulf %114, %116 : vector<16x128xf32>
    %c0_73 = arith.constant 0 : index
    %c0_74 = arith.constant 0 : index
    %118 = vector.load %arg7[%c0_73, %c0_74] : memref<1x128xf32, #tpu.memory_space<vmem>>, vector<1x128xf32>
    %119 = vector.broadcast %118 : vector<1x128xf32> to vector<16x128xf32>
    %120 = arith.addf %117, %119 : vector<16x128xf32>
    %cst_75 = arith.constant 0.000000e+00 : f32
    %121 = vector.broadcast %cst_75 : f32 to vector<16x128xf32>
    %122 = arith.maximumf %120, %121 : vector<16x128xf32>
    %123 = arith.truncf %122 : vector<16x128xf32> to vector<16x128xbf16>
    %c0_76 = arith.constant 0 : index
    %c0_77 = arith.constant 0 : index
    %124 = vector.load %arg8[%c0_76, %c0_77] : memref<128x512xbf16, #tpu.memory_space<vmem>>, vector<128x512xbf16>
    %cst_78 = arith.constant dense<0.000000e+00> : vector<16x512xf32>
    %125 = tpu.matmul %123, %124, %cst_78 {dimension_numbers = #tpu.dot_dimension_numbers<[1], [0], [0], [1], [0, 0, 1, 1], [], []>} : vector<16x128xbf16>, vector<128x512xbf16>, vector<16x512xf32> -> vector<16x512xf32>
    %c0_79 = arith.constant 0 : index
    %c0_80 = arith.constant 0 : index
    %126 = vector.load %arg9[%c0_79, %c0_80] : memref<1x512xf32, #tpu.memory_space<vmem>>, vector<1x512xf32>
    %127 = vector.broadcast %126 : vector<1x512xf32> to vector<16x512xf32>
    %128 = arith.mulf %125, %127 : vector<16x512xf32>
    %c0_81 = arith.constant 0 : index
    %c0_82 = arith.constant 0 : index
    %129 = vector.load %arg10[%c0_81, %c0_82] : memref<1x512xf32, #tpu.memory_space<vmem>>, vector<1x512xf32>
    %130 = vector.broadcast %129 : vector<1x512xf32> to vector<16x512xf32>
    %131 = arith.addf %128, %130 : vector<16x512xf32>
    %132 = arith.extf %1 : vector<16x512xbf16> to vector<16x512xf32>
    %133 = arith.addf %131, %132 : vector<16x512xf32>
    %cst_83 = arith.constant 0.000000e+00 : f32
    %134 = vector.broadcast %cst_83 : f32 to vector<16x512xf32>
    %135 = arith.maximumf %133, %134 : vector<16x512xf32>
    %136 = arith.truncf %135 : vector<16x512xf32> to vector<16x512xbf16>
    %c0_84 = arith.constant 0 : index
    %c0_85 = arith.constant 0 : index
    %c0_86 = arith.constant 0 : index
    %137 = vector.load %arg11[%c0_84, %c0_85, %c0_86] : memref<1x16x512xbf16, #tpu.memory_space<vmem>>, vector<1x16x512xbf16>
    %138 = vector.shape_cast %137 : vector<1x16x512xbf16> to vector<16x512xbf16>
    %139 = vector.shape_cast %136 : vector<16x512xbf16> to vector<1x16x512xbf16>
    tpu.vector_store %arg11[%c0_84, %c0_85, %c0_86], %139 {strides = array<i32>} : memref<1x16x512xbf16, #tpu.memory_space<vmem>>, vector<1x16x512xbf16>,
    return
  }
  func.func @transform_0(%arg0: i32) -> (i32, i32, i32) {
    %c0_i32 = arith.constant 0 : i32
    %c0_i32_0 = arith.constant 0 : i32
    %c0_i32_1 = arith.constant 0 : i32
    return %arg0, %c0_i32, %c0_i32_0 : i32, i32, i32
  }
  func.func @transform_1(%arg0: i32) -> (i32, i32) {
    %c0_i32 = arith.constant 0 : i32
    %c0_i32_0 = arith.constant 0 : i32
    %c0_i32_1 = arith.constant 0 : i32
    return %c0_i32, %c0_i32_0 : i32, i32
  }
  func.func @transform_2(%arg0: i32) -> (i32, i32) {
    %c0_i32 = arith.constant 0 : i32
    %c0_i32_0 = arith.constant 0 : i32
    %c0_i32_1 = arith.constant 0 : i32
    return %c0_i32, %c0_i32_0 : i32, i32
  }
  func.func @transform_3(%arg0: i32) -> (i32, i32) {
    %c0_i32 = arith.constant 0 : i32
    %c0_i32_0 = arith.constant 0 : i32
    %c0_i32_1 = arith.constant 0 : i32
    return %c0_i32, %c0_i32_0 : i32, i32
  }
  func.func @transform_4(%arg0: i32) -> (i32, i32, i32) {
    %c0_i32 = arith.constant 0 : i32
    %c0_i32_0 = arith.constant 0 : i32
    %c0_i32_1 = arith.constant 0 : i32
    %c0_i32_2 = arith.constant 0 : i32
    return %c0_i32, %c0_i32_0, %c0_i32_1 : i32, i32, i32
  }
  func.func @transform_5(%arg0: i32) -> (i32, i32) {
    %c0_i32 = arith.constant 0 : i32
    %c0_i32_0 = arith.constant 0 : i32
    %c0_i32_1 = arith.constant 0 : i32
    return %c0_i32, %c0_i32_0 : i32, i32
  }
  func.func @transform_6(%arg0: i32) -> (i32, i32) {
    %c0_i32 = arith.constant 0 : i32
    %c0_i32_0 = arith.constant 0 : i32
    %c0_i32_1 = arith.constant 0 : i32
    return %c0_i32, %c0_i32_0 : i32, i32
  }
  func.func @transform_7(%arg0: i32) -> (i32, i32) {
    %c0_i32 = arith.constant 0 : i32
    %c0_i32_0 = arith.constant 0 : i32
    %c0_i32_1 = arith.constant 0 : i32
    return %c0_i32, %c0_i32_0 : i32, i32
  }
  func.func @transform_8(%arg0: i32) -> (i32, i32) {
    %c0_i32 = arith.constant 0 : i32
    %c0_i32_0 = arith.constant 0 : i32
    %c0_i32_1 = arith.constant 0 : i32
    return %c0_i32, %c0_i32_0 : i32, i32
  }
  func.func @transform_9(%arg0: i32) -> (i32, i32) {
    %c0_i32 = arith.constant 0 : i32
    %c0_i32_0 = arith.constant 0 : i32
    %c0_i32_1 = arith.constant 0 : i32
    return %c0_i32, %c0_i32_0 : i32, i32
  }
  func.func @transform_10(%arg0: i32) -> (i32, i32, i32) {
    %c0_i32 = arith.constant 0 : i32
    %c0_i32_0 = arith.constant 0 : i32
    %c0_i32_1 = arith.constant 0 : i32
    return %arg0, %c0_i32, %c0_i32_0 : i32, i32, i32
  }
}

</mosaic_0001>

<bundles_post_ra>
// kernel: extractor_resnet152_forward.16
= control target key start
LH: loop header
LB: loop body
LE: loop exit
PB: predicated region body
PF: predicated region fallthrough
CT: control target
= control target key end

     0   :  { %s1090_s15 = smov 0   ;;  %s1341_s0 = inlined_call_operand.vmem [shape: bf16[2,8,8,64], index: 0, kind: input, shape index: {}]   ;;  %s1342_s1 = inlined_call_operand.vmem [shape: bf16[2,8,8,64], index: 1, kind: input, shape index: {}]   ;;  %s1343_s2 = inlined_call_operand.vmem [shape: bf16[2,8,8,64], index: 2, kind: input, shape index: {}]   ;;  %s1344_s3 = inlined_call_operand.vmem [shape: bf16[2,8,8,64], index: 3, kind: input, shape index: {}]   ;;  %s1345_s4 = inlined_call_operand.vmem [shape: bf16[2,8,8,64], index: 4, kind: output, shape index: {}]  }
   0x1 LB: > { %s792_s16 = sadd.s32 4294967295, %s1063_s15   ;;  %p796_p0 = scmp.ge.s32.totalorder %s1063_s15, 1  ;;  %s1063_s15 = sphi %s1090_s15, %s14_s15  }
   0x2   : > { %p192_p1 = scmp.lt.s32.totalorder %s1063_s15, 3 }
   0x4   : > { %p193_p2 = pnand %p796_p0, %p192_p1 }
   0x5   : > { %p233_p3 = scmp.lt.s32.totalorder (!%p193_p2), %s792_s16, 1 }
   0x6   : > { %196 = sbr.rel (%p193_p2) target bundleno = 82 (0x52), region = 36 }
   0xb   : > { %s1349_s16 = smov (!%p233_p3, %s792_s16), 1  ;;  %vm386_vm0 = vcmask 519168   ;;  %vm508_vm1 = vsmask.f32 7938 }
   0xc   : > { %s1098_s17 = sshll.u32 %s1349_s16, 5  ;;  %vm1233_vm2 = vmand %vm386_vm0, %vm508_vm1 }
   0xd   : > { %s1104_s20 = scalar_lea.vmem %s1341_s0, %s1098_s17  ;;  %s1110_s23 = scalar_lea.vmem %s1342_s1, %s1098_s17 }
   0xe   : > { %s1116_s26 = scalar_lea.vmem %s1343_s2, %s1098_s17  ;;  %s1122_s29 = scalar_lea.vmem %s1344_s3, %s1098_s17  ;;  %v1125_v0 = vld [vmem:[%s1104_s20] sm:$0xff]   ;;  %v1016_v2 = vld [vmem:[%s1104_s20 + $0x8] sm:$0xff]   ;;  %v1017_v16 = vld [vmem:[%s1104_s20 + $0x10] sm:$0xff]  }
   0xf   : > { %v1128_v1 = vld [vmem:[%s1110_s23] sm:$0xff]   ;;  %v851_v3 = vunpack.c.h.bf16 %v1125_v0  ;;  %v854_v7 = vunpack.c.l.bf16 %v1016_v2  ;;  %v1140_v8 = vld [vmem:[%s1110_s23 + $0x8] sm:$0xff]   ;;  %v855_v9 = vunpack.c.h.bf16 %v1016_v2  ;;  %v1156_v21 = vld [vmem:[%s1110_s23 + $0x10] sm:$0xff]   ;;  %v858_v29 = vunpack.c.l.bf16 %v1017_v16  ;;  %s1183_s6 = scalar_lea.vmem %s1345_s4, %s1098_s17 }
  0x10   : > { %v867_v4 = vunpack.c.h.bf16 %v1128_v1  ;;  %v1134_v5 = vld [vmem:[%s1116_s26] sm:$0xff]   ;;  %v870_v12 = vunpack.c.l.bf16 %v1140_v8  ;;  %v1022_v13 = vld [vmem:[%s1116_s26 + $0x8] sm:$0xff]   ;;  %v871_v15 = vunpack.c.h.bf16 %v1140_v8  ;;  %v1023_v22 = vld [vmem:[%s1116_s26 + $0x10] sm:$0xff]   ;;  %v874_v30 = vunpack.c.l.bf16 %v1156_v21 }
  0x11   : > { %v1137_v6 = vld [vmem:[%s1122_s29] sm:$0xff]   ;;  %v883_v10 = vunpack.c.h.bf16 %v1134_v5  ;;  %v1025_v14 = vld [vmem:[%s1122_s29 + $0x8] sm:$0xff]   ;;  %v886_v18 = vunpack.c.l.bf16 %v1022_v13  ;;  %v887_v20 = vunpack.c.h.bf16 %v1022_v13  ;;  %v1026_v23 = vld [vmem:[%s1122_s29 + $0x10] sm:$0xff]   ;;  %v890_v31 = vunpack.c.l.bf16 %v1023_v22 }
  0x12   : > { %v1144_v11 = vunpack.c.h.bf16 %v1137_v6  ;;  %v291_v17 = vmax.f32 %v851_v3, %v867_v4  ;;  %v1153_v19 = vunpack.c.l.bf16 %v1025_v14  ;;  %v292_v25 = vmax.f32 %v854_v7, %v870_v12  ;;  %v1018_v36 = vld [vmem:[%s1104_s20 + $0x18] sm:$0xff]  }
  0x13   : > { %v293_v26 = vmax.f32 %v855_v9, %v871_v15  ;;  %v1163_v27 = vunpack.c.h.bf16 %v1025_v14  ;;  %v1173_v34 = vunpack.c.l.bf16 %v1026_v23  ;;  %v859_v35 = vunpack.c.h.bf16 %v1017_v16  ;;  %v1177_v37 = vld [vmem:[%s1110_s23 + $0x18] sm:$0xff]  }
  0x14   : > { %v1161_v24 = vmax.f32 %v883_v10, %v1144_v11  ;;  %v1166_v28 = vmax.f32 %v886_v18, %v1153_v19  ;;  %v294_v39 = vmax.f32 %v858_v29, %v874_v30  ;;  %v875_v40 = vunpack.c.h.bf16 %v1156_v21  ;;  %v1024_v42 = vld [vmem:[%s1116_s26 + $0x18] sm:$0xff]  }
  0x15   : > { %v1171_v33 = vmax.f32 %v887_v20, %v1163_v27  ;;  %v891_v41 = vunpack.c.h.bf16 %v1023_v22  ;;  %v1190_v45 = vmax.f32 %v890_v31, %v1173_v34  ;;  %v1192_v46 = vunpack.c.h.bf16 %v1026_v23  ;;  %v1027_v47 = vld [vmem:[%s1122_s29 + $0x18] sm:$0xff]  }
  0x16   : > { %v371_v32 = vmax.f32 %v291_v17, %v1161_v24  ;;  %v372_v38 = vmax.f32 %v292_v25, %v1166_v28  ;;  %v295_v49 = vmax.f32 %v859_v35, %v875_v40  ;;  %v862_v50 = vunpack.c.l.bf16 %v1018_v36 }
  0x17   : > { %v373_v44 = vmax.f32 %v293_v26, %v1171_v33  ;;  %v878_v51 = vunpack.c.l.bf16 %v1177_v37  ;;  %v374_v53 = vmax.f32 %v294_v39, %v1190_v45  ;;  %v1200_v54 = vmax.f32 %v891_v41, %v1192_v46 }
  0x18   : > { %v379_v43 = vpack.c.bf16 %v371_v32, %v371_v32  ;;  %v380_v48 = vpack.c.bf16 %v372_v38, %v372_v38  ;;  %v894_v55 = vunpack.c.l.bf16 %v1024_v42  ;;  %v910_v57 = vunpack.c.l.bf16 %v1027_v47 }
  0x19   : > { %v381_v52 = vpack.c.bf16 %v373_v44, %v373_v44  ;;  %v296_v56 = vmax.f32 %v862_v50, %v878_v51  ;;  %v863_v58 = vunpack.c.h.bf16 %v1018_v36  ;;  %v879_v59 = vunpack.c.h.bf16 %v1177_v37 }
  0x1a   : > { %388 = vst.msk [vmem:[%s1183_s6 + $0x4] sm:$0xf] %vm386_vm0, %v379_v43  ;;  %v382_v60 = vpack.c.bf16 %v374_v53, %v374_v53  ;;  %v375_v61 = vmax.f32 %v295_v49, %v1200_v54  ;;  %v895_v62 = vunpack.c.h.bf16 %v1024_v42  ;;  %v911_v63 = vunpack.c.h.bf16 %v1027_v47 }
  0x1b   : > { %389 = vst.msk [vmem:[%s1183_s6 + $0x8] sm:$0xf] %vm386_vm0, %v380_v48  ;;  %v344_v2 = vmax.f32 %v894_v55, %v910_v57  ;;  %v297_v3 = vmax.f32 %v863_v58, %v879_v59  ;;  %v428_v7 = vmax.f32 %v867_v4, %v1144_v11  ;;  %v429_v8 = vmax.f32 %v870_v12, %v1153_v19 }
  0x1c   : > { %390 = vst.msk [vmem:[%s1183_s6 + $0xc] sm:$0xf] %vm386_vm0, %v381_v52  ;;  %v383_v9 = vpack.c.bf16 %v375_v61, %v375_v61  ;;  %v345_v10 = vmax.f32 %v895_v62, %v911_v63  ;;  %v430_v13 = vmax.f32 %v871_v15, %v1163_v27  ;;  %v431_v12 = vmax.f32 %v874_v30, %v1173_v34 }
  0x1d   : > { %391 = vst.msk [vmem:[%s1183_s6 + $0x10] sm:$0xf] %vm386_vm0, %v382_v60  ;;  %v376_v14 = vmax.f32 %v296_v56, %v344_v2  ;;  %v476_v17 = vrot.slane %v428_v7, 7  ;;  %v477_v4 = vrot.slane %v429_v8, 7  ;;  %v850_v21 = vunpack.c.l.bf16 %v1125_v0 }
  0x1e   : > { %392 = vst.msk [vmem:[%s1183_s6 + $0x14] sm:$0xf] %vm386_vm0, %v383_v9  ;;  %v377_v16 = vmax.f32 %v297_v3, %v345_v10  ;;  %v478_v25 = vrot.slane %v430_v13, 7  ;;  %v866_v15 = vunpack.c.l.bf16 %v1128_v1  ;;  %v432_v29 = vmax.f32 %v875_v40, %v1192_v46 }
  0x1f   : > { %v384_v18 = vpack.c.bf16 %v376_v14, %v376_v14  ;;  %v882_v31 = vunpack.c.l.bf16 %v1134_v5  ;;  %v1227_v32 = vunpack.c.l.bf16 %v1137_v6  ;;  %v479_v37 = vrot.slane %v431_v12, 7 }
  0x20   : > { %v385_v22 = vpack.c.bf16 %v377_v16, %v377_v16  ;;  %v290_v36 = vmax.f32 %v850_v21, %v866_v15  ;;  %v433_v5 = vmax.f32 %v878_v51, %v910_v57  ;;  %v434_v41 = vmax.f32 %v879_v59, %v911_v63 }
  0x21   : > { %v444_v20 = vld [vmem:[%s1183_s6 + $0x4] sm:$0xf]  ;;  %393 = vst.msk [vmem:[%s1183_s6 + $0x18] sm:$0xf] %vm386_vm0, %v384_v18  ;;  %v338_v6 = vmax.f32 %v882_v31, %v1227_v32  ;;  %v480_v44 = vrot.slane %v432_v29, 7  ;;  %v427_v18 = vmax.f32 %v866_v15, %v1227_v32 }
  0x22   : > { %v452_v23 = vunpack.c.l.bf16 %v444_v20  ;;  %394 = vst.msk [vmem:[%s1183_s6 + $0x1c] sm:$0xf] %vm386_vm0, %v385_v22  ;;  %v512_v42 = vld [vmem:[%s1183_s6 + $0x4] sm:$0xf]  ;;  %v515_v50 = vld [vmem:[%s1183_s6 + $0x8] sm:$0xf] }
  0x23   : > { %v1034_v26 = vld [vmem:[%s1183_s6 + $0x8] sm:$0xff]   ;;  %v370_v47 = vmax.f32 %v290_v36, %v338_v6  ;;  %v481_v56 = vrot.slane %v433_v5, 7  ;;  %v482_v61 = vrot.slane %v434_v41, 7  ;;  %v539_v29 = vld [vmem:[%s1116_s26 + $0x18] sm:$0xf] }
  0x24   : > { %v492_v0 = vmax.f32 %v452_v23, %v476_v17  ;;  %v946_v30 = vunpack.c.l.bf16 %v1034_v26  ;;  %v947_v35 = vunpack.c.h.bf16 %v1034_v26  ;;  %v518_v53 = vld [vmem:[%s1183_s6 + $0xc] sm:$0xf]  ;;  %v521_v8 = vld [vmem:[%s1183_s6 + $0x10] sm:$0xf]  ;;  %v553_v41 = vunpack.c.l.bf16 %v539_v29 }
  0x25   : > { %v1035_v43 = vld [vmem:[%s1183_s6 + $0x10] sm:$0xff]   ;;  %v378_v57 = vpack.c.bf16 %v370_v47, %v370_v47 }
  0x26   : > { %v500_v38 = vpack.c.bf16 %v492_v0, %v492_v0  ;;  %v493_v39 = vmax.f32 %v946_v30, %v477_v4  ;;  %v494_v40 = vmax.f32 %v947_v35, %v478_v25  ;;  %v950_v52 = vunpack.c.l.bf16 %v1035_v43  ;;  %v524_v13 = vld [vmem:[%s1183_s6 + $0x14] sm:$0xf]  ;;  %v546_v0 = vld [vmem:[%s1122_s29 + $0x18] sm:$0xf] }
  0x27   : > { %v951_v55 = vunpack.c.h.bf16 %v1035_v43  ;;  %387 = vst.msk [vmem:[%s1183_s6] sm:$0xf] %vm386_vm0, %v378_v57  ;;  %v475_v30 = vrot.slane %v427_v18, 7 }
  0x28   : > { %v513_v48 = vsel %vm1233_vm2, %v500_v38, %v512_v42  ;;  %v501_v49 = vpack.c.bf16 %v493_v39, %v493_v39  ;;  %v502_v51 = vpack.c.bf16 %v494_v40, %v494_v40  ;;  %v495_v60 = vmax.f32 %v950_v52, %v479_v37  ;;  %v527_v21 = vld [vmem:[%s1183_s6 + $0x18] sm:$0xf] }
  0x29   : > { %514 = vst [vmem:[%s1183_s6 + $0x4] sm:$0xf] %v513_v48  ;;  %v496_v62 = vmax.f32 %v951_v55, %v480_v44  ;;  %v1036_v63 = vld [vmem:[%s1183_s6 + $0x18] sm:$0xff]   ;;  %v560_v42 = vunpack.c.l.bf16 %v546_v0 }
  0x2a   : > { %v516_v58 = vsel %vm1233_vm2, %v501_v49, %v515_v50  ;;  %v519_v59 = vsel %vm1233_vm2, %v502_v51, %v518_v53  ;;  %v503_v2 = vpack.c.bf16 %v495_v60, %v495_v60  ;;  %v954_v3 = vunpack.c.l.bf16 %v1036_v63  ;;  %v530_v22 = vld [vmem:[%s1183_s6 + $0x1c] sm:$0xf] }
  0x2b   : > { %517 = vst [vmem:[%s1183_s6 + $0x8] sm:$0xf] %v516_v58  ;;  %v955_v7 = vunpack.c.h.bf16 %v1036_v63  ;;  %v504_v9 = vpack.c.bf16 %v496_v62, %v496_v62  ;;  %v567_v51 = vmax.f32 %v553_v41, %v560_v42 }
  0x2c   : > { %520 = vst [vmem:[%s1183_s6 + $0xc] sm:$0xf] %v519_v59  ;;  %v522_v10 = vsel %vm1233_vm2, %v503_v2, %v521_v8  ;;  %v497_v14 = vmax.f32 %v954_v3, %v481_v56  ;;  %v654_v2 = vrot.slane %v1144_v11, 7  ;;  %v631_v8 = vld [vmem:[%s1122_s29 + $0x18] sm:$0xf] }
  0x2d   : > { %v498_v16 = vmax.f32 %v955_v7, %v482_v61  ;;  %523 = vst [vmem:[%s1183_s6 + $0x10] sm:$0xf] %v522_v10  ;;  %v525_v17 = vsel %vm1233_vm2, %v504_v9, %v524_v13  ;;  %v655_v7 = vrot.slane %v1153_v19, 7  ;;  %v656_v13 = vrot.slane %v1163_v27, 7 }
  0x2e   : > { %526 = vst [vmem:[%s1183_s6 + $0x14] sm:$0xf] %v525_v17  ;;  %v505_v20 = vpack.c.bf16 %v497_v14, %v497_v14  ;;  %v443_v37 = vld [vmem:[%s1183_s6] sm:$0xf]  ;;  %v645_v14 = vunpack.c.l.bf16 %v631_v8  ;;  %v657_v19 = vrot.slane %v1173_v34, 7 }
  0x2f   : > { %v506_v4 = vpack.c.bf16 %v498_v16, %v498_v16  ;;  %v451_v38 = vunpack.c.l.bf16 %v443_v37 }
  0x30   : > { %v807_v12 = vld [vmem:[%s1183_s6 + $0x4] sm:$0xf]  ;;  %v528_v25 = vsel %vm1233_vm2, %v505_v20, %v527_v21 }
  0x31   : > { %v583_v23 = vunpack.c.l.bf16 %v807_v12  ;;  %v531_v26 = vsel %vm1233_vm2, %v506_v4, %v530_v22  ;;  %529 = vst [vmem:[%s1183_s6 + $0x18] sm:$0xf] %v528_v25  ;;  %v491_v43 = vmax.f32 %v451_v38, %v475_v30  ;;  %v659_v25 = vrot.slane %v645_v14, 7 }
  0x32   : > { %532 = vst [vmem:[%s1183_s6 + $0x1c] sm:$0xf] %v531_v26 }
  0x33   : > { %v597_v15 = vmax.f32 %v583_v23, %v338_v6  ;;  %v1041_v31 = vld [vmem:[%s1183_s6 + $0x8] sm:$0xff]   ;;  %v499_v50 = vpack.c.bf16 %v491_v43, %v491_v43  ;;  %v658_v23 = vrot.slane %v1192_v46, 7 }
  0x34   : > { %v982_v35 = vunpack.c.l.bf16 %v1041_v31  ;;  %v983_v36 = vunpack.c.h.bf16 %v1041_v31 }
  0x35   : > { %v604_v5 = vpack.c.bf16 %v597_v15, %v597_v15  ;;  %v1042_v6 = vld [vmem:[%s1183_s6 + $0x10] sm:$0xff]   ;;  %v510_v53 = vsel %vm1233_vm2, %v499_v50, %v443_v37 }
  0x36   : > { %v598_v39 = vmax.f32 %v982_v35, %v1161_v24  ;;  %v599_v40 = vmax.f32 %v983_v36, %v1166_v28  ;;  %v986_v48 = vunpack.c.l.bf16 %v1042_v6  ;;  %v987_v49 = vunpack.c.h.bf16 %v1042_v6  ;;  %511 = vst [vmem:[%s1183_s6] sm:$0xf] %v510_v53 }
  0x37   : > { %814 = vst.msk [vmem:[%s1183_s6 + $0x4] sm:$0xf] %vm386_vm0, %v604_v5 }
  0x38   : > { %v605_v44 = vpack.c.bf16 %v598_v39, %v598_v39  ;;  %v606_v47 = vpack.c.bf16 %v599_v40, %v599_v40  ;;  %v600_v24 = vmax.f32 %v986_v48, %v1171_v33  ;;  %v601_v28 = vmax.f32 %v987_v49, %v1190_v45 }
  0x39   : > { %v1043_v52 = vld [vmem:[%s1183_s6 + $0x18] sm:$0xff]   ;;  %v653_v33 = vrot.slane %v1227_v32, 7 }
  0x3a   : > { %815 = vst.msk [vmem:[%s1183_s6 + $0x8] sm:$0xf] %vm386_vm0, %v605_v44  ;;  %v607_v55 = vpack.c.bf16 %v600_v24, %v600_v24  ;;  %v608_v56 = vpack.c.bf16 %v601_v28, %v601_v28  ;;  %v990_v57 = vunpack.c.l.bf16 %v1043_v52  ;;  %v991_v58 = vunpack.c.h.bf16 %v1043_v52 }
  0x3b   : > { %816 = vst.msk [vmem:[%s1183_s6 + $0xc] sm:$0xf] %vm386_vm0, %v606_v47 }
  0x3c   : > { %817 = vst.msk [vmem:[%s1183_s6 + $0x10] sm:$0xf] %vm386_vm0, %v607_v55  ;;  %v602_v45 = vmax.f32 %v990_v57, %v1200_v54  ;;  %v603_v59 = vmax.f32 %v991_v58, %v567_v51 }
  0x3d   : > { %818 = vst.msk [vmem:[%s1183_s6 + $0x14] sm:$0xf] %vm386_vm0, %v608_v56 }
  0x3e   : > { %v821_v60 = vld [vmem:[%s1183_s6 + $0x4] sm:$0xf]  ;;  %v609_v62 = vpack.c.bf16 %v602_v45, %v602_v45  ;;  %v610_v63 = vpack.c.bf16 %v603_v59, %v603_v59 }
  0x3f   : > { %v632_v61 = vunpack.c.l.bf16 %v821_v60 }
  0x40   : > { %819 = vst.msk [vmem:[%s1183_s6 + $0x18] sm:$0xf] %vm386_vm0, %v609_v62 }
  0x41   : > { %v667_v3 = vmax.f32 %v632_v61, %v653_v33  ;;  %820 = vst.msk [vmem:[%s1183_s6 + $0x1c] sm:$0xf] %vm386_vm0, %v610_v63  ;;  %v829_v22 = vld [vmem:[%s1183_s6 + $0x8] sm:$0xf] }
  0x42   : > { %v1044_v32 = vld [vmem:[%s1183_s6 + $0x8] sm:$0xff]  }
  0x43   : > { %v674_v54 = vpack.c.bf16 %v667_v3, %v667_v3  ;;  %v994_v9 = vunpack.c.l.bf16 %v1044_v32  ;;  %v995_v10 = vunpack.c.h.bf16 %v1044_v32  ;;  %v831_v27 = vld [vmem:[%s1183_s6 + $0xc] sm:$0xf]  ;;  %v833_v36 = vld [vmem:[%s1183_s6 + $0x10] sm:$0xf] }
  0x44   : > { %v1045_v18 = vld [vmem:[%s1183_s6 + $0x10] sm:$0xff]  }
  0x45   : > { %v681_v11 = vsel %vm1233_vm2, %v674_v54, %v821_v60  ;;  %v668_v16 = vmax.f32 %v994_v9, %v654_v2  ;;  %v669_v17 = vmax.f32 %v995_v10, %v655_v7  ;;  %v998_v12 = vunpack.c.l.bf16 %v1045_v18  ;;  %v835_v37 = vld [vmem:[%s1183_s6 + $0x14] sm:$0xf] }
  0x46   : > { %828 = vst [vmem:[%s1183_s6 + $0x4] sm:$0xf] %v681_v11  ;;  %v999_v21 = vunpack.c.h.bf16 %v1045_v18 }
  0x47   : > { %v675_v20 = vpack.c.bf16 %v668_v16, %v668_v16  ;;  %v676_v4 = vpack.c.bf16 %v669_v17, %v669_v17  ;;  %v670_v29 = vmax.f32 %v998_v12, %v656_v13  ;;  %v837_v6 = vld [vmem:[%s1183_s6 + $0x18] sm:$0xf] }
  0x48   : > { %v671_v15 = vmax.f32 %v999_v21, %v657_v19  ;;  %v1046_v31 = vld [vmem:[%s1183_s6 + $0x18] sm:$0xff]  }
  0x49   : > { %v684_v26 = vsel %vm1233_vm2, %v675_v20, %v829_v22  ;;  %v687_v34 = vsel %vm1233_vm2, %v676_v4, %v831_v27  ;;  %v677_v0 = vpack.c.bf16 %v670_v29, %v670_v29  ;;  %v1002_v35 = vunpack.c.l.bf16 %v1046_v31  ;;  %v839_v43 = vld [vmem:[%s1183_s6 + $0x1c] sm:$0xf] }
  0x4a   : > { %830 = vst [vmem:[%s1183_s6 + $0x8] sm:$0xf] %v684_v26  ;;  %v678_v30 = vpack.c.bf16 %v671_v15, %v671_v15  ;;  %v1003_v46 = vunpack.c.h.bf16 %v1046_v31 }
  0x4b   : > { %832 = vst [vmem:[%s1183_s6 + $0xc] sm:$0xf] %v687_v34  ;;  %v690_v5 = vsel %vm1233_vm2, %v677_v0, %v833_v36  ;;  %v672_v39 = vmax.f32 %v1002_v35, %v658_v23 }
  0x4c   : > { %v693_v38 = vsel %vm1233_vm2, %v678_v30, %v835_v37  ;;  %v673_v40 = vmax.f32 %v1003_v46, %v659_v25  ;;  %834 = vst [vmem:[%s1183_s6 + $0x10] sm:$0xf] %v690_v5 }
  0x4d   : > { %836 = vst [vmem:[%s1183_s6 + $0x14] sm:$0xf] %v693_v38  ;;  %v679_v41 = vpack.c.bf16 %v672_v39, %v672_v39 }
  0x4e   : > { %v680_v42 = vpack.c.bf16 %v673_v40, %v673_v40 }
  0x4f   : > { %v696_v44 = vsel %vm1233_vm2, %v679_v41, %v837_v6 }
  0x50   : > { %v699_v47 = vsel %vm1233_vm2, %v680_v42, %v839_v43  ;;  %838 = vst [vmem:[%s1183_s6 + $0x18] sm:$0xf] %v696_v44 }
  0x51   : > { %840 = vst [vmem:[%s1183_s6 + $0x1c] sm:$0xf] %v699_v47 }
  0x52 PF: > { %s14_s15 = sadd.s32 1, %s1063_s15  }
  0x53   : > { %p11_p4 = scmp.ge.s32.totalorder %s14_s15, 4  }
  0x55   :  { %13 = sbr.rel (!%p11_p4) target bundleno = 1 (0x1), region = 76 }

// kernel: extractor_resnet152_forward.15
= control target key start
LH: loop header
LB: loop body
LE: loop exit
PB: predicated region body
PF: predicated region fallthrough
CT: control target
= control target key end

     0   :  { %vm367_vm0 = vcmask 1040384   ;;  %v1097_v2 = vmov 0   ;;  %vm270_vm1 = vcmask 400384   ;;  %vm806_vm2 = vcmask 519168   ;;  %s1657_s1 = inlined_call_operand.vmem [shape: bf16[49,64], index: 1, kind: input, shape index: {}]   ;;  %s1658_s2 = inlined_call_operand.vmem [shape: f32[1,64], index: 2, kind: input, shape index: {}]   ;;  %s1659_s3 = inlined_call_operand.vmem [shape: f32[1,64], index: 3, kind: input, shape index: {}]   ;;  %s1660_s0 = inlined_call_operand.vmem [shape: bf16[512,49], index: 0, kind: input, shape index: {}]   ;;  %s1661_s4 = inlined_call_operand.vmem [shape: bf16[512,64], index: 4, kind: output, shape index: {}]  }
   0x1   :  { %v88_v0 = vld [vmem:[%s1657_s1 + $0x18] sm:$0x1]  ;;  %v369_v3 = vsel %vm367_vm0, 65535, %v1097_v2  ;;  %v1081_v6 = vld [vmem:[%s1657_s1 + $0x10] sm:$0xff]  ;;  %v1080_v7 = vld [vmem:[%s1657_s1 + $0x8] sm:$0xff] }
   0x2   :  { %v262_v1 = vunpack.c.l.b16 %v88_v0  ;;  %v1079_v8 = vld [vmem:[%s1657_s1] sm:$0xff]  ;;  %v1048_v13 = vld [vmem:[%s1660_s0 + $0x8] sm:$0xff]  ;;  %v1049_v17 = vld [vmem:[%s1660_s0 + $0x10] sm:$0xff] }
   0x3   :  { %v1047_v9 = vld [vmem:[%s1660_s0] sm:$0xff]  ;;  %v1056_v14 = vld [vmem:[%s1660_s0 + $0x48] sm:$0xff]  ;;  %v1057_v18 = vld [vmem:[%s1660_s0 + $0x50] sm:$0xff] }
   0x4   :  { %v266_v4 = vpack.c.b16 %v262_v1, %v262_v1  ;;  %v1055_v10 = vld [vmem:[%s1660_s0 + $0x40] sm:$0xff]  ;;  %v1064_v15 = vld [vmem:[%s1660_s0 + $0x88] sm:$0xff]  ;;  %v1065_v19 = vld [vmem:[%s1660_s0 + $0x90] sm:$0xff] }
   0x5   :  { %v1063_v11 = vld [vmem:[%s1660_s0 + $0x80] sm:$0xff]  ;;  %v1072_v16 = vld [vmem:[%s1660_s0 + $0xc8] sm:$0xff]  ;;  %v1073_v20 = vld [vmem:[%s1660_s0 + $0xd0] sm:$0xff] }
   0x6   :  { %v371_v5 = vand.u32 %v369_v3, %v266_v4  ;;  %v1071_v12 = vld [vmem:[%s1660_s0 + $0xc0] sm:$0xff]  ;;  %v1050_v21 = vld [vmem:[%s1660_s0 + $0x18] sm:$0xff]  ;;  %v1052_v29 = vld [vmem:[%s1660_s0 + $0x28] sm:$0xff] }
   0x7   :  { %v1058_v22 = vld [vmem:[%s1660_s0 + $0x58] sm:$0xff]  ;;  %v1051_v25 = vld [vmem:[%s1660_s0 + $0x20] sm:$0xff]  ;;  %v1060_v30 = vld [vmem:[%s1660_s0 + $0x68] sm:$0xff] }
   0x8   :  { %377 = vmatpush.bf16.msra.mxu0 %v371_v5  ;;  %1082 = vmatpush.bf16.msra.mxu1 %v371_v5  ;;  %v1066_v23 = vld [vmem:[%s1660_s0 + $0x98] sm:$0xff]  ;;  %v1059_v26 = vld [vmem:[%s1660_s0 + $0x60] sm:$0xff]  ;;  %v1068_v31 = vld [vmem:[%s1660_s0 + $0xa8] sm:$0xff] }
   0x9   :  { %1083 = vmatpush.bf16.msra.mxu2 %v371_v5  ;;  %1084 = vmatpush.bf16.msra.mxu3 %v371_v5  ;;  %v1074_v24 = vld [vmem:[%s1660_s0 + $0xd8] sm:$0xff]  ;;  %v1067_v27 = vld [vmem:[%s1660_s0 + $0xa0] sm:$0xff]  ;;  %v1076_v32 = vld [vmem:[%s1660_s0 + $0xe8] sm:$0xff] }
   0xa   :  { %v1075_v28 = vld [vmem:[%s1660_s0 + $0xe0] sm:$0xff]  ;;  %v1053_v33 = vld [vmem:[%s1660_s0 + $0x30] sm:$0xff]  ;;  %v1054_v37 = vld [vmem:[%s1660_s0 + $0x38] sm:$0xff] }
   0xb   :  { %v1061_v34 = vld [vmem:[%s1660_s0 + $0x70] sm:$0xff]  ;;  %v1062_v38 = vld [vmem:[%s1660_s0 + $0x78] sm:$0xff]  ;;  %v1266_v41 = vld [vmem:[%s1658_s2] ss:$0 sm:$0xff] }
   0xc   :  { %378 = vmatpush.bf16.msra.mxu0 %v1081_v6  ;;  %1085 = vmatpush.bf16.msra.mxu1 %v1081_v6  ;;  %v1069_v35 = vld [vmem:[%s1660_s0 + $0xb0] sm:$0xff]  ;;  %v1070_v39 = vld [vmem:[%s1660_s0 + $0xb8] sm:$0xff]  ;;  %v1271_v42 = vld [vmem:[%s1659_s3] ss:$0 sm:$0xff] }
   0xd   :  { %1086 = vmatpush.bf16.msra.mxu2 %v1081_v6  ;;  %1087 = vmatpush.bf16.msra.mxu3 %v1081_v6  ;;  %v1077_v36 = vld [vmem:[%s1660_s0 + $0xf0] sm:$0xff]  ;;  %v1078_v40 = vld [vmem:[%s1660_s0 + $0xf8] sm:$0xff] }
  0x10   :  { %379 = vmatpush.bf16.msra.mxu0 %v1080_v7  ;;  %1088 = vmatpush.bf16.msra.mxu1 %v1080_v7 }
  0x11   :  { %1089 = vmatpush.bf16.msra.mxu2 %v1080_v7  ;;  %1090 = vmatpush.bf16.msra.mxu3 %v1080_v7 }
  0x14   :  { %380 = vmatpush.bf16.msra.mxu0 %v1079_v8  ;;  %1091 = vmatpush.bf16.msra.mxu1 %v1079_v8 }
  0x15   :  { %1092 = vmatpush.bf16.msra.mxu2 %v1079_v8  ;;  %1093 = vmatpush.bf16.msra.mxu3 %v1079_v8 }
  0x17   :  { %1015 = vmatmul.msk.bf16.vlgmr.msra.gmra.mxu0 %vm270_vm1, %v1047_v9  ;;  %1023 = vmatmul.msk.bf16.vlgmr.msra.gmra.mxu1 %vm270_vm1, %v1055_v10 }
  0x18   :  { %1031 = vmatmul.msk.bf16.vlgmr.msra.gmra.mxu2 %vm270_vm1, %v1063_v11  ;;  %1039 = vmatmul.msk.bf16.vlgmr.msra.gmra.mxu3 %vm270_vm1, %v1071_v12 }
  0x27   :  { %1016 = vmatmul.msk.bf16.gmra.mxu0 %vm270_vm1, %v1048_v13  ;;  %1024 = vmatmul.msk.bf16.gmra.mxu1 %vm270_vm1, %v1056_v14 }
  0x28   :  { %1032 = vmatmul.msk.bf16.gmra.mxu2 %vm270_vm1, %v1064_v15  ;;  %1040 = vmatmul.msk.bf16.gmra.mxu3 %vm270_vm1, %v1072_v16 }
  0x37   :  { %1017 = vmatmul.msk.bf16.gmra.mxu0 %vm270_vm1, %v1049_v17  ;;  %1025 = vmatmul.msk.bf16.gmra.mxu1 %vm270_vm1, %v1057_v18 }
  0x38   :  { %1033 = vmatmul.msk.bf16.gmra.mxu2 %vm270_vm1, %v1065_v19  ;;  %1041 = vmatmul.msk.bf16.gmra.mxu3 %vm270_vm1, %v1073_v20 }
  0x47   :  { %1018 = vmatmul.msk.bf16.gmra.mxu0 %vm270_vm1, %v1050_v21  ;;  %1026 = vmatmul.msk.bf16.gmra.mxu1 %vm270_vm1, %v1058_v22 }
  0x48   :  { %1034 = vmatmul.msk.bf16.gmra.mxu2 %vm270_vm1, %v1066_v23  ;;  %1042 = vmatmul.msk.bf16.gmra.mxu3 %vm270_vm1, %v1074_v24 }
  0x57   :  { %1019 = vmatmul.msk.bf16.gmra.mxu0 %vm270_vm1, %v1051_v25  ;;  %1027 = vmatmul.msk.bf16.gmra.mxu1 %vm270_vm1, %v1059_v26 }
  0x58   :  { %1035 = vmatmul.msk.bf16.gmra.mxu2 %vm270_vm1, %v1067_v27  ;;  %1043 = vmatmul.msk.bf16.gmra.mxu3 %vm270_vm1, %v1075_v28 }
  0x67   :  { %1020 = vmatmul.msk.bf16.gmra.mxu0 %vm270_vm1, %v1052_v29  ;;  %1028 = vmatmul.msk.bf16.gmra.mxu1 %vm270_vm1, %v1060_v30 }
  0x68   :  { %1036 = vmatmul.msk.bf16.gmra.mxu2 %vm270_vm1, %v1068_v31  ;;  %1044 = vmatmul.msk.bf16.gmra.mxu3 %vm270_vm1, %v1076_v32 }
  0x77   :  { %1021 = vmatmul.msk.bf16.gmra.mxu0 %vm270_vm1, %v1053_v33  ;;  %1029 = vmatmul.msk.bf16.gmra.mxu1 %vm270_vm1, %v1061_v34 }
  0x78   :  { %1037 = vmatmul.msk.bf16.gmra.mxu2 %vm270_vm1, %v1069_v35  ;;  %1045 = vmatmul.msk.bf16.gmra.mxu3 %vm270_vm1, %v1077_v36 }
  0x87   :  { %1022 = vmatmul.msk.bf16.gmra.mxu0 %vm270_vm1, %v1054_v37  ;;  %1030 = vmatmul.msk.bf16.gmra.mxu1 %vm270_vm1, %v1062_v38 }
  0x88   :  { %1038 = vmatmul.msk.bf16.gmra.mxu2 %vm270_vm1, %v1070_v39  ;;  %1046 = vmatmul.msk.bf16.gmra.mxu3 %vm270_vm1, %v1078_v40 }
  0x94   :  { %v382_v43 = vpop.f32.mrf.mxu0  ;;  %v422_v44 = vpop.f32.mrf.mxu1 }
  0x95   :  { %v546_v45 = vmul.f32 %v1266_v41, %v382_v43  ;;  %v562_v46 = vmul.f32 %v1266_v41, %v422_v44 }
  0x97   :  { %v614_v47 = vadd.f32 %v1271_v42, %v546_v45  ;;  %v630_v48 = vadd.f32 %v1271_v42, %v562_v46 }
  0x99   :  { %v678_v49 = vmax.f32 %v614_v47, 0.0  ;;  %v694_v50 = vmax.f32 %v630_v48, 0.0 }
  0x9b   :  { %v742_v51 = vpack.c.bf16 %v678_v49, %v678_v49  ;;  %v758_v52 = vpack.c.bf16 %v694_v50, %v694_v50  ;;  %v462_v53 = vpop.f32.mrf.mxu2  ;;  %v502_v54 = vpop.f32.mrf.mxu3 }
  0x9c   :  { %v578_v55 = vmul.f32 %v1266_v41, %v462_v53  ;;  %v594_v56 = vmul.f32 %v1266_v41, %v502_v54  ;;  %v384_v57 = vpop.f32.mrf.mxu0  ;;  %v424_v58 = vpop.f32.mrf.mxu1 }
  0x9d   :  { %807 = vst.msk [vmem:[%s1661_s4] sm:$0xf] %vm806_vm2, %v742_v51  ;;  %v547_v59 = vmul.f32 %v1266_v41, %v384_v57  ;;  %v563_v60 = vmul.f32 %v1266_v41, %v424_v58 }
  0x9e   :  { %823 = vst.msk [vmem:[%s1661_s4 + $0x40] sm:$0xf] %vm806_vm2, %v758_v52  ;;  %v646_v61 = vadd.f32 %v1271_v42, %v578_v55  ;;  %v662_v62 = vadd.f32 %v1271_v42, %v594_v56 }
  0x9f   :  { %v615_v63 = vadd.f32 %v1271_v42, %v547_v59  ;;  %v631_v0 = vadd.f32 %v1271_v42, %v563_v60 }
  0xa0   :  { %v710_v1 = vmax.f32 %v646_v61, 0.0  ;;  %v726_v2 = vmax.f32 %v662_v62, 0.0 }
  0xa1   :  { %v679_v3 = vmax.f32 %v615_v63, 0.0  ;;  %v695_v4 = vmax.f32 %v631_v0, 0.0 }
  0xa2   :  { %v774_v5 = vpack.c.bf16 %v710_v1, %v710_v1  ;;  %v790_v6 = vpack.c.bf16 %v726_v2, %v726_v2 }
  0xa3   :  { %v743_v7 = vpack.c.bf16 %v679_v3, %v679_v3  ;;  %v759_v8 = vpack.c.bf16 %v695_v4, %v695_v4  ;;  %v464_v9 = vpop.f32.mrf.mxu2  ;;  %v504_v10 = vpop.f32.mrf.mxu3 }
  0xa4   :  { %839 = vst.msk [vmem:[%s1661_s4 + $0x80] sm:$0xf] %vm806_vm2, %v774_v5  ;;  %v579_v11 = vmul.f32 %v1266_v41, %v464_v9  ;;  %v595_v12 = vmul.f32 %v1266_v41, %v504_v10  ;;  %v387_v13 = vpop.f32.mrf.mxu0  ;;  %v427_v14 = vpop.f32.mrf.mxu1 }
  0xa5   :  { %855 = vst.msk [vmem:[%s1661_s4 + $0xc0] sm:$0xf] %vm806_vm2, %v790_v6  ;;  %v548_v15 = vmul.f32 %v1266_v41, %v387_v13  ;;  %v564_v16 = vmul.f32 %v1266_v41, %v427_v14 }
  0xa6   :  { %808 = vst.msk [vmem:[%s1661_s4 + $0x4] sm:$0xf] %vm806_vm2, %v743_v7  ;;  %v647_v17 = vadd.f32 %v1271_v42, %v579_v11  ;;  %v663_v18 = vadd.f32 %v1271_v42, %v595_v12 }
  0xa7   :  { %824 = vst.msk [vmem:[%s1661_s4 + $0x44] sm:$0xf] %vm806_vm2, %v759_v8  ;;  %v616_v19 = vadd.f32 %v1271_v42, %v548_v15  ;;  %v632_v20 = vadd.f32 %v1271_v42, %v564_v16 }
  0xa8   :  { %v711_v21 = vmax.f32 %v647_v17, 0.0  ;;  %v727_v22 = vmax.f32 %v663_v18, 0.0 }
  0xa9   :  { %v680_v23 = vmax.f32 %v616_v19, 0.0  ;;  %v696_v24 = vmax.f32 %v632_v20, 0.0 }
  0xaa   :  { %v775_v25 = vpack.c.bf16 %v711_v21, %v711_v21  ;;  %v791_v26 = vpack.c.bf16 %v727_v22, %v727_v22 }
  0xab   :  { %v744_v27 = vpack.c.bf16 %v680_v23, %v680_v23  ;;  %v760_v28 = vpack.c.bf16 %v696_v24, %v696_v24  ;;  %v467_v29 = vpop.f32.mrf.mxu2  ;;  %v507_v30 = vpop.f32.mrf.mxu3 }
  0xac   :  { %840 = vst.msk [vmem:[%s1661_s4 + $0x84] sm:$0xf] %vm806_vm2, %v775_v25  ;;  %v580_v31 = vmul.f32 %v1266_v41, %v467_v29  ;;  %v596_v32 = vmul.f32 %v1266_v41, %v507_v30  ;;  %v389_v33 = vpop.f32.mrf.mxu0  ;;  %v429_v34 = vpop.f32.mrf.mxu1 }
  0xad   :  { %856 = vst.msk [vmem:[%s1661_s4 + $0xc4] sm:$0xf] %vm806_vm2, %v791_v26  ;;  %v549_v35 = vmul.f32 %v1266_v41, %v389_v33  ;;  %v565_v36 = vmul.f32 %v1266_v41, %v429_v34 }
  0xae   :  { %809 = vst.msk [vmem:[%s1661_s4 + $0x8] sm:$0xf] %vm806_vm2, %v744_v27  ;;  %v648_v37 = vadd.f32 %v1271_v42, %v580_v31  ;;  %v664_v38 = vadd.f32 %v1271_v42, %v596_v32 }
  0xaf   :  { %825 = vst.msk [vmem:[%s1661_s4 + $0x48] sm:$0xf] %vm806_vm2, %v760_v28  ;;  %v617_v39 = vadd.f32 %v1271_v42, %v549_v35  ;;  %v633_v40 = vadd.f32 %v1271_v42, %v565_v36 }
  0xb0   :  { %v712_v43 = vmax.f32 %v648_v37, 0.0  ;;  %v728_v44 = vmax.f32 %v664_v38, 0.0 }
  0xb1   :  { %v681_v45 = vmax.f32 %v617_v39, 0.0  ;;  %v697_v46 = vmax.f32 %v633_v40, 0.0 }
  0xb2   :  { %v776_v47 = vpack.c.bf16 %v712_v43, %v712_v43  ;;  %v792_v48 = vpack.c.bf16 %v728_v44, %v728_v44 }
  0xb3   :  { %v745_v49 = vpack.c.bf16 %v681_v45, %v681_v45  ;;  %v761_v50 = vpack.c.bf16 %v697_v46, %v697_v46  ;;  %v469_v51 = vpop.f32.mrf.mxu2  ;;  %v509_v52 = vpop.f32.mrf.mxu3 }
  0xb4   :  { %841 = vst.msk [vmem:[%s1661_s4 + $0x88] sm:$0xf] %vm806_vm2, %v776_v47  ;;  %v581_v53 = vmul.f32 %v1266_v41, %v469_v51  ;;  %v597_v54 = vmul.f32 %v1266_v41, %v509_v52  ;;  %v392_v55 = vpop.f32.mrf.mxu0  ;;  %v432_v56 = vpop.f32.mrf.mxu1 }
  0xb5   :  { %857 = vst.msk [vmem:[%s1661_s4 + $0xc8] sm:$0xf] %vm806_vm2, %v792_v48  ;;  %v550_v57 = vmul.f32 %v1266_v41, %v392_v55  ;;  %v566_v58 = vmul.f32 %v1266_v41, %v432_v56 }
  0xb6   :  { %810 = vst.msk [vmem:[%s1661_s4 + $0xc] sm:$0xf] %vm806_vm2, %v745_v49  ;;  %v649_v59 = vadd.f32 %v1271_v42, %v581_v53  ;;  %v665_v60 = vadd.f32 %v1271_v42, %v597_v54 }
  0xb7   :  { %826 = vst.msk [vmem:[%s1661_s4 + $0x4c] sm:$0xf] %vm806_vm2, %v761_v50  ;;  %v618_v61 = vadd.f32 %v1271_v42, %v550_v57  ;;  %v634_v62 = vadd.f32 %v1271_v42, %v566_v58 }
  0xb8   :  { %v713_v63 = vmax.f32 %v649_v59, 0.0  ;;  %v729_v0 = vmax.f32 %v665_v60, 0.0 }
  0xb9   :  { %v682_v1 = vmax.f32 %v618_v61, 0.0  ;;  %v698_v2 = vmax.f32 %v634_v62, 0.0 }
  0xba   :  { %v777_v3 = vpack.c.bf16 %v713_v63, %v713_v63  ;;  %v793_v4 = vpack.c.bf16 %v729_v0, %v729_v0 }
  0xbb   :  { %v746_v5 = vpack.c.bf16 %v682_v1, %v682_v1  ;;  %v762_v6 = vpack.c.bf16 %v698_v2, %v698_v2  ;;  %v472_v7 = vpop.f32.mrf.mxu2  ;;  %v512_v8 = vpop.f32.mrf.mxu3 }
  0xbc   :  { %842 = vst.msk [vmem:[%s1661_s4 + $0x8c] sm:$0xf] %vm806_vm2, %v777_v3  ;;  %v582_v9 = vmul.f32 %v1266_v41, %v472_v7  ;;  %v598_v10 = vmul.f32 %v1266_v41, %v512_v8  ;;  %v394_v11 = vpop.f32.mrf.mxu0  ;;  %v434_v12 = vpop.f32.mrf.mxu1 }
  0xbd   :  { %858 = vst.msk [vmem:[%s1661_s4 + $0xcc] sm:$0xf] %vm806_vm2, %v793_v4  ;;  %v551_v13 = vmul.f32 %v1266_v41, %v394_v11  ;;  %v567_v14 = vmul.f32 %v1266_v41, %v434_v12 }
  0xbe   :  { %811 = vst.msk [vmem:[%s1661_s4 + $0x10] sm:$0xf] %vm806_vm2, %v746_v5  ;;  %v650_v15 = vadd.f32 %v1271_v42, %v582_v9  ;;  %v666_v16 = vadd.f32 %v1271_v42, %v598_v10 }
  0xbf   :  { %827 = vst.msk [vmem:[%s1661_s4 + $0x50] sm:$0xf] %vm806_vm2, %v762_v6  ;;  %v619_v17 = vadd.f32 %v1271_v42, %v551_v13  ;;  %v635_v18 = vadd.f32 %v1271_v42, %v567_v14 }
  0xc0   :  { %v714_v19 = vmax.f32 %v650_v15, 0.0  ;;  %v730_v20 = vmax.f32 %v666_v16, 0.0 }
  0xc1   :  { %v683_v21 = vmax.f32 %v619_v17, 0.0  ;;  %v699_v22 = vmax.f32 %v635_v18, 0.0 }
  0xc2   :  { %v778_v23 = vpack.c.bf16 %v714_v19, %v714_v19  ;;  %v794_v24 = vpack.c.bf16 %v730_v20, %v730_v20 }
  0xc3   :  { %v747_v25 = vpack.c.bf16 %v683_v21, %v683_v21  ;;  %v763_v26 = vpack.c.bf16 %v699_v22, %v699_v22  ;;  %v474_v27 = vpop.f32.mrf.mxu2  ;;  %v514_v28 = vpop.f32.mrf.mxu3 }
  0xc4   :  { %843 = vst.msk [vmem:[%s1661_s4 + $0x90] sm:$0xf] %vm806_vm2, %v778_v23  ;;  %v583_v29 = vmul.f32 %v1266_v41, %v474_v27  ;;  %v599_v30 = vmul.f32 %v1266_v41, %v514_v28  ;;  %v397_v31 = vpop.f32.mrf.mxu0  ;;  %v437_v32 = vpop.f32.mrf.mxu1 }
  0xc5   :  { %859 = vst.msk [vmem:[%s1661_s4 + $0xd0] sm:$0xf] %vm806_vm2, %v794_v24  ;;  %v552_v33 = vmul.f32 %v1266_v41, %v397_v31  ;;  %v568_v34 = vmul.f32 %v1266_v41, %v437_v32 }
  0xc6   :  { %812 = vst.msk [vmem:[%s1661_s4 + $0x14] sm:$0xf] %vm806_vm2, %v747_v25  ;;  %v651_v35 = vadd.f32 %v1271_v42, %v583_v29  ;;  %v667_v36 = vadd.f32 %v1271_v42, %v599_v30 }
  0xc7   :  { %828 = vst.msk [vmem:[%s1661_s4 + $0x54] sm:$0xf] %vm806_vm2, %v763_v26  ;;  %v620_v37 = vadd.f32 %v1271_v42, %v552_v33  ;;  %v636_v38 = vadd.f32 %v1271_v42, %v568_v34 }
  0xc8   :  { %v715_v39 = vmax.f32 %v651_v35, 0.0  ;;  %v731_v40 = vmax.f32 %v667_v36, 0.0 }
  0xc9   :  { %v684_v43 = vmax.f32 %v620_v37, 0.0  ;;  %v700_v44 = vmax.f32 %v636_v38, 0.0 }
  0xca   :  { %v779_v45 = vpack.c.bf16 %v715_v39, %v715_v39  ;;  %v795_v46 = vpack.c.bf16 %v731_v40, %v731_v40 }
  0xcb   :  { %v748_v47 = vpack.c.bf16 %v684_v43, %v684_v43  ;;  %v764_v48 = vpack.c.bf16 %v700_v44, %v700_v44  ;;  %v477_v49 = vpop.f32.mrf.mxu2  ;;  %v517_v50 = vpop.f32.mrf.mxu3 }
  0xcc   :  { %844 = vst.msk [vmem:[%s1661_s4 + $0x94] sm:$0xf] %vm806_vm2, %v779_v45  ;;  %v584_v51 = vmul.f32 %v1266_v41, %v477_v49  ;;  %v600_v52 = vmul.f32 %v1266_v41, %v517_v50  ;;  %v399_v53 = vpop.f32.mrf.mxu0  ;;  %v439_v54 = vpop.f32.mrf.mxu1 }
  0xcd   :  { %860 = vst.msk [vmem:[%s1661_s4 + $0xd4] sm:$0xf] %vm806_vm2, %v795_v46  ;;  %v553_v55 = vmul.f32 %v1266_v41, %v399_v53  ;;  %v569_v56 = vmul.f32 %v1266_v41, %v439_v54 }
  0xce   :  { %813 = vst.msk [vmem:[%s1661_s4 + $0x18] sm:$0xf] %vm806_vm2, %v748_v47  ;;  %v652_v57 = vadd.f32 %v1271_v42, %v584_v51  ;;  %v668_v58 = vadd.f32 %v1271_v42, %v600_v52 }
  0xcf   :  { %829 = vst.msk [vmem:[%s1661_s4 + $0x58] sm:$0xf] %vm806_vm2, %v764_v48  ;;  %v621_v59 = vadd.f32 %v1271_v42, %v553_v55  ;;  %v637_v60 = vadd.f32 %v1271_v42, %v569_v56 }
  0xd0   :  { %v716_v61 = vmax.f32 %v652_v57, 0.0  ;;  %v732_v62 = vmax.f32 %v668_v58, 0.0 }
  0xd1   :  { %v685_v63 = vmax.f32 %v621_v59, 0.0  ;;  %v701_v0 = vmax.f32 %v637_v60, 0.0 }
  0xd2   :  { %v780_v1 = vpack.c.bf16 %v716_v61, %v716_v61  ;;  %v796_v2 = vpack.c.bf16 %v732_v62, %v732_v62 }
  0xd3   :  { %v749_v3 = vpack.c.bf16 %v685_v63, %v685_v63  ;;  %v765_v4 = vpack.c.bf16 %v701_v0, %v701_v0  ;;  %v479_v5 = vpop.f32.mrf.mxu2  ;;  %v519_v6 = vpop.f32.mrf.mxu3 }
  0xd4   :  { %845 = vst.msk [vmem:[%s1661_s4 + $0x98] sm:$0xf] %vm806_vm2, %v780_v1  ;;  %v585_v7 = vmul.f32 %v1266_v41, %v479_v5  ;;  %v601_v8 = vmul.f32 %v1266_v41, %v519_v6  ;;  %v402_v9 = vpop.f32.mrf.mxu0  ;;  %v442_v10 = vpop.f32.mrf.mxu1 }
  0xd5   :  { %861 = vst.msk [vmem:[%s1661_s4 + $0xd8] sm:$0xf] %vm806_vm2, %v796_v2  ;;  %v554_v11 = vmul.f32 %v1266_v41, %v402_v9  ;;  %v570_v12 = vmul.f32 %v1266_v41, %v442_v10 }
  0xd6   :  { %814 = vst.msk [vmem:[%s1661_s4 + $0x1c] sm:$0xf] %vm806_vm2, %v749_v3  ;;  %v653_v13 = vadd.f32 %v1271_v42, %v585_v7  ;;  %v669_v14 = vadd.f32 %v1271_v42, %v601_v8 }
  0xd7   :  { %830 = vst.msk [vmem:[%s1661_s4 + $0x5c] sm:$0xf] %vm806_vm2, %v765_v4  ;;  %v622_v15 = vadd.f32 %v1271_v42, %v554_v11  ;;  %v638_v16 = vadd.f32 %v1271_v42, %v570_v12 }
  0xd8   :  { %v717_v17 = vmax.f32 %v653_v13, 0.0  ;;  %v733_v18 = vmax.f32 %v669_v14, 0.0 }
  0xd9   :  { %v686_v19 = vmax.f32 %v622_v15, 0.0  ;;  %v702_v20 = vmax.f32 %v638_v16, 0.0 }
  0xda   :  { %v781_v21 = vpack.c.bf16 %v717_v17, %v717_v17  ;;  %v797_v22 = vpack.c.bf16 %v733_v18, %v733_v18 }
  0xdb   :  { %v750_v23 = vpack.c.bf16 %v686_v19, %v686_v19  ;;  %v766_v24 = vpack.c.bf16 %v702_v20, %v702_v20  ;;  %v482_v25 = vpop.f32.mrf.mxu2  ;;  %v522_v26 = vpop.f32.mrf.mxu3 }
  0xdc   :  { %846 = vst.msk [vmem:[%s1661_s4 + $0x9c] sm:$0xf] %vm806_vm2, %v781_v21  ;;  %v586_v27 = vmul.f32 %v1266_v41, %v482_v25  ;;  %v602_v28 = vmul.f32 %v1266_v41, %v522_v26  ;;  %v404_v29 = vpop.f32.mrf.mxu0  ;;  %v444_v30 = vpop.f32.mrf.mxu1 }
  0xdd   :  { %862 = vst.msk [vmem:[%s1661_s4 + $0xdc] sm:$0xf] %vm806_vm2, %v797_v22  ;;  %v555_v31 = vmul.f32 %v1266_v41, %v404_v29  ;;  %v571_v32 = vmul.f32 %v1266_v41, %v444_v30 }
  0xde   :  { %815 = vst.msk [vmem:[%s1661_s4 + $0x20] sm:$0xf] %vm806_vm2, %v750_v23  ;;  %v654_v33 = vadd.f32 %v1271_v42, %v586_v27  ;;  %v670_v34 = vadd.f32 %v1271_v42, %v602_v28 }
  0xdf   :  { %831 = vst.msk [vmem:[%s1661_s4 + $0x60] sm:$0xf] %vm806_vm2, %v766_v24  ;;  %v623_v35 = vadd.f32 %v1271_v42, %v555_v31  ;;  %v639_v36 = vadd.f32 %v1271_v42, %v571_v32 }
  0xe0   :  { %v718_v37 = vmax.f32 %v654_v33, 0.0  ;;  %v734_v38 = vmax.f32 %v670_v34, 0.0 }
  0xe1   :  { %v687_v39 = vmax.f32 %v623_v35, 0.0  ;;  %v703_v40 = vmax.f32 %v639_v36, 0.0 }
  0xe2   :  { %v782_v43 = vpack.c.bf16 %v718_v37, %v718_v37  ;;  %v798_v44 = vpack.c.bf16 %v734_v38, %v734_v38 }
  0xe3   :  { %v751_v45 = vpack.c.bf16 %v687_v39, %v687_v39  ;;  %v767_v46 = vpack.c.bf16 %v703_v40, %v703_v40  ;;  %v484_v47 = vpop.f32.mrf.mxu2  ;;  %v524_v48 = vpop.f32.mrf.mxu3 }
  0xe4   :  { %847 = vst.msk [vmem:[%s1661_s4 + $0xa0] sm:$0xf] %vm806_vm2, %v782_v43  ;;  %v587_v49 = vmul.f32 %v1266_v41, %v484_v47  ;;  %v603_v50 = vmul.f32 %v1266_v41, %v524_v48  ;;  %v407_v51 = vpop.f32.mrf.mxu0  ;;  %v447_v52 = vpop.f32.mrf.mxu1 }
  0xe5   :  { %863 = vst.msk [vmem:[%s1661_s4 + $0xe0] sm:$0xf] %vm806_vm2, %v798_v44  ;;  %v556_v53 = vmul.f32 %v1266_v41, %v407_v51  ;;  %v572_v54 = vmul.f32 %v1266_v41, %v447_v52 }
  0xe6   :  { %816 = vst.msk [vmem:[%s1661_s4 + $0x24] sm:$0xf] %vm806_vm2, %v751_v45  ;;  %v655_v55 = vadd.f32 %v1271_v42, %v587_v49  ;;  %v671_v56 = vadd.f32 %v1271_v42, %v603_v50 }
  0xe7   :  { %832 = vst.msk [vmem:[%s1661_s4 + $0x64] sm:$0xf] %vm806_vm2, %v767_v46  ;;  %v624_v57 = vadd.f32 %v1271_v42, %v556_v53  ;;  %v640_v58 = vadd.f32 %v1271_v42, %v572_v54 }
  0xe8   :  { %v719_v59 = vmax.f32 %v655_v55, 0.0  ;;  %v735_v60 = vmax.f32 %v671_v56, 0.0 }
  0xe9   :  { %v688_v61 = vmax.f32 %v624_v57, 0.0  ;;  %v704_v62 = vmax.f32 %v640_v58, 0.0 }
  0xea   :  { %v783_v63 = vpack.c.bf16 %v719_v59, %v719_v59  ;;  %v799_v0 = vpack.c.bf16 %v735_v60, %v735_v60 }
  0xeb   :  { %v752_v1 = vpack.c.bf16 %v688_v61, %v688_v61  ;;  %v768_v2 = vpack.c.bf16 %v704_v62, %v704_v62  ;;  %v487_v3 = vpop.f32.mrf.mxu2  ;;  %v527_v4 = vpop.f32.mrf.mxu3 }
  0xec   :  { %848 = vst.msk [vmem:[%s1661_s4 + $0xa4] sm:$0xf] %vm806_vm2, %v783_v63  ;;  %v588_v5 = vmul.f32 %v1266_v41, %v487_v3  ;;  %v604_v6 = vmul.f32 %v1266_v41, %v527_v4  ;;  %v409_v7 = vpop.f32.mrf.mxu0  ;;  %v449_v8 = vpop.f32.mrf.mxu1 }
  0xed   :  { %864 = vst.msk [vmem:[%s1661_s4 + $0xe4] sm:$0xf] %vm806_vm2, %v799_v0  ;;  %v557_v9 = vmul.f32 %v1266_v41, %v409_v7  ;;  %v573_v10 = vmul.f32 %v1266_v41, %v449_v8 }
  0xee   :  { %817 = vst.msk [vmem:[%s1661_s4 + $0x28] sm:$0xf] %vm806_vm2, %v752_v1  ;;  %v656_v11 = vadd.f32 %v1271_v42, %v588_v5  ;;  %v672_v12 = vadd.f32 %v1271_v42, %v604_v6 }
  0xef   :  { %833 = vst.msk [vmem:[%s1661_s4 + $0x68] sm:$0xf] %vm806_vm2, %v768_v2  ;;  %v625_v13 = vadd.f32 %v1271_v42, %v557_v9  ;;  %v641_v14 = vadd.f32 %v1271_v42, %v573_v10 }
  0xf0   :  { %v720_v15 = vmax.f32 %v656_v11, 0.0  ;;  %v736_v16 = vmax.f32 %v672_v12, 0.0 }
  0xf1   :  { %v689_v17 = vmax.f32 %v625_v13, 0.0  ;;  %v705_v18 = vmax.f32 %v641_v14, 0.0 }
  0xf2   :  { %v784_v19 = vpack.c.bf16 %v720_v15, %v720_v15  ;;  %v800_v20 = vpack.c.bf16 %v736_v16, %v736_v16 }
  0xf3   :  { %v753_v21 = vpack.c.bf16 %v689_v17, %v689_v17  ;;  %v769_v22 = vpack.c.bf16 %v705_v18, %v705_v18  ;;  %v489_v23 = vpop.f32.mrf.mxu2  ;;  %v529_v24 = vpop.f32.mrf.mxu3 }
  0xf4   :  { %849 = vst.msk [vmem:[%s1661_s4 + $0xa8] sm:$0xf] %vm806_vm2, %v784_v19  ;;  %v589_v25 = vmul.f32 %v1266_v41, %v489_v23  ;;  %v605_v26 = vmul.f32 %v1266_v41, %v529_v24  ;;  %v412_v27 = vpop.f32.mrf.mxu0  ;;  %v452_v28 = vpop.f32.mrf.mxu1 }
  0xf5   :  { %865 = vst.msk [vmem:[%s1661_s4 + $0xe8] sm:$0xf] %vm806_vm2, %v800_v20  ;;  %v558_v29 = vmul.f32 %v1266_v41, %v412_v27  ;;  %v574_v30 = vmul.f32 %v1266_v41, %v452_v28 }
  0xf6   :  { %818 = vst.msk [vmem:[%s1661_s4 + $0x2c] sm:$0xf] %vm806_vm2, %v753_v21  ;;  %v657_v31 = vadd.f32 %v1271_v42, %v589_v25  ;;  %v673_v32 = vadd.f32 %v1271_v42, %v605_v26 }
  0xf7   :  { %834 = vst.msk [vmem:[%s1661_s4 + $0x6c] sm:$0xf] %vm806_vm2, %v769_v22  ;;  %v626_v33 = vadd.f32 %v1271_v42, %v558_v29  ;;  %v642_v34 = vadd.f32 %v1271_v42, %v574_v30 }
  0xf8   :  { %v721_v35 = vmax.f32 %v657_v31, 0.0  ;;  %v737_v36 = vmax.f32 %v673_v32, 0.0 }
  0xf9   :  { %v690_v37 = vmax.f32 %v626_v33, 0.0  ;;  %v706_v38 = vmax.f32 %v642_v34, 0.0 }
  0xfa   :  { %v785_v39 = vpack.c.bf16 %v721_v35, %v721_v35  ;;  %v801_v40 = vpack.c.bf16 %v737_v36, %v737_v36 }
  0xfb   :  { %v754_v43 = vpack.c.bf16 %v690_v37, %v690_v37  ;;  %v770_v44 = vpack.c.bf16 %v706_v38, %v706_v38  ;;  %v492_v45 = vpop.f32.mrf.mxu2  ;;  %v532_v46 = vpop.f32.mrf.mxu3 }
  0xfc   :  { %850 = vst.msk [vmem:[%s1661_s4 + $0xac] sm:$0xf] %vm806_vm2, %v785_v39  ;;  %v590_v47 = vmul.f32 %v1266_v41, %v492_v45  ;;  %v606_v48 = vmul.f32 %v1266_v41, %v532_v46  ;;  %v414_v49 = vpop.f32.mrf.mxu0  ;;  %v454_v50 = vpop.f32.mrf.mxu1 }
  0xfd   :  { %866 = vst.msk [vmem:[%s1661_s4 + $0xec] sm:$0xf] %vm806_vm2, %v801_v40  ;;  %v559_v51 = vmul.f32 %v1266_v41, %v414_v49  ;;  %v575_v52 = vmul.f32 %v1266_v41, %v454_v50 }
  0xfe   :  { %819 = vst.msk [vmem:[%s1661_s4 + $0x30] sm:$0xf] %vm806_vm2, %v754_v43  ;;  %v658_v53 = vadd.f32 %v1271_v42, %v590_v47  ;;  %v674_v54 = vadd.f32 %v1271_v42, %v606_v48 }
  0xff   :  { %835 = vst.msk [vmem:[%s1661_s4 + $0x70] sm:$0xf] %vm806_vm2, %v770_v44  ;;  %v627_v55 = vadd.f32 %v1271_v42, %v559_v51  ;;  %v643_v56 = vadd.f32 %v1271_v42, %v575_v52 }
 0x100   :  { %v722_v57 = vmax.f32 %v658_v53, 0.0  ;;  %v738_v58 = vmax.f32 %v674_v54, 0.0 }
 0x101   :  { %v691_v59 = vmax.f32 %v627_v55, 0.0  ;;  %v707_v60 = vmax.f32 %v643_v56, 0.0 }
 0x102   :  { %v786_v61 = vpack.c.bf16 %v722_v57, %v722_v57  ;;  %v802_v62 = vpack.c.bf16 %v738_v58, %v738_v58 }
 0x103   :  { %v755_v63 = vpack.c.bf16 %v691_v59, %v691_v59  ;;  %v771_v0 = vpack.c.bf16 %v707_v60, %v707_v60  ;;  %v494_v1 = vpop.f32.mrf.mxu2  ;;  %v534_v2 = vpop.f32.mrf.mxu3 }
 0x104   :  { %851 = vst.msk [vmem:[%s1661_s4 + $0xb0] sm:$0xf] %vm806_vm2, %v786_v61  ;;  %v591_v3 = vmul.f32 %v1266_v41, %v494_v1  ;;  %v607_v4 = vmul.f32 %v1266_v41, %v534_v2  ;;  %v417_v5 = vpop.f32.mrf.mxu0  ;;  %v457_v6 = vpop.f32.mrf.mxu1 }
 0x105   :  { %867 = vst.msk [vmem:[%s1661_s4 + $0xf0] sm:$0xf] %vm806_vm2, %v802_v62  ;;  %v560_v7 = vmul.f32 %v1266_v41, %v417_v5  ;;  %v576_v8 = vmul.f32 %v1266_v41, %v457_v6 }
 0x106   :  { %820 = vst.msk [vmem:[%s1661_s4 + $0x34] sm:$0xf] %vm806_vm2, %v755_v63  ;;  %v659_v9 = vadd.f32 %v1271_v42, %v591_v3  ;;  %v675_v10 = vadd.f32 %v1271_v42, %v607_v4 }
 0x107   :  { %836 = vst.msk [vmem:[%s1661_s4 + $0x74] sm:$0xf] %vm806_vm2, %v771_v0  ;;  %v628_v11 = vadd.f32 %v1271_v42, %v560_v7  ;;  %v644_v12 = vadd.f32 %v1271_v42, %v576_v8 }
 0x108   :  { %v723_v13 = vmax.f32 %v659_v9, 0.0  ;;  %v739_v14 = vmax.f32 %v675_v10, 0.0 }
 0x109   :  { %v692_v15 = vmax.f32 %v628_v11, 0.0  ;;  %v708_v16 = vmax.f32 %v644_v12, 0.0 }
 0x10a   :  { %v787_v17 = vpack.c.bf16 %v723_v13, %v723_v13  ;;  %v803_v18 = vpack.c.bf16 %v739_v14, %v739_v14 }
 0x10b   :  { %v756_v19 = vpack.c.bf16 %v692_v15, %v692_v15  ;;  %v772_v20 = vpack.c.bf16 %v708_v16, %v708_v16  ;;  %v497_v21 = vpop.f32.mrf.mxu2  ;;  %v537_v22 = vpop.f32.mrf.mxu3 }
 0x10c   :  { %852 = vst.msk [vmem:[%s1661_s4 + $0xb4] sm:$0xf] %vm806_vm2, %v787_v17  ;;  %v592_v23 = vmul.f32 %v1266_v41, %v497_v21  ;;  %v608_v24 = vmul.f32 %v1266_v41, %v537_v22  ;;  %v419_v25 = vpop.f32.mrf.mxu0  ;;  %v459_v26 = vpop.f32.mrf.mxu1 }
 0x10d   :  { %868 = vst.msk [vmem:[%s1661_s4 + $0xf4] sm:$0xf] %vm806_vm2, %v803_v18  ;;  %v561_v27 = vmul.f32 %v1266_v41, %v419_v25  ;;  %v577_v28 = vmul.f32 %v1266_v41, %v459_v26 }
 0x10e   :  { %821 = vst.msk [vmem:[%s1661_s4 + $0x38] sm:$0xf] %vm806_vm2, %v756_v19  ;;  %v660_v29 = vadd.f32 %v1271_v42, %v592_v23  ;;  %v676_v30 = vadd.f32 %v1271_v42, %v608_v24 }
 0x10f   :  { %837 = vst.msk [vmem:[%s1661_s4 + $0x78] sm:$0xf] %vm806_vm2, %v772_v20  ;;  %v629_v31 = vadd.f32 %v1271_v42, %v561_v27  ;;  %v645_v32 = vadd.f32 %v1271_v42, %v577_v28 }
 0x110   :  { %v724_v33 = vmax.f32 %v660_v29, 0.0  ;;  %v740_v34 = vmax.f32 %v676_v30, 0.0 }
 0x111   :  { %v693_v35 = vmax.f32 %v629_v31, 0.0  ;;  %v709_v36 = vmax.f32 %v645_v32, 0.0 }
 0x112   :  { %v788_v37 = vpack.c.bf16 %v724_v33, %v724_v33  ;;  %v804_v38 = vpack.c.bf16 %v740_v34, %v740_v34 }
 0x113   :  { %v757_v39 = vpack.c.bf16 %v693_v35, %v693_v35  ;;  %v773_v40 = vpack.c.bf16 %v709_v36, %v709_v36  ;;  %v499_v43 = vpop.f32.mrf.mxu2  ;;  %v539_v44 = vpop.f32.mrf.mxu3 }
 0x114   :  { %853 = vst.msk [vmem:[%s1661_s4 + $0xb8] sm:$0xf] %vm806_vm2, %v788_v37  ;;  %v593_v45 = vmul.f32 %v1266_v41, %v499_v43  ;;  %v609_v46 = vmul.f32 %v1266_v41, %v539_v44 }
 0x115   :  { %869 = vst.msk [vmem:[%s1661_s4 + $0xf8] sm:$0xf] %vm806_vm2, %v804_v38 }
 0x116   :  { %822 = vst.msk [vmem:[%s1661_s4 + $0x3c] sm:$0xf] %vm806_vm2, %v757_v39  ;;  %v661_v47 = vadd.f32 %v1271_v42, %v593_v45  ;;  %v677_v48 = vadd.f32 %v1271_v42, %v609_v46 }
 0x117   :  { %838 = vst.msk [vmem:[%s1661_s4 + $0x7c] sm:$0xf] %vm806_vm2, %v773_v40 }
 0x118   :  { %v725_v41 = vmax.f32 %v661_v47, 0.0  ;;  %v741_v49 = vmax.f32 %v677_v48, 0.0 }
 0x11a   :  { %v789_v50 = vpack.c.bf16 %v725_v41, %v725_v41  ;;  %v805_v51 = vpack.c.bf16 %v741_v49, %v741_v49 }
 0x11c   :  { %854 = vst.msk [vmem:[%s1661_s4 + $0xbc] sm:$0xf] %vm806_vm2, %v789_v50 }
 0x11d   :  { %870 = vst.msk [vmem:[%s1661_s4 + $0xfc] sm:$0xf] %vm806_vm2, %v805_v51 }

// kernel: extractor_resnet152_forward.20
= control target key start
LH: loop header
LB: loop body
LE: loop exit
PB: predicated region body
PF: predicated region fallthrough
CT: control target
= control target key end

     0   :  { %s891_s1 = inlined_call_operand.vmem [shape: bf16[256,128], index: 1, kind: input, shape index: {}]   ;;  %s892_s0 = inlined_call_operand.vmem [shape: bf16[128,256], index: 0, kind: input, shape index: {}]   ;;  %s893_s2 = inlined_call_operand.vmem [shape: f32[1,128], index: 2, kind: input, shape index: {}]   ;;  %s894_s3 = inlined_call_operand.vmem [shape: f32[1,128], index: 3, kind: input, shape index: {}]   ;;  %s895_s4 = inlined_call_operand.vmem [shape: bf16[128,128], index: 4, kind: output, shape index: {}]  }
   0x1   :  { %v582_v0 = vld [vmem:[%s891_s1 + $0x38] sm:$0xff]  ;;  %v581_v2 = vld [vmem:[%s891_s1 + $0x30] sm:$0xff]  ;;  %v580_v4 = vld [vmem:[%s891_s1 + $0x28] sm:$0xff] }
   0x2   :  { %v590_v1 = vld [vmem:[%s891_s1 + $0x78] sm:$0xff]  ;;  %241 = vmatpush.bf16.msra.mxu0 %v582_v0  ;;  %638 = vmatpush.bf16.msra.mxu2 %v582_v0  ;;  %v589_v3 = vld [vmem:[%s891_s1 + $0x70] sm:$0xff]  ;;  %v588_v5 = vld [vmem:[%s891_s1 + $0x68] sm:$0xff] }
   0x3   :  { %290 = vmatpush.bf16.msra.mxu1 %v590_v1  ;;  %646 = vmatpush.bf16.msra.mxu3 %v590_v1  ;;  %v579_v6 = vld [vmem:[%s891_s1 + $0x20] sm:$0xff]  ;;  %v578_v8 = vld [vmem:[%s891_s1 + $0x18] sm:$0xff]  ;;  %v577_v10 = vld [vmem:[%s891_s1 + $0x10] sm:$0xff] }
   0x4   :  { %v587_v7 = vld [vmem:[%s891_s1 + $0x60] sm:$0xff]  ;;  %v586_v9 = vld [vmem:[%s891_s1 + $0x58] sm:$0xff]  ;;  %v585_v11 = vld [vmem:[%s891_s1 + $0x50] sm:$0xff] }
   0x5   :  { %v576_v12 = vld [vmem:[%s891_s1 + $0x8] sm:$0xff]  ;;  %v575_v14 = vld [vmem:[%s891_s1] sm:$0xff]  ;;  %v441_v28 = vld [vmem:[%s892_s0 + $0x10] sm:$0xf] }
   0x6   :  { %242 = vmatpush.bf16.msra.mxu0 %v581_v2  ;;  %639 = vmatpush.bf16.msra.mxu2 %v581_v2  ;;  %v584_v13 = vld [vmem:[%s891_s1 + $0x48] sm:$0xff]  ;;  %v583_v15 = vld [vmem:[%s891_s1 + $0x40] sm:$0xff]  ;;  %v562_v29 = vld [vmem:[%s892_s0 + $0x14] sm:$0xf0] }
   0x7   :  { %291 = vmatpush.bf16.msra.mxu1 %v589_v3  ;;  %647 = vmatpush.bf16.msra.mxu3 %v589_v3  ;;  %v433_v16 = vld [vmem:[%s892_s0] sm:$0xf]  ;;  %v560_v17 = vld [vmem:[%s892_s0 + $0x4] sm:$0xf0]  ;;  %v559_v20 = vld [vmem:[%s892_s0 + $0x4] sm:$0xf]  ;;  %v442_v36 = vor.u32 %v562_v29, %v441_v28 }
   0x8   :  { %v465_v18 = vld [vmem:[%s892_s0 + $0x40] sm:$0xf]  ;;  %v568_v19 = vld [vmem:[%s892_s0 + $0x44] sm:$0xf0]  ;;  %v435_v21 = vld [vmem:[%s892_s0 + $0x8] sm:$0xf0]  ;;  %v434_v24 = vor.u32 %v560_v17, %v433_v16 }
   0x9   :  { %v567_v22 = vld [vmem:[%s892_s0 + $0x44] sm:$0xf]  ;;  %v467_v23 = vld [vmem:[%s892_s0 + $0x48] sm:$0xf0]  ;;  %v466_v25 = vor.u32 %v568_v19, %v465_v18  ;;  %v438_v26 = vor.u32 %v559_v20, %v435_v21  ;;  %v473_v30 = vld [vmem:[%s892_s0 + $0x50] sm:$0xf] }
   0xa   :  { %243 = vmatpush.bf16.msra.mxu0 %v580_v4  ;;  %640 = vmatpush.bf16.msra.mxu2 %v580_v4  ;;  %v470_v27 = vor.u32 %v567_v22, %v467_v23  ;;  %v570_v31 = vld [vmem:[%s892_s0 + $0x54] sm:$0xf0]  ;;  %v561_v32 = vld [vmem:[%s892_s0 + $0x14] sm:$0xf]  ;;  %v443_v33 = vld [vmem:[%s892_s0 + $0x18] sm:$0xf0] }
   0xb   :  { %292 = vmatpush.bf16.msra.mxu1 %v588_v5  ;;  %648 = vmatpush.bf16.msra.mxu3 %v588_v5  ;;  %v569_v34 = vld [vmem:[%s892_s0 + $0x54] sm:$0xf]  ;;  %v475_v35 = vld [vmem:[%s892_s0 + $0x58] sm:$0xf0]  ;;  %v474_v37 = vor.u32 %v570_v31, %v473_v30  ;;  %v446_v38 = vor.u32 %v561_v32, %v443_v33  ;;  %v449_v40 = vld [vmem:[%s892_s0 + $0x20] sm:$0xf] }
   0xc   :  { %v478_v39 = vor.u32 %v569_v34, %v475_v35  ;;  %v564_v41 = vld [vmem:[%s892_s0 + $0x24] sm:$0xf0]  ;;  %v481_v42 = vld [vmem:[%s892_s0 + $0x60] sm:$0xf]  ;;  %v563_v44 = vld [vmem:[%s892_s0 + $0x24] sm:$0xf] }
   0xd   :  { %v572_v43 = vld [vmem:[%s892_s0 + $0x64] sm:$0xf0]  ;;  %v451_v45 = vld [vmem:[%s892_s0 + $0x28] sm:$0xf0]  ;;  %v571_v46 = vld [vmem:[%s892_s0 + $0x64] sm:$0xf]  ;;  %v450_v48 = vor.u32 %v564_v41, %v449_v40 }
   0xe   :  { %244 = vmatpush.bf16.msra.mxu0 %v579_v6  ;;  %641 = vmatpush.bf16.msra.mxu2 %v579_v6  ;;  %v483_v47 = vld [vmem:[%s892_s0 + $0x68] sm:$0xf0]  ;;  %v482_v49 = vor.u32 %v572_v43, %v481_v42  ;;  %v454_v50 = vor.u32 %v563_v44, %v451_v45  ;;  %v457_v52 = vld [vmem:[%s892_s0 + $0x30] sm:$0xf]  ;;  %v566_v53 = vld [vmem:[%s892_s0 + $0x34] sm:$0xf0] }
   0xf   :  { %293 = vmatpush.bf16.msra.mxu1 %v587_v7  ;;  %649 = vmatpush.bf16.msra.mxu3 %v587_v7  ;;  %v486_v51 = vor.u32 %v571_v46, %v483_v47  ;;  %v489_v54 = vld [vmem:[%s892_s0 + $0x70] sm:$0xf]  ;;  %v574_v55 = vld [vmem:[%s892_s0 + $0x74] sm:$0xf0]  ;;  %v565_v56 = vld [vmem:[%s892_s0 + $0x34] sm:$0xf]  ;;  %v458_v60 = vor.u32 %v566_v53, %v457_v52 }
  0x10   :  { %v459_v57 = vld [vmem:[%s892_s0 + $0x38] sm:$0xf0]  ;;  %v573_v58 = vld [vmem:[%s892_s0 + $0x74] sm:$0xf]  ;;  %v490_v61 = vor.u32 %v574_v55, %v489_v54  ;;  %v828_v3 = vld [vmem:[%s893_s2] ss:$0 sm:$0xff] }
  0x11   :  { %v491_v59 = vld [vmem:[%s892_s0 + $0x78] sm:$0xf0]  ;;  %v462_v62 = vor.u32 %v565_v56, %v459_v57  ;;  %v834_v7 = vld [vmem:[%s894_s3] ss:$0 sm:$0xff] }
  0x12   :  { %245 = vmatpush.bf16.msra.mxu0 %v578_v8  ;;  %642 = vmatpush.bf16.msra.mxu2 %v578_v8  ;;  %v494_v63 = vor.u32 %v573_v58, %v491_v59 }
  0x13   :  { %294 = vmatpush.bf16.msra.mxu1 %v586_v9  ;;  %650 = vmatpush.bf16.msra.mxu3 %v586_v9 }
  0x16   :  { %246 = vmatpush.bf16.msra.mxu0 %v577_v10  ;;  %643 = vmatpush.bf16.msra.mxu2 %v577_v10 }
  0x17   :  { %295 = vmatpush.bf16.msra.mxu1 %v585_v11  ;;  %651 = vmatpush.bf16.msra.mxu3 %v585_v11 }
  0x1a   :  { %247 = vmatpush.bf16.msra.mxu0 %v576_v12  ;;  %644 = vmatpush.bf16.msra.mxu2 %v576_v12 }
  0x1b   :  { %296 = vmatpush.bf16.msra.mxu1 %v584_v13  ;;  %652 = vmatpush.bf16.msra.mxu3 %v584_v13 }
  0x1e   :  { %248 = vmatpush.bf16.msra.mxu0 %v575_v14  ;;  %645 = vmatpush.bf16.msra.mxu2 %v575_v14 }
  0x1f   :  { %297 = vmatpush.bf16.msra.mxu1 %v583_v15  ;;  %653 = vmatpush.bf16.msra.mxu3 %v583_v15 }
  0x21   :  { %249 = vmatmul.bf16.vlgmr.msra.gmra.mxu0 %v434_v24  ;;  %269 = vmatmul.bf16.vlgmr.msra.gmra.mxu2 %v466_v25 }
  0x22   :  { %298 = vmatmul.bf16.vlgmr.msra.gmra.mxu1 %v438_v26  ;;  %318 = vmatmul.bf16.vlgmr.msra.gmra.mxu3 %v470_v27 }
  0x31   :  { %254 = vmatmul.bf16.gmra.mxu0 %v442_v36  ;;  %274 = vmatmul.bf16.gmra.mxu2 %v474_v37 }
  0x32   :  { %303 = vmatmul.bf16.gmra.mxu1 %v446_v38  ;;  %323 = vmatmul.bf16.gmra.mxu3 %v478_v39 }
  0x41   :  { %259 = vmatmul.bf16.gmra.mxu0 %v450_v48  ;;  %279 = vmatmul.bf16.gmra.mxu2 %v482_v49 }
  0x42   :  { %308 = vmatmul.bf16.gmra.mxu1 %v454_v50  ;;  %328 = vmatmul.bf16.gmra.mxu3 %v486_v51 }
  0x51   :  { %264 = vmatmul.bf16.gmra.mxu0 %v458_v60  ;;  %284 = vmatmul.bf16.gmra.mxu2 %v490_v61 }
  0x52   :  { %313 = vmatmul.bf16.gmra.mxu1 %v462_v62  ;;  %333 = vmatmul.bf16.gmra.mxu3 %v494_v63 }
  0x9e   :  { %v250_v0 = vpop.f32.mrf.mxu0 }
  0x9f   :  { %v299_v1 = vpop.f32.mrf.mxu1 }
  0xa0   :  { %v300_v2 = vadd.f32 %v299_v1, %v250_v0 }
  0xa2   :  { %v343_v6 = vmul.f32 %v828_v3, %v300_v2 }
  0xa4   :  { %v270_v4 = vpop.f32.mrf.mxu2  ;;  %v363_v12 = vadd.f32 %v834_v7, %v343_v6 }
  0xa5   :  { %v319_v5 = vpop.f32.mrf.mxu3 }
  0xa6   :  { %v252_v8 = vpop.f32.mrf.mxu0  ;;  %v320_v10 = vadd.f32 %v319_v5, %v270_v4  ;;  %v379_v18 = vmax.f32 %v363_v12, 0.0 }
  0xa7   :  { %v301_v9 = vpop.f32.mrf.mxu1 }
  0xa8   :  { %v302_v11 = vadd.f32 %v301_v9, %v252_v8  ;;  %v351_v14 = vmul.f32 %v828_v3, %v320_v10 }
  0xaa   :  { %v344_v13 = vmul.f32 %v828_v3, %v302_v11  ;;  %v371_v23 = vadd.f32 %v834_v7, %v351_v14 }
  0xac   :  { %v364_v15 = vadd.f32 %v834_v7, %v344_v13  ;;  %v272_v16 = vpop.f32.mrf.mxu2  ;;  %v387_v28 = vmax.f32 %v371_v23, 0.0 }
  0xad   :  { %v321_v17 = vpop.f32.mrf.mxu3 }
  0xae   :  { %v380_v19 = vmax.f32 %v364_v15, 0.0  ;;  %v322_v20 = vadd.f32 %v321_v17, %v272_v16  ;;  %v255_v21 = vpop.f32.mrf.mxu0 }
  0xaf   :  { %v304_v22 = vpop.f32.mrf.mxu1 }
  0xb0   :  { %v594_v24 = vpack.c.bf16 %v380_v19, %v379_v18  ;;  %v352_v25 = vmul.f32 %v828_v3, %v322_v20  ;;  %v305_v27 = vadd.f32 %v304_v22, %v255_v21 }
  0xb2   :  { %595 = vst [vmem:[%s895_s4] sm:$0xff] %v594_v24   ;;  %v372_v26 = vadd.f32 %v834_v7, %v352_v25  ;;  %v345_v33 = vmul.f32 %v828_v3, %v305_v27 }
  0xb4   :  { %v388_v29 = vmax.f32 %v372_v26, 0.0  ;;  %v275_v30 = vpop.f32.mrf.mxu2  ;;  %v365_v38 = vadd.f32 %v834_v7, %v345_v33 }
  0xb5   :  { %v324_v31 = vpop.f32.mrf.mxu3 }
  0xb6   :  { %v614_v32 = vpack.c.bf16 %v388_v29, %v387_v28  ;;  %v257_v34 = vpop.f32.mrf.mxu0  ;;  %v325_v36 = vadd.f32 %v324_v31, %v275_v30  ;;  %v381_v44 = vmax.f32 %v365_v38, 0.0 }
  0xb7   :  { %v306_v35 = vpop.f32.mrf.mxu1 }
  0xb8   :  { %634 = vst [vmem:[%s895_s4 + $0x20] sm:$0xff] %v614_v32   ;;  %v307_v37 = vadd.f32 %v306_v35, %v257_v34  ;;  %v353_v40 = vmul.f32 %v828_v3, %v325_v36 }
  0xba   :  { %v346_v39 = vmul.f32 %v828_v3, %v307_v37  ;;  %v373_v49 = vadd.f32 %v834_v7, %v353_v40 }
  0xbc   :  { %v366_v41 = vadd.f32 %v834_v7, %v346_v39  ;;  %v277_v42 = vpop.f32.mrf.mxu2  ;;  %v389_v54 = vmax.f32 %v373_v49, 0.0 }
  0xbd   :  { %v326_v43 = vpop.f32.mrf.mxu3 }
  0xbe   :  { %v382_v45 = vmax.f32 %v366_v41, 0.0  ;;  %v327_v46 = vadd.f32 %v326_v43, %v277_v42  ;;  %v260_v47 = vpop.f32.mrf.mxu0 }
  0xbf   :  { %v309_v48 = vpop.f32.mrf.mxu1 }
  0xc0   :  { %v599_v50 = vpack.c.bf16 %v382_v45, %v381_v44  ;;  %v354_v51 = vmul.f32 %v828_v3, %v327_v46  ;;  %v310_v53 = vadd.f32 %v309_v48, %v260_v47 }
  0xc2   :  { %631 = vst [vmem:[%s895_s4 + $0x8] sm:$0xff] %v599_v50   ;;  %v374_v52 = vadd.f32 %v834_v7, %v354_v51  ;;  %v347_v59 = vmul.f32 %v828_v3, %v310_v53 }
  0xc4   :  { %v390_v55 = vmax.f32 %v374_v52, 0.0  ;;  %v280_v56 = vpop.f32.mrf.mxu2  ;;  %v367_v0 = vadd.f32 %v834_v7, %v347_v59 }
  0xc5   :  { %v329_v57 = vpop.f32.mrf.mxu3 }
  0xc6   :  { %v619_v58 = vpack.c.bf16 %v390_v55, %v389_v54  ;;  %v262_v60 = vpop.f32.mrf.mxu0  ;;  %v330_v62 = vadd.f32 %v329_v57, %v280_v56  ;;  %v383_v8 = vmax.f32 %v367_v0, 0.0 }
  0xc7   :  { %v311_v61 = vpop.f32.mrf.mxu1 }
  0xc8   :  { %635 = vst [vmem:[%s895_s4 + $0x28] sm:$0xff] %v619_v58   ;;  %v312_v63 = vadd.f32 %v311_v61, %v262_v60  ;;  %v355_v2 = vmul.f32 %v828_v3, %v330_v62 }
  0xca   :  { %v348_v1 = vmul.f32 %v828_v3, %v312_v63  ;;  %v375_v13 = vadd.f32 %v834_v7, %v355_v2 }
  0xcc   :  { %v368_v4 = vadd.f32 %v834_v7, %v348_v1  ;;  %v282_v5 = vpop.f32.mrf.mxu2  ;;  %v391_v18 = vmax.f32 %v375_v13, 0.0 }
  0xcd   :  { %v331_v6 = vpop.f32.mrf.mxu3 }
  0xce   :  { %v384_v9 = vmax.f32 %v368_v4, 0.0  ;;  %v332_v10 = vadd.f32 %v331_v6, %v282_v5  ;;  %v265_v11 = vpop.f32.mrf.mxu0 }
  0xcf   :  { %v314_v12 = vpop.f32.mrf.mxu1 }
  0xd0   :  { %v604_v14 = vpack.c.bf16 %v384_v9, %v383_v8  ;;  %v356_v15 = vmul.f32 %v828_v3, %v332_v10  ;;  %v315_v17 = vadd.f32 %v314_v12, %v265_v11 }
  0xd2   :  { %632 = vst [vmem:[%s895_s4 + $0x10] sm:$0xff] %v604_v14   ;;  %v376_v16 = vadd.f32 %v834_v7, %v356_v15  ;;  %v349_v23 = vmul.f32 %v828_v3, %v315_v17 }
  0xd4   :  { %v392_v19 = vmax.f32 %v376_v16, 0.0  ;;  %v285_v20 = vpop.f32.mrf.mxu2  ;;  %v369_v28 = vadd.f32 %v834_v7, %v349_v23 }
  0xd5   :  { %v334_v21 = vpop.f32.mrf.mxu3 }
  0xd6   :  { %v624_v22 = vpack.c.bf16 %v392_v19, %v391_v18  ;;  %v267_v24 = vpop.f32.mrf.mxu0  ;;  %v335_v26 = vadd.f32 %v334_v21, %v285_v20  ;;  %v385_v34 = vmax.f32 %v369_v28, 0.0 }
  0xd7   :  { %v316_v25 = vpop.f32.mrf.mxu1 }
  0xd8   :  { %636 = vst [vmem:[%s895_s4 + $0x30] sm:$0xff] %v624_v22   ;;  %v317_v27 = vadd.f32 %v316_v25, %v267_v24  ;;  %v357_v30 = vmul.f32 %v828_v3, %v335_v26 }
  0xda   :  { %v350_v29 = vmul.f32 %v828_v3, %v317_v27  ;;  %v377_v37 = vadd.f32 %v834_v7, %v357_v30 }
  0xdc   :  { %v370_v31 = vadd.f32 %v834_v7, %v350_v29  ;;  %v287_v32 = vpop.f32.mrf.mxu2  ;;  %v393_v41 = vmax.f32 %v377_v37, 0.0 }
  0xdd   :  { %v336_v33 = vpop.f32.mrf.mxu3 }
  0xde   :  { %v386_v35 = vmax.f32 %v370_v31, 0.0  ;;  %v337_v36 = vadd.f32 %v336_v33, %v287_v32 }
  0xe0   :  { %v609_v38 = vpack.c.bf16 %v386_v35, %v385_v34  ;;  %v358_v39 = vmul.f32 %v828_v3, %v337_v36 }
  0xe2   :  { %633 = vst [vmem:[%s895_s4 + $0x18] sm:$0xff] %v609_v38   ;;  %v378_v40 = vadd.f32 %v834_v7, %v358_v39 }
  0xe4   :  { %v394_v42 = vmax.f32 %v378_v40, 0.0 }
  0xe6   :  { %v629_v43 = vpack.c.bf16 %v394_v42, %v393_v41 }
  0xe8   :  { %637 = vst [vmem:[%s895_s4 + $0x38] sm:$0xff] %v629_v43  }

// kernel: extractor_resnet152_forward.17
= control target key start
LH: loop header
LB: loop body
LE: loop exit
PB: predicated region body
PF: predicated region fallthrough
CT: control target
= control target key end

     0   :  { %s3150_s25 = smov 0   ;;  %s4453_s0 = inlined_call_operand.vmem [shape: bf16[2,64,64], index: 0, kind: input, shape index: {}]   ;;  %s4454_s1 = inlined_call_operand.vmem [shape: bf16[64,64], index: 1, kind: input, shape index: {}]   ;;  %s4455_s2 = inlined_call_operand.vmem [shape: f32[1,64], index: 2, kind: input, shape index: {}]   ;;  %s4456_s3 = inlined_call_operand.vmem [shape: f32[1,64], index: 3, kind: input, shape index: {}]   ;;  %s4457_s4 = inlined_call_operand.vmem [shape: bf16[9,64,64], index: 4, kind: input, shape index: {}]   ;;  %s4458_s5 = inlined_call_operand.vmem [shape: f32[1,64], index: 5, kind: input, shape index: {}]   ;;  %s4459_s6 = inlined_call_operand.vmem [shape: f32[1,64], index: 6, kind: input, shape index: {}]   ;;  %s4460_s7 = inlined_call_operand.vmem [shape: bf16[64,256], index: 7, kind: input, shape index: {}]   ;;  %s4461_s8 = inlined_call_operand.vmem [shape: f32[1,256], index: 8, kind: input, shape index: {}]   ;;  %s4462_s9 = inlined_call_operand.vmem [shape: f32[1,256], index: 9, kind: input, shape index: {}]   ;;  %s4463_s10 = inlined_call_operand.vmem [shape: bf16[64,256], index: 10, kind: input, shape index: {}]   ;;  %s4464_s11 = inlined_call_operand.vmem [shape: f32[1,256], index: 11, kind: input, shape index: {}]   ;;  %s4465_s12 = inlined_call_operand.vmem [shape: f32[1,256], index: 12, kind: input, shape index: {}]   ;;  %s4466_s13 = inlined_call_operand.vmem [shape: bf16[2,64,256], index: 13, kind: output, shape index: {}]  }
   0x1 LB: > { %s2553_s26 = sadd.s32 4294967295, %s3077_s25   ;;  %p2557_p0 = scmp.ge.s32.totalorder %s3077_s25, 1  ;;  %s3077_s25 = sphi %s3150_s25, %s23_s25  }
   0x2   : > { %p387_p1 = scmp.lt.s32.totalorder %s3077_s25, 3 }
   0x4   : > { %p388_p2 = pnand %p2557_p0, %p387_p1 }
   0x5   : > { %p431_p3 = scmp.lt.s32.totalorder (!%p388_p2), %s2553_s26, 1 }
   0x6   : > { %391 = sbr.rel (%p388_p2) target bundleno = 657 (0x291), region = 72 }
   0xb   : > { %v2981_v0 = vld [vmem:[%s4454_s1 + $0x18] sm:$0xff]  ;;  %v2980_v1 = vld [vmem:[%s4454_s1 + $0x10] sm:$0xff]  ;;  %s4627_s26 = smov (!%p431_p3, %s2553_s26), 1  ;;  %v2979_v2 = vld [vmem:[%s4454_s1 + $0x8] sm:$0xff]  ;;  %vm4468_vm0 = vcmask 523264   ;;  %vm580_vm1 = vcmask 516096   ;;  %v697_v19 = vlaneseq }
   0xc   : > { %521 = vmatpush.bf16.msra.mxu0 %v2981_v0  ;;  %3046 = vmatpush.bf16.msra.mxu2 %v2981_v0  ;;  %s2972_s16 = sshll.u32 %s4627_s26, 5  ;;  %v2978_v3 = vld [vmem:[%s4454_s1] sm:$0xff]  ;;  %vm581_vm2 = vsmask.f32 256  ;;  %vm578_vm3 = vcmask 519168   ;;  %v3079_v13 = vmov 0  }
   0xd   : > { %s3176_s21 = scalar_lea.vmem %s4453_s0, %s2972_s16  ;;  %vm3187_vm4 = vmand %vm580_vm1, %vm581_vm2  ;;  %v583_v9 = vld [vmem:[#allocation2 + $0x4] sm:$0x1]  ;;  %vm587_vm5 = vsmask.f32 7938  ;;  %593 = vst.msk [vmem:[#allocation2 + $0x28] sm:$0x1] %vm580_vm1, %v3079_v13 }
   0xe   : > { %v2974_v4 = vld [vmem:[%s3176_s21] sm:$0xff]  ;;  %v2976_v5 = vld [vmem:[%s3176_s21 + $0x10] sm:$0xff]  ;;  %v2975_v6 = vld [vmem:[%s3176_s21 + $0x8] sm:$0xff]  ;;  %v584_v10 = vsel %vm3187_vm4, 0, %v583_v9  ;;  %579 = vst.msk [vmem:[#allocation2] sm:$0xf] %vm578_vm3, %v3079_v13 }
   0xf   : > { %v2977_v7 = vld [vmem:[%s3176_s21 + $0x18] sm:$0xff]  ;;  %vm3194_vm6 = vmand %vm578_vm3, %vm587_vm5  ;;  %v589_v12 = vld [vmem:[#allocation2 + $0x24] sm:$0xf]  ;;  %585 = vst [vmem:[#allocation2 + $0x4] sm:$0x1] %v584_v10  ;;  %v3221_v22 = vshrl.u32 %v697_v19, 7 }
  0x10   : > { %522 = vmatpush.bf16.msra.mxu0 %v2980_v1  ;;  %3047 = vmatpush.bf16.msra.mxu2 %v2980_v1  ;;  %v590_v14 = vsel %vm3194_vm6, 0, %v589_v12  ;;  %v2989_v15 = vld [vmem:[%s4457_s4 + $0x18] sm:$0xff]  ;;  %v2988_v16 = vld [vmem:[%s4457_s4 + $0x10] sm:$0xff]  ;;  %v2987_v17 = vld [vmem:[%s4457_s4 + $0x8] sm:$0xff]  ;;  %vm1119_vm11 = vcmask 1040384   ;;  %vm1120_vm12 = vcmask 1044484  }
  0x11   : > { %591 = vst [vmem:[#allocation2 + $0x24] sm:$0xf] %v590_v14  ;;  %v3001_v18 = vld [vmem:[%s4457_s4 + $0x78] sm:$0xff]  ;;  %v2986_v20 = vld [vmem:[%s4457_s4] sm:$0xff]  ;;  %v3000_v21 = vld [vmem:[%s4457_s4 + $0x70] sm:$0xff]  ;;  %v699_v26 = vadd.s32 8, %v3221_v22 }
  0x12   : > { %v3226_v23 = vld [vmem:[%s4455_s2] ss:$0 sm:$0xff]  ;;  %v2999_v24 = vld [vmem:[%s4457_s4 + $0x68] sm:$0xff]  ;;  %v710_v27 = vand.u32 7, %v3221_v22  ;;  %v2993_v28 = vld [vmem:[%s4457_s4 + $0x38] sm:$0xff]  ;;  %v3282_v60 = vadd.s32 16, %v3221_v22 }
  0x13   : > { %v3234_v25 = vld [vmem:[%s4456_s3] ss:$0 sm:$0xff]  ;;  %976 = vmatpush.bf16.msra.mxu1 %v2993_v28  ;;  %3050 = vmatpush.bf16.msra.mxu3 %v2993_v28  ;;  %v717_v33 = vand.u32 7, %v699_v26  ;;  %v2992_v35 = vld [vmem:[%s4457_s4 + $0x30] sm:$0xff]  ;;  %v2991_v41 = vld [vmem:[%s4457_s4 + $0x28] sm:$0xff]  ;;  %s2973_s18 = sshll.u32 %s4627_s26, 6 }
  0x14   : > { %523 = vmatpush.bf16.msra.mxu0 %v2979_v2  ;;  %3048 = vmatpush.bf16.msra.mxu2 %v2979_v2  ;;  %v2998_v31 = vld [vmem:[%s4457_s4 + $0x60] sm:$0xff]  ;;  %vm3246_vm7 = vcmp.ne.s32.totalorder %v710_v27, 7  ;;  %vm802_vm13 = vcmp.ne.s32.totalorder %v710_v27, 0  ;;  %vm602_vm14 = vsmask.f32 4368  ;;  %vm3288_vm15 = vmor %vm1119_vm11, %vm1120_vm12  ;;  %v724_v12 = vand.u32 7, %v3282_v60  ;;  %s4386_s22 = scalar_lea.vmem %s4466_s13, %s2973_s18 }
  0x15   : > { %vm1103_vm8 = vmpackc.low %vm3246_vm7, %vm3246_vm7  ;;  %vm3257_vm9 = vcmp.ne.s32.totalorder %v717_v33, 7  ;;  %v2990_v50 = vld [vmem:[%s4457_s4 + $0x20] sm:$0xff]  ;;  %vm803_vm1 = vcmp.ne.s32.totalorder %v717_v33, 0 }
  0x16   : > { %v1111_v45 = vsel %vm1103_vm8, 65537, %v3079_v13  ;;  %vm1104_vm10 = vmpackc.low %vm3257_vm9, %vm3257_vm9  ;;  %v684_v51 = vld [vmem:[#allocation2 + $0x4] sm:$0xf]  ;;  %vm3393_vm8 = vcmp.ne.s32.totalorder %v724_v12, 0 }
  0x17   : > { %977 = vmatpush.bf16.msra.mxu1 %v2992_v35  ;;  %3051 = vmatpush.bf16.msra.mxu3 %v2992_v35  ;;  %v3274_v52 = vrot.slane %v1111_v45, 7  ;;  %v3277_v55 = vsel %vm1104_vm10, 65537, %v3079_v13  ;;  %vm3295_vm5 = vmpackc.low %vm802_vm13, %vm802_vm13  ;;  %v2997_v45 = vld [vmem:[%s4457_s4 + $0x58] sm:$0xff]  ;;  %v2994_v8 = vld [vmem:[%s4457_s4 + $0x40] sm:$0xff]  ;;  %v4530_v35 = vmov 0 }
  0x18   : > { %524 = vmatpush.bf16.msra.mxu0 %v2978_v3  ;;  %3049 = vmatpush.bf16.msra.mxu2 %v2978_v3  ;;  %v1124_v63 = vrot.slane %v3277_v55, 7  ;;  %vm3316_vm7 = vmpackc.low %vm803_vm1, %vm803_vm1 }
  0x19   : > { %v1123_v0 = vrot.slane %v3274_v52, 4  ;;  %vm3415_vm11 = vmpackc.low %vm3393_vm8, %vm3393_vm8 }
  0x1b   : > { %2594 = vmatmul.msk.bf16.vlgmr.msra.gmra.mxu0 %vm4468_vm0, %v2974_v4  ;;  %2596 = vmatmul.msk.bf16.vlgmr.msra.gmra.mxu2 %vm4468_vm0, %v2976_v5 }
  0x1c   : > { %1061 = vmatpush.bf16.msrb.mxu2 %v2989_v15  ;;  %1410 = vmatpush.bf16.msrb.mxu0 %v3001_v18 }
  0x1d   : > { %978 = vmatpush.bf16.msra.mxu1 %v2991_v41  ;;  %3052 = vmatpush.bf16.msra.mxu3 %v2991_v41  ;;  %v3346_v41 = vunpack.c.h.b16 %v3079_v13 }
  0x20   : > { %1062 = vmatpush.bf16.msrb.mxu2 %v2988_v16  ;;  %1411 = vmatpush.bf16.msrb.mxu0 %v3000_v21  ;;  %v3312_v16 = vsel %vm3288_vm15, %v1123_v0, %v1124_v63  ;;  %v4487_v21 = vmov 0 }
  0x21   : > { %979 = vmatpush.bf16.msra.mxu1 %v2990_v50  ;;  %3053 = vmatpush.bf16.msra.mxu3 %v2990_v50  ;;  %v4488_v21 = vsel %vm3316_vm7, 4294967295, %v4487_v21 }
  0x24   : > { %1063 = vmatpush.bf16.msrb.mxu2 %v2987_v17  ;;  %1412 = vmatpush.bf16.msrb.mxu0 %v2999_v24  ;;  %v1145_v17 = vunpack.c.l.b16 %v3274_v52 }
  0x25   : > { %1299 = vmatpush.bf16.msrb.mxu3 %v2997_v45 }
  0x28   : > { %1064 = vmatpush.bf16.msrb.mxu2 %v2986_v20  ;;  %1413 = vmatpush.bf16.msrb.mxu0 %v2998_v31 }
  0x2b   : > { %2595 = vmatmul.msk.bf16.gmra.mxu0 %vm4468_vm0, %v2975_v6  ;;  %2597 = vmatmul.msk.bf16.gmra.mxu2 %vm4468_vm0, %v2977_v7  ;;  %v818_v6 = vld [vmem:[#allocation2] sm:$0xf]  ;;  %v4483_v7 = vmov 0 }
  0x2c   : > { %v4484_v7 = vsel %vm3295_vm5, 4294967295, %v4483_v7  ;;  %v850_v24 = vsel %vm3295_vm5, %v818_v6, 0 }
  0x2d   : > { %v1009_v40 = vunpack.c.l.b16 %v850_v24 }
  0x98   : > { %v526_v29 = vpop.f32.mrf.mxu0 }
  0x99   : > { %v550_v30 = vmul.f32 %v3226_v23, %v526_v29  ;;  %v3324_v29 = vadd.s32 24, %v3221_v22 }
  0x9b   : > { %v562_v32 = vadd.f32 %v3234_v25, %v550_v30  ;;  %v1146_v30 = vunpack.c.h.b16 %v3274_v52 }
  0x9d   : > { %v570_v36 = vmax.f32 %v562_v32, 0.0 }
  0x9e   : > { %v536_v37 = vpop.f32.mrf.mxu2 }
  0x9f   : > { %v594_v38 = vpack.c.bf16 %v570_v36, %v570_v36  ;;  %v554_v39 = vmul.f32 %v3226_v23, %v536_v37  ;;  %v3339_v36 = vunpack.c.l.b16 %v3079_v13 }
  0xa0   : > { %v528_v42 = vpop.f32.mrf.mxu0 }
  0xa1   : > { %v605_v43 = vshrl.u32 %v594_v38, 16  ;;  %v551_v44 = vmul.f32 %v3226_v23, %v528_v42  ;;  %v566_v46 = vadd.f32 %v3234_v25, %v554_v39  ;;  %v608_v48 = vshll.u32 %v594_v38, 16 }
  0xa3   : > { %v607_v47 = vrot.slane %v605_v43, 7  ;;  %v563_v49 = vadd.f32 %v3234_v25, %v551_v44  ;;  %v574_v56 = vmax.f32 %v566_v46, 0.0  ;;  %v3354_v46 = vadd.s32 32, %v3221_v22 }
  0xa5   : > { %v610_v53 = vor.u32 %v608_v48, %v607_v47  ;;  %v571_v54 = vmax.f32 %v563_v49, 0.0  ;;  %v3292_v4 = vpack.c.bf16 %v574_v56, %v574_v56  ;;  %v611_v18 = vrot.slane %v607_v47, 4 }
  0xa6   : > { %v538_v57 = vpop.f32.mrf.mxu2 }
  0xa7   : > { %v685_v58 = vsel %vm3194_vm6, %v610_v53, %v684_v51  ;;  %v595_v59 = vpack.c.bf16 %v571_v54, %v571_v54  ;;  %v555_v61 = vmul.f32 %v3226_v23, %v538_v57  ;;  %vm3304_vm6 = vmor %vm581_vm2, %vm602_vm14  ;;  %v640_v26 = vshrl.u32 %v3292_v4, 16 }
  0xa8   : > { %686 = vst [vmem:[#allocation2 + $0x4] sm:$0xf] %v685_v58  ;;  %v531_v62 = vpop.f32.mrf.mxu0  ;;  %vm3334_vm2 = vcmp.ne.s32.totalorder %v724_v12, 7 }
  0xa9   : > { %v613_v1 = vshrl.u32 %v595_v59, 16  ;;  %v552_v2 = vmul.f32 %v3226_v23, %v531_v62  ;;  %v567_v5 = vadd.f32 %v3234_v25, %v555_v61  ;;  %v616_v10 = vshll.u32 %v595_v59, 16  ;;  %vm1105_vm10 = vmpackc.low %vm3334_vm2, %vm3334_vm2 }
  0xaa   : > { %v642_v47 = vrot.slane %v640_v26, 7  ;;  %v3360_v61 = vadd.s32 40, %v3221_v22  ;;  %vm4467_vm2 = vsmask.f32 7424 }
  0xab   : > { %v3299_v9 = vrot.slane %v613_v1, 7  ;;  %v564_v11 = vadd.f32 %v3234_v25, %v552_v2  ;;  %v575_v15 = vmax.f32 %v567_v5, 0.0 }
  0xac   : > { %v647_v57 = vrot.slane %v642_v47, 4 }
  0xad   : > { %v618_v19 = vor.u32 %v616_v10, %v3299_v9  ;;  %v572_v20 = vmax.f32 %v564_v11, 0.0  ;;  %v599_v27 = vpack.c.bf16 %v575_v15, %v575_v15  ;;  %v620_v62 = vrot.slane %v3299_v9, 4 }
  0xae   : > { %v541_v28 = vpop.f32.mrf.mxu2  ;;  %v731_v11 = vand.u32 7, %v3324_v29  ;;  %v738_v9 = vand.u32 7, %v3354_v46  ;;  %v643_v29 = vshll.u32 %v3292_v4, 16  ;;  %v3008_v4 = vld [vmem:[%s4457_s4 + $0x90] sm:$0xff]  ;;  %v3017_v46 = vld [vmem:[%s4457_s4 + $0xd8] sm:$0xff] }
  0xaf   : > { %v619_v31 = vsel %vm3304_vm6, %v611_v18, %v618_v19  ;;  %v596_v32 = vpack.c.bf16 %v572_v20, %v572_v20  ;;  %v556_v33 = vmul.f32 %v3226_v23, %v541_v28  ;;  %v3330_v34 = vld [vmem:[#allocation2 + $0x4] sm:$0xf]  ;;  %v649_v37 = vshrl.u32 %v599_v27, 16  ;;  %v3009_v18 = vld [vmem:[%s4457_s4 + $0x98] sm:$0xff]  ;;  %v2996_v19 = vld [vmem:[%s4457_s4 + $0x50] sm:$0xff] }
  0xb0   : > { %687 = vst.msk [vmem:[#allocation2 + $0x8] sm:$0xf] %vm578_vm3, %v619_v31  ;;  %v533_v38 = vpop.f32.mrf.mxu0  ;;  %v851_v39 = vsel %vm3316_vm7, %v3330_v34, 0  ;;  %v652_v49 = vshll.u32 %v599_v27, 16  ;;  %v1333_v10 = vsel %vm3295_vm5, %v3330_v34, 0  ;;  %v3371_v15 = vld [vmem:[#allocation2] sm:$0xff]  ;;  %1560 = vmatpush.bf16.msrb.mxu1 %v3009_v18  ;;  %1300 = vmatpush.bf16.msrb.mxu3 %v2996_v19 }
  0xb1   : > { %v622_v42 = vshrl.u32 %v596_v32, 16  ;;  %v568_v43 = vadd.f32 %v3234_v25, %v556_v33  ;;  %v553_v44 = vmul.f32 %v3226_v23, %v533_v38  ;;  %v651_v48 = vrot.slane %v649_v37, 7 }
  0xb2   : > { %v1010_v50 = vunpack.c.l.b16 %v851_v39  ;;  %v625_v53 = vshll.u32 %v596_v32, 16  ;;  %vm3403_vm9 = vcmp.ne.s32.totalorder %v731_v11, 0  ;;  %v903_v12 = vshll.u32 %v3371_v15, 16 }
  0xb3   : > { %v3356_v51 = vrot.slane %v622_v42, 7  ;;  %v576_v54 = vmax.f32 %v568_v43, 0.0  ;;  %v565_v56 = vadd.f32 %v3234_v25, %v553_v44  ;;  %v654_v58 = vor.u32 %v652_v49, %v651_v48  ;;  %vm3433_vm13 = vmpackc.low %vm3403_vm9, %vm3403_vm9 }
  0xb4   : > { %v1017_v59 = vpack.c.b16 %v1010_v50, %v1009_v40  ;;  %v656_v40 = vrot.slane %v651_v48, 4  ;;  %v645_v48 = vor.u32 %v643_v29, %v642_v47  ;;  %vm3419_vm12 = vcmp.ne.s32.totalorder %v731_v11, 7  ;;  %1561 = vmatpush.bf16.msrb.mxu1 %v3008_v4 }
  0xb5   : > { %v627_v0 = vor.u32 %v625_v53, %v3356_v51  ;;  %v600_v1 = vpack.c.bf16 %v576_v54, %v576_v54  ;;  %v573_v2 = vmax.f32 %v565_v56, 0.0  ;;  %v655_v5 = vsel %vm3304_vm6, %v647_v57, %v654_v58  ;;  %vm1106_vm14 = vmpackc.low %vm3419_vm12, %vm3419_vm12 }
  0xb6   : > { %2658 = vmatmul.msk.bf16.vlgmr.msrb.gmra.mxu2 %vm4468_vm0, %v1017_v59  ;;  %v543_v6 = vpop.f32.mrf.mxu2  ;;  %691 = vst.msk [vmem:[#allocation2 + $0x18] sm:$0xf] %vm578_vm3, %v655_v5  ;;  %v3424_v54 = vadd.s32 48, %v3221_v22  ;;  %v629_v56 = vrot.slane %v3356_v51, 4  ;;  %v3443_v51 = vrot.slane %v1124_v63, 4  ;;  %vm3469_vm1 = vcmp.ne.s32.totalorder %v738_v9, 7 }
  0xb7   : > { %v628_v20 = vsel %vm3304_vm6, %v620_v62, %v627_v0  ;;  %v658_v24 = vshrl.u32 %v600_v1, 16  ;;  %v661_v26 = vshll.u32 %v600_v1, 16  ;;  %v597_v27 = vpack.c.bf16 %v573_v2, %v573_v2  ;;  %v3383_v28 = vld [vmem:[#allocation2 + $0x8] sm:$0xf]  ;;  %vm1107_vm8 = vmpackc.low %vm3469_vm1, %vm3469_vm1 }
  0xb8   : > { %688 = vst.msk [vmem:[#allocation2 + $0xc] sm:$0xf] %vm578_vm3, %v628_v20  ;;  %v557_v31 = vmul.f32 %v3226_v23, %v543_v6  ;;  %v1334_v32 = vsel %vm3316_vm7, %v3383_v28, 0  ;;  %v1358_v23 = vunpack.c.l.b16 %v1333_v10  ;;  %v3007_v62 = vld [vmem:[%s4457_s4 + $0x88] sm:$0xff]  ;;  %v852_v1 = vsel %vm3415_vm11, %v3383_v28, 0 }
  0xb9   : > { %v3400_v37 = vrot.slane %v658_v24, 7  ;;  %v631_v38 = vshrl.u32 %v597_v27, 16  ;;  %v1359_v39 = vunpack.c.l.b16 %v1334_v32  ;;  %v634_v45 = vshll.u32 %v597_v27, 16  ;;  %1562 = vmatpush.bf16.msrb.mxu1 %v3007_v62  ;;  %v3006_v32 = vld [vmem:[%s4457_s4 + $0x80] sm:$0xff] }
  0xba   : > { %v569_v42 = vadd.f32 %v3234_v25, %v557_v31  ;;  %v3454_v2 = vsel %vm1105_vm10, 65537, %v3079_v13  ;;  %v905_v10 = vrot.slane %v903_v12, 1  ;;  %v745_v19 = vand.u32 7, %v3360_v61  ;;  %v2995_v31 = vld [vmem:[%s4457_s4 + $0x48] sm:$0xff] }
  0xbb   : > { %v663_v43 = vor.u32 %v661_v26, %v3400_v37  ;;  %v633_v44 = vrot.slane %v631_v38, 7  ;;  %v1366_v49 = vpack.c.b16 %v1359_v39, %v1358_v23  ;;  %v752_v20 = vand.u32 7, %v3424_v54  ;;  %1301 = vmatpush.bf16.msrb.mxu3 %v2995_v31  ;;  %v3015_v25 = vld [vmem:[%s4457_s4 + $0xc8] sm:$0xff] }
  0xbc   : > { %v577_v50 = vmax.f32 %v569_v42, 0.0  ;;  %v1011_v24 = vunpack.c.l.b16 %v852_v1  ;;  %v901_v27 = vshrl.u32 %v3371_v15, 16  ;;  %v3494_v4 = vsel %vm1106_vm14, 65537, %v3079_v13  ;;  %v694_v15 = vld [vmem:[#allocation2 + $0x24] sm:$0x1] }
  0xbd   : > { %v664_v57 = vsel %vm3304_vm6, %v656_v40, %v663_v43  ;;  %v636_v58 = vor.u32 %v634_v45, %v633_v44  ;;  %v638_v59 = vrot.slane %v633_v44, 4  ;;  %2714 = vmatmul.msk.bf16.vlgmr.msrb.gmra.mxu0 %vm4468_vm0, %v1366_v49  ;;  %v3502_v40 = vadd.s32 56, %v3221_v22  ;;  %1563 = vmatpush.bf16.msrb.mxu1 %v3006_v32 }
  0xbe   : > { %692 = vst.msk [vmem:[#allocation2 + $0x1c] sm:$0xf] %vm578_vm3, %v664_v57  ;;  %v601_v0 = vpack.c.bf16 %v577_v50, %v577_v50  ;;  %v906_v23 = vor.u32 %v905_v10, %v901_v27  ;;  %v665_v42 = vrot.slane %v3400_v37, 4  ;;  %v1127_v43 = vrot.slane %v3454_v2, 7  ;;  %v3013_v57 = vld [vmem:[%s4457_s4 + $0xb8] sm:$0xff] }
  0xbf   : > { %v637_v5 = vsel %vm3304_vm6, %v629_v56, %v636_v58  ;;  %v646_v55 = vsel %vm3304_vm6, %v638_v59, %v645_v48  ;;  %v3460_v63 = vld [vmem:[#allocation2 + $0xc] sm:$0xf]  ;;  %v1130_v44 = vrot.slane %v3494_v4, 7  ;;  %vm3509_vm9 = vcmp.ne.s32.totalorder %v745_v19, 7  ;;  %1684 = vmatpush.bf16.msra.mxu2 %v3013_v57  ;;  %1302 = vmatpush.bf16.msrb.mxu3 %v2994_v8 }
  0xc0   : > { %v3465_v6 = vld [vmem:[#allocation2 + $0x8] sm:$0xff]  ;;  %689 = vst.msk [vmem:[#allocation2 + $0x10] sm:$0xf] %vm578_vm3, %v637_v5  ;;  %v667_v11 = vshrl.u32 %v601_v0, 16  ;;  %v853_v18 = vsel %vm3433_vm13, %v3460_v63, 0  ;;  %v670_v33 = vshll.u32 %v601_v0, 16  ;;  %v1152_v62 = vunpack.c.l.b16 %v3312_v16 }
  0xc1   : > { %690 = vst.msk [vmem:[#allocation2 + $0x14] sm:$0xf] %vm578_vm3, %v646_v55  ;;  %v1012_v26 = vunpack.c.l.b16 %v853_v18  ;;  %v908_v29 = vshll.u32 %v3465_v6, 16  ;;  %v3514_v48 = vsel %vm1107_vm8, 65537, %v3079_v13  ;;  %v1129_v50 = vrot.slane %v1127_v43, 4  ;;  %v3012_v5 = vld [vmem:[%s4457_s4 + $0xb0] sm:$0xff] }
  0xc2   : > { %v669_v61 = vrot.slane %v667_v11, 7  ;;  %v1335_v53 = vsel %vm3415_vm11, %v3460_v63, 0  ;;  %v759_v58 = vand.u32 7, %v3502_v40  ;;  %v1128_v55 = vsel %vm3288_vm15, %v3443_v51, %v1127_v43 }
  0xc3   : > { %v1018_v38 = vpack.c.b16 %v1012_v26, %v1011_v24  ;;  %v3499_v39 = vrot.slane %v908_v29, 1  ;;  %vm3565_vm10 = vcmp.ne.s32.totalorder %v1145_v17, %v3339_v36  ;;  %vm807_vm12 = vcmp.ne.s32.totalorder %v745_v19, 0  ;;  %1685 = vmatpush.bf16.msra.mxu2 %v3012_v5 }
  0xc4   : > { %v672_v60 = vor.u32 %v670_v33, %v669_v61  ;;  %v674_v12 = vrot.slane %v669_v61, 4  ;;  %vm3572_vm14 = vcmp.ne.s32.totalorder %v1146_v30, %v3346_v41  ;;  %v1131_v17 = vsel %vm3288_vm15, %v1129_v50, %v1130_v44 }
  0xc5   : > { %v911_v45 = vsel %vm4467_vm2, %v906_v23, %v3499_v39  ;;  %v3525_v56 = vld [vmem:[#allocation2 + $0x18] sm:$0xff]  ;;  %v1153_v19 = vunpack.c.h.b16 %v3312_v16  ;;  %v1133_v26 = vrot.slane %v3514_v48, 7  ;;  %v1159_v27 = vunpack.c.l.b16 %v1128_v55  ;;  %vm3601_vm2 = vmpackc.low %vm807_vm12, %vm807_vm12 }
  0xc6   : > { %v673_v22 = vsel %vm3304_vm6, %v665_v42, %v672_v60  ;;  %v695_v37 = vsel %vm3187_vm4, %v674_v12, %v694_v15  ;;  %2659 = vmatmul.msk.bf16.gmra.mxu2 %vm4468_vm0, %v1018_v38  ;;  %2638 = vmatmul.msk.bf16.vlgmr.msra.gmra.mxu1 %vm4468_vm0, %v911_v45  ;;  %vm3539_vm4 = vcmp.ne.s32.totalorder %v752_v20, 7  ;;  %vm1108_vm6 = vmpackc.low %vm3509_vm9, %vm3509_vm9  ;;  %v924_v51 = vshll.u32 %v3525_v56, 16  ;;  %v3011_v15 = vld [vmem:[%s4457_s4 + $0xa8] sm:$0xff]  ;;  %v3025_v38 = vld [vmem:[%s4457_s4 + $0xf8] sm:$0xff] }
  0xc7   : > { %693 = vst.msk [vmem:[#allocation2 + $0x20] sm:$0xf] %vm578_vm3, %v673_v22  ;;  %v3534_v14 = vld [vmem:[#allocation2 + $0x10] sm:$0xf]  ;;  %vm3549_vm3 = vcmp.ne.s32.totalorder %v738_v9, 0  ;;  %v1360_v9 = vunpack.c.l.b16 %v1335_v53  ;;  %vm1109_vm1 = vmpackc.low %vm3539_vm4, %vm3539_vm4  ;;  %v3598_v30 = vsel %vm1108_vm6, 65537, %v3079_v13  ;;  %v1160_v61 = vunpack.c.h.b16 %v1128_v55  ;;  %1945 = vmatpush.bf16.msra.mxu0 %v3025_v38  ;;  %1686 = vmatpush.bf16.msra.mxu2 %v3011_v15 }
  0xc8   : > { %696 = vst [vmem:[#allocation2 + $0x24] sm:$0x1] %v695_v37  ;;  %v1336_v0 = vsel %vm3433_vm13, %v3534_v14, 0  ;;  %v2984_v1 = vld [vmem:[#allocation2 + $0x10] sm:$0xff]  ;;  %vm3588_vm8 = vmpackc.low %vm3549_vm3, %vm3549_vm3  ;;  %vm3607_vm3 = vcmp.ne.s32.totalorder %v759_v58, 7  ;;  %v1166_v23 = vunpack.c.l.b16 %v1131_v17  ;;  %v1167_v42 = vunpack.c.h.b16 %v1131_v17 }
  0xc9   : > { %v1361_v10 = vunpack.c.l.b16 %v1336_v0  ;;  %v916_v11 = vshll.u32 %v2984_v1, 16  ;;  %v3577_v18 = vld [vmem:[#allocation2 + $0x14] sm:$0xf]  ;;  %v920_v29 = vshrl.u32 %v2984_v1, 16  ;;  %v854_v33 = vsel %vm3588_vm8, %v3534_v14, 0  ;;  %vm3641_vm9 = vmpackc.low %vm3572_vm14, %vm3565_vm10  ;;  %v3783_v53 = vld [vmem:[#allocation2 + $0xc] sm:$0xff] }
  0xca   : > { %v855_v4 = vsel %vm3601_vm2, %v3577_v18, 0  ;;  %v3624_v12 = vrot.slane %v924_v51, 1  ;;  %v1136_v43 = vrot.slane %v3598_v30, 7  ;;  %v3635_v49 = vsel %vm1109_vm1, 65537, %v3079_v13  ;;  %v1086_v37 = vld [vmem:[#allocation2] sm:$0xe]  ;;  %vm4540_vm5 = vmpackc.low %vm3607_vm3, %vm3607_vm3 }
  0xcb   : > { %v1367_v24 = vpack.c.b16 %v1361_v10, %v1360_v9  ;;  %v918_v16 = vrot.slane %v916_v11, 1  ;;  %v1132_v48 = vrot.slane %v1130_v44, 4  ;;  %v1135_v22 = vrot.slane %v1133_v26, 4  ;;  %v3024_v9 = vld [vmem:[%s4457_s4 + $0xf0] sm:$0xff]  ;;  %v1593_v15 = vld [vmem:[#allocation2 + $0x4] sm:$0xe] }
  0xcc   : > { %v4519_v50 = vmov 0  ;;  %vm3646_vm6 = vcmp.ne.s32.totalorder %v1152_v62, %v3339_v36  ;;  %vm3651_vm4 = vcmp.ne.s32.totalorder %v1153_v19, %v3346_v41  ;;  %vm4525_vm12 = vsmask.f32 7424  ;;  %v3661_v62 = vld [vmem:[#allocation2 + $0x4] sm:$0xff]  ;;  %1946 = vmatpush.bf16.msra.mxu0 %v3024_v9  ;;  %v3812_v11 = vld [vmem:[#allocation2 + $0xc] sm:$0xf] }
  0xcd   : > { %2715 = vmatmul.msk.bf16.gmra.mxu0 %vm4468_vm0, %v1367_v24  ;;  %v922_v60 = vor.u32 %v920_v29, %v918_v16  ;;  %v4520_v50 = vsel %vm3641_vm9, 4294967295, %v4519_v50  ;;  %v1013_v8 = vunpack.c.l.b16 %v854_v33  ;;  %v1014_v59 = vunpack.c.l.b16 %v855_v4  ;;  %v3706_v24 = vld [vmem:[#allocation2 + $0x18] sm:$0xf] }
  0xce   : > { %v3627_v45 = vld [vmem:[#allocation2 + $0x20] sm:$0x1]  ;;  %v912_v1 = vshrl.u32 %v3465_v6, 16  ;;  %v1139_v2 = vrot.slane %v3635_v49, 7  ;;  %vm3667_vm14 = vcmp.ne.s32.totalorder %v1166_v23, %v3339_v36  ;;  %vm3672_vm1 = vcmp.ne.s32.totalorder %v1167_v42, %v3346_v41  ;;  %v3762_v23 = vld [vmem:[#allocation2 + $0x8] sm:$0xf] }
  0xcf   : > { %v927_v44 = vsel %vm4525_vm12, %v922_v60, %v3624_v12  ;;  %v893_v0 = vunpack.c.l.b16 %v3627_v45  ;;  %v3010_v6 = vld [vmem:[%s4457_s4 + $0xa0] sm:$0xff]  ;;  %v1138_v10 = vrot.slane %v1136_v43, 4  ;;  %vm3689_vm12 = vmpackc.low %vm3651_vm4, %vm3646_vm6  ;;  %vm3699_vm10 = vcmp.ne.s32.totalorder %v1160_v61, %v3346_v41  ;;  %v3023_v42 = vld [vmem:[%s4457_s4 + $0xe8] sm:$0xff] }
  0xd0   : > { %2640 = vmatmul.msk.bf16.vlgmr.msra.gmra.mxu3 %vm4468_vm0, %v927_v44  ;;  %v4531_v35 = vsel %vm3689_vm12, 4294967295, %v4530_v35  ;;  %vm3694_vm0 = vcmp.ne.s32.totalorder %v1159_v27, %v3339_v36  ;;  %v1208_v17 = vsel %vm3641_vm9, %v1086_v37, 0  ;;  %v914_v19 = vor.u32 %v912_v1, %v3499_v39  ;;  %vm3735_vm7 = vmpackc.low %vm3672_vm1, %vm3667_vm14  ;;  %1687 = vmatpush.bf16.msra.mxu2 %v3010_v6  ;;  %v3022_v1 = vld [vmem:[%s4457_s4 + $0xe0] sm:$0xff]  ;;  %v3027_v37 = vld [vmem:[%s4457_s4 + $0x108] sm:$0xff] }
  0xd1   : > { %vm3710_vm6 = vcmp.ne.s32.totalorder %v752_v20, 0  ;;  %vm3716_vm4 = vcmp.ne.s32.totalorder %v759_v58, 0  ;;  %v3726_v39 = vsel %vm4540_vm5, 65537, %v3079_v13  ;;  %1795 = vmatpush.bf16.msra.mxu3 %v3017_v46  ;;  %v1019_v54 = vpack.c.b16 %v1014_v59, %v1013_v8  ;;  %vm3749_vm3 = vmpackc.low %vm3699_vm10, %vm3694_vm0  ;;  %1947 = vmatpush.bf16.msra.mxu0 %v3023_v42 }
  0xd2   : > { %v1337_v20 = vsel %vm3588_vm8, %v3577_v18, 0  ;;  %v898_v40 = vpack.c.b16 %v893_v0, %v893_v0  ;;  %v3741_v13 = vsel %vm3288_vm15, %v1132_v48, %v1133_v26  ;;  %vm4543_vm5 = vsmask.f32 7424  ;;  %v3774_v48 = vld [vmem:[#allocation2 + $0x1c] sm:$0xf]  ;;  %vm3779_vm0 = vmpackc.low %vm3716_vm4, %vm3716_vm4 }
  0xd3   : > { %v919_v29 = vsel %vm4543_vm5, %v914_v19, %v918_v16  ;;  %v1141_v32 = vrot.slane %v1139_v2, 4  ;;  %v1487_v61 = vshll.u32 %v3661_v62, 16  ;;  %v1209_v4 = vsel %vm3689_vm12, %v3330_v34, 0  ;;  %v3029_v34 = vld [vmem:[%s4457_s4 + $0x118] sm:$0xff]  ;;  %vm3805_vm10 = vmpackc.low %vm3710_vm6, %vm3710_vm6 }
  0xd4   : > { %vm4546_vm14 = vcmask 523264   ;;  %v1338_v26 = vsel %vm3601_vm2, %v3706_v24, 0  ;;  %v1142_v16 = vrot.slane %v3726_v39, 7  ;;  %v1235_v38 = vunpack.c.l.b16 %v1208_v17  ;;  %2069 = vmatpush.bf16.msra.mxu1 %v3029_v34 }
  0xd5   : > { %vm4547_vm1 = vmmov %vm4546_vm14  ;;  %v3772_v60 = vsel %vm3288_vm15, %v1135_v22, %v1136_v43  ;;  %v1362_v49 = vunpack.c.l.b16 %v1337_v20  ;;  %v1211_v57 = vsel %vm3735_vm7, %v3460_v63, 0  ;;  %v1173_v44 = vunpack.c.l.b16 %v3741_v13  ;;  %v3822_v20 = vld [vmem:[#allocation2 + $0x10] sm:$0xf]  ;;  %1948 = vmatpush.bf16.msra.mxu0 %v3022_v1 }
  0xd6   : > { %2660 = vmatmul.msk.bf16.gmra.mxu2 %vm4546_vm14, %v1019_v54  ;;  %2639 = vmatmul.msk.bf16.gmra.mxu1 %vm4547_vm1, %v919_v29  ;;  %v1174_v43 = vunpack.c.h.b16 %v3741_v13  ;;  %v932_v22 = vshll.u32 %v898_v40, 16  ;;  %v1485_v8 = vshrl.u32 %v3661_v62, 16  ;;  %v1236_v59 = vunpack.c.l.b16 %v1209_v4  ;;  %vm4552_vm6 = vmmov %vm4547_vm1  ;;  %v3921_v13 = vld [vmem:[#allocation2 + $0x10] sm:$0xff] }
  0xd7   : > { %v1594_v0 = vsel %vm3641_vm9, %v1593_v15, 0  ;;  %v1363_v5 = vunpack.c.l.b16 %v1338_v26  ;;  %v1489_v55 = vrot.slane %v1487_v61, 1  ;;  %v1210_v63 = vsel %vm3749_vm3, %v3383_v28, 0 }
  0xd8   : > { %v1595_v62 = vsel %vm3689_vm12, %v3762_v23, 0  ;;  %v857_v6 = vsel %vm3779_vm0, %v3774_v48, 0  ;;  %v1238_v9 = vunpack.c.l.b16 %v1211_v57  ;;  %v1140_v28 = vsel %vm3288_vm15, %v1138_v10, %v1139_v2 }
  0xd9   : > { %v1143_v51 = vsel %vm3288_vm15, %v1141_v32, %v1142_v16  ;;  %v1368_v17 = vpack.c.b16 %v1363_v5, %v1362_v49  ;;  %v928_v19 = vshrl.u32 %v3525_v56, 16  ;;  %v1492_v30 = vshll.u32 %v3783_v53, 16  ;;  %v1332_v5 = vld [vmem:[#allocation2 + $0x20] sm:$0xf] }
  0xda   : > { %v1187_v27 = vunpack.c.l.b16 %v1140_v28  ;;  %v934_v54 = vrot.slane %v932_v22, 1  ;;  %v1188_v40 = vunpack.c.h.b16 %v1140_v28  ;;  %v1194_v29 = vunpack.c.l.b16 %v1143_v51 }
  0xdb   : > { %v1195_v61 = vunpack.c.h.b16 %v1143_v51  ;;  %v856_v3 = vsel %vm3805_vm10, %v3706_v24, 0  ;;  %v1237_v2 = vunpack.c.l.b16 %v1210_v63  ;;  %v1244_v10 = vpack.c.b16 %v1236_v59, %v1235_v38 }
  0xdc   : > { %v1596_v56 = vsel %vm3749_vm3, %v3812_v11, 0  ;;  %v930_v32 = vor.u32 %v928_v19, %v3624_v12  ;;  %v3832_v4 = vunpack.c.l.b16 %v1595_v62  ;;  %vm1198_vm15 = vcmp.ne.s32.totalorder %v1194_v29, %v3339_v36 }
  0xdd   : > { %2716 = vmatmul.msk.bf16.gmra.mxu0 %vm4552_vm6, %v1368_v17  ;;  %vm1199_vm4 = vcmp.ne.s32.totalorder %v1195_v61, %v3346_v41  ;;  %v1016_v15 = vunpack.c.l.b16 %v857_v6  ;;  %v1597_v26 = vsel %vm3735_vm7, %v3822_v20, 0  ;;  %vm3840_vm5 = vcmp.ne.s32.totalorder %v1187_v27, %v3339_v36  ;;  %v3016_v6 = vld [vmem:[%s4457_s4 + $0xd0] sm:$0xff] }
  0xde   : > { %vm3845_vm14 = vcmp.ne.s32.totalorder %v1188_v40, %v3346_v41  ;;  %vm4557_vm1 = vsmask.f32 7424  ;;  %v1494_v34 = vrot.slane %v1492_v30, 1  ;;  %v1245_v49 = vpack.c.b16 %v1238_v9, %v1237_v2  ;;  %vm3852_vm9 = vmpackc.low %vm1199_vm4, %vm1198_vm15  ;;  %1796 = vmatpush.bf16.msra.mxu3 %v3016_v6  ;;  %v1831_v27 = vld [vmem:[#allocation2 + $0x14] sm:$0xf] }
  0xdf   : > { %v935_v12 = vsel %vm4557_vm1, %v930_v32, %v934_v54  ;;  %vm1249_vm6 = vcmask 1046528   ;;  %v3850_v57 = vunpack.c.l.b16 %v1594_v0  ;;  %vm4560_vm12 = vcmask 523264   ;;  %vm4565_vm4 = vmmov %vm4557_vm1  ;;  %v3889_v61 = vld [vmem:[#allocation2 + $0x14] sm:$0xff]  ;;  %v1833_v6 = vld [vmem:[#allocation2 + $0x1c] sm:$0xf] }
  0xe0   : > { %2641 = vmatmul.msk.bf16.gmra.mxu3 %vm4560_vm12, %v935_v12  ;;  %v1015_v59 = vunpack.c.l.b16 %v856_v3  ;;  %v1490_v1 = vor.u32 %v1489_v55, %v1485_v8  ;;  %v1250_v63 = vrot.slane %v1244_v10, 1  ;;  %v1623_v62 = vunpack.c.l.b16 %v1596_v56  ;;  %vm3874_vm12 = vmpackc.low %vm3845_vm14, %vm3840_vm5  ;;  %v1830_v55 = vld [vmem:[#allocation2 + $0x10] sm:$0xf] }
  0xe1   : > { %v1339_v0 = vsel %vm3805_vm10, %v3774_v48, 0  ;;  %v1624_v9 = vunpack.c.l.b16 %v1597_v26  ;;  %v1630_v28 = vpack.c.b16 %v3832_v4, %v3850_v57  ;;  %vm3866_vm15 = vcmp.ne.s32.totalorder %v1173_v44, %v3339_v36 }
  0xe2   : > { %v1020_v17 = vpack.c.b16 %v1016_v15, %v1015_v59  ;;  %v1180_v19 = vunpack.c.l.b16 %v3772_v60  ;;  %v1215_v44 = vsel %vm3852_vm9, %v3774_v48, 0  ;;  %v1144_v30 = vrot.slane %v1142_v16, 4  ;;  %v3905_v15 = vld [vmem:[#allocation2 + $0x8] sm:$0xff]  ;;  %1797 = vmatpush.bf16.msra.mxu3 %v3015_v25 }
  0xe3   : > { %v1495_v54 = vsel %vm4565_vm4, %v1490_v1, %v1494_v34  ;;  %v1340_v40 = vsel %vm3779_vm0, %v1332_v5, 0  ;;  %v3887_v29 = vrot.slane %v1245_v49, 1  ;;  %v1181_v3 = vunpack.c.h.b16 %v3772_v60  ;;  %v3028_v60 = vld [vmem:[%s4457_s4 + $0x110] sm:$0xff] }
  0xe4   : > { %v1214_v2 = vsel %vm3874_vm12, %v3706_v24, 0  ;;  %v1201_v48 = vunpack.c.l.b16 %v1144_v30  ;;  %v1202_v10 = vunpack.c.h.b16 %v1144_v30  ;;  %v1981_v39 = vsel %vm3749_vm3, %v1830_v55, 0  ;;  %2070 = vmatpush.bf16.msra.mxu1 %v3028_v60  ;;  %v1835_v60 = vld [vmem:[#allocation2 + $0x24] sm:$0xf] }
  0xe5   : > { %vm4566_vm5 = vcmask 523264   ;;  %v1631_v16 = vpack.c.b16 %v1624_v9, %v1623_v62  ;;  %v1496_v56 = vshrl.u32 %v3783_v53, 16  ;;  %v1242_v32 = vunpack.c.l.b16 %v1215_v44  ;;  %v1832_v62 = vld [vmem:[#allocation2 + $0x18] sm:$0xf]  ;;  %v1447_v44 = vld [vmem:[#allocation2 + $0x14] sm:$0xf] }
  0xe6   : > { %2661 = vmatmul.msk.bf16.gmra.mxu2 %vm4566_vm5, %v1020_v17  ;;  %vm4567_vm14 = vmmov %vm4566_vm5  ;;  %v1982_v24 = vsel %vm3735_vm7, %v1831_v27, 0  ;;  %v1365_v4 = vunpack.c.l.b16 %v1340_v40  ;;  %vm3910_vm3 = vcmp.ne.s32.totalorder %v1174_v43, %v3346_v41  ;;  %vm1205_vm1 = vcmp.ne.s32.totalorder %v1201_v48, %v3339_v36  ;;  %v1448_v40 = vld [vmem:[#allocation2 + $0x18] sm:$0xf]  ;;  %v1834_v48 = vld [vmem:[#allocation2 + $0x20] sm:$0xf] }
  0xe7   : > { %2758 = vmatmul.msk.bf16.vlgmr.msrb.gmra.mxu1 %vm4567_vm14, %v1495_v54  ;;  %vm1206_vm4 = vcmp.ne.s32.totalorder %v1202_v10, %v3346_v41  ;;  %v1500_v53 = vshll.u32 %v3889_v61, 16  ;;  %v1241_v26 = vunpack.c.l.b16 %v1214_v2  ;;  %v2008_v38 = vunpack.c.l.b16 %v1981_v39  ;;  %v1717_v43 = vld [vmem:[#allocation2 + $0x24] sm:$0xf] }
  0xe8   : > { %vm3917_vm5 = vmpackc.low %vm1206_vm4, %vm1205_vm1  ;;  %v2009_v42 = vunpack.c.l.b16 %v1982_v24  ;;  %v1364_v12 = vunpack.c.l.b16 %v1339_v0  ;;  %vm3924_vm7 = vcmp.ne.s32.totalorder %v1180_v19, %v3339_v36  ;;  %vm1185_vm14 = vcmp.ne.s32.totalorder %v1181_v3, %v3346_v41  ;;  %v3976_v24 = vld [vmem:[#allocation2 + $0x20] sm:$0xf]  ;;  %2071 = vmatpush.bf16.msra.mxu1 %v3027_v37 }
  0xe9   : > { %v1216_v49 = vsel %vm3917_vm5, %v3627_v45, 0  ;;  %v3932_v57 = vrot.slane %v1631_v16, 1  ;;  %v1498_v59 = vor.u32 %v1496_v56, %v1494_v34  ;;  %vm3938_vm1 = vmpackc.low %vm3910_vm3, %vm3866_vm15  ;;  %v1247_v36 = vpack.c.b16 %v1242_v32, %v1241_v26 }
  0xea   : > { %v1243_v5 = vunpack.c.l.b16 %v1216_v49  ;;  %v1369_v41 = vpack.c.b16 %v1365_v4, %v1364_v12  ;;  %v1252_v0 = vsel %vm1249_vm6, %v1250_v63, %v3887_v29  ;;  %v1635_v45 = vrot.slane %v1630_v28, 1  ;;  %vm3949_vm4 = vmpackc.low %vm1185_vm14, %vm3924_vm7 }
  0xeb   : > { %v1872_v9 = vshll.u32 %v3905_v15, 16  ;;  %v3945_v34 = vrot.slane %v1500_v53, 1  ;;  %v1212_v55 = vsel %vm3938_vm1, %v3534_v14, 0  ;;  %v2016_v19 = vpack.c.b16 %v2009_v42, %v2008_v38 }
  0xec   : > { %v1248_v17 = vpack.c.b16 %v1243_v5, %v1243_v5  ;;  %vm4578_vm15 = vcmask 523264   ;;  %v1877_v63 = vshll.u32 %v3921_v13, 16  ;;  %v1213_v28 = vsel %vm3949_vm4, %v3577_v18, 0  ;;  %v3971_v18 = vld [vmem:[#allocation2 + $0x1c] sm:$0xf] }
  0xed   : > { %2717 = vmatmul.msk.bf16.gmra.mxu0 %vm4578_vm15, %v1369_v41  ;;  %v1983_v30 = vsel %vm3938_vm1, %v1832_v62, 0  ;;  %v1984_v27 = vsel %vm3949_vm4, %v1833_v6, 0  ;;  %v1637_v14 = vsel %vm1249_vm6, %v1635_v45, %v3932_v57  ;;  %vm4579_vm3 = vsmask.f32 7424  ;;  %vm4580_vm7 = vmmov %vm4578_vm15 }
  0xee   : > { %v1503_v54 = vsel %vm4579_vm3, %v1498_v59, %v3945_v34  ;;  %v3969_v3 = vrot.slane %v1247_v36, 1  ;;  %v1257_v2 = vrot.slane %v1248_v17, 1  ;;  %v1239_v10 = vunpack.c.l.b16 %v1212_v55 }
  0xef   : > { %v2010_v39 = vunpack.c.l.b16 %v1983_v30  ;;  %v2011_v16 = vunpack.c.l.b16 %v1984_v27  ;;  %v1720_v56 = vsel %vm3415_vm11, %v3822_v20, 0  ;;  %v1240_v32 = vunpack.c.l.b16 %v1213_v28  ;;  %v3990_v20 = vld [vmem:[#allocation2 + $0x28] sm:$0x1]  ;;  %vm4581_vm11 = vmmov %vm4580_vm7 }
  0xf0   : > { %v3980_v4 = vsel %vm1249_vm6, %v3969_v3, %v1257_v2  ;;  %v3982_v33 = vrot.slane %v2016_v19, 1  ;;  %v1721_v53 = vsel %vm3433_vm13, %v1447_v44, 0  ;;  %2686 = vmatmul.msk.bf16.vlgmr.msrb.gmra.mxu3 %vm4580_vm7, %v1252_v0  ;;  %v3992_v38 = vunpack.c.l.b16 %v1720_v56  ;;  %vm4582_vm13 = vmmov %vm4580_vm7 }
  0xf1   : > { %v2017_v26 = vpack.c.b16 %v2011_v16, %v2010_v39  ;;  %v3994_v42 = vunpack.c.l.b16 %v1721_v53  ;;  %v1985_v12 = vsel %vm3874_vm12, %v1834_v48, 0  ;;  %v1986_v47 = vsel %vm3852_vm9, %v1835_v60, 0 }
  0xf2   : > { %v2012_v49 = vunpack.c.l.b16 %v1985_v12  ;;  %v1722_v59 = vsel %vm3588_vm8, %v1448_v40, 0  ;;  %v1723_v36 = vsel %vm3601_vm2, %v3971_v18, 0  ;;  %v2013_v6 = vunpack.c.l.b16 %v1986_v47  ;;  %vm4583_vm2 = vmmov %vm4579_vm3 }
  0xf3   : > { %v2023_v5 = vrot.slane %v2017_v26, 1  ;;  %v1752_v62 = vpack.c.b16 %v3994_v42, %v3992_v38  ;;  %v4007_v41 = vunpack.c.l.b16 %v1722_v59  ;;  %v4009_v0 = vunpack.c.l.b16 %v1723_v36  ;;  %vm4584_vm8 = vmmov %vm4580_vm7  ;;  %v3026_v59 = vld [vmem:[%s4457_s4 + $0x100] sm:$0xff]  ;;  %v3020_v36 = vld [vmem:[#allocation2 + $0x18] sm:$0xff] }
  0xf4   : > { %v1987_v45 = vsel %vm3917_vm5, %v3990_v20, 0  ;;  %v1724_v52 = vsel %vm3805_vm10, %v3976_v24, 0  ;;  %v1725_v31 = vsel %vm3779_vm0, %v1717_v43, 0  ;;  %v2018_v17 = vpack.c.b16 %v2013_v6, %v2012_v49  ;;  %vm4585_vm0 = vmmov %vm4580_vm7  ;;  %v3014_v49 = vld [vmem:[%s4457_s4 + $0xc0] sm:$0xff]  ;;  %2072 = vmatpush.bf16.msra.mxu1 %v3026_v59 }
  0xf5   : > { %v4021_v55 = vsel %vm1249_vm6, %v3982_v33, %v2023_v5  ;;  %v2014_v19 = vunpack.c.l.b16 %v1987_v45  ;;  %v4023_v28 = vunpack.c.l.b16 %v1724_v52  ;;  %v1874_v30 = vrot.slane %v1872_v9, 1  ;;  %1798 = vmatpush.bf16.msra.mxu3 %v3014_v49  ;;  %vm4586_vm10 = vmmov %vm4583_vm2 }
  0xf6   : > { %2786 = vmatmul.msk.bf16.vlgmr.msra.gmra.mxu2 %vm4581_vm11, %v1637_v14  ;;  %v1598_v46 = vsel %vm3938_vm1, %v1447_v44, 0  ;;  %v1753_v27 = vpack.c.b16 %v4009_v0, %v4007_v41  ;;  %v4034_v2 = vunpack.c.l.b16 %v1725_v31  ;;  %v1870_v48 = vshrl.u32 %v3905_v15, 16  ;;  %vm4587_vm14 = vmmov %vm4585_vm0 }
  0xf7   : > { %2759 = vmatmul.msk.bf16.gmra.mxu1 %vm4582_vm13, %v1503_v54  ;;  %v2025_v39 = vrot.slane %v2018_v17, 1  ;;  %v2019_v16 = vpack.c.b16 %v2014_v19, %v2014_v19  ;;  %v1879_v14 = vrot.slane %v1877_v63, 1  ;;  %v1246_v56 = vpack.c.b16 %v1240_v32, %v1239_v10  ;;  %v3005_v54 = vld [vmem:[#allocation2 + $0x1c] sm:$0xff]  ;;  %vm4588_vm1 = vmmov %vm4585_vm0 }
  0xf8   : > { %v1599_v9 = vsel %vm3949_vm4, %v1448_v40, 0  ;;  %v1754_v1 = vpack.c.b16 %v4034_v2, %v4023_v28  ;;  %v1625_v44 = vunpack.c.l.b16 %v1598_v46  ;;  %v1875_v25 = vor.u32 %v1874_v30, %v1870_v48  ;;  %vm4589_vm4 = vmmov %vm4583_vm2  ;;  %v3036_v28 = vld [vmem:[%s4460_s7 + $0x34] sm:$0xf] }
  0xf9   : > { %v4042_v60 = vsel %vm1249_vm6, %v2023_v5, %v2025_v39  ;;  %v2027_v53 = vrot.slane %v2019_v16, 1  ;;  %v1626_v26 = vunpack.c.l.b16 %v1599_v9  ;;  %v1253_v10 = vrot.slane %v1246_v56, 1  ;;  %v1451_v5 = vld [vmem:[#allocation2 + $0x24] sm:$0x1]  ;;  %vm4590_vm15 = vmmov %vm4585_vm0 }
  0xfa   : > { %v1880_v63 = vsel %vm4583_vm2, %v1875_v25, %v1879_v14  ;;  %v1508_v40 = vshll.u32 %v3005_v54, 16  ;;  %v1504_v43 = vshrl.u32 %v3889_v61, 16  ;;  %v1478_v45 = vunpack.c.l.b16 %v1451_v5  ;;  %vm4593_vm3 = vmmov %vm4585_vm0 }
  0xfb   : > { %v4045_v15 = vsel %vm1249_vm6, %v2025_v39, %v2027_v53  ;;  %v1632_v51 = vpack.c.b16 %v1626_v26, %v1625_v44  ;;  %v1254_v32 = vsel %vm1249_vm6, %v3887_v29, %v1253_v10  ;;  %v1881_v52 = vshrl.u32 %v3921_v13, 16  ;;  %v1829_v53 = vld [vmem:[#allocation2 + $0xc] sm:$0xf]  ;;  %vm4594_vm7 = vmmov %vm4585_vm0 }
  0xfc   : > { %v1510_v47 = vrot.slane %v1508_v40, 1  ;;  %v1506_v6 = vor.u32 %v1504_v43, %v3945_v34  ;;  %v1885_v31 = vshll.u32 %v3020_v36, 16  ;;  %v1601_v17 = vsel %vm3852_vm9, %v3976_v24, 0  ;;  %v3021_v24 = vld [vmem:[#allocation2 + $0x20] sm:$0xff]  ;;  %vm4591_vm9 = vmmov %vm4585_vm0 }
  0xfd   : > { %2858 = vmatmul.msk.bf16.vlgmr.msra.gmra.mxu0 %vm4584_vm8, %v1880_v63  ;;  %v1638_v12 = vrot.slane %v1632_v51, 1  ;;  %v1883_v34 = vor.u32 %v1881_v52, %v1879_v14  ;;  %v1600_v19 = vsel %vm3874_vm12, %v3971_v18, 0  ;;  %v1483_v30 = vpack.c.b16 %v1478_v45, %v1478_v45  ;;  %vm4592_vm12 = vmmov %vm4583_vm2 }
  0xfe   : > { %v1511_v61 = vsel %vm4586_vm10, %v1506_v6, %v1510_v47  ;;  %v1887_v46 = vrot.slane %v1885_v31, 1  ;;  %v1627_v37 = vunpack.c.l.b16 %v1600_v19  ;;  %v1512_v16 = vshrl.u32 %v3005_v54, 16  ;;  %vm4597_vm8 = vmmov %vm4585_vm0 }
  0xff   : > { %v1639_v29 = vsel %vm1249_vm6, %v3932_v57, %v1638_v12  ;;  %v1628_v57 = vunpack.c.l.b16 %v1601_v17  ;;  %v1516_v13 = vshll.u32 %v1483_v30, 16  ;;  %v1256_v22 = vsel %vm1249_vm6, %v1253_v10, %v3969_v3  ;;  %v1978_v3 = vld [vmem:[#allocation2 + $0x8] sm:$0xe]  ;;  %vm4599_vm10 = vmmov %vm4585_vm0 }
 0x100   : > { %2687 = vmatmul.msk.bf16.gmra.mxu3 %vm4585_vm0, %v1254_v32  ;;  %v1888_v48 = vsel %vm4589_vm4, %v1883_v34, %v1887_v46  ;;  %v1514_v8 = vor.u32 %v1512_v16, %v1510_v47  ;;  %v1893_v56 = vshll.u32 %v3021_v24, 16  ;;  %v1602_v54 = vsel %vm3917_vm5, %v1451_v5, 0  ;;  %vm4598_vm5 = vmmov %vm4585_vm0  ;;  %v2916_v16 = vld [vmem:[%s4460_s7 + $0x30] sm:$0xf] }
 0x101   : > { %v1633_v39 = vpack.c.b16 %v1628_v57, %v1627_v37  ;;  %v1518_v18 = vrot.slane %v1516_v13, 1  ;;  %v1889_v25 = vshrl.u32 %v3020_v36, 16  ;;  %vm4595_vm11 = vnez %v4531_v35  ;;  %vm4602_vm4 = vmmov %vm4583_vm2 }
 0x102   : > { %v1895_v26 = vrot.slane %v1893_v56, 1  ;;  %v1980_v63 = vsel %vm4595_vm11, %v1829_v53, 0  ;;  %v1629_v10 = vunpack.c.l.b16 %v1602_v54  ;;  %vm4596_vm13 = vnez %v4520_v50  ;;  %vm4609_vm11 = vmmov %vm4585_vm0  ;;  %v2956_v56 = vld [vmem:[%s4463_s10 + $0x30] sm:$0xf] }
 0x103   : > { %v1640_v14 = vrot.slane %v1633_v39, 1  ;;  %v1519_v44 = vsel %vm4592_vm12, %v1514_v8, %v1518_v18  ;;  %v1891_v51 = vor.u32 %v1889_v25, %v1887_v46  ;;  %v1979_v40 = vsel %vm4596_vm13, %v1978_v3, 0  ;;  %vm4606_vm12 = vmmov %vm4585_vm0  ;;  %v2958_v3 = vld [vmem:[%s4463_s10 + $0x38] sm:$0xf0] }
 0x104   : > { %v2007_v32 = vunpack.c.l.b16 %v1980_v63  ;;  %v1863_v43 = vunpack.c.l.b16 %v3990_v20  ;;  %v1634_v58 = vpack.c.b16 %v1629_v10, %v1629_v10  ;;  %v2006_v47 = vunpack.c.l.b16 %v1979_v40  ;;  %vm4610_vm13 = vmmov %vm4585_vm0 }
 0x105   : > { %v1641_v9 = vsel %vm1249_vm6, %v1638_v12, %v1640_v14  ;;  %v1896_v12 = vsel %vm4583_vm2, %v1891_v51, %v1895_v26  ;;  %v1897_v20 = vshrl.u32 %v3021_v24, 16  ;;  %vm4611_vm2 = vmmov %vm4585_vm0 }
 0x106   : > { %2787 = vmatmul.msk.bf16.gmra.mxu2 %vm4587_vm14, %v1639_v29  ;;  %v2015_v49 = vpack.c.b16 %v2007_v32, %v2006_v47  ;;  %v1868_v59 = vpack.c.b16 %v1863_v43, %v1863_v43  ;;  %v1642_v35 = vrot.slane %v1634_v58, 1  ;;  %vm4600_vm14 = vnez %v4488_v21  ;;  %v2908_v32 = vld [vmem:[%s4460_s7 + $0x20] sm:$0xf]  ;;  %v3034_v43 = vld [vmem:[%s4460_s7 + $0x24] sm:$0xf] }
 0x107   : > { %2760 = vmatmul.msk.bf16.gmra.mxu1 %vm4588_vm1, %v1511_v61  ;;  %v1899_v29 = vor.u32 %v1897_v20, %v1895_v26  ;;  %v1719_v45 = vsel %vm4600_vm14, %v3812_v11, 0  ;;  %vm4601_vm1 = vnez %v4484_v7  ;;  %vm4615_vm14 = vmmov %vm4585_vm0 }
 0x108   : > { %v2020_v36 = vrot.slane %v2015_v49, 1  ;;  %v1901_v5 = vshll.u32 %v1868_v59, 16  ;;  %v1643_v50 = vsel %vm1249_vm6, %v1640_v14, %v1642_v35  ;;  %v1744_v52 = vunpack.c.l.b16 %v1719_v45  ;;  %v2918_v14 = vld [vmem:[%s4460_s7 + $0x38] sm:$0xf0]  ;;  %v2910_v49 = vld [vmem:[%s4460_s7 + $0x28] sm:$0xf0] }
 0x109   : > { %v2921_v8 = vor.u32 %v3036_v28, %v2918_v14  ;;  %v2913_v59 = vor.u32 %v3034_v43, %v2910_v49 }
 0x10a   : > { %v2022_v6 = vsel %vm1249_vm6, %v2020_v36, %v3982_v33  ;;  %v1903_v61 = vrot.slane %v1901_v5, 1  ;;  %vm4604_vm6 = vmmov %vm4585_vm0  ;;  %v2948_v5 = vld [vmem:[%s4463_s10 + $0x20] sm:$0xf] }
 0x10b   : > { %2231 = vmatpush.bf16.msrb.mxu3 %v2921_v8 }
 0x10c   : > { %v1904_v31 = vsel %vm4602_vm4, %v1899_v29, %v1903_v61  ;;  %v2950_v61 = vld [vmem:[%s4463_s10 + $0x28] sm:$0xf0]  ;;  %vm4617_vm4 = vmmov %vm4585_vm0 }
 0x10d   : > { %2859 = vmatmul.msk.bf16.gmra.mxu0 %vm4590_vm15, %v1888_v48  ;;  %vm4603_vm15 = vmmov %vm4585_vm0 }
 0x10f   : > { %2232 = vmatpush.bf16.msrb.mxu3 %v2913_v59  ;;  %v2932_v59 = vld [vmem:[%s4463_s10] sm:$0xf] }
 0x110   : > { %2688 = vmatmul.msk.bf16.gmra.mxu3 %vm4591_vm9, %v1256_v22  ;;  %vm4605_vm9 = vmmov %vm4585_vm0  ;;  %v3037_v22 = vld [vmem:[%s4460_s7 + $0x34] sm:$0xf0] }
 0x111   : > { %v2917_v24 = vor.u32 %v3037_v22, %v2916_v16  ;;  %v2942_v22 = vld [vmem:[%s4463_s10 + $0x18] sm:$0xf0] }
 0x113   : > { %2202 = vmatpush.bf16.msrb.mxu2 %v2917_v24 }
 0x116   : > { %2788 = vmatmul.msk.bf16.gmra.mxu2 %vm4593_vm3, %v1641_v9  ;;  %vm4607_vm3 = vmmov %vm4585_vm0  ;;  %v3045_v9 = vld [vmem:[%s4463_s10 + $0x34] sm:$0xf0] }
 0x117   : > { %2761 = vmatmul.msk.bf16.gmra.mxu1 %vm4594_vm7, %v1519_v44  ;;  %vm4608_vm7 = vmmov %vm4585_vm0  ;;  %v3044_v44 = vld [vmem:[%s4463_s10 + $0x34] sm:$0xf]  ;;  %v2957_v54 = vor.u32 %v3045_v9, %v2956_v56 }
 0x118   : > { %v2961_v26 = vor.u32 %v3044_v44, %v2958_v3  ;;  %v2892_v44 = vld [vmem:[%s4460_s7] sm:$0xf] }
 0x119   : > { %2352 = vmatpush.bf16.msrb.mxu0 %v2957_v54 }
 0x11a   : > { %2381 = vmatpush.bf16.msrb.mxu1 %v2961_v26 }
 0x11d   : > { %2860 = vmatmul.msk.bf16.gmra.mxu0 %vm4597_vm8, %v1896_v12  ;;  %v3035_v12 = vld [vmem:[%s4460_s7 + $0x24] sm:$0xf0]  ;;  %vm4612_vm8 = vmmov %vm4585_vm0 }
 0x11e   : > { %v2909_v47 = vor.u32 %v3035_v12, %v2908_v32 }
 0x120   : > { %2689 = vmatmul.msk.bf16.gmra.mxu3 %vm4598_vm5, %v3980_v4  ;;  %v1718_v4 = vsel %vm4601_vm1, %v3762_v23, 0  ;;  %2203 = vmatpush.bf16.msrb.mxu2 %v2909_v47  ;;  %vm4613_vm5 = vmmov %vm4585_vm0 }
 0x121   : > { %v1743_v33 = vunpack.c.l.b16 %v1718_v4  ;;  %vm4616_vm1 = vmmov %vm4585_vm0 }
 0x123   : > { %v1751_v17 = vpack.c.b16 %v1744_v52, %v1743_v33 }
 0x126   : > { %2789 = vmatmul.msk.bf16.gmra.mxu2 %vm4585_vm0, %v1643_v50  ;;  %v3043_v50 = vld [vmem:[%s4463_s10 + $0x24] sm:$0xf0] }
 0x127   : > { %2886 = vmatmul.msk.bf16.vlgmr.msra.gmra.mxu1 %vm4599_vm10, %v2022_v6  ;;  %v3042_v6 = vld [vmem:[%s4463_s10 + $0x24] sm:$0xf]  ;;  %v2949_v29 = vor.u32 %v3043_v50, %v2948_v5  ;;  %vm4614_vm10 = vmmov %vm4585_vm0 }
 0x128   : > { %v2953_v4 = vor.u32 %v3042_v6, %v2950_v61 }
 0x129   : > { %2353 = vmatpush.bf16.msrb.mxu0 %v2949_v29 }
 0x12a   : > { %2382 = vmatpush.bf16.msrb.mxu1 %v2953_v4  ;;  %v3067_v4 = vld [vmem:[%s3176_s21] sm:$0xff] }
 0x12d   : > { %2861 = vmatmul.msk.bf16.gmra.mxu0 %vm4603_vm15, %v1904_v31  ;;  %vm4618_vm15 = vmmov %vm4585_vm0 }
 0x130   : > { %2814 = vmatmul.msk.bf16.vlgmr.msra.gmra.mxu3 %vm4604_vm6, %v1751_v17  ;;  %v2900_v17 = vld [vmem:[%s4460_s7 + $0x10] sm:$0xf]  ;;  %vm4619_vm6 = vmmov %vm4585_vm0 }
 0x137   : > { %2887 = vmatmul.msk.bf16.gmra.mxu1 %vm4605_vm9, %v4021_v55  ;;  %vm4620_vm9 = vmmov %vm4585_vm0 }
 0x139   : > { %v1066_v34 = vpop.f32.mrf.mxu2 }
 0x13a   : > { %v1415_v42 = vpop.f32.mrf.mxu0 }
 0x140   : > { %2815 = vmatmul.msk.bf16.gmra.mxu3 %vm4606_vm12, %v1752_v62  ;;  %vm4621_vm12 = vmmov %vm4585_vm0 }
 0x141   : > { %v4108_v19 = vpop.f32.mrf.mxu2 }
 0x142   : > { %v4138_v41 = vpop.f32.mrf.mxu0 }
 0x143   : > { %v981_v7 = vpop.f32.mrf.mxu1 }
 0x144   : > { %v1067_v21 = vadd.f32 %v1066_v34, %v981_v7  ;;  %v3033_v34 = vld [vmem:[%s4460_s7 + $0x14] sm:$0xf0]  ;;  %v3032_v7 = vld [vmem:[%s4460_s7 + $0x14] sm:$0xf] }
 0x147   : > { %2888 = vmatmul.msk.bf16.gmra.mxu1 %vm4607_vm3, %v4042_v60  ;;  %vm4622_vm3 = vmmov %vm4585_vm0 }
 0x149   : > { %v1071_v23 = vpop.f32.mrf.mxu2 }
 0x14a   : > { %v1420_v2 = vpop.f32.mrf.mxu0 }
 0x14b   : > { %v4116_v11 = vpop.f32.mrf.mxu1 }
 0x14c   : > { %v1069_v61 = vadd.f32 %v4108_v19, %v4116_v11 }
 0x150   : > { %2816 = vmatmul.msk.bf16.gmra.mxu3 %vm4608_vm7, %v1753_v27  ;;  %vm4623_vm7 = vmmov %vm4585_vm0 }
 0x151   : > { %v4118_v57 = vpop.f32.mrf.mxu2 }
 0x152   : > { %v4170_v63 = vpop.f32.mrf.mxu0 }
 0x153   : > { %v986_v55 = vpop.f32.mrf.mxu1  ;;  %v991_v38 = vpop.f32.mrf.mxu3 }
 0x154   : > { %v1072_v30 = vadd.f32 %v1071_v23, %v986_v55  ;;  %v2901_v55 = vor.u32 %v3033_v34, %v2900_v17 }
 0x156   : > { %2204 = vmatpush.bf16.msrb.mxu2 %v2901_v55 }
 0x157   : > { %2889 = vmatmul.msk.bf16.gmra.mxu1 %vm4609_vm11, %v4045_v15  ;;  %vm4624_vm11 = vmmov %vm4585_vm0 }
 0x159   : > { %v1076_v62 = vpop.f32.mrf.mxu2 }
 0x15a   : > { %v4126_v46 = vadd.f32 %v1076_v62, %v991_v38  ;;  %v1425_v35 = vpop.f32.mrf.mxu0  ;;  %v3041_v62 = vld [vmem:[%s4463_s10 + $0x14] sm:$0xf0] }
 0x15b   : > { %v4128_v60 = vpop.f32.mrf.mxu1  ;;  %v4130_v37 = vpop.f32.mrf.mxu3 }
 0x160   : > { %2817 = vmatmul.msk.bf16.gmra.mxu3 %vm4610_vm13, %v1754_v1  ;;  %vm4625_vm13 = vmmov %vm4585_vm0 }
 0x161   : > { %v4132_v48 = vpop.f32.mrf.mxu2 }
 0x162   : > { %v4204_v33 = vpop.f32.mrf.mxu0 }
 0x163   : > { %v996_v27 = vpop.f32.mrf.mxu3 }
 0x164   : > { %v1565_v0 = vpop.f32.mrf.mxu1 }
 0x169   : > { %v1081_v15 = vpop.f32.mrf.mxu2 }
 0x16a   : > { %v4140_v39 = vadd.f32 %v1081_v15, %v996_v27  ;;  %v1430_v27 = vpop.f32.mrf.mxu0 }
 0x16b   : > { %v4153_v1 = vpop.f32.mrf.mxu3 }
 0x16c   : > { %v4142_v13 = vpop.f32.mrf.mxu1 }
 0x171   : > { %v4235_v8 = vpop.f32.mrf.mxu2 }
 0x172   : > { %v4241_v9 = vpop.f32.mrf.mxu0 }
 0x173   : > { %v1304_v53 = vpop.f32.mrf.mxu3 }
 0x174   : > { %v1570_v18 = vpop.f32.mrf.mxu1  ;;  %v1324_v25 = vadd.f32 %v1304_v53, %v1067_v21  ;;  %v3030_v53 = vld [vmem:[%s4460_s7 + $0x4] sm:$0xf] }
 0x176   : > { %v1435_v10 = vadd.f32 %v1415_v42, %v1324_v25  ;;  %v2940_v42 = vld [vmem:[%s4463_s10 + $0x10] sm:$0xf]  ;;  %v2894_v25 = vld [vmem:[%s4460_s7 + $0x8] sm:$0xf0] }
 0x177   : > { %v2941_v16 = vor.u32 %v3041_v62, %v2940_v42  ;;  %v2897_v26 = vor.u32 %v3030_v53, %v2894_v25  ;;  %v4286_v62 = vld [vmem:[%s4458_s5] ss:$0 sm:$0xff] }
 0x178   : > { %v4172_v51 = vadd.f32 %v1565_v0, %v1435_v10  ;;  %v3040_v0 = vld [vmem:[%s4463_s10 + $0x14] sm:$0xf] }
 0x179   : > { %2354 = vmatpush.bf16.msrb.mxu0 %v2941_v16  ;;  %v1689_v10 = vpop.f32.mrf.mxu2 }
 0x17a   : > { %v1950_v47 = vpop.f32.mrf.mxu0  ;;  %v1709_v17 = vadd.f32 %v1689_v10, %v4172_v51 }
 0x17b   : > { %v4185_v58 = vpop.f32.mrf.mxu3 }
 0x17c   : > { %v4174_v40 = vpop.f32.mrf.mxu1 }
 0x183   : > { %v1309_v20 = vpop.f32.mrf.mxu3 }
 0x184   : > { %v1575_v36 = vpop.f32.mrf.mxu1  ;;  %v1326_v45 = vadd.f32 %v1309_v20, %v1072_v30  ;;  %v2902_v30 = vld [vmem:[%s4460_s7 + $0x18] sm:$0xf0]  ;;  %v1691_v20 = vpop.f32.mrf.mxu2 }
 0x185   : > { %v2905_v38 = vor.u32 %v3032_v7, %v2902_v30 }
 0x186   : > { %v1437_v52 = vadd.f32 %v1420_v2, %v1326_v45  ;;  %v2945_v2 = vor.u32 %v3040_v0, %v2942_v22  ;;  %v1325_v45 = vadd.f32 %v4185_v58, %v1069_v61 }
 0x187   : > { %2233 = vmatpush.bf16.msrb.mxu3 %v2905_v38 }
 0x188   : > { %v4202_v31 = vadd.f32 %v1570_v18, %v1437_v52  ;;  %2383 = vmatpush.bf16.msrb.mxu1 %v2945_v2  ;;  %v1952_v52 = vpop.f32.mrf.mxu0  ;;  %v1436_v34 = vadd.f32 %v4138_v41, %v1325_v45  ;;  %v1074_v41 = vadd.f32 %v4118_v57, %v4128_v60  ;;  %v3068_v2 = vld [vmem:[%s3176_s21 + $0x8] sm:$0xff] }
 0x18a   : > { %v1586_v19 = vadd.f32 %v4142_v13, %v1436_v34  ;;  %v4295_v13 = vld [vmem:[%s4459_s6] ss:$0 sm:$0xff] }
 0x18b   : > { %v4215_v21 = vpop.f32.mrf.mxu3  ;;  %2234 = vmatpush.bf16.msrb.mxu3 %v2897_v26 }
 0x18c   : > { %v4217_v23 = vpop.f32.mrf.mxu1  ;;  %v1694_v38 = vpop.f32.mrf.mxu2  ;;  %v1710_v42 = vadd.f32 %v1691_v20, %v1586_v19  ;;  %v1327_v16 = vadd.f32 %v4215_v21, %v1074_v41 }
 0x18d   : > { %v1711_v57 = vadd.f32 %v1694_v38, %v4202_v31 }
 0x18e   : > { %v1438_v60 = vadd.f32 %v4170_v63, %v1327_v16 }
 0x190   : > { %v1955_v0 = vpop.f32.mrf.mxu0  ;;  %v1588_v26 = vadd.f32 %v4174_v40, %v1438_v60 }
 0x193   : > { %v1314_v15 = vpop.f32.mrf.mxu3 }
 0x194   : > { %v1328_v28 = vadd.f32 %v1314_v15, %v4126_v46  ;;  %v1580_v24 = vpop.f32.mrf.mxu1  ;;  %v3031_v46 = vld [vmem:[%s4460_s7 + $0x4] sm:$0xf0] }
 0x195   : > { %v2893_v3 = vor.u32 %v3031_v46, %v2892_v44 }
 0x196   : > { %v1439_v14 = vadd.f32 %v1425_v35, %v1328_v28  ;;  %v3039_v35 = vld [vmem:[%s4463_s10 + $0x4] sm:$0xf0] }
 0x197   : > { %2205 = vmatpush.bf16.msrb.mxu2 %v2893_v3  ;;  %v2933_v50 = vor.u32 %v3039_v35, %v2932_v59 }
 0x198   : > { %v4237_v18 = vadd.f32 %v1575_v36, %v1439_v14  ;;  %v3038_v36 = vld [vmem:[%s4463_s10 + $0x4] sm:$0xf]  ;;  %v1957_v25 = vpop.f32.mrf.mxu0 }
 0x199   : > { %2355 = vmatpush.bf16.msrb.mxu0 %v2933_v50 }
 0x19b   : > { %v4239_v56 = vpop.f32.mrf.mxu3 }
 0x19c   : > { %v4252_v54 = vpop.f32.mrf.mxu1  ;;  %2962 = vmatmul.msk.bf16.vlgmr.msrb.gmra.mxu0 %vm4611_vm2, %v3067_v4 }
 0x1a0   : > { %v1960_v20 = vpop.f32.mrf.mxu0 }
 0x1a3   : > { %v1319_v32 = vpop.f32.mrf.mxu3 }
 0x1a4   : > { %v1330_v12 = vadd.f32 %v1319_v32, %v4140_v39  ;;  %v2074_v5 = vpop.f32.mrf.mxu1  ;;  %v2934_v39 = vld [vmem:[%s4463_s10 + $0x8] sm:$0xf0] }
 0x1a5   : > { %v2937_v6 = vor.u32 %v3038_v36, %v2934_v39  ;;  %v1079_v36 = vadd.f32 %v4132_v48, %v4130_v37 }
 0x1a6   : > { %v1441_v43 = vadd.f32 %v1430_v27, %v1330_v12 }
 0x1a7   : > { %2384 = vmatpush.bf16.msrb.mxu1 %v2937_v6  ;;  %v1329_v40 = vadd.f32 %v4239_v56, %v1079_v36  ;;  %v3069_v6 = vld [vmem:[%s3176_s21 + $0x10] sm:$0xff] }
 0x1a8   : > { %v4258_v49 = vadd.f32 %v1580_v24, %v1441_v43  ;;  %v1696_v24 = vpop.f32.mrf.mxu2 }
 0x1a9   : > { %v1712_v59 = vadd.f32 %v1696_v24, %v1588_v26 }
 0x1aa   : > { %2966 = vmatmul.msk.bf16.vlgmr.msrb.gmra.mxu1 %vm4612_vm8, %v3067_v4 }
 0x1ab   : > { %v4272_v29 = vpop.f32.mrf.mxu3 }
 0x1ac   : > { %v2076_v7 = vpop.f32.mrf.mxu1  ;;  %2963 = vmatmul.msk.bf16.gmra.mxu0 %vm4613_vm5, %v3068_v2 }
 0x1b0   : > { %v1699_v31 = vpop.f32.mrf.mxu2 }
 0x1b1   : > { %v1713_v4 = vadd.f32 %v1699_v31, %v4237_v18 }
 0x1b3   : > { %v1800_v55 = vpop.f32.mrf.mxu3 }
 0x1b4   : > { %v1820_v30 = vadd.f32 %v1800_v55, %v1709_v17  ;;  %v2079_v15 = vpop.f32.mrf.mxu1 }
 0x1b6   : > { %v1970_v11 = vadd.f32 %v1950_v47, %v1820_v30 }
 0x1b8   : > { %v2094_v58 = vadd.f32 %v2074_v5, %v1970_v11  ;;  %v1701_v56 = vpop.f32.mrf.mxu2 }
 0x1ba   : > { %v2106_v22 = vmul.f32 %v4286_v62, %v2094_v58  ;;  %2967 = vmatmul.msk.bf16.gmra.mxu1 %vm4585_vm0, %v3068_v2 }
 0x1bb   : > { %v1802_v27 = vpop.f32.mrf.mxu3 }
 0x1bc   : > { %v1821_v51 = vadd.f32 %v1802_v27, %v1710_v42  ;;  %v2118_v21 = vadd.f32 %v4295_v13, %v2106_v22  ;;  %v2081_v43 = vpop.f32.mrf.mxu1  ;;  %2964 = vmatmul.msk.bf16.gmra.mxu0 %vm4616_vm1, %v3069_v6  ;;  %v1962_v42 = vpop.f32.mrf.mxu0  ;;  %v1084_v27 = vadd.f32 %v4235_v8, %v4153_v1  ;;  %v3070_v22 = vld [vmem:[%s3176_s21 + $0x18] sm:$0xff] }
 0x1be   : > { %v1971_v28 = vadd.f32 %v1952_v52, %v1821_v51  ;;  %v2126_v10 = vmax.f32 %v2118_v21, 0.0  ;;  %v1440_v52 = vadd.f32 %v4204_v33, %v1329_v40 }
 0x1c0   : > { %v2095_v14 = vadd.f32 %v2076_v7, %v1971_v28  ;;  %v1590_v55 = vadd.f32 %v4217_v23, %v1440_v52  ;;  %v1704_v51 = vpop.f32.mrf.mxu2  ;;  %v1331_v23 = vadd.f32 %v4272_v29, %v1084_v27 }
 0x1c1   : > { %v1715_v2 = vadd.f32 %v1704_v51, %v4258_v49 }
 0x1c2   : > { %v2107_v44 = vmul.f32 %v4286_v62, %v2095_v14  ;;  %v1714_v18 = vadd.f32 %v1701_v56, %v1590_v55  ;;  %v1442_v24 = vadd.f32 %v4241_v9, %v1331_v23 }
 0x1c3   : > { %v1805_v46 = vpop.f32.mrf.mxu3 }
 0x1c4   : > { %v2119_v53 = vadd.f32 %v4295_v13, %v2107_v44  ;;  %v1822_v3 = vadd.f32 %v1805_v46, %v1711_v57  ;;  %v2084_v45 = vpop.f32.mrf.mxu1  ;;  %v1965_v8 = vpop.f32.mrf.mxu0  ;;  %v1592_v44 = vadd.f32 %v4252_v54, %v1442_v24 }
 0x1c6   : > { %v2127_v32 = vmax.f32 %v2119_v53, 0.0  ;;  %v1972_v12 = vadd.f32 %v1955_v0, %v1822_v3 }
 0x1c8   : > { %v2134_v47 = vpack.c.bf16 %v2127_v32, %v2126_v10  ;;  %v2096_v63 = vadd.f32 %v2079_v15, %v1972_v12 }
 0x1ca   : > { %2922 = vmatmul.msk.bf16.vlgmr.msrb.gmra.mxu2 %vm4614_vm10, %v2134_v47  ;;  %2926 = vmatmul.msk.bf16.vlgmr.msrb.gmra.mxu3 %vm4615_vm14, %v2134_v47  ;;  %v2108_v50 = vmul.f32 %v4286_v62, %v2096_v63 }
 0x1cb   : > { %v1807_v35 = vpop.f32.mrf.mxu3  ;;  %2968 = vmatmul.msk.bf16.gmra.mxu1 %vm4617_vm4, %v3069_v6  ;;  %v2406_v6 = vld [vmem:[%s4464_s11] sm:$0x3] }
 0x1cc   : > { %v1823_v5 = vadd.f32 %v1807_v35, %v1712_v59  ;;  %v2120_v48 = vadd.f32 %v4295_v13, %v2108_v50  ;;  %v2086_v33 = vpop.f32.mrf.mxu1  ;;  %2965 = vmatmul.msk.bf16.gmra.mxu0 %vm4620_vm9, %v3070_v22  ;;  %v1967_v12 = vpop.f32.mrf.mxu0 }
 0x1ce   : > { %v1973_v39 = vadd.f32 %v1957_v25, %v1823_v5  ;;  %v2128_v38 = vmax.f32 %v2120_v48, 0.0  ;;  %v1706_v25 = vpop.f32.mrf.mxu2  ;;  %v2278_v48 = vld [vmem:[%s4462_s9] sm:$0x3] }
 0x1cf   : > { %v1716_v49 = vadd.f32 %v1706_v25, %v1592_v44  ;;  %v4370_v55 = vperm.slane %v2278_v48, 0 }
 0x1d0   : > { %v2097_v61 = vadd.f32 %v2081_v43, %v1973_v39 }
 0x1d2   : > { %v2109_v37 = vmul.f32 %v4286_v62, %v2097_v61 }
 0x1d3   : > { %v1810_v17 = vpop.f32.mrf.mxu3 }
 0x1d4   : > { %v1824_v34 = vadd.f32 %v1810_v17, %v1713_v4  ;;  %v2121_v7 = vadd.f32 %v4295_v13, %v2109_v37  ;;  %v2089_v21 = vpop.f32.mrf.mxu1  ;;  %v2256_v4 = vld [vmem:[%s4461_s8] sm:$0x3] }
 0x1d6   : > { %v1974_v30 = vadd.f32 %v1960_v20, %v1824_v34  ;;  %v2129_v19 = vmax.f32 %v2121_v7, 0.0  ;;  %v4366_v34 = vperm.slane %v2256_v4, 0  ;;  %v4368_v7 = vperm.slane %v2256_v4, 1 }
 0x1d8   : > { %v2135_v11 = vpack.c.bf16 %v2129_v19, %v2128_v38  ;;  %v2098_v58 = vadd.f32 %v2084_v45, %v1974_v30  ;;  %v4347_v45 = vperm.slane %v2406_v6, 0  ;;  %v4372_v30 = vperm.slane %v2278_v48, 1 }
 0x1da   : > { %2923 = vmatmul.msk.bf16.gmra.mxu2 %vm4618_vm15, %v2135_v11  ;;  %2927 = vmatmul.msk.bf16.gmra.mxu3 %vm4619_vm6, %v2135_v11  ;;  %v2110_v15 = vmul.f32 %v4286_v62, %v2098_v58 }
 0x1db   : > { %v1812_v0 = vpop.f32.mrf.mxu3  ;;  %2969 = vmatmul.msk.bf16.gmra.mxu1 %vm4621_vm12, %v3070_v22 }
 0x1dc   : > { %v1825_v41 = vadd.f32 %v1812_v0, %v1714_v18  ;;  %v2122_v14 = vadd.f32 %v4295_v13, %v2110_v15  ;;  %v2091_v31 = vpop.f32.mrf.mxu1 }
 0x1de   : > { %v1975_v16 = vadd.f32 %v1962_v42, %v1825_v41  ;;  %v2130_v46 = vmax.f32 %v2122_v14, 0.0 }
 0x1e0   : > { %v2099_v28 = vadd.f32 %v2086_v33, %v1975_v16 }
 0x1e2   : > { %v2111_v1 = vmul.f32 %v4286_v62, %v2099_v28 }
 0x1e3   : > { %v1815_v57 = vpop.f32.mrf.mxu3 }
 0x1e4   : > { %v2123_v29 = vadd.f32 %v4295_v13, %v2111_v1  ;;  %v1826_v60 = vadd.f32 %v1815_v57, %v1715_v2 }
 0x1e6   : > { %v2131_v53 = vmax.f32 %v2123_v29, 0.0  ;;  %v1976_v3 = vadd.f32 %v1965_v8, %v1826_v60 }
 0x1e8   : > { %v2136_v26 = vpack.c.bf16 %v2131_v53, %v2130_v46  ;;  %v2100_v10 = vadd.f32 %v2089_v21, %v1976_v3 }
 0x1ea   : > { %2924 = vmatmul.msk.bf16.gmra.mxu2 %vm4622_vm3, %v2136_v26  ;;  %2928 = vmatmul.msk.bf16.gmra.mxu3 %vm4623_vm7, %v2136_v26  ;;  %v2112_v43 = vmul.f32 %v4286_v62, %v2100_v10 }
 0x1eb   : > { %v1817_v9 = vpop.f32.mrf.mxu3 }
 0x1ec   : > { %v1827_v32 = vadd.f32 %v1817_v9, %v1716_v49  ;;  %v2124_v54 = vadd.f32 %v4295_v13, %v2112_v43 }
 0x1ee   : > { %v1977_v47 = vadd.f32 %v1967_v12, %v1827_v32  ;;  %v2132_v36 = vmax.f32 %v2124_v54, 0.0 }
 0x1f0   : > { %v2101_v59 = vadd.f32 %v2091_v31, %v1977_v47 }
 0x1f2   : > { %v2113_v63 = vmul.f32 %v4286_v62, %v2101_v59  ;;  %v2428_v62 = vld [vmem:[%s4465_s12] sm:$0x3] }
 0x1f3   : > { %v4357_v52 = vperm.slane %v2428_v62, 0  ;;  %v4359_v37 = vperm.slane %v2428_v62, 1 }
 0x1f4   : > { %v2125_v35 = vadd.f32 %v4295_v13, %v2113_v63  ;;  %v4352_v13 = vperm.slane %v2406_v6, 1 }
 0x1f6   : > { %v2133_v5 = vmax.f32 %v2125_v35, 0.0 }
 0x1f8   : > { %v2137_v40 = vpack.c.bf16 %v2133_v5, %v2132_v36 }
 0x1fa   : > { %2925 = vmatmul.msk.bf16.gmra.mxu2 %vm4624_vm11, %v2137_v40  ;;  %2929 = vmatmul.msk.bf16.gmra.mxu3 %vm4625_vm13, %v2137_v40 }
 0x219   : > { %v2357_v50 = vpop.f32.mrf.mxu0 }
 0x21a   : > { %v2412_v56 = vmul.f32 %v4347_v45, %v2357_v50 }
 0x21c   : > { %v2434_v11 = vadd.f32 %v4357_v52, %v2412_v56 }
 0x221   : > { %v2359_v20 = vpop.f32.mrf.mxu0 }
 0x222   : > { %v2414_v22 = vmul.f32 %v4347_v45, %v2359_v20 }
 0x224   : > { %v2436_v57 = vadd.f32 %v4357_v52, %v2414_v22 }
 0x227   : > { %v2386_v39 = vpop.f32.mrf.mxu1 }
 0x228   : > { %v2413_v17 = vmul.f32 %v4352_v13, %v2386_v39 }
 0x229   : > { %v2362_v33 = vpop.f32.mrf.mxu0 }
 0x22a   : > { %v2435_v42 = vadd.f32 %v4359_v37, %v2413_v17  ;;  %v2416_v53 = vmul.f32 %v4347_v45, %v2362_v33 }
 0x22c   : > { %v2438_v9 = vadd.f32 %v4357_v52, %v2416_v53 }
 0x22f   : > { %v2388_v61 = vpop.f32.mrf.mxu1 }
 0x230   : > { %v2415_v28 = vmul.f32 %v4352_v13, %v2388_v61 }
 0x231   : > { %v2364_v44 = vpop.f32.mrf.mxu0 }
 0x232   : > { %v2437_v29 = vadd.f32 %v4359_v37, %v2415_v28  ;;  %v2418_v6 = vmul.f32 %v4347_v45, %v2364_v44 }
 0x234   : > { %v2440_v17 = vadd.f32 %v4357_v52, %v2418_v6 }
 0x237   : > { %v2391_v0 = vpop.f32.mrf.mxu1 }
 0x238   : > { %v2417_v26 = vmul.f32 %v4352_v13, %v2391_v0 }
 0x239   : > { %v2367_v5 = vpop.f32.mrf.mxu0 }
 0x23a   : > { %v2439_v47 = vadd.f32 %v4359_v37, %v2417_v26 }
 0x23f   : > { %v2393_v46 = vpop.f32.mrf.mxu1 }
 0x240   : > { %v2419_v20 = vmul.f32 %v4352_v13, %v2393_v46 }
 0x248   : > { %v2396_v40 = vpop.f32.mrf.mxu1 }
 0x249   : > { %v2421_v33 = vmul.f32 %v4352_v13, %v2396_v40 }
 0x24b   : > { %v2443_v28 = vadd.f32 %v4359_v37, %v2421_v33 }
 0x24d   : > { %v2207_v38 = vpop.f32.mrf.mxu2  ;;  %v2236_v19 = vpop.f32.mrf.mxu3 }
 0x24e   : > { %v2262_v18 = vmul.f32 %v4366_v34, %v2207_v38  ;;  %v2263_v58 = vmul.f32 %v4368_v7, %v2236_v19  ;;  %v2441_v38 = vadd.f32 %v4359_v37, %v2419_v20 }
 0x250   : > { %v2284_v27 = vadd.f32 %v4370_v55, %v2262_v18  ;;  %v2285_v41 = vadd.f32 %v4372_v30, %v2263_v58 }
 0x252   : > { %v2450_v51 = vadd.f32 %v2434_v11, %v2284_v27  ;;  %v2451_v23 = vadd.f32 %v2435_v42, %v2285_v41  ;;  %v2420_v42 = vmul.f32 %v4347_v45, %v2367_v5  ;;  %v2369_v41 = vpop.f32.mrf.mxu0 }
 0x254   : > { %v2466_v15 = vmax.f32 %v2450_v51, 0.0  ;;  %v2467_v16 = vmax.f32 %v2451_v23, 0.0  ;;  %v2398_v51 = vpop.f32.mrf.mxu1  ;;  %v2442_v23 = vadd.f32 %v4357_v52, %v2420_v42 }
 0x255   : > { %v2209_v2 = vpop.f32.mrf.mxu2  ;;  %v2238_v24 = vpop.f32.mrf.mxu3  ;;  %v2423_v44 = vmul.f32 %v4352_v13, %v2398_v51 }
 0x256   : > { %v2482_v14 = vpack.c.bf16 %v2467_v16, %v2466_v15  ;;  %v2264_v1 = vmul.f32 %v4366_v34, %v2209_v2  ;;  %v2265_v8 = vmul.f32 %v4368_v7, %v2238_v24 }
 0x258   : > { %2490 = vst [vmem:[%s4386_s22] sm:$0xff] %v2482_v14  ;;  %v2286_v60 = vadd.f32 %v4370_v55, %v2264_v1  ;;  %v2287_v21 = vadd.f32 %v4372_v30, %v2265_v8 }
 0x25a   : > { %v2452_v3 = vadd.f32 %v2436_v57, %v2286_v60  ;;  %v2453_v25 = vadd.f32 %v2437_v29, %v2287_v21  ;;  %v2422_v21 = vmul.f32 %v4347_v45, %v2369_v41 }
 0x25c   : > { %v2468_v49 = vmax.f32 %v2452_v3, 0.0  ;;  %v2469_v10 = vmax.f32 %v2453_v25, 0.0 }
 0x25d   : > { %v2212_v32 = vpop.f32.mrf.mxu2  ;;  %v2241_v12 = vpop.f32.mrf.mxu3 }
 0x25e   : > { %v2483_v43 = vpack.c.bf16 %v2469_v10, %v2468_v49  ;;  %v2266_v31 = vmul.f32 %v4366_v34, %v2212_v32  ;;  %v2267_v59 = vmul.f32 %v4368_v7, %v2241_v12  ;;  %v2372_v49 = vpop.f32.mrf.mxu0  ;;  %v2401_v10 = vpop.f32.mrf.mxu1  ;;  %v2445_v32 = vadd.f32 %v4359_v37, %v2423_v44 }
 0x260   : > { %2491 = vst [vmem:[%s4386_s22 + $0x8] sm:$0xff] %v2483_v43  ;;  %v2288_v54 = vadd.f32 %v4370_v55, %v2266_v31  ;;  %v2289_v63 = vadd.f32 %v4372_v30, %v2267_v59 }
 0x262   : > { %v2454_v35 = vadd.f32 %v2438_v9, %v2288_v54  ;;  %v2455_v36 = vadd.f32 %v2439_v47, %v2289_v63  ;;  %v2444_v9 = vadd.f32 %v4357_v52, %v2422_v21  ;;  %v2424_v47 = vmul.f32 %v4347_v45, %v2372_v49 }
 0x263   : > { %v2425_v54 = vmul.f32 %v4352_v13, %v2401_v10 }
 0x264   : > { %v2470_v50 = vmax.f32 %v2454_v35, 0.0  ;;  %v2471_v39 = vmax.f32 %v2455_v36, 0.0  ;;  %v2446_v36 = vadd.f32 %v4357_v52, %v2424_v47 }
 0x265   : > { %v2214_v61 = vpop.f32.mrf.mxu2  ;;  %v2243_v62 = vpop.f32.mrf.mxu3 }
 0x266   : > { %v2484_v4 = vpack.c.bf16 %v2471_v39, %v2470_v50  ;;  %v2268_v48 = vmul.f32 %v4366_v34, %v2214_v61  ;;  %v2269_v56 = vmul.f32 %v4368_v7, %v2243_v62  ;;  %v2447_v39 = vadd.f32 %v4359_v37, %v2425_v54 }
 0x268   : > { %2492 = vst [vmem:[%s4386_s22 + $0x10] sm:$0xff] %v2484_v4  ;;  %v2290_v19 = vadd.f32 %v4370_v55, %v2268_v48  ;;  %v2291_v11 = vadd.f32 %v4372_v30, %v2269_v56  ;;  %v2374_v4 = vpop.f32.mrf.mxu0  ;;  %v2403_v48 = vpop.f32.mrf.mxu1 }
 0x269   : > { %v2427_v42 = vmul.f32 %v4352_v13, %v2403_v48 }
 0x26a   : > { %v2456_v18 = vadd.f32 %v2440_v17, %v2290_v19  ;;  %v2457_v58 = vadd.f32 %v2441_v38, %v2291_v11  ;;  %v2426_v11 = vmul.f32 %v4347_v45, %v2374_v4 }
 0x26b   : > { %v2449_v51 = vadd.f32 %v4359_v37, %v2427_v42 }
 0x26c   : > { %v2472_v0 = vmax.f32 %v2456_v18, 0.0  ;;  %v2473_v27 = vmax.f32 %v2457_v58, 0.0  ;;  %v2448_v41 = vadd.f32 %v4357_v52, %v2426_v11 }
 0x26d   : > { %v2217_v15 = vpop.f32.mrf.mxu2  ;;  %v2246_v16 = vpop.f32.mrf.mxu3 }
 0x26e   : > { %v2485_v22 = vpack.c.bf16 %v2473_v27, %v2472_v0  ;;  %v2270_v2 = vmul.f32 %v4366_v34, %v2217_v15  ;;  %v2271_v24 = vmul.f32 %v4368_v7, %v2246_v16 }
 0x270   : > { %2493 = vst [vmem:[%s4386_s22 + $0x18] sm:$0xff] %v2485_v22  ;;  %v2292_v14 = vadd.f32 %v4370_v55, %v2270_v2  ;;  %v2293_v1 = vadd.f32 %v4372_v30, %v2271_v24 }
 0x272   : > { %v2458_v8 = vadd.f32 %v2442_v23, %v2292_v14  ;;  %v2459_v57 = vadd.f32 %v2443_v28, %v2293_v1 }
 0x274   : > { %v2474_v29 = vmax.f32 %v2458_v8, 0.0  ;;  %v2475_v60 = vmax.f32 %v2459_v57, 0.0 }
 0x275   : > { %v2219_v46 = vpop.f32.mrf.mxu2  ;;  %v2248_v53 = vpop.f32.mrf.mxu3 }
 0x276   : > { %v2486_v3 = vpack.c.bf16 %v2475_v60, %v2474_v29  ;;  %v2272_v25 = vmul.f32 %v4366_v34, %v2219_v46  ;;  %v2273_v26 = vmul.f32 %v4368_v7, %v2248_v53 }
 0x278   : > { %2494 = vst [vmem:[%s4386_s22 + $0x20] sm:$0xff] %v2486_v3  ;;  %v2294_v12 = vadd.f32 %v4370_v55, %v2272_v25  ;;  %v2295_v43 = vadd.f32 %v4372_v30, %v2273_v26 }
 0x27a   : > { %v2460_v31 = vadd.f32 %v2444_v9, %v2294_v12  ;;  %v2461_v59 = vadd.f32 %v2445_v32, %v2295_v43 }
 0x27c   : > { %v2476_v63 = vmax.f32 %v2460_v31, 0.0  ;;  %v2477_v35 = vmax.f32 %v2461_v59, 0.0 }
 0x27d   : > { %v2222_v5 = vpop.f32.mrf.mxu2  ;;  %v2251_v40 = vpop.f32.mrf.mxu3 }
 0x27e   : > { %v2487_v50 = vpack.c.bf16 %v2477_v35, %v2476_v63  ;;  %v2274_v6 = vmul.f32 %v4366_v34, %v2222_v5  ;;  %v2275_v20 = vmul.f32 %v4368_v7, %v2251_v40 }
 0x280   : > { %2495 = vst [vmem:[%s4386_s22 + $0x28] sm:$0xff] %v2487_v50  ;;  %v2296_v61 = vadd.f32 %v4370_v55, %v2274_v6  ;;  %v2297_v62 = vadd.f32 %v4372_v30, %v2275_v20 }
 0x282   : > { %v2462_v56 = vadd.f32 %v2446_v36, %v2296_v61  ;;  %v2463_v17 = vadd.f32 %v2447_v39, %v2297_v62 }
 0x284   : > { %v2478_v38 = vmax.f32 %v2462_v56, 0.0  ;;  %v2479_v19 = vmax.f32 %v2463_v17, 0.0 }
 0x285   : > { %v2224_v18 = vpop.f32.mrf.mxu2  ;;  %v2253_v58 = vpop.f32.mrf.mxu3 }
 0x286   : > { %v2488_v33 = vpack.c.bf16 %v2479_v19, %v2478_v38  ;;  %v2276_v0 = vmul.f32 %v4366_v34, %v2224_v18  ;;  %v2277_v27 = vmul.f32 %v4368_v7, %v2253_v58 }
 0x288   : > { %2496 = vst [vmem:[%s4386_s22 + $0x30] sm:$0xff] %v2488_v33  ;;  %v2298_v23 = vadd.f32 %v4370_v55, %v2276_v0  ;;  %v2299_v15 = vadd.f32 %v4372_v30, %v2277_v27 }
 0x28a   : > { %v2464_v45 = vadd.f32 %v2448_v41, %v2298_v23  ;;  %v2465_v16 = vadd.f32 %v2449_v51, %v2299_v15 }
 0x28c   : > { %v2480_v13 = vmax.f32 %v2464_v45, 0.0  ;;  %v2481_v22 = vmax.f32 %v2465_v16, 0.0 }
 0x28e   : > { %v2489_v28 = vpack.c.bf16 %v2481_v22, %v2480_v13 }
 0x290   : > { %2497 = vst [vmem:[%s4386_s22 + $0x38] sm:$0xff] %v2489_v28 }
 0x291 PF: > { %s23_s25 = sadd.s32 1, %s3077_s25  }
 0x292   : > { %p20_p4 = scmp.ge.s32.totalorder %s23_s25, 4  }
 0x294   :  { %22 = sbr.rel (!%p20_p4) target bundleno = 1 (0x1), region = 110 }

// kernel: extractor_resnet152_forward.18
= control target key start
LH: loop header
LB: loop body
LE: loop exit
PB: predicated region body
PF: predicated region fallthrough
CT: control target
= control target key end

     0   :  { %s3073_s13 = smov 0   ;;  %s4426_s0 = inlined_call_operand.vmem [shape: bf16[2,64,256], index: 0, kind: input, shape index: {}]   ;;  %s4427_s1 = inlined_call_operand.vmem [shape: bf16[256,64], index: 1, kind: input, shape index: {}]   ;;  %s4428_s2 = inlined_call_operand.vmem [shape: f32[1,64], index: 2, kind: input, shape index: {}]   ;;  %s4429_s3 = inlined_call_operand.vmem [shape: f32[1,64], index: 3, kind: input, shape index: {}]   ;;  %s4430_s4 = inlined_call_operand.vmem [shape: bf16[9,64,64], index: 4, kind: input, shape index: {}]   ;;  %s4431_s5 = inlined_call_operand.vmem [shape: f32[1,64], index: 5, kind: input, shape index: {}]   ;;  %s4432_s6 = inlined_call_operand.vmem [shape: f32[1,64], index: 6, kind: input, shape index: {}]   ;;  %s4433_s7 = inlined_call_operand.vmem [shape: bf16[64,256], index: 7, kind: input, shape index: {}]   ;;  %s4434_s8 = inlined_call_operand.vmem [shape: f32[1,256], index: 8, kind: input, shape index: {}]   ;;  %s4435_s9 = inlined_call_operand.vmem [shape: f32[1,256], index: 9, kind: input, shape index: {}]   ;;  %s4436_s10 = inlined_call_operand.vmem [shape: bf16[2,64,256], index: 10, kind: output, shape index: {}]  }
   0x1 LB: > { %s2471_s14 = sadd.s32 4294967295, %s3015_s13   ;;  %p2475_p0 = scmp.ge.s32.totalorder %s3015_s13, 1  ;;  %s3015_s13 = sphi %s3073_s13, %s20_s13  }
   0x2   : > { %p312_p1 = scmp.lt.s32.totalorder %s3015_s13, 3 }
   0x4   : > { %p313_p2 = pnand %p2475_p0, %p312_p1 }
   0x5   : > { %p350_p3 = scmp.lt.s32.totalorder (!%p313_p2), %s2471_s14, 1 }
   0x6   : > { %316 = sbr.rel (%p313_p2) target bundleno = 762 (0x2fa), region = 60 }
   0xb   : > { %v2927_v0 = vld [vmem:[%s4427_s1 + $0x38] sm:$0xff]  ;;  %v2926_v2 = vld [vmem:[%s4427_s1 + $0x30] sm:$0xff]  ;;  %v2925_v4 = vld [vmem:[%s4427_s1 + $0x28] sm:$0xff]  ;;  %s4621_s14 = smov (!%p350_p3, %s2471_s14), 1  ;;  %vm631_vm0 = vcmask 516096   ;;  %vm4437_vm2 = vcmask 519168   ;;  %v748_v47 = vlaneseq }
   0xc   : > { %v2935_v1 = vld [vmem:[%s4427_s1 + $0x78] sm:$0xff]  ;;  %539 = vmatpush.bf16.msra.mxu0 %v2927_v0  ;;  %v2934_v3 = vld [vmem:[%s4427_s1 + $0x70] sm:$0xff]  ;;  %v2933_v5 = vld [vmem:[%s4427_s1 + $0x68] sm:$0xff]  ;;  %s2910_s21 = sshll.u32 %s4621_s14, 6  ;;  %vm632_vm1 = vsmask.f32 256 }
   0xd   : > { %568 = vmatpush.bf16.msra.mxu1 %v2935_v1  ;;  %v2924_v6 = vld [vmem:[%s4427_s1 + $0x20] sm:$0xff]  ;;  %v2923_v8 = vld [vmem:[%s4427_s1 + $0x18] sm:$0xff]  ;;  %v2922_v10 = vld [vmem:[%s4427_s1 + $0x10] sm:$0xff]  ;;  %s3131_s28 = scalar_lea.vmem %s4426_s0, %s2910_s21  ;;  %vm638_vm4 = vsmask.f32 7938  ;;  %v3017_v45 = vmov 0   ;;  %s4381_s22 = scalar_lea.vmem %s4436_s10, %s2910_s21 }
   0xe   : > { %v2932_v7 = vld [vmem:[%s4427_s1 + $0x60] sm:$0xff]  ;;  %v2931_v9 = vld [vmem:[%s4427_s1 + $0x58] sm:$0xff]  ;;  %v2930_v11 = vld [vmem:[%s4427_s1 + $0x50] sm:$0xff]  ;;  %644 = vst.msk [vmem:[#allocation2 + $0x28] sm:$0x1] %vm631_vm0, %v3017_v45  ;;  %v3172_v48 = vshrl.u32 %v748_v47, 7 }
   0xf   : > { %v2921_v12 = vld [vmem:[%s4427_s1 + $0x8] sm:$0xff]  ;;  %v2920_v14 = vld [vmem:[%s4427_s1] sm:$0xff]  ;;  %v2490_v22 = vld [vmem:[%s3131_s28 + $0x10] sm:$0xf]  ;;  %630 = vst.msk [vmem:[#allocation2] sm:$0xf] %vm4437_vm2, %v3017_v45 }
  0x10   : > { %540 = vmatpush.bf16.msra.mxu0 %v2926_v2  ;;  %v2929_v13 = vld [vmem:[%s4427_s1 + $0x48] sm:$0xff]  ;;  %v2928_v15 = vld [vmem:[%s4427_s1 + $0x40] sm:$0xff]  ;;  %v2915_v23 = vld [vmem:[%s3131_s28 + $0x14] sm:$0xf0]  ;;  %v761_v49 = vand.u32 7, %v3172_v48  ;;  %v3176_v50 = vadd.s32 8, %v3172_v48 }
  0x11   : > { %569 = vmatpush.bf16.msra.mxu1 %v2934_v3  ;;  %v2482_v16 = vld [vmem:[%s3131_s28] sm:$0xf]  ;;  %v2913_v17 = vld [vmem:[%s3131_s28 + $0x4] sm:$0xf0]  ;;  %v2912_v18 = vld [vmem:[%s3131_s28 + $0x4] sm:$0xf]  ;;  %v2491_v26 = vor.u32 %v2915_v23, %v2490_v22 }
  0x12   : > { %v2484_v19 = vld [vmem:[%s3131_s28 + $0x8] sm:$0xf0]  ;;  %v2483_v20 = vor.u32 %v2913_v17, %v2482_v16  ;;  %v2914_v24 = vld [vmem:[%s3131_s28 + $0x14] sm:$0xf]  ;;  %v2492_v25 = vld [vmem:[%s3131_s28 + $0x18] sm:$0xf0] }
  0x13   : > { %v2487_v21 = vor.u32 %v2912_v18, %v2484_v19  ;;  %v2495_v27 = vor.u32 %v2914_v24, %v2492_v25  ;;  %v2498_v28 = vld [vmem:[%s3131_s28 + $0x20] sm:$0xf]  ;;  %v2917_v29 = vld [vmem:[%s3131_s28 + $0x24] sm:$0xf0]  ;;  %v2916_v30 = vld [vmem:[%s3131_s28 + $0x24] sm:$0xf]  ;;  %v3254_v24 = vunpack.c.l.b16 %v3017_v45  ;;  %v3257_v25 = vunpack.c.h.b16 %v3017_v45 }
  0x14   : > { %541 = vmatpush.bf16.msra.mxu0 %v2925_v4  ;;  %v2500_v31 = vld [vmem:[%s3131_s28 + $0x28] sm:$0xf0]  ;;  %v2499_v32 = vor.u32 %v2917_v29, %v2498_v28  ;;  %v2506_v34 = vld [vmem:[%s3131_s28 + $0x30] sm:$0xf]  ;;  %v2919_v35 = vld [vmem:[%s3131_s28 + $0x34] sm:$0xf0] }
  0x15   : > { %570 = vmatpush.bf16.msra.mxu1 %v2933_v5  ;;  %v2503_v33 = vor.u32 %v2916_v30, %v2500_v31  ;;  %v2918_v36 = vld [vmem:[%s3131_s28 + $0x34] sm:$0xf]  ;;  %v2508_v37 = vld [vmem:[%s3131_s28 + $0x38] sm:$0xf0]  ;;  %v2507_v38 = vor.u32 %v2919_v35, %v2506_v34  ;;  %vm3156_vm3 = vmand %vm631_vm0, %vm632_vm1  ;;  %vm3180_vm6 = vcmp.ne.s32.totalorder %v761_v49, 7  ;;  %v768_v52 = vand.u32 7, %v3176_v50 }
  0x16   : > { %v2511_v39 = vor.u32 %v2918_v36, %v2508_v37  ;;  %v634_v41 = vld [vmem:[#allocation2 + $0x4] sm:$0x1]  ;;  %vm3163_vm5 = vmand %vm4437_vm2, %vm638_vm4  ;;  %v3188_v53 = vld [vmem:[%s4428_s2] ss:$0 sm:$0xff]  ;;  %v3202_v59 = vadd.s32 16, %v3172_v48  ;;  %v3221_v2 = vadd.s32 24, %v3172_v48 }
  0x17   : > { %v635_v42 = vsel %vm3156_vm3, 0, %v634_v41  ;;  %v640_v44 = vld [vmem:[#allocation2 + $0x24] sm:$0xf]  ;;  %v2947_v54 = vld [vmem:[%s4430_s4 + $0x38] sm:$0xff]  ;;  %vm1155_vm7 = vmpackc.low %vm3180_vm6, %vm3180_vm6  ;;  %vm3206_vm8 = vcmp.ne.s32.totalorder %v768_v52, 7  ;;  %vm1171_vm11 = vcmask 1040384  }
  0x18   : > { %542 = vmatpush.bf16.msra.mxu0 %v2924_v6  ;;  %636 = vst [vmem:[#allocation2 + $0x4] sm:$0x1] %v635_v42  ;;  %v641_v46 = vsel %vm3163_vm5, 0, %v640_v44  ;;  %v3199_v58 = vld [vmem:[%s4429_s3] ss:$0 sm:$0xff]  ;;  %1028 = vmatpush.bf16.msra.mxu2 %v2947_v54  ;;  %v2946_v62 = vld [vmem:[%s4430_s4 + $0x30] sm:$0xff]  ;;  %vm1156_vm9 = vmpackc.low %vm3206_vm8, %vm3206_vm8 }
  0x19   : > { %571 = vmatpush.bf16.msra.mxu1 %v2932_v7  ;;  %642 = vst [vmem:[#allocation2 + $0x24] sm:$0xf] %v641_v46  ;;  %2992 = vmatpush.bf16.msra.mxu3 %v2947_v54  ;;  %v1163_v63 = vsel %vm1155_vm7, 65537, %v3017_v45  ;;  %v775_v1 = vand.u32 7, %v3202_v59  ;;  %v2945_v5 = vld [vmem:[%s4430_s4 + $0x28] sm:$0xff]  ;;  %v2963_v6 = vld [vmem:[%s4430_s4 + $0x98] sm:$0xff] }
  0x1a   : > { %v1174_v3 = vrot.slane %v1163_v63, 7  ;;  %vm1172_vm12 = vcmask 1044484   ;;  %v2944_v18 = vld [vmem:[%s4430_s4 + $0x20] sm:$0xff]  ;;  %v2962_v19 = vld [vmem:[%s4430_s4 + $0x90] sm:$0xff]  ;;  %vm653_vm0 = vsmask.f32 4368 }
  0x1b   : > { %vm3235_vm10 = vcmp.ne.s32.totalorder %v775_v1, 7  ;;  %v2966_v29 = vld [vmem:[%s4430_s4 + $0xb0] sm:$0xff]  ;;  %vm3267_vm14 = vmor %vm1171_vm11, %vm1172_vm12  ;;  %v2961_v41 = vld [vmem:[%s4430_s4 + $0x88] sm:$0xff]  ;;  %vm3306_vm8 = vcmp.ne.s32.totalorder %v761_v49, 0  ;;  %v4460_v49 = vmov 0 }
  0x1c   : > { %543 = vmatpush.bf16.msra.mxu0 %v2923_v8  ;;  %1029 = vmatpush.bf16.msra.mxu2 %v2946_v62  ;;  %vm1157_vm13 = vmpackc.low %vm3235_vm10, %vm3235_vm10  ;;  %v1197_v22 = vunpack.c.l.b16 %v1174_v3  ;;  %v1198_v23 = vunpack.c.h.b16 %v1174_v3  ;;  %v1138_v63 = vld [vmem:[#allocation2] sm:$0xe]  ;;  %v2983_v40 = vld [vmem:[%s4430_s4 + $0x118] sm:$0xff] }
  0x1d   : > { %572 = vmatpush.bf16.msra.mxu1 %v2931_v9  ;;  %2993 = vmatpush.bf16.msra.mxu3 %v2946_v62  ;;  %v1164_v9 = vsel %vm1156_vm9, 65537, %v3017_v45  ;;  %v1165_v36 = vsel %vm1157_vm13, 65537, %v3017_v45  ;;  %vm3329_vm10 = vmor %vm632_vm1, %vm653_vm0  ;;  %vm3347_vm1 = vcmp.ne.s32.totalorder %v768_v52, 0 }
  0x1e   : > { %vm3294_vm4 = vcmp.ne.s32.totalorder %v1197_v22, %v3254_v24  ;;  %vm1202_vm6 = vcmp.ne.s32.totalorder %v1198_v23, %v3257_v25  ;;  %vm3354_vm11 = vmpackc.low %vm3306_vm8, %vm3306_vm8 }
  0x1f   : > { %v735_v31 = vld [vmem:[#allocation2 + $0x4] sm:$0xf] }
  0x20   : > { %544 = vmatpush.bf16.msra.mxu0 %v2922_v10  ;;  %1030 = vmatpush.bf16.msra.mxu2 %v2945_v5 }
  0x21   : > { %573 = vmatpush.bf16.msra.mxu1 %v2930_v11  ;;  %2994 = vmatpush.bf16.msra.mxu3 %v2945_v5 }
  0x24   : > { %545 = vmatpush.bf16.msra.mxu0 %v2921_v12  ;;  %v2967_v12 = vld [vmem:[%s4430_s4 + $0xb8] sm:$0xff]  ;;  %1031 = vmatpush.bf16.msra.mxu2 %v2944_v18 }
  0x25   : > { %574 = vmatpush.bf16.msra.mxu1 %v2929_v13  ;;  %2995 = vmatpush.bf16.msra.mxu3 %v2944_v18  ;;  %v2964_v13 = vld [vmem:[%s4430_s4 + $0xa0] sm:$0xff] }
  0x28   : > { %546 = vmatpush.bf16.msra.mxu0 %v2920_v14  ;;  %v782_v14 = vand.u32 7, %v3221_v2 }
  0x29   : > { %575 = vmatpush.bf16.msra.mxu1 %v2928_v15  ;;  %v1175_v15 = vrot.slane %v1174_v3, 4  ;;  %v2960_v3 = vld [vmem:[%s4430_s4 + $0x80] sm:$0xff] }
  0x2a   : > { %vm3273_vm15 = vcmp.ne.s32.totalorder %v782_v14, 7 }
  0x2b   : > { %547 = vmatmul.bf16.vlgmr.msra.gmra.mxu0 %v2483_v20  ;;  %v1176_v20 = vrot.slane %v1164_v9, 7  ;;  %vm1158_vm7 = vmpackc.low %vm3273_vm15, %vm3273_vm15 }
  0x2c   : > { %576 = vmatmul.bf16.vlgmr.msra.gmra.mxu1 %v2487_v21  ;;  %1612 = vmatpush.bf16.msrb.mxu0 %v2963_v6  ;;  %v3248_v21 = vadd.s32 32, %v3172_v48 }
  0x2d   : > { %1736 = vmatpush.bf16.msrb.mxu1 %v2967_v12  ;;  %v1177_v42 = vsel %vm3267_vm14, %v1175_v15, %v1176_v20  ;;  %v1178_v43 = vrot.slane %v1176_v20, 4  ;;  %v2951_v15 = vld [vmem:[%s4430_s4 + $0x58] sm:$0xff] }
  0x2e   : > { %v789_v37 = vand.u32 7, %v3248_v21  ;;  %v1204_v5 = vunpack.c.l.b16 %v1177_v42  ;;  %v1205_v6 = vunpack.c.h.b16 %v1177_v42  ;;  %1351 = vmatpush.bf16.msrb.mxu2 %v2951_v15  ;;  %v2941_v21 = vld [vmem:[%s4430_s4 + $0x8] sm:$0xff] }
  0x30   : > { %1613 = vmatpush.bf16.msrb.mxu0 %v2962_v19  ;;  %vm3323_vm9 = vcmp.ne.s32.totalorder %v789_v37, 7  ;;  %vm3377_vm15 = vcmp.ne.s32.totalorder %v1204_v5, %v3254_v24 }
  0x31   : > { %1737 = vmatpush.bf16.msrb.mxu1 %v2966_v29  ;;  %vm1159_vm13 = vmpackc.low %vm3323_vm9, %vm3323_vm9 }
  0x34   : > { %1614 = vmatpush.bf16.msrb.mxu0 %v2961_v41 }
  0x38   : > { %1615 = vmatpush.bf16.msrb.mxu0 %v2960_v3 }
  0x3b   : > { %552 = vmatmul.bf16.gmra.mxu0 %v2491_v26 }
  0x3c   : > { %581 = vmatmul.bf16.gmra.mxu1 %v2495_v27  ;;  %2121 = vmatpush.bf16.msra.mxu0 %v2983_v40  ;;  %v2981_v40 = vld [vmem:[%s4430_s4 + $0x108] sm:$0xff] }
  0x4b   : > { %557 = vmatmul.bf16.gmra.mxu0 %v2499_v32  ;;  %v1167_v32 = vsel %vm1159_vm13, 65537, %v3017_v45 }
  0x4c   : > { %586 = vmatmul.bf16.gmra.mxu1 %v2503_v33  ;;  %v3278_v33 = vadd.s32 40, %v3172_v48 }
  0x5b   : > { %562 = vmatmul.bf16.gmra.mxu0 %v2507_v38 }
  0x5c   : > { %591 = vmatmul.bf16.gmra.mxu1 %v2511_v39 }
  0xa8   : > { %v548_v55 = vpop.f32.mrf.mxu0 }
  0xa9   : > { %v577_v56 = vpop.f32.mrf.mxu1 }
  0xaa   : > { %v578_v57 = vadd.f32 %v577_v56, %v548_v55  ;;  %v2965_v55 = vld [vmem:[%s4430_s4 + $0xa8] sm:$0xff]  ;;  %v1179_v56 = vrot.slane %v1165_v36, 7 }
  0xab   : > { %1738 = vmatpush.bf16.msrb.mxu1 %v2965_v55  ;;  %v1185_v55 = vrot.slane %v1167_v32, 7 }
  0xac   : > { %v601_v61 = vmul.f32 %v3188_v53, %v578_v57  ;;  %v796_v57 = vand.u32 7, %v3278_v33  ;;  %v1180_v50 = vsel %vm3267_vm14, %v1178_v43, %v1179_v56  ;;  %v1181_v52 = vrot.slane %v1179_v56, 4 }
  0xad   : > { %v1212_v36 = vunpack.c.h.b16 %v1180_v50 }
  0xae   : > { %v613_v0 = vadd.f32 %v3199_v58, %v601_v61  ;;  %vm3365_vm12 = vcmp.ne.s32.totalorder %v796_v57, 7 }
  0xaf   : > { %1739 = vmatpush.bf16.msrb.mxu1 %v2964_v13  ;;  %vm1160_vm0 = vmpackc.low %vm3365_vm12, %vm3365_vm12  ;;  %vm3437_vm8 = vcmp.ne.s32.totalorder %v1212_v36, %v3257_v25 }
  0xb0   : > { %v621_v4 = vmax.f32 %v613_v0, 0.0  ;;  %v550_v7 = vpop.f32.mrf.mxu0 }
  0xb1   : > { %v579_v8 = vpop.f32.mrf.mxu1 }
  0xb2   : > { %v645_v10 = vpack.c.bf16 %v621_v4, %v621_v4  ;;  %v580_v11 = vadd.f32 %v579_v8, %v550_v7  ;;  %v1166_v4 = vsel %vm1158_vm7, 65537, %v3017_v45 }
  0xb3   : > { %v1182_v20 = vrot.slane %v1166_v4, 7 }
  0xb4   : > { %v656_v16 = vshrl.u32 %v645_v10, 16  ;;  %v602_v17 = vmul.f32 %v3188_v53, %v580_v11  ;;  %v659_v27 = vshll.u32 %v645_v10, 16  ;;  %v869_v11 = vld [vmem:[#allocation2] sm:$0xf]  ;;  %v3443_v10 = vadd.s32 56, %v3172_v48 }
  0xb5   : > { %v1184_v54 = vrot.slane %v1182_v20, 4 }
  0xb6   : > { %v3259_v26 = vrot.slane %v656_v16, 7  ;;  %v614_v28 = vadd.f32 %v3199_v58, %v602_v17 }
  0xb8   : > { %v661_v34 = vor.u32 %v659_v27, %v3259_v26  ;;  %v622_v35 = vmax.f32 %v614_v28, 0.0  ;;  %v553_v38 = vpop.f32.mrf.mxu0  ;;  %v662_v17 = vrot.slane %v3259_v26, 4  ;;  %v901_v28 = vsel %vm3354_vm11, %v869_v11, 0 }
  0xb9   : > { %v582_v39 = vpop.f32.mrf.mxu1  ;;  %v3420_v43 = vunpack.c.l.b16 %v901_v28 }
  0xba   : > { %v736_v46 = vsel %vm3163_vm5, %v661_v34, %v735_v31  ;;  %v646_v47 = vpack.c.bf16 %v622_v35, %v622_v35  ;;  %v583_v51 = vadd.f32 %v582_v39, %v553_v38  ;;  %vm3317_vm5 = vmpackc.low %vm1202_vm6, %vm3294_vm4  ;;  %vm3396_vm4 = vcmp.ne.s32.totalorder %v1205_v6, %v3257_v25 }
  0xbb   : > { %737 = vst [vmem:[#allocation2 + $0x4] sm:$0xf] %v736_v46  ;;  %v4461_v49 = vsel %vm3317_vm5, 4294967295, %v4460_v49  ;;  %v1260_v16 = vsel %vm3317_vm5, %v1138_v63, 0  ;;  %v1211_v35 = vunpack.c.l.b16 %v1180_v50  ;;  %vm3407_vm6 = vmpackc.low %vm3347_vm1, %vm3347_vm1  ;;  %v1183_v46 = vsel %vm3267_vm14, %v1181_v52, %v1182_v20 }
  0xbc   : > { %v664_v60 = vshrl.u32 %v646_v47, 16  ;;  %v603_v61 = vmul.f32 %v3188_v53, %v583_v51  ;;  %v667_v8 = vshll.u32 %v646_v47, 16  ;;  %v3402_v39 = vunpack.c.l.b16 %v1260_v16  ;;  %vm3450_vm9 = vmpackc.low %vm3396_vm4, %vm3377_vm15 }
  0xbd   : > { %v3415_v47 = vadd.s32 48, %v3172_v48  ;;  %v3418_v51 = vsel %vm1160_vm0, 65537, %v3017_v45  ;;  %vm3432_vm7 = vcmp.ne.s32.totalorder %v1211_v35, %v3254_v24  ;;  %v1218_v6 = vunpack.c.l.b16 %v1183_v46 }
  0xbe   : > { %v3342_v7 = vrot.slane %v664_v60, 7  ;;  %v615_v9 = vadd.f32 %v3199_v58, %v603_v61  ;;  %v4482_v50 = vmov 0  ;;  %v1219_v52 = vunpack.c.h.b16 %v1183_v46  ;;  %vm3528_vm13 = vmpackc.low %vm3437_vm8, %vm3432_vm7 }
  0xbf   : > { %v4483_v50 = vsel %vm3450_vm9, 4294967295, %v4482_v50  ;;  %v1187_v16 = vrot.slane %v1185_v55, 4  ;;  %v1188_v48 = vrot.slane %v3418_v51, 7  ;;  %vm3469_vm1 = vcmp.ne.s32.totalorder %v1218_v6, %v3254_v24 }
  0xc0   : > { %v669_v18 = vor.u32 %v667_v8, %v3342_v7  ;;  %v623_v19 = vmax.f32 %v615_v9, 0.0  ;;  %v555_v22 = vpop.f32.mrf.mxu0  ;;  %v671_v63 = vrot.slane %v3342_v7, 4  ;;  %v803_v7 = vand.u32 7, %v3415_v47 }
  0xc1   : > { %v584_v23 = vpop.f32.mrf.mxu1  ;;  %vm3487_vm15 = vcmp.ne.s32.totalorder %v1219_v52, %v3257_v25  ;;  %v1189_v46 = vsel %vm3267_vm14, %v1187_v16, %v1188_v48 }
  0xc2   : > { %v670_v29 = vsel %vm3329_vm10, %v662_v17, %v669_v18  ;;  %v647_v31 = vpack.c.bf16 %v623_v19, %v623_v19  ;;  %v585_v26 = vadd.f32 %v584_v23, %v555_v22  ;;  %v3400_v38 = vld [vmem:[#allocation2 + $0x4] sm:$0xf]  ;;  %v3464_v22 = vsel %vm3267_vm14, %v1184_v54, %v1185_v55  ;;  %vm3558_vm8 = vmpackc.low %vm3487_vm15, %vm3469_vm1 }
  0xc3   : > { %738 = vst.msk [vmem:[#allocation2 + $0x8] sm:$0xf] %vm4437_vm2, %v670_v29  ;;  %v902_v62 = vsel %vm3407_vm6, %v3400_v38, 0  ;;  %v3429_v3 = vld [vmem:[#allocation2] sm:$0xff]  ;;  %v4439_v29 = vand.u32 7, %v3443_v10  ;;  %v1261_v34 = vsel %vm3450_vm9, %v3400_v38, 0  ;;  %v1225_v51 = vunpack.c.l.b16 %v3464_v22 }
  0xc4   : > { %v673_v42 = vshrl.u32 %v647_v31, 16  ;;  %v604_v44 = vmul.f32 %v3188_v53, %v585_v26  ;;  %v676_v60 = vshll.u32 %v647_v31, 16  ;;  %v3458_v17 = vunpack.c.l.b16 %v902_v62  ;;  %v1645_v28 = vld [vmem:[#allocation2 + $0x4] sm:$0xe] }
  0xc5   : > { %v954_v23 = vshll.u32 %v3429_v3, 16  ;;  %vm3482_vm12 = vcmp.ne.s32.totalorder %v803_v7, 7  ;;  %v1226_v6 = vunpack.c.h.b16 %v3464_v22  ;;  %vm3511_vm4 = vcmp.ne.s32.totalorder %v4439_v29, 7  ;;  %v2949_v22 = vld [vmem:[%s4430_s4 + $0x48] sm:$0xff] }
  0xc6   : > { %v3422_v56 = vrot.slane %v673_v42, 7  ;;  %v616_v61 = vadd.f32 %v3199_v58, %v604_v44  ;;  %v2950_v44 = vld [vmem:[%s4430_s4 + $0x50] sm:$0xff]  ;;  %vm1161_vm0 = vmpackc.low %vm3482_vm12, %vm3482_vm12  ;;  %vm3569_vm12 = vcmp.ne.s32.totalorder %v1225_v51, %v3254_v24  ;;  %vm3592_vm15 = vcmp.ne.s32.totalorder %v775_v1, 0 }
  0xc7   : > { %v956_v62 = vrot.slane %v954_v23, 1  ;;  %1352 = vmatpush.bf16.msrb.mxu2 %v2950_v44  ;;  %v1232_v23 = vunpack.c.l.b16 %v1189_v46  ;;  %vm1162_vm7 = vmpackc.low %vm3511_vm4, %vm3511_vm4  ;;  %vm3574_vm1 = vcmp.ne.s32.totalorder %v1226_v6, %v3257_v25 }
  0xc8   : > { %v678_v8 = vor.u32 %v676_v60, %v3422_v56  ;;  %v624_v9 = vmax.f32 %v616_v61, 0.0  ;;  %v558_v11 = vpop.f32.mrf.mxu0  ;;  %v1646_v61 = vsel %vm3317_vm5, %v1645_v28, 0  ;;  %v1233_v28 = vunpack.c.h.b16 %v1189_v46 }
  0xc9   : > { %v587_v13 = vpop.f32.mrf.mxu1  ;;  %v1170_v51 = vsel %vm1162_vm7, 65537, %v3017_v45  ;;  %vm4506_vm7 = vsmask.f32 7424  ;;  %vm4510_vm5 = vcmask 519168  }
  0xca   : > { %v679_v18 = vsel %vm3329_vm10, %v671_v63, %v678_v8  ;;  %v648_v19 = vpack.c.bf16 %v624_v9, %v624_v9  ;;  %v588_v20 = vadd.f32 %v587_v13, %v558_v11  ;;  %v3491_v42 = vld [vmem:[#allocation2 + $0x8] sm:$0xf]  ;;  %v3507_v8 = vunpack.c.l.b16 %v1261_v34 }
  0xcb   : > { %739 = vst.msk [vmem:[#allocation2 + $0xc] sm:$0xf] %vm4437_vm2, %v679_v18  ;;  %v3504_v63 = vld [vmem:[#allocation2 + $0x4] sm:$0xff]  ;;  %v680_v11 = vrot.slane %v3422_v56, 4  ;;  %v1647_v15 = vsel %vm3450_vm9, %v3491_v42, 0  ;;  %v3532_v56 = vunpack.c.l.b16 %v1646_v61  ;;  %v1169_v34 = vsel %vm1161_vm0, 65537, %v3017_v45  ;;  %1353 = vmatpush.bf16.msrb.mxu2 %v2949_v22 }
  0xcc   : > { %v682_v26 = vshrl.u32 %v648_v19, 16  ;;  %v605_v32 = vmul.f32 %v3188_v53, %v588_v20  ;;  %v685_v55 = vshll.u32 %v648_v19, 16  ;;  %v952_v19 = vshrl.u32 %v3429_v3, 16  ;;  %v3541_v5 = vld [vmem:[#allocation2 + $0x8] sm:$0xf] }
  0xcd   : > { %v1539_v44 = vshll.u32 %v3504_v63, 16  ;;  %v1296_v35 = vpack.c.b16 %v3507_v8, %v3402_v39  ;;  %v1190_v61 = vrot.slane %v1188_v48, 4  ;;  %v2948_v39 = vld [vmem:[%s4430_s4 + $0x40] sm:$0xff]  ;;  %v1191_v6 = vrot.slane %v1169_v34, 7 }
  0xce   : > { %v3499_v54 = vrot.slane %v682_v26, 7  ;;  %v617_v60 = vadd.f32 %v3199_v58, %v605_v32  ;;  %vm3602_vm0 = vcmp.ne.s32.totalorder %v1232_v23, %v3254_v24  ;;  %vm3607_vm4 = vcmp.ne.s32.totalorder %v1233_v28, %v3257_v25 }
  0xcf   : > { %v1541_v9 = vrot.slane %v1539_v44, 1  ;;  %1354 = vmatpush.bf16.msrb.mxu2 %v2948_v39  ;;  %v1193_v23 = vrot.slane %v1191_v6, 4  ;;  %v2943_v44 = vld [vmem:[%s4430_s4 + $0x18] sm:$0xff]  ;;  %v1192_v39 = vsel %vm3267_vm14, %v1190_v61, %v1191_v6  ;;  %vm4533_vm9 = vcmask 523264  }
  0xd0   : > { %v687_v13 = vor.u32 %v685_v55, %v3499_v54  ;;  %v625_v52 = vmax.f32 %v617_v60, 0.0  ;;  %v560_v16 = vpop.f32.mrf.mxu0  ;;  %v1674_v55 = vunpack.c.l.b16 %v1647_v15  ;;  %v689_v1 = vrot.slane %v3499_v54, 4  ;;  %1113 = vmatpush.bf16.msrb.mxu3 %v2943_v44 }
  0xd1   : > { %v589_v18 = vpop.f32.mrf.mxu1  ;;  %v1537_v54 = vshrl.u32 %v3504_v63, 16  ;;  %v1240_v30 = vunpack.c.h.b16 %v1192_v39 }
  0xd2   : > { %v688_v26 = vsel %vm3329_vm10, %v680_v11, %v687_v13  ;;  %v649_v3 = vpack.c.bf16 %v625_v52, %v625_v52  ;;  %v590_v32 = vadd.f32 %v589_v18, %v560_v16  ;;  %v3539_v4 = vld [vmem:[#allocation2 + $0x8] sm:$0xff]  ;;  %v957_v52 = vor.u32 %v956_v62, %v952_v19 }
  0xd3   : > { %740 = vst.msk [vmem:[#allocation2 + $0x10] sm:$0xf] %vm4437_vm2, %v688_v26  ;;  %v3562_v60 = vld [vmem:[#allocation2 + $0xc] sm:$0xf]  ;;  %v959_v27 = vshll.u32 %v3539_v4, 16  ;;  %v1262_v62 = vsel %vm3528_vm13, %v3541_v5, 0  ;;  %v1542_v2 = vor.u32 %v1541_v9, %v1537_v54 }
  0xd4   : > { %v691_v11 = vshrl.u32 %v649_v3, 16  ;;  %v606_v13 = vmul.f32 %v3188_v53, %v590_v32  ;;  %v694_v48 = vshll.u32 %v649_v3, 16  ;;  %v1263_v59 = vsel %vm3558_vm8, %v3562_v60, 0  ;;  %v3615_v26 = vld [vmem:[#allocation2 + $0xc] sm:$0xf] }
  0xd5   : > { %v3599_v19 = vrot.slane %v959_v27, 1  ;;  %v1682_v3 = vpack.c.b16 %v1674_v55, %v3532_v56  ;;  %vm4507_vm2 = vcmask 523264   ;;  %v1290_v56 = vunpack.c.l.b16 %v1263_v59 }
  0xd6   : > { %v3596_v16 = vrot.slane %v691_v11, 7  ;;  %v618_v18 = vadd.f32 %v3199_v58, %v606_v13  ;;  %v1194_v11 = vrot.slane %v1170_v51, 7  ;;  %v3626_v55 = vrot.slane %v1296_v35, 1 }
  0xd7   : > { %v962_v28 = vsel %vm4506_vm7, %v957_v52, %v3599_v19  ;;  %vm3632_vm7 = vcmp.ne.s32.totalorder %v782_v14, 0  ;;  %v1648_v35 = vsel %vm3528_vm13, %v3615_v26, 0  ;;  %v1687_v61 = vrot.slane %v1682_v3, 1 }
  0xd8   : > { %v696_v32 = vor.u32 %v694_v48, %v3596_v16  ;;  %v626_v34 = vmax.f32 %v618_v18, 0.0  ;;  %v563_v13 = vpop.f32.mrf.mxu0  ;;  %2616 = vmatmul.msk.bf16.vlgmr.msra.gmra.mxu2 %vm4507_vm2, %v962_v28  ;;  %vm4440_vm2 = vcmask 1046528   ;;  %v1289_v6 = vunpack.c.l.b16 %v1262_v62 }
  0xd9   : > { %v592_v27 = vpop.f32.mrf.mxu1  ;;  %v1675_v9 = vunpack.c.l.b16 %v1648_v35  ;;  %v3671_v35 = vrot.slane %v1194_v11, 4 }
  0xda   : > { %v697_v48 = vsel %vm3329_vm10, %v689_v1, %v696_v32  ;;  %v650_v63 = vpack.c.bf16 %v626_v34, %v626_v34  ;;  %v593_v51 = vadd.f32 %v592_v27, %v563_v13  ;;  %v3638_v18 = vld [vmem:[#allocation2 + $0xc] sm:$0xff]  ;;  %v1195_v13 = vsel %vm3267_vm14, %v1193_v23, %v1194_v11 }
  0xdb   : > { %v3640_v59 = vld [vmem:[#allocation2 + $0x10] sm:$0xf]  ;;  %741 = vst.msk [vmem:[#allocation2 + $0x14] sm:$0xf] %vm4510_vm5, %v697_v48  ;;  %v1544_v28 = vshll.u32 %v3638_v18, 16  ;;  %v1297_v54 = vpack.c.b16 %v1290_v56, %v1289_v6  ;;  %v1239_v48 = vunpack.c.l.b16 %v1192_v39  ;;  %vm3665_vm5 = vmpackc.low %vm3574_vm1, %vm3569_vm12  ;;  %v1246_v23 = vunpack.c.l.b16 %v1195_v13 }
  0xdc   : > { %v1649_v14 = vsel %vm3558_vm8, %v3640_v59, 0  ;;  %v2942_v1 = vld [vmem:[%s4430_s4 + $0x10] sm:$0xff]  ;;  %v700_v32 = vshrl.u32 %v650_v63, 16  ;;  %v607_v34 = vmul.f32 %v3188_v53, %v593_v51  ;;  %v703_v3 = vshll.u32 %v650_v63, 16  ;;  %vm3680_vm12 = vmpackc.low %vm3592_vm15, %vm3592_vm15 }
  0xdd   : > { %v1676_v27 = vunpack.c.l.b16 %v1649_v14  ;;  %v3659_v44 = vrot.slane %v1544_v28, 1  ;;  %1114 = vmatpush.bf16.msrb.mxu3 %v2942_v1  ;;  %v3669_v56 = vld [vmem:[#allocation2 + $0x10] sm:$0xf]  ;;  %v698_v63 = vrot.slane %v3596_v16, 4  ;;  %vm4513_vm14 = vsmask.f32 7424 }
  0xde   : > { %v3656_v31 = vrot.slane %v700_v32, 7  ;;  %v619_v62 = vadd.f32 %v3199_v58, %v607_v34  ;;  %vm4516_vm1 = vcmask 523264   ;;  %v963_v16 = vshrl.u32 %v3539_v4, 16  ;;  %v1882_v22 = vld [vmem:[#allocation2 + $0x10] sm:$0xf] }
  0xdf   : > { %v1683_v29 = vpack.c.b16 %v1676_v27, %v1675_v9  ;;  %v1547_v36 = vsel %vm4513_vm14, %v1542_v2, %v3659_v44  ;;  %vm3692_vm14 = vmpackc.low %vm3607_vm4, %vm3602_vm0  ;;  %v3696_v8 = vrot.slane %v1297_v54, 1  ;;  %v1247_v32 = vunpack.c.h.b16 %v1195_v13 }
  0xe0   : > { %v705_v14 = vor.u32 %v703_v3, %v3656_v31  ;;  %v627_v6 = vmax.f32 %v619_v62, 0.0  ;;  %v565_v39 = vpop.f32.mrf.mxu0  ;;  %2736 = vmatmul.msk.bf16.vlgmr.msrb.gmra.mxu0 %vm4516_vm1, %v1547_v36  ;;  %v1264_v4 = vsel %vm3665_vm5, %v3669_v56, 0  ;;  %vm4519_vm15 = vcmask 519168  }
  0xe1   : > { %v594_v1 = vpop.f32.mrf.mxu1  ;;  %v3685_v11 = vrot.slane %v1683_v29, 1  ;;  %v965_v13 = vor.u32 %v963_v16, %v3599_v19  ;;  %vm3712_vm0 = vcmp.ne.s32.totalorder %v1239_v48, %v3254_v24  ;;  %vm3717_vm4 = vcmp.ne.s32.totalorder %v1240_v30, %v3257_v25  ;;  %1115 = vmatpush.bf16.msrb.mxu3 %v2941_v21  ;;  %v2971_v30 = vld [vmem:[%s4430_s4 + $0xd8] sm:$0xff] }
  0xe2   : > { %v706_v34 = vsel %vm3329_vm10, %v698_v63, %v705_v14  ;;  %v651_v28 = vpack.c.bf16 %v627_v6, %v627_v6  ;;  %v595_v9 = vadd.f32 %v594_v1, %v565_v39  ;;  %v3700_v29 = vld [vmem:[#allocation2 + $0x10] sm:$0xff]  ;;  %v1253_v62 = vunpack.c.l.b16 %v3671_v35  ;;  %1847 = vmatpush.bf16.msra.mxu2 %v2971_v30 }
  0xe3   : > { %v3702_v27 = vld [vmem:[#allocation2 + $0x14] sm:$0xf]  ;;  %742 = vst.msk [vmem:[#allocation2 + $0x18] sm:$0xf] %vm4519_vm15, %v706_v34  ;;  %v1689_v45 = vsel %vm4440_vm2, %v1687_v61, %v3685_v11  ;;  %v903_v63 = vsel %vm3680_vm12, %v3541_v5, 0  ;;  %v967_v19 = vshll.u32 %v3700_v29, 16  ;;  %vm3734_vm15 = vmpackc.low %vm3632_vm7, %vm3632_vm7  ;;  %v1291_v36 = vunpack.c.l.b16 %v1264_v4 }
  0xe4   : > { %v709_v14 = vshrl.u32 %v651_v28, 16  ;;  %v608_v61 = vmul.f32 %v3188_v53, %v595_v9  ;;  %2764 = vmatmul.msk.bf16.vlgmr.msrb.gmra.mxu1 %vm4516_vm1, %v1689_v45  ;;  %v1265_v48 = vsel %vm3692_vm14, %v3702_v27, 0  ;;  %v1548_v6 = vshrl.u32 %v3638_v18, 16  ;;  %v1883_v39 = vld [vmem:[#allocation2 + $0x14] sm:$0xf] }
  0xe5   : > { %v3742_v53 = vsel %vm4440_vm2, %v3626_v55, %v3696_v8  ;;  %v2033_v1 = vsel %vm3528_vm13, %v1882_v22, 0  ;;  %v712_v52 = vshll.u32 %v651_v28, 16  ;;  %v3749_v9 = vrot.slane %v967_v19, 1  ;;  %v3751_v45 = vld [vmem:[#allocation2 + $0x14] sm:$0xf] }
  0xe6   : > { %v3746_v16 = vrot.slane %v709_v14, 7  ;;  %v620_v34 = vadd.f32 %v3199_v58, %v608_v61  ;;  %v707_v18 = vrot.slane %v3656_v31, 4  ;;  %vm3755_vm7 = vcmp.ne.s32.totalorder %v1246_v23, %v3254_v24 }
  0xe7   : > { %vm3760_vm1 = vcmp.ne.s32.totalorder %v1247_v32, %v3257_v25  ;;  %v1292_v4 = vunpack.c.l.b16 %v1265_v48  ;;  %v904_v58 = vsel %vm3734_vm15, %v3562_v60, 0  ;;  %vm3769_vm13 = vcmp.ne.s32.totalorder %v789_v37, 0 }
  0xe8   : > { %v714_v31 = vor.u32 %v712_v52, %v3746_v16  ;;  %v628_v23 = vmax.f32 %v620_v34, 0.0  ;;  %vm4532_vm2 = vsmask.f32 7424  ;;  %v2034_v22 = vsel %vm3558_vm8, %v1883_v39, 0 }
  0xe9   : > { %v970_v32 = vsel %vm4532_vm2, %v965_v13, %v3749_v9  ;;  %v1650_v14 = vsel %vm3665_vm5, %v3751_v45, 0  ;;  %v1254_v37 = vunpack.c.h.b16 %v3671_v35  ;;  %v3786_v61 = vunpack.c.l.b16 %v904_v58 }
  0xea   : > { %2617 = vmatmul.msk.bf16.gmra.mxu2 %vm4533_vm9, %v970_v32  ;;  %vm3790_vm2 = vcmp.ne.s32.totalorder %v796_v57, 0  ;;  %v715_v46 = vsel %vm3329_vm10, %v707_v18, %v714_v31  ;;  %v652_v19 = vpack.c.bf16 %v628_v23, %v628_v23  ;;  %v3796_v48 = vld [vmem:[#allocation2 + $0x14] sm:$0xff]  ;;  %v1550_v39 = vor.u32 %v1548_v6, %v3659_v44  ;;  %vm3804_vm9 = vmpackc.low %vm3769_vm13, %vm3769_vm13  ;;  %v2940_v44 = vld [vmem:[%s4430_s4] sm:$0xff] }
  0xeb   : > { %v3799_v52 = vld [vmem:[#allocation2 + $0x18] sm:$0xf]  ;;  %v2060_v34 = vunpack.c.l.b16 %v2033_v1  ;;  %vm4538_vm8 = vcmask 519168   ;;  %v1298_v18 = vpack.c.b16 %v1292_v4, %v1291_v36  ;;  %v2061_v6 = vunpack.c.l.b16 %v2034_v22  ;;  %vm3821_vm13 = vmpackc.low %vm3790_vm2, %vm3790_vm2  ;;  %1116 = vmatpush.bf16.msrb.mxu3 %v2940_v44  ;;  %v2970_v32 = vld [vmem:[%s4430_s4 + $0xd0] sm:$0xff] }
  0xec   : > { %743 = vst.msk [vmem:[#allocation2 + $0x1c] sm:$0xf] %vm4538_vm8, %v715_v46  ;;  %v1651_v57 = vsel %vm3692_vm14, %v3799_v52, 0  ;;  %v3815_v1 = vunpack.c.l.b16 %v903_v63  ;;  %v718_v58 = vshrl.u32 %v652_v19, 16  ;;  %v1552_v28 = vshll.u32 %v3796_v48, 16  ;;  %vm3843_vm2 = vmpackc.low %vm3717_vm4, %vm3712_vm0  ;;  %v2955_v63 = vld [vmem:[%s4430_s4 + $0x78] sm:$0xff]  ;;  %1848 = vmatpush.bf16.msra.mxu2 %v2970_v32 }
  0xed   : > { %v1677_v31 = vunpack.c.l.b16 %v1650_v14  ;;  %v1678_v23 = vunpack.c.l.b16 %v1651_v57  ;;  %v716_v36 = vrot.slane %v3746_v16, 4  ;;  %v971_v4 = vshrl.u32 %v3700_v29, 16  ;;  %v3847_v29 = vld [vmem:[#allocation2 + $0x18] sm:$0xf] }
  0xee   : > { %vm3828_vm8 = vcmp.ne.s32.totalorder %v1253_v62, %v3254_v24  ;;  %v905_v14 = vsel %vm3804_vm9, %v3669_v56, 0  ;;  %v720_v21 = vrot.slane %v718_v58, 7  ;;  %v721_v13 = vshll.u32 %v652_v19, 16  ;;  %v745_v62 = vld [vmem:[#allocation2 + $0x24] sm:$0x1] }
  0xef   : > { %v3837_v46 = vrot.slane %v1552_v28, 1  ;;  %v1684_v57 = vpack.c.b16 %v1678_v23, %v1677_v31  ;;  %v3849_v16 = vrot.slane %v1298_v18, 1  ;;  %v2068_v22 = vpack.c.b16 %v2061_v6, %v2060_v34  ;;  %v1884_v18 = vld [vmem:[#allocation2 + $0x18] sm:$0xf] }
  0xf0   : > { %v906_v19 = vsel %vm3821_vm13, %v3702_v27, 0  ;;  %v1770_v54 = vsel %vm3354_vm11, %v3491_v42, 0  ;;  %v723_v3 = vor.u32 %v721_v13, %v720_v21  ;;  %v725_v58 = vrot.slane %v720_v21, 4 }
  0xf1   : > { %vm4545_vm0 = vsmask.f32 7424  ;;  %v3859_v31 = vrot.slane %v1684_v57, 1  ;;  %vm4546_vm4 = vcmask 523264   ;;  %v1266_v34 = vsel %vm3843_vm2, %v3847_v29, 0 }
  0xf2   : > { %v1555_v28 = vsel %vm4545_vm0, %v1550_v39, %v3837_v46  ;;  %v3865_v44 = vunpack.c.l.b16 %v905_v14  ;;  %v3867_v6 = vunpack.c.l.b16 %v906_v19  ;;  %v1771_v42 = vsel %vm3407_vm6, %v3615_v26, 0 }
  0xf3   : > { %2737 = vmatmul.msk.bf16.gmra.mxu0 %vm4546_vm4, %v1555_v28  ;;  %v724_v39 = vsel %vm3329_vm10, %v716_v36, %v723_v3  ;;  %v746_v23 = vsel %vm3156_vm3, %v725_v58, %v745_v62  ;;  %vm4547_vm0 = vcmask 1046528   ;;  %v3879_v13 = vld [vmem:[#allocation2 + $0x18] sm:$0xff]  ;;  %vm3885_vm4 = vmpackc.low %vm3760_vm1, %vm3755_vm7  ;;  %v3891_v0 = vunpack.c.l.b16 %v1771_v42 }
  0xf4   : > { %v1691_v21 = vsel %vm4547_vm0, %v3685_v11, %v3859_v31  ;;  %v3889_v26 = vld [vmem:[#allocation2 + $0x1c] sm:$0xf]  ;;  %vm4550_vm10 = vcmask 519168   ;;  %v3897_v11 = vrot.slane %v2068_v22, 1  ;;  %v1071_v55 = vpack.c.b16 %v3867_v6, %v3865_v44  ;;  %747 = vst [vmem:[#allocation2 + $0x24] sm:$0x1] %v746_v23 }
  0xf5   : > { %744 = vst.msk [vmem:[#allocation2 + $0x20] sm:$0xf] %vm4550_vm10, %v724_v39  ;;  %v3901_v20 = vunpack.c.l.b16 %v1770_v54  ;;  %vm3905_vm3 = vcmp.ne.s32.totalorder %v803_v7, 0  ;;  %vm4553_vm7 = vcmask 523264   ;;  %v973_v57 = vor.u32 %v971_v4, %v3749_v9  ;;  %v3912_v22 = vld [vmem:[#allocation2 + $0x1c] sm:$0xf] }
  0xf6   : > { %2765 = vmatmul.msk.bf16.gmra.mxu1 %vm4553_vm7, %v1691_v21  ;;  %v975_v62 = vshll.u32 %v3879_v13, 16  ;;  %vm3917_vm1 = vcmp.ne.s32.totalorder %v1254_v37, %v3257_v25  ;;  %v2035_v47 = vsel %vm3665_vm5, %v1884_v18, 0  ;;  %v1267_v7 = vsel %vm3885_vm4, %v3889_v26, 0  ;;  %v1885_v9 = vld [vmem:[#allocation2 + $0x1c] sm:$0xf]  ;;  %v2982_v54 = vld [vmem:[%s4430_s4 + $0x110] sm:$0xff]  ;;  %vm3947_vm0 = vmpackc.low %vm3905_vm3, %vm3905_vm3 }
  0xf7   : > { %v1772_v35 = vsel %vm3680_vm12, %v3640_v59, 0  ;;  %v1773_v25 = vsel %vm3734_vm15, %v3751_v45, 0  ;;  %v1556_v51 = vshrl.u32 %v3796_v48, 16  ;;  %v2036_v3 = vsel %vm3692_vm14, %v1885_v9, 0  ;;  %vm3968_vm3 = vmpackc.low %vm3917_vm1, %vm3828_vm8  ;;  %2122 = vmatpush.bf16.msra.mxu0 %v2982_v54  ;;  %v2968_v59 = vld [vmem:[%s4430_s4 + $0xc0] sm:$0xff]  ;;  %v2978_v44 = vld [vmem:[%s4430_s4 + $0xf0] sm:$0xff] }
  0xf8   : > { %v3934_v37 = vrot.slane %v975_v62, 1  ;;  %v4556_v58 = vand.u32 7, %v3443_v10  ;;  %v2062_v45 = vunpack.c.l.b16 %v2035_v47  ;;  %v2063_v28 = vunpack.c.l.b16 %v2036_v3  ;;  %v2977_v6 = vld [vmem:[%s4430_s4 + $0xe8] sm:$0xff] }
  0xf9   : > { %v3955_v18 = vunpack.c.l.b16 %v1772_v35  ;;  %v3957_v2 = vunpack.c.l.b16 %v1773_v25  ;;  %vm4561_vm14 = vsmask.f32 7424  ;;  %v1652_v42 = vsel %vm3843_vm2, %v3912_v22, 0 }
  0xfa   : > { %vm860_vm5 = vcmp.ne.s32.totalorder %v4556_v58, 0  ;;  %v978_v10 = vsel %vm4561_vm14, %v973_v57, %v3934_v37  ;;  %v1294_v23 = vunpack.c.l.b16 %v1267_v7  ;;  %v2069_v36 = vpack.c.b16 %v2063_v28, %v2062_v45  ;;  %vm4567_vm8 = vmmov %vm4561_vm14 }
  0xfb   : > { %vm3951_vm10 = vmpackc.low %vm860_vm5, %vm860_vm5  ;;  %2618 = vmatmul.msk.bf16.vlgmr.msra.gmra.mxu3 %vm4553_vm7, %v978_v10  ;;  %v907_v57 = vsel %vm3947_vm0, %v3847_v29, 0  ;;  %v1293_v9 = vunpack.c.l.b16 %v1266_v34  ;;  %v1386_v25 = vsel %vm3407_vm6, %v3541_v5, 0  ;;  %v1679_v34 = vunpack.c.l.b16 %v1652_v42  ;;  %v1503_v28 = vld [vmem:[#allocation2 + $0x24] sm:$0x1]  ;;  %2123 = vmatpush.bf16.msra.mxu0 %v2981_v40 }
  0xfc   : > { %v908_v21 = vsel %vm3951_vm10, %v3889_v26, 0  ;;  %vm4564_vm5 = vmmov %vm4553_vm7  ;;  %v3992_v19 = vld [vmem:[#allocation2 + $0x1c] sm:$0xff]  ;;  %1462 = vmatpush.bf16.msra.mxu3 %v2955_v63  ;;  %v4014_v62 = vunpack.c.l.b16 %v907_v57  ;;  %v1558_v63 = vor.u32 %v1556_v51, %v3837_v46  ;;  %v4032_v40 = vunpack.c.l.b16 %v1386_v25 }
  0xfd   : > { %2664 = vmatmul.msk.bf16.vlgmr.msrb.gmra.mxu2 %vm4564_vm5, %v3742_v53  ;;  %v1385_v53 = vsel %vm3354_vm11, %v3400_v38, 0  ;;  %v3994_v47 = vld [vmem:[#allocation2 + $0x20] sm:$0xf]  ;;  %v3996_v35 = vunpack.c.l.b16 %v908_v21  ;;  %v4006_v38 = vrot.slane %v2069_v36, 1  ;;  %v1560_v54 = vshll.u32 %v3992_v19, 16  ;;  %vm4568_vm1 = vmmov %vm4564_vm5 }
  0xfe   : > { %v917_v7 = vld [vmem:[#allocation2 + $0x20] sm:$0x1]  ;;  %v1653_v3 = vsel %vm3885_vm4, %v3994_v47, 0  ;;  %v1299_v10 = vpack.c.b16 %v1294_v23, %v1293_v9  ;;  %vm4565_vm11 = vcmask 1046528   ;;  %v979_v9 = vshrl.u32 %v3879_v13, 16  ;;  %vm4571_vm7 = vmmov %vm4568_vm1 }
  0xff   : > { %v944_v58 = vunpack.c.l.b16 %v917_v7  ;;  %v1268_v12 = vsel %vm3968_vm3, %v917_v7, 0  ;;  %v1680_v45 = vunpack.c.l.b16 %v1653_v3  ;;  %v4012_v5 = vsel %vm4565_vm11, %v3897_v11, %v4006_v38  ;;  %vm4566_vm6 = vmmov %vm4565_vm11  ;;  %v2980_v23 = vld [vmem:[%s4430_s4 + $0x100] sm:$0xff] }
 0x100   : > { %v1295_v41 = vunpack.c.l.b16 %v1268_v12  ;;  %v4017_v7 = vrot.slane %v1560_v54, 1  ;;  %v1306_v42 = vsel %vm4566_vm6, %v3696_v8, %v3849_v16  ;;  %v1530_v3 = vunpack.c.l.b16 %v1503_v28  ;;  %v1886_v57 = vld [vmem:[#allocation2 + $0x20] sm:$0xf]  ;;  %v1887_v12 = vld [vmem:[#allocation2 + $0x24] sm:$0xf]  ;;  %vm4569_vm14 = vmmov %vm4566_vm6  ;;  %2124 = vmatpush.bf16.msra.mxu0 %v2980_v23 }
 0x101   : > { %v949_v21 = vpack.c.b16 %v944_v58, %v944_v58  ;;  %v1685_v36 = vpack.c.b16 %v1680_v45, %v1679_v34  ;;  %v1072_v46 = vpack.c.b16 %v3996_v35, %v4014_v62  ;;  %v4035_v34 = vrot.slane %v1299_v10, 1  ;;  %vm4578_vm5 = vmmov %vm4568_vm1  ;;  %v2973_v62 = vld [vmem:[#allocation2 + $0x10] sm:$0xff] }
 0x102   : > { %v1300_v58 = vpack.c.b16 %v1295_v41, %v1295_v41  ;;  %v1563_v51 = vsel %vm4567_vm8, %v1558_v63, %v4017_v7  ;;  %v2037_v45 = vsel %vm3843_vm2, %v1886_v57, 0  ;;  %v4039_v41 = vld [vmem:[#allocation2 + $0x28] sm:$0x1]  ;;  %v4041_v4 = vunpack.c.l.b16 %v1385_v53  ;;  %vm4570_vm2 = vmmov %vm4566_vm6 }
 0x103   : > { %v4030_v54 = vrot.slane %v1685_v36, 1  ;;  %v983_v8 = vshll.u32 %v949_v21, 16  ;;  %2738 = vmatmul.msk.bf16.gmra.mxu0 %vm4568_vm1, %v1563_v51  ;;  %v1654_v25 = vsel %vm3968_vm3, %v1503_v28, 0  ;;  %v2038_v10 = vsel %vm3885_vm4, %v1887_v12, 0  ;;  %vm4572_vm4 = vmmov %vm4567_vm8 }
 0x104   : > { %v1309_v13 = vrot.slane %v1300_v58, 1  ;;  %v2064_v21 = vunpack.c.l.b16 %v2037_v45  ;;  %v981_v36 = vor.u32 %v979_v9, %v3934_v37  ;;  %v1535_v24 = vpack.c.b16 %v1530_v3, %v1530_v3  ;;  %vm4579_vm11 = vmmov %vm4570_vm2 }
 0x105   : > { %v1693_v63 = vsel %vm4569_vm14, %v3859_v31, %v4030_v54  ;;  %v2065_v53 = vunpack.c.l.b16 %v2038_v10  ;;  %v985_v57 = vrot.slane %v983_v8, 1  ;;  %v2039_v31 = vsel %vm3968_vm3, %v4039_v41, 0  ;;  %vm4577_vm3 = vmmov %vm4572_vm4 }
 0x106   : > { %v4053_v58 = vsel %vm4570_vm2, %v4035_v34, %v1309_v13  ;;  %2766 = vmatmul.msk.bf16.gmra.mxu1 %vm4571_vm7, %v1693_v63  ;;  %v1418_v14 = vpack.c.b16 %v4032_v40, %v4041_v4  ;;  %v1774_v37 = vsel %vm3804_vm9, %v3799_v52, 0  ;;  %v1564_v28 = vshrl.u32 %v3992_v19, 16  ;;  %vm4583_vm8 = vmmov %vm4570_vm2 }
 0x107   : > { %v1681_v23 = vunpack.c.l.b16 %v1654_v25  ;;  %v2070_v9 = vpack.c.b16 %v2065_v53, %v2064_v21  ;;  %v2066_v3 = vunpack.c.l.b16 %v2039_v31  ;;  %v1387_v12 = vsel %vm3680_vm12, %v3562_v60, 0  ;;  %vm4573_vm12 = vmmov %vm4568_vm1 }
 0x108   : > { %v1388_v39 = vsel %vm3734_vm15, %v3669_v56, 0  ;;  %v1389_v51 = vsel %vm3804_vm9, %v3702_v27, 0  ;;  %v1390_v52 = vsel %vm3821_vm13, %v3847_v29, 0  ;;  %v4077_v13 = vunpack.c.l.b16 %v1387_v12  ;;  %vm4574_vm15 = vmmov %vm4568_vm1  ;;  %v2954_v27 = vld [vmem:[%s4430_s4 + $0x70] sm:$0xff]  ;;  %v2969_v12 = vld [vmem:[%s4430_s4 + $0xc8] sm:$0xff] }
 0x109   : > { %v2077_v19 = vrot.slane %v2070_v9, 1  ;;  %v2071_v8 = vpack.c.b16 %v2066_v3, %v2066_v3  ;;  %v4079_v45 = vunpack.c.l.b16 %v1388_v39  ;;  %v986_v60 = vsel %vm4572_vm4, %v981_v36, %v985_v57  ;;  %vm4575_vm9 = vmmov %vm4570_vm2  ;;  %1463 = vmatpush.bf16.msra.mxu3 %v2954_v27  ;;  %v1384_v3 = vld [vmem:[#allocation2 + $0x20] sm:$0xf]  ;;  %1849 = vmatpush.bf16.msra.mxu2 %v2969_v12 }
 0x10a   : > { %v1568_v15 = vshll.u32 %v1535_v24, 16  ;;  %v4082_v63 = vunpack.c.l.b16 %v1389_v51  ;;  %v4084_v56 = vunpack.c.l.b16 %v1390_v52  ;;  %v1775_v25 = vsel %vm3821_vm13, %v3912_v22, 0  ;;  %vm4576_vm13 = vmmov %vm4570_vm2  ;;  %v2030_v51 = vld [vmem:[#allocation2 + $0x8] sm:$0xe] }
 0x10b   : > { %2619 = vmatmul.msk.bf16.gmra.mxu3 %vm4573_vm12, %v986_v60  ;;  %v2078_v33 = vsel %vm4575_vm9, %v4006_v38, %v2077_v19  ;;  %v2079_v29 = vrot.slane %v2071_v8, 1  ;;  %v1419_v10 = vpack.c.b16 %v4079_v45, %v4077_v13  ;;  %v4103_v21 = vunpack.c.l.b16 %v1775_v25 }
 0x10c   : > { %v1420_v36 = vpack.c.b16 %v4084_v56, %v4082_v63  ;;  %v1391_v24 = vsel %vm3947_vm0, %v3889_v26, 0  ;;  %v1686_v38 = vpack.c.b16 %v1681_v23, %v1681_v23  ;;  %v1566_v53 = vor.u32 %v1564_v28, %v4017_v7  ;;  %v1881_v26 = vld [vmem:[#allocation2 + $0xc] sm:$0xf]  ;;  %v1769_v23 = vld [vmem:[#allocation2 + $0x24] sm:$0xf]  ;;  %v2974_v56 = vld [vmem:[#allocation2 + $0x18] sm:$0xff] }
 0x10d   : > { %2665 = vmatmul.msk.bf16.gmra.mxu2 %vm4574_vm15, %v1306_v42  ;;  %v4101_v42 = vunpack.c.l.b16 %v1774_v37  ;;  %v2080_v22 = vsel %vm4576_vm13, %v2077_v19, %v2079_v29  ;;  %v1570_v57 = vrot.slane %v1568_v15, 1  ;;  %v1776_v7 = vsel %vm3947_vm0, %v3994_v47, 0  ;;  %vm4581_vm0 = vmmov %vm4568_vm1 }
 0x10e   : > { %v1694_v37 = vrot.slane %v1686_v38, 1  ;;  %v1777_v28 = vsel %vm3951_vm10, %v1769_v23, 0  ;;  %v1392_v39 = vsel %vm3951_vm10, %v1384_v3, 0  ;;  %v1801_v52 = vunpack.c.l.b16 %v1776_v7  ;;  %1850 = vmatpush.bf16.msra.mxu2 %v2968_v59  ;;  %vm4585_vm1 = vmmov %vm4581_vm0 }
 0x10f   : > { %v1805_v31 = vpack.c.b16 %v4103_v21, %v4101_v42  ;;  %v1571_v9 = vsel %vm4577_vm3, %v1566_v53, %v1570_v57  ;;  %v1802_v19 = vunpack.c.l.b16 %v1777_v28  ;;  %v1416_v8 = vunpack.c.l.b16 %v1391_v24  ;;  %vm4586_vm14 = vmmov %vm4581_vm0  ;;  %v2953_v42 = vld [vmem:[%s4430_s4 + $0x68] sm:$0xff] }
 0x110   : > { %v1417_v60 = vunpack.c.l.b16 %v1392_v39  ;;  %v1695_v15 = vsel %vm4579_vm11, %v4030_v54, %v1694_v37  ;;  %vm4580_vm6 = vnez %v4483_v50  ;;  %vm4582_vm10 = vnez %v4461_v49  ;;  %1464 = vmatpush.bf16.msra.mxu3 %v2953_v42  ;;  %vm4587_vm7 = vmmov %vm4581_vm0 }
 0x111   : > { %v2032_v27 = vsel %vm4580_vm6, %v1881_v26, 0  ;;  %v1806_v48 = vpack.c.b16 %v1802_v19, %v1801_v52  ;;  %v2031_v30 = vsel %vm4582_vm10, %v2030_v51, 0  ;;  %v1308_v54 = vsel %vm4583_vm8, %v3849_v16, %v4035_v34  ;;  %vm4589_vm4 = vmmov %vm4581_vm0 }
 0x112   : > { %v1421_v47 = vpack.c.b16 %v1417_v60, %v1416_v8  ;;  %v2059_v29 = vunpack.c.l.b16 %v2032_v27  ;;  %v2058_v50 = vunpack.c.l.b16 %v2031_v30  ;;  %v4584_v25 = vpack.c.b16 %v3458_v17, %v3420_v43  ;;  %vm4590_vm12 = vmmov %vm4581_vm0  ;;  %v2952_v43 = vld [vmem:[%s4430_s4 + $0x60] sm:$0xff] }
 0x113   : > { %2739 = vmatmul.msk.bf16.gmra.mxu0 %vm4578_vm5, %v1571_v9  ;;  %v4588_v16 = vpack.c.b16 %v3786_v61, %v3815_v1  ;;  %vm4591_vm15 = vmmov %vm4581_vm0  ;;  %v4593_v17 = vpack.c.b16 %v3891_v0, %v3901_v20  ;;  %v2979_v61 = vld [vmem:[%s4430_s4 + $0xf8] sm:$0xff]  ;;  %v4597_v1 = vpack.c.b16 %v3957_v2, %v3955_v18  ;;  %v2976_v0 = vld [vmem:[%s4430_s4 + $0xe0] sm:$0xff]  ;;  %v1933_v32 = vshrl.u32 %v2973_v62, 16 }
 0x114   : > { %v2067_v49 = vpack.c.b16 %v2059_v29, %v2058_v50  ;;  %1465 = vmatpush.bf16.msra.mxu3 %v2952_v43  ;;  %vm4592_vm9 = vmmov %vm4581_vm0  ;;  %v2972_v18 = vld [vmem:[#allocation2 + $0x8] sm:$0xff]  ;;  %v2975_v9 = vld [vmem:[#allocation2 + $0x20] sm:$0xff]  ;;  %v1941_v7 = vshrl.u32 %v2974_v56, 16  ;;  %v1915_v19 = vunpack.c.l.b16 %v4039_v41 }
 0x115   : > { %vm4594_vm13 = vmmov %vm4581_vm0  ;;  %v1924_v35 = vshll.u32 %v2972_v18, 16  ;;  %v1945_v23 = vshll.u32 %v2975_v9, 16  ;;  %v2896_v43 = vld [vmem:[%s4433_s7 + $0x38] sm:$0xf0] }
 0x116   : > { %2767 = vmatmul.msk.bf16.gmra.mxu1 %vm4581_vm0, %v1695_v15  ;;  %v2072_v21 = vrot.slane %v2067_v49, 1  ;;  %vm4595_vm3 = vmmov %vm4581_vm0  ;;  %v1920_v15 = vpack.c.b16 %v1915_v19, %v1915_v19 }
 0x117   : > { %vm4596_vm5 = vmmov %vm4581_vm0  ;;  %v1947_v28 = vrot.slane %v1945_v23, 1  ;;  %v2987_v23 = vld [vmem:[%s4433_s7 + $0x14] sm:$0xf0] }
 0x118   : > { %v2074_v24 = vsel %vm4570_vm2, %v2072_v21, %v3897_v11  ;;  %vm4598_vm11 = vmmov %vm4581_vm0 }
 0x119   : > { %vm4599_vm6 = vmmov %vm4581_vm0 }
 0x11a   : > { %vm4600_vm10 = vmmov %vm4581_vm0 }
 0x11b   : > { %2636 = vmatmul.msk.bf16.vlgmr.msrb.gmra.mxu3 %vm4585_vm1, %v4584_v25  ;;  %vm4601_vm8 = vmmov %vm4581_vm0 }
 0x11c   : > { %1997 = vmatpush.bf16.msrb.mxu3 %v2979_v61  ;;  %vm4602_vm1 = vmmov %vm4581_vm0 }
 0x11d   : > { %2666 = vmatmul.msk.bf16.gmra.mxu2 %vm4586_vm14, %v1308_v54  ;;  %vm4603_vm14 = vmmov %vm4581_vm0 }
 0x11e   : > { %vm4604_vm2 = vmmov %vm4581_vm0 }
 0x120   : > { %1998 = vmatpush.bf16.msrb.mxu3 %v2978_v44 }
 0x123   : > { %2864 = vmatmul.msk.bf16.vlgmr.msra.gmra.mxu0 %vm4587_vm7, %v2074_v24  ;;  %vm4605_vm7 = vsmask.f32 7424 }
 0x124   : > { %1999 = vmatpush.bf16.msrb.mxu3 %v2977_v6 }
 0x128   : > { %2000 = vmatpush.bf16.msrb.mxu3 %v2976_v0 }
 0x12b   : > { %2637 = vmatmul.msk.bf16.gmra.mxu3 %vm4589_vm4, %v4588_v16  ;;  %vm4606_vm4 = vmmov %vm4581_vm0  ;;  %v2990_v16 = vld [vmem:[%s4433_s7 + $0x34] sm:$0xf] }
 0x12c   : > { %v2899_v61 = vor.u32 %v2990_v16, %v2896_v43 }
 0x12d   : > { %2667 = vmatmul.msk.bf16.gmra.mxu2 %vm4590_vm12, %v4053_v58  ;;  %v1922_v58 = vshrl.u32 %v2972_v18, 16  ;;  %vm4607_vm12 = vmmov %vm4605_vm7 }
 0x12e   : > { %2283 = vmatpush.bf16.msrb.mxu2 %v2899_v61 }
 0x133   : > { %2865 = vmatmul.msk.bf16.gmra.mxu0 %vm4591_vm15, %v4012_v5  ;;  %v1929_v5 = vshll.u32 %v2973_v62, 16  ;;  %vm4608_vm15 = vmmov %vm4581_vm0 }
 0x13b   : > { %2638 = vmatmul.msk.bf16.gmra.mxu3 %vm4592_vm9, %v1071_v55  ;;  %vm4609_vm9 = vmmov %vm4605_vm7 }
 0x13d   : > { %2792 = vmatmul.msk.bf16.vlgmr.msra.gmra.mxu2 %vm4594_vm13, %v4593_v17  ;;  %vm4610_vm13 = vmmov %vm4581_vm0 }
 0x143   : > { %2866 = vmatmul.msk.bf16.gmra.mxu0 %vm4595_vm3, %v2078_v33  ;;  %vm4611_vm3 = vmmov %vm4605_vm7 }
 0x14b   : > { %2639 = vmatmul.msk.bf16.gmra.mxu3 %vm4596_vm5, %v1072_v46  ;;  %v1926_v46 = vrot.slane %v1924_v35, 1  ;;  %vm4612_vm5 = vmmov %vm4581_vm0 }
 0x14d   : > { %2793 = vmatmul.msk.bf16.gmra.mxu2 %vm4598_vm11, %v4597_v1  ;;  %v1927_v13 = vor.u32 %v1926_v46, %v1922_v58  ;;  %v2988_v46 = vld [vmem:[%s4433_s7 + $0x24] sm:$0xf]  ;;  %vm4613_vm11 = vmmov %vm4581_vm0 }
 0x153   : > { %2867 = vmatmul.msk.bf16.gmra.mxu0 %vm4599_vm6, %v2080_v22  ;;  %vm4614_vm6 = vmmov %vm4581_vm0 }
 0x15b   : > { %2692 = vmatmul.msk.bf16.vlgmr.msra.gmra.mxu3 %vm4581_vm0, %v1418_v14  ;;  %v1033_v55 = vpop.f32.mrf.mxu2  ;;  %v1931_v14 = vrot.slane %v1929_v5, 1 }
 0x15d   : > { %2794 = vmatmul.msk.bf16.gmra.mxu2 %vm4600_vm10, %v1805_v31  ;;  %v1932_v45 = vsel %vm4605_vm7, %v1927_v13, %v1931_v14  ;;  %v1935_v53 = vor.u32 %v1933_v32, %v1931_v14  ;;  %v1617_v59 = vpop.f32.mrf.mxu0  ;;  %vm4615_vm10 = vmmov %vm4581_vm0 }
 0x163   : > { %v4209_v4 = vpop.f32.mrf.mxu2 }
 0x165   : > { %v4232_v41 = vpop.f32.mrf.mxu0 }
 0x16b   : > { %2693 = vmatmul.msk.bf16.gmra.mxu3 %vm4601_vm8, %v1419_v10  ;;  %vm4616_vm8 = vmmov %vm4581_vm0 }
 0x16d   : > { %2795 = vmatmul.msk.bf16.gmra.mxu2 %vm4602_vm1, %v1806_v48  ;;  %v1038_v40 = vpop.f32.mrf.mxu2  ;;  %v1953_v48 = vshll.u32 %v1920_v15, 16  ;;  %v2872_v15 = vld [vmem:[%s4433_s7 + $0x8] sm:$0xf0]  ;;  %vm4617_vm1 = vmmov %vm4581_vm0 }
 0x16f   : > { %v1955_v54 = vrot.slane %v1953_v48, 1  ;;  %v1741_v48 = vpop.f32.mrf.mxu1 }
 0x170   : > { %v1622_v1 = vpop.f32.mrf.mxu0 }
 0x175   : > { %v4213_v10 = vpop.f32.mrf.mxu2 }
 0x177   : > { %v1743_v43 = vpop.f32.mrf.mxu1 }
 0x178   : > { %v4250_v35 = vpop.f32.mrf.mxu0 }
 0x17b   : > { %2694 = vmatmul.msk.bf16.gmra.mxu3 %vm4603_vm14, %v1420_v36  ;;  %v1937_v36 = vshll.u32 %v2974_v56, 16  ;;  %vm4618_vm14 = vmmov %vm4581_vm0 }
 0x17d   : > { %v1939_v22 = vrot.slane %v1937_v36, 1 }
 0x17e   : > { %v1043_v11 = vpop.f32.mrf.mxu3 }
 0x17f   : > { %v1940_v31 = vsel %vm4607_vm12, %v1935_v53, %v1939_v22  ;;  %v1943_v51 = vor.u32 %v1941_v7, %v1939_v22  ;;  %v2986_v53 = vld [vmem:[%s4433_s7 + $0x14] sm:$0xf] }
 0x180   : > { %v1356_v57 = vpop.f32.mrf.mxu2  ;;  %v1627_v56 = vpop.f32.mrf.mxu0 }
 0x181   : > { %v1948_v52 = vsel %vm4609_vm9, %v1943_v51, %v1947_v28 }
 0x186   : > { %v1045_v20 = vpop.f32.mrf.mxu3 }
 0x188   : > { %v4219_v3 = vpop.f32.mrf.mxu2 }
 0x18b   : > { %2695 = vmatmul.msk.bf16.gmra.mxu3 %vm4604_vm2, %v1421_v47  ;;  %v1949_v47 = vshrl.u32 %v2975_v9, 16  ;;  %vm4619_vm2 = vmmov %vm4581_vm0 }
 0x18d   : > { %v1951_v29 = vor.u32 %v1949_v47, %v1947_v28 }
 0x18e   : > { %v1048_v2 = vpop.f32.mrf.mxu3 }
 0x18f   : > { %v1956_v49 = vsel %vm4611_vm3, %v1951_v29, %v1955_v54 }
 0x190   : > { %v1361_v8 = vpop.f32.mrf.mxu2 }
 0x196   : > { %v1050_v34 = vpop.f32.mrf.mxu3 }
 0x198   : > { %v4228_v42 = vpop.f32.mrf.mxu2 }
 0x19b   : > { %2836 = vmatmul.msk.bf16.vlgmr.msrb.gmra.mxu3 %vm4606_vm4, %v1932_v45  ;;  %v2886_v45 = vld [vmem:[%s4433_s7 + $0x20] sm:$0xf] }
 0x19e   : > { %v1118_v63 = vpop.f32.mrf.mxu3 }
 0x19f   : > { %v1119_v33 = vadd.f32 %v1118_v63, %v1033_v55  ;;  %v2991_v55 = vld [vmem:[%s4433_s7 + $0x34] sm:$0xf0]  ;;  %v2989_v63 = vld [vmem:[%s4433_s7 + $0x24] sm:$0xf0] }
 0x1a0   : > { %v1366_v17 = vpop.f32.mrf.mxu2 }
 0x1a1   : > { %v1376_v39 = vadd.f32 %v1356_v57, %v1119_v33  ;;  %v2887_v33 = vor.u32 %v2989_v63, %v2886_v45  ;;  %v2880_v57 = vld [vmem:[%s4433_s7 + $0x18] sm:$0xf0]  ;;  %v4318_v45 = vld [vmem:[%s4432_s6] ss:$0 sm:$0xff] }
 0x1a6   : > { %v4215_v38 = vpop.f32.mrf.mxu3 }
 0x1a7   : > { %v1121_v16 = vadd.f32 %v4215_v38, %v4209_v4 }
 0x1a8   : > { %v4248_v18 = vpop.f32.mrf.mxu2 }
 0x1a9   : > { %v1377_v61 = vadd.f32 %v4219_v3, %v1121_v16  ;;  %v4311_v3 = vld [vmem:[%s4431_s5] ss:$0 sm:$0xff] }
 0x1ab   : > { %2837 = vmatmul.msk.bf16.gmra.mxu3 %vm4608_vm15, %v1940_v31  ;;  %v2883_v31 = vor.u32 %v2986_v53, %v2880_v57 }
 0x1ae   : > { %v1123_v37 = vpop.f32.mrf.mxu3 }
 0x1af   : > { %v1124_v26 = vadd.f32 %v1123_v37, %v1038_v40  ;;  %v2888_v40 = vld [vmem:[%s4433_s7 + $0x28] sm:$0xf0]  ;;  %v4270_v37 = vpop.f32.mrf.mxu0 }
 0x1b0   : > { %v1371_v58 = vpop.f32.mrf.mxu2 }
 0x1b1   : > { %v1378_v25 = vadd.f32 %v1361_v8, %v1124_v26  ;;  %v2878_v26 = vld [vmem:[%s4433_s7 + $0x10] sm:$0xf] }
 0x1b2   : > { %v2879_v7 = vor.u32 %v2987_v23, %v2878_v26 }
 0x1b6   : > { %v4221_v12 = vpop.f32.mrf.mxu3 }
 0x1b7   : > { %v1632_v28 = vpop.f32.mrf.mxu0  ;;  %v1126_v4 = vadd.f32 %v4221_v12, %v4213_v10 }
 0x1b8   : > { %v4280_v19 = vpop.f32.mrf.mxu2 }
 0x1bb   : > { %2838 = vmatmul.msk.bf16.gmra.mxu3 %vm4610_vm13, %v1948_v52 }
 0x1be   : > { %v1128_v60 = vpop.f32.mrf.mxu3 }
 0x1bf   : > { %v1129_v27 = vadd.f32 %v1128_v60, %v1043_v11  ;;  %v2894_v11 = vld [vmem:[%s4433_s7 + $0x30] sm:$0xf]  ;;  %v2984_v60 = vld [vmem:[%s4433_s7 + $0x4] sm:$0xf] }
 0x1c0   : > { %v1852_v47 = vpop.f32.mrf.mxu2 }
 0x1c1   : > { %v1380_v0 = vadd.f32 %v1366_v17, %v1129_v27  ;;  %v4290_v27 = vpop.f32.mrf.mxu0 }
 0x1c6   : > { %v1130_v30 = vpop.f32.mrf.mxu3 }
 0x1c7   : > { %v4226_v50 = vadd.f32 %v1130_v30, %v1045_v20  ;;  %v2895_v20 = vor.u32 %v2991_v55, %v2894_v11 }
 0x1c9   : > { %2254 = vmatpush.bf16.msra.mxu1 %v2895_v20 }
 0x1cb   : > { %2839 = vmatmul.msk.bf16.gmra.mxu3 %vm4612_vm5, %v1956_v49  ;;  %v2985_v49 = vld [vmem:[%s4433_s7 + $0x4] sm:$0xf0] }
 0x1cd   : > { %2255 = vmatpush.bf16.msra.mxu1 %v2887_v33 }
 0x1ce   : > { %v1133_v21 = vpop.f32.mrf.mxu3 }
 0x1cf   : > { %v1134_v24 = vadd.f32 %v1133_v21, %v1048_v2  ;;  %v2126_v21 = vpop.f32.mrf.mxu0 }
 0x1d1   : > { %v1382_v13 = vadd.f32 %v1371_v58, %v1134_v24  ;;  %2256 = vmatpush.bf16.msra.mxu1 %v2879_v7 }
 0x1d6   : > { %v1135_v44 = vpop.f32.mrf.mxu3 }
 0x1d7   : > { %v4240_v6 = vadd.f32 %v1135_v44, %v1050_v34  ;;  %v2891_v34 = vor.u32 %v2988_v46, %v2888_v40  ;;  %v2128_v11 = vpop.f32.mrf.mxu0 }
 0x1d9   : > { %2284 = vmatpush.bf16.msrb.mxu2 %v2891_v34 }
 0x1dd   : > { %2285 = vmatpush.bf16.msrb.mxu2 %v2883_v31 }
 0x1de   : > { %v1467_v2 = vpop.f32.mrf.mxu3 }
 0x1df   : > { %v1487_v62 = vadd.f32 %v1467_v2, %v1376_v39  ;;  %v1746_v2 = vpop.f32.mrf.mxu1 }
 0x1e1   : > { %v1637_v5 = vadd.f32 %v1617_v59, %v1487_v62  ;;  %v2875_v59 = vor.u32 %v2984_v60, %v2872_v15 }
 0x1e3   : > { %2286 = vmatpush.bf16.msrb.mxu2 %v2875_v59 }
 0x1e6   : > { %v1469_v14 = vpop.f32.mrf.mxu3 }
 0x1e7   : > { %v1488_v44 = vadd.f32 %v1469_v14, %v1377_v61  ;;  %v1748_v10 = vpop.f32.mrf.mxu1 }
 0x1e9   : > { %v1638_v55 = vadd.f32 %v4232_v41, %v1488_v44  ;;  %v1379_v41 = vadd.f32 %v4228_v42, %v1126_v4 }
 0x1eb   : > { %v1762_v40 = vadd.f32 %v1743_v43, %v1638_v55 }
 0x1ee   : > { %v1472_v36 = vpop.f32.mrf.mxu3 }
 0x1ef   : > { %v1489_v32 = vadd.f32 %v1472_v36, %v1378_v25  ;;  %v2870_v25 = vld [vmem:[%s4433_s7] sm:$0xf] }
 0x1f0   : > { %v2871_v24 = vor.u32 %v2985_v49, %v2870_v25 }
 0x1f1   : > { %v1639_v22 = vadd.f32 %v1622_v1, %v1489_v32  ;;  %v1854_v1 = vpop.f32.mrf.mxu2 }
 0x1f2   : > { %2257 = vmatpush.bf16.msra.mxu1 %v2871_v24  ;;  %v1873_v58 = vadd.f32 %v1854_v1, %v1762_v40 }
 0x1f3   : > { %v1763_v33 = vadd.f32 %v1746_v2, %v1639_v22 }
 0x1f6   : > { %v1474_v9 = vpop.f32.mrf.mxu3 }
 0x1f7   : > { %v1490_v12 = vadd.f32 %v1474_v9, %v1379_v41  ;;  %v1751_v9 = vpop.f32.mrf.mxu1 }
 0x1f9   : > { %v1857_v34 = vpop.f32.mrf.mxu2  ;;  %v1640_v57 = vadd.f32 %v4250_v35, %v1490_v12  ;;  %v1381_v35 = vadd.f32 %v4248_v18, %v4226_v50 }
 0x1fa   : > { %v1874_v31 = vadd.f32 %v1857_v34, %v1763_v33 }
 0x1fb   : > { %v1764_v60 = vadd.f32 %v1748_v10, %v1640_v57 }
 0x1fe   : > { %v1477_v39 = vpop.f32.mrf.mxu3 }
 0x1ff   : > { %v1491_v51 = vadd.f32 %v1477_v39, %v1380_v0  ;;  %v1761_v0 = vadd.f32 %v1741_v48, %v1637_v5  ;;  %v2131_v5 = vpop.f32.mrf.mxu0  ;;  %v1753_v43 = vpop.f32.mrf.mxu1 }
 0x201   : > { %v4278_v52 = vadd.f32 %v1627_v56, %v1491_v51  ;;  %v1872_v20 = vadd.f32 %v1852_v47, %v1761_v0  ;;  %v1859_v53 = vpop.f32.mrf.mxu2 }
 0x202   : > { %v1875_v22 = vadd.f32 %v1859_v53, %v1764_v60 }
 0x203   : > { %v1765_v49 = vadd.f32 %v1751_v9, %v4278_v52 }
 0x206   : > { %v4282_v8 = vpop.f32.mrf.mxu3 }
 0x207   : > { %v2133_v39 = vpop.f32.mrf.mxu0 }
 0x209   : > { %v1862_v59 = vpop.f32.mrf.mxu2 }
 0x20a   : > { %v1876_v1 = vadd.f32 %v1862_v59, %v1765_v49 }
 0x20e   : > { %v1482_v30 = vpop.f32.mrf.mxu3 }
 0x20f   : > { %v1493_v29 = vadd.f32 %v1482_v30, %v1382_v13 }
 0x211   : > { %v4292_v54 = vadd.f32 %v1632_v28, %v1493_v29  ;;  %v1492_v29 = vadd.f32 %v4282_v8, %v1381_v35  ;;  %v1864_v55 = vpop.f32.mrf.mxu2 }
 0x213   : > { %v1642_v61 = vadd.f32 %v4270_v37, %v1492_v29  ;;  %v1383_v37 = vadd.f32 %v4280_v19, %v4240_v6 }
 0x216   : > { %v4302_v17 = vpop.f32.mrf.mxu3 }
 0x21e   : > { %v2002_v62 = vpop.f32.mrf.mxu3 }
 0x21f   : > { %v2022_v46 = vadd.f32 %v2002_v62, %v1872_v20  ;;  %v1766_v20 = vadd.f32 %v1753_v43, %v1642_v61 }
 0x221   : > { %v2146_v38 = vadd.f32 %v2126_v21, %v2022_v46  ;;  %v2136_v21 = vpop.f32.mrf.mxu0  ;;  %v1877_v62 = vadd.f32 %v1864_v55, %v1766_v20  ;;  %v1756_v46 = vpop.f32.mrf.mxu1 }
 0x223   : > { %v2158_v13 = vmul.f32 %v4311_v3, %v2146_v38  ;;  %v1494_v38 = vadd.f32 %v4302_v17, %v1383_v37 }
 0x225   : > { %v2170_v36 = vadd.f32 %v4318_v45, %v2158_v13 }
 0x226   : > { %v2004_v14 = vpop.f32.mrf.mxu3 }
 0x227   : > { %v2023_v63 = vadd.f32 %v2004_v14, %v1873_v58  ;;  %v2178_v23 = vmax.f32 %v2170_v36, 0.0  ;;  %v1867_v14 = vpop.f32.mrf.mxu2 }
 0x229   : > { %v2147_v56 = vadd.f32 %v2128_v11, %v2023_v63  ;;  %v2138_v52 = vpop.f32.mrf.mxu0  ;;  %v1644_v63 = vadd.f32 %v4290_v27, %v1494_v38 }
 0x22b   : > { %v2159_v32 = vmul.f32 %v4311_v3, %v2147_v56 }
 0x22d   : > { %v2171_v42 = vadd.f32 %v4318_v45, %v2159_v32  ;;  %v1758_v32 = vpop.f32.mrf.mxu1 }
 0x22e   : > { %v2007_v26 = vpop.f32.mrf.mxu3  ;;  %v1768_v53 = vadd.f32 %v1758_v32, %v1644_v63 }
 0x22f   : > { %v2179_v7 = vmax.f32 %v2171_v42, 0.0  ;;  %v2024_v28 = vadd.f32 %v2007_v26, %v1874_v31 }
 0x231   : > { %v2186_v51 = vpack.c.bf16 %v2179_v7, %v2178_v23  ;;  %v2148_v15 = vadd.f32 %v2131_v5, %v2024_v28  ;;  %v1767_v5 = vadd.f32 %v1756_v46, %v4292_v54  ;;  %v2141_v56 = vpop.f32.mrf.mxu0  ;;  %v1869_v54 = vpop.f32.mrf.mxu2 }
 0x232   : > { %v1879_v42 = vadd.f32 %v1869_v54, %v1768_v53 }
 0x233   : > { %2900 = vmatmul.msk.bf16.vlgmr.msra.gmra.mxu1 %vm4613_vm11, %v2186_v51  ;;  %2904 = vmatmul.msk.bf16.vlgmr.msrb.gmra.mxu2 %vm4614_vm6, %v2186_v51  ;;  %v2160_v47 = vmul.f32 %v4311_v3, %v2148_v15  ;;  %v1878_v10 = vadd.f32 %v1867_v14, %v1767_v5 }
 0x235   : > { %v2172_v16 = vadd.f32 %v4318_v45, %v2160_v47  ;;  %v363_v47 = vld [vmem:[%s3131_s28] sm:$0xff] }
 0x236   : > { %v2009_v48 = vpop.f32.mrf.mxu3 }
 0x237   : > { %v2025_v30 = vadd.f32 %v2009_v48, %v1875_v22  ;;  %v2180_v0 = vmax.f32 %v2172_v16, 0.0  ;;  %v2308_v22 = vld [vmem:[%s4434_s8] sm:$0x3]  ;;  %v2353_v16 = vunpack.c.h.bf16 %v363_v47 }
 0x238   : > { %v4357_v59 = vperm.slane %v2308_v22, 0 }
 0x239   : > { %v2149_v25 = vadd.f32 %v2133_v39, %v2025_v30  ;;  %v2143_v23 = vpop.f32.mrf.mxu0  ;;  %v4366_v30 = vperm.slane %v2308_v22, 1 }
 0x23b   : > { %v2161_v24 = vmul.f32 %v4311_v3, %v2149_v25  ;;  %v2352_v25 = vunpack.c.l.bf16 %v363_v47 }
 0x23d   : > { %v2173_v44 = vadd.f32 %v4318_v45, %v2161_v24 }
 0x23e   : > { %v2012_v50 = vpop.f32.mrf.mxu3 }
 0x23f   : > { %v2026_v18 = vadd.f32 %v2012_v50, %v1876_v1  ;;  %v2181_v11 = vmax.f32 %v2173_v44, 0.0  ;;  %v364_v50 = vld [vmem:[%s3131_s28 + $0x8] sm:$0xff] }
 0x241   : > { %v2187_v8 = vpack.c.bf16 %v2181_v11, %v2180_v0  ;;  %v2150_v2 = vadd.f32 %v2136_v21, %v2026_v18 }
 0x243   : > { %2901 = vmatmul.msk.bf16.gmra.mxu1 %vm4581_vm0, %v2187_v8  ;;  %2905 = vmatmul.msk.bf16.gmra.mxu2 %vm4615_vm10, %v2187_v8  ;;  %v2162_v34 = vmul.f32 %v4311_v3, %v2150_v2  ;;  %v2354_v8 = vunpack.c.l.bf16 %v364_v50 }
 0x245   : > { %v2174_v13 = vadd.f32 %v4318_v45, %v2162_v34 }
 0x246   : > { %v2014_v40 = vpop.f32.mrf.mxu3 }
 0x247   : > { %v2027_v4 = vadd.f32 %v2014_v40, %v1877_v62  ;;  %v2182_v33 = vmax.f32 %v2174_v13, 0.0  ;;  %v2355_v62 = vunpack.c.h.bf16 %v364_v50 }
 0x249   : > { %v2151_v58 = vadd.f32 %v2138_v52, %v2027_v4  ;;  %v365_v4 = vld [vmem:[%s3131_s28 + $0x10] sm:$0xff] }
 0x24b   : > { %v2163_v41 = vmul.f32 %v4311_v3, %v2151_v58 }
 0x24d   : > { %v2175_v12 = vadd.f32 %v4318_v45, %v2163_v41  ;;  %v2356_v41 = vunpack.c.l.bf16 %v365_v4 }
 0x24e   : > { %v2017_v6 = vpop.f32.mrf.mxu3 }
 0x24f   : > { %v2028_v19 = vadd.f32 %v2017_v6, %v1878_v10  ;;  %v2183_v36 = vmax.f32 %v2175_v12, 0.0  ;;  %v2357_v12 = vunpack.c.h.bf16 %v365_v4 }
 0x251   : > { %v2188_v17 = vpack.c.bf16 %v2183_v36, %v2182_v33  ;;  %v2152_v57 = vadd.f32 %v2141_v56, %v2028_v19  ;;  %v366_v36 = vld [vmem:[%s3131_s28 + $0x18] sm:$0xff] }
 0x252   : > { %v2358_v54 = vunpack.c.l.bf16 %v366_v36 }
 0x253   : > { %2902 = vmatmul.msk.bf16.gmra.mxu1 %vm4616_vm8, %v2188_v17  ;;  %2906 = vmatmul.msk.bf16.gmra.mxu2 %vm4617_vm1, %v2188_v17  ;;  %v2164_v27 = vmul.f32 %v4311_v3, %v2152_v57 }
 0x255   : > { %v2176_v39 = vadd.f32 %v4318_v45, %v2164_v27 }
 0x256   : > { %v2019_v31 = vpop.f32.mrf.mxu3 }
 0x257   : > { %v2029_v26 = vadd.f32 %v2019_v31, %v1879_v42  ;;  %v2184_v60 = vmax.f32 %v2176_v39, 0.0 }
 0x259   : > { %v2153_v7 = vadd.f32 %v2143_v23, %v2029_v26  ;;  %v2359_v26 = vunpack.c.h.bf16 %v366_v36 }
 0x25b   : > { %v2165_v28 = vmul.f32 %v4311_v3, %v2153_v7  ;;  %v2330_v3 = vld [vmem:[%s4435_s9] sm:$0x3] }
 0x25c   : > { %v4363_v35 = vperm.slane %v2330_v3, 0  ;;  %v4369_v49 = vperm.slane %v2330_v3, 1 }
 0x25d   : > { %v2177_v51 = vadd.f32 %v4318_v45, %v2165_v28 }
 0x25f   : > { %v2185_v9 = vmax.f32 %v2177_v51, 0.0  ;;  %v367_v51 = vld [vmem:[%s3131_s28 + $0x20] sm:$0xff] }
 0x260   : > { %v2360_v3 = vunpack.c.l.bf16 %v367_v51 }
 0x261   : > { %v2189_v15 = vpack.c.bf16 %v2185_v9, %v2184_v60 }
 0x263   : > { %2903 = vmatmul.msk.bf16.gmra.mxu1 %vm4618_vm14, %v2189_v15  ;;  %2907 = vmatmul.msk.bf16.gmra.mxu2 %vm4619_vm2, %v2189_v15 }
 0x2b0   : > { %v2259_v48 = vpop.f32.mrf.mxu1 }
 0x2b1   : > { %v2314_v45 = vmul.f32 %v4357_v59, %v2259_v48 }
 0x2b3   : > { %v2336_v29 = vadd.f32 %v4363_v35, %v2314_v45 }
 0x2b5   : > { %v2368_v61 = vadd.f32 %v2352_v25, %v2336_v29  ;;  %v2361_v29 = vunpack.c.h.bf16 %v367_v51 }
 0x2b6   : > { %v2288_v21 = vpop.f32.mrf.mxu2 }
 0x2b7   : > { %v2315_v24 = vmul.f32 %v4366_v30, %v2288_v21  ;;  %v2384_v0 = vmax.f32 %v2368_v61, 0.0 }
 0x2b8   : > { %v2261_v43 = vpop.f32.mrf.mxu1 }
 0x2b9   : > { %v2337_v1 = vadd.f32 %v4369_v49, %v2315_v24  ;;  %v2316_v44 = vmul.f32 %v4357_v59, %v2261_v43  ;;  %v368_v43 = vld [vmem:[%s3131_s28 + $0x28] sm:$0xff] }
 0x2bb   : > { %v2369_v18 = vadd.f32 %v2353_v16, %v2337_v1  ;;  %v2338_v55 = vadd.f32 %v4363_v35, %v2316_v44 }
 0x2bd   : > { %v2385_v11 = vmax.f32 %v2369_v18, 0.0  ;;  %v2370_v40 = vadd.f32 %v2354_v8, %v2338_v55  ;;  %v2362_v18 = vunpack.c.l.bf16 %v368_v43  ;;  %v2363_v8 = vunpack.c.h.bf16 %v368_v43 }
 0x2be   : > { %v2290_v20 = vpop.f32.mrf.mxu2 }
 0x2bf   : > { %v2400_v2 = vpack.c.bf16 %v2385_v11, %v2384_v0  ;;  %v2317_v52 = vmul.f32 %v4366_v30, %v2290_v20  ;;  %v2386_v58 = vmax.f32 %v2370_v40, 0.0 }
 0x2c0   : > { %v2264_v46 = vpop.f32.mrf.mxu1 }
 0x2c1   : > { %2408 = vst [vmem:[%s4381_s22] sm:$0xff] %v2400_v2  ;;  %v2339_v37 = vadd.f32 %v4369_v49, %v2317_v52  ;;  %v2318_v34 = vmul.f32 %v4357_v59, %v2264_v46  ;;  %v369_v46 = vld [vmem:[%s3131_s28 + $0x30] sm:$0xff] }
 0x2c3   : > { %v2371_v38 = vadd.f32 %v2355_v62, %v2339_v37  ;;  %v2340_v14 = vadd.f32 %v4363_v35, %v2318_v34 }
 0x2c5   : > { %v2387_v5 = vmax.f32 %v2371_v38, 0.0  ;;  %v2372_v6 = vadd.f32 %v2356_v41, %v2340_v14  ;;  %v2364_v38 = vunpack.c.l.bf16 %v369_v46  ;;  %v2365_v41 = vunpack.c.h.bf16 %v369_v46 }
 0x2c6   : > { %v2293_v13 = vpop.f32.mrf.mxu2 }
 0x2c7   : > { %v2401_v63 = vpack.c.bf16 %v2387_v5, %v2386_v58  ;;  %v2319_v10 = vmul.f32 %v4366_v30, %v2293_v13  ;;  %v2388_v17 = vmax.f32 %v2372_v6, 0.0 }
 0x2c8   : > { %v2266_v56 = vpop.f32.mrf.mxu1 }
 0x2c9   : > { %2409 = vst [vmem:[%s4381_s22 + $0x8] sm:$0xff] %v2401_v63  ;;  %v2341_v19 = vadd.f32 %v4369_v49, %v2319_v10  ;;  %v2320_v33 = vmul.f32 %v4357_v59, %v2266_v56  ;;  %v370_v56 = vld [vmem:[%s3131_s28 + $0x38] sm:$0xff] }
 0x2cb   : > { %v2373_v32 = vadd.f32 %v2357_v12, %v2341_v19  ;;  %v2342_v57 = vadd.f32 %v4363_v35, %v2320_v33 }
 0x2cd   : > { %v2389_v53 = vmax.f32 %v2373_v32, 0.0  ;;  %v2374_v7 = vadd.f32 %v2358_v54, %v2342_v57  ;;  %v2366_v32 = vunpack.c.l.bf16 %v370_v56  ;;  %v2367_v54 = vunpack.c.h.bf16 %v370_v56 }
 0x2ce   : > { %v2295_v42 = vpop.f32.mrf.mxu2 }
 0x2cf   : > { %v2402_v31 = vpack.c.bf16 %v2389_v53, %v2388_v17  ;;  %v2321_v27 = vmul.f32 %v4366_v30, %v2295_v42  ;;  %v2390_v9 = vmax.f32 %v2374_v7, 0.0 }
 0x2d0   : > { %v2269_v23 = vpop.f32.mrf.mxu1 }
 0x2d1   : > { %2410 = vst [vmem:[%s4381_s22 + $0x10] sm:$0xff] %v2402_v31  ;;  %v2343_v28 = vadd.f32 %v4369_v49, %v2321_v27  ;;  %v2322_v39 = vmul.f32 %v4357_v59, %v2269_v23 }
 0x2d3   : > { %v2375_v60 = vadd.f32 %v2359_v26, %v2343_v28  ;;  %v2344_v22 = vadd.f32 %v4363_v35, %v2322_v39 }
 0x2d5   : > { %v2391_v15 = vmax.f32 %v2375_v60, 0.0  ;;  %v2376_v21 = vadd.f32 %v2360_v3, %v2344_v22 }
 0x2d6   : > { %v2298_v48 = vpop.f32.mrf.mxu2 }
 0x2d7   : > { %v2403_v45 = vpack.c.bf16 %v2391_v15, %v2390_v9  ;;  %v2323_v47 = vmul.f32 %v4366_v30, %v2298_v48  ;;  %v2392_v1 = vmax.f32 %v2376_v21, 0.0 }
 0x2d8   : > { %v2271_v25 = vpop.f32.mrf.mxu1 }
 0x2d9   : > { %2411 = vst [vmem:[%s4381_s22 + $0x18] sm:$0xff] %v2403_v45  ;;  %v2345_v24 = vadd.f32 %v4369_v49, %v2323_v47  ;;  %v2324_v16 = vmul.f32 %v4357_v59, %v2271_v25 }
 0x2db   : > { %v2377_v61 = vadd.f32 %v2361_v29, %v2345_v24  ;;  %v2346_v50 = vadd.f32 %v4363_v35, %v2324_v16 }
 0x2dd   : > { %v2393_v44 = vmax.f32 %v2377_v61, 0.0  ;;  %v2378_v2 = vadd.f32 %v2362_v18, %v2346_v50 }
 0x2de   : > { %v2300_v0 = vpop.f32.mrf.mxu2 }
 0x2df   : > { %v2404_v11 = vpack.c.bf16 %v2393_v44, %v2392_v1  ;;  %v2325_v55 = vmul.f32 %v4366_v30, %v2300_v0  ;;  %v2394_v37 = vmax.f32 %v2378_v2, 0.0 }
 0x2e0   : > { %v2274_v20 = vpop.f32.mrf.mxu1 }
 0x2e1   : > { %2412 = vst [vmem:[%s4381_s22 + $0x20] sm:$0xff] %v2404_v11  ;;  %v2347_v52 = vadd.f32 %v4369_v49, %v2325_v55  ;;  %v2326_v62 = vmul.f32 %v4357_v59, %v2274_v20 }
 0x2e3   : > { %v2379_v40 = vadd.f32 %v2363_v8, %v2347_v52  ;;  %v2348_v4 = vadd.f32 %v4363_v35, %v2326_v62 }
 0x2e5   : > { %v2395_v34 = vmax.f32 %v2379_v40, 0.0  ;;  %v2380_v63 = vadd.f32 %v2364_v38, %v2348_v4 }
 0x2e6   : > { %v2303_v58 = vpop.f32.mrf.mxu2 }
 0x2e7   : > { %v2405_v5 = vpack.c.bf16 %v2395_v34, %v2394_v37  ;;  %v2327_v14 = vmul.f32 %v4366_v30, %v2303_v58  ;;  %v2396_v19 = vmax.f32 %v2380_v63, 0.0 }
 0x2e8   : > { %v2276_v13 = vpop.f32.mrf.mxu1 }
 0x2e9   : > { %2413 = vst [vmem:[%s4381_s22 + $0x28] sm:$0xff] %v2405_v5  ;;  %v2349_v10 = vadd.f32 %v4369_v49, %v2327_v14  ;;  %v2328_v12 = vmul.f32 %v4357_v59, %v2276_v13 }
 0x2eb   : > { %v2381_v6 = vadd.f32 %v2365_v41, %v2349_v10  ;;  %v2350_v36 = vadd.f32 %v4363_v35, %v2328_v12 }
 0x2ed   : > { %v2397_v33 = vmax.f32 %v2381_v6, 0.0  ;;  %v2382_v42 = vadd.f32 %v2366_v32, %v2350_v36 }
 0x2ee   : > { %v2305_v17 = vpop.f32.mrf.mxu2 }
 0x2ef   : > { %v2406_v53 = vpack.c.bf16 %v2397_v33, %v2396_v19  ;;  %v2329_v57 = vmul.f32 %v4366_v30, %v2305_v17  ;;  %v2398_v26 = vmax.f32 %v2382_v42, 0.0 }
 0x2f1   : > { %2414 = vst [vmem:[%s4381_s22 + $0x30] sm:$0xff] %v2406_v53  ;;  %v2351_v31 = vadd.f32 %v4369_v49, %v2329_v57 }
 0x2f3   : > { %v2383_v27 = vadd.f32 %v2367_v54, %v2351_v31 }
 0x2f5   : > { %v2399_v59 = vmax.f32 %v2383_v27, 0.0 }
 0x2f7   : > { %v2407_v23 = vpack.c.bf16 %v2399_v59, %v2398_v26 }
 0x2f9   : > { %2415 = vst [vmem:[%s4381_s22 + $0x38] sm:$0xff] %v2407_v23 }
 0x2fa PF: > { %s20_s13 = sadd.s32 1, %s3015_s13  }
 0x2fb   : > { %p17_p4 = scmp.ge.s32.totalorder %s20_s13, 4  }
 0x2fd   :  { %19 = sbr.rel (!%p17_p4) target bundleno = 1 (0x1), region = 98 }

// kernel: extractor_resnet152_forward.21
= control target key start
LH: loop header
LB: loop body
LE: loop exit
PB: predicated region body
PF: predicated region fallthrough
CT: control target
= control target key end

     0   :  { %s1740_s1 = inlined_call_operand.vmem [shape: bf16[1152,128], index: 1, kind: input, shape index: {}]   ;;  %s1741_s0 = inlined_call_operand.vmem [shape: bf16[32,1152], index: 0, kind: input, shape index: {}]   ;;  %s1742_s2 = inlined_call_operand.vmem [shape: f32[1,128], index: 2, kind: input, shape index: {}]   ;;  %s1743_s3 = inlined_call_operand.vmem [shape: f32[1,128], index: 3, kind: input, shape index: {}]   ;;  %s1744_s4 = inlined_call_operand.vmem [shape: bf16[32,128], index: 4, kind: output, shape index: {}]  }
   0x1   :  { %v1293_v0 = vld [vmem:[%s1740_s1 + $0x38] sm:$0xff]  ;;  %v1292_v4 = vld [vmem:[%s1740_s1 + $0x30] sm:$0xff]  ;;  %v1291_v8 = vld [vmem:[%s1740_s1 + $0x28] sm:$0xff] }
   0x2   :  { %v1301_v1 = vld [vmem:[%s1740_s1 + $0x78] sm:$0xff]  ;;  %705 = vmatpush.bf16.msra.mxu0 %v1293_v0  ;;  %v1300_v5 = vld [vmem:[%s1740_s1 + $0x70] sm:$0xff]  ;;  %v1299_v9 = vld [vmem:[%s1740_s1 + $0x68] sm:$0xff] }
   0x3   :  { %v1309_v2 = vld [vmem:[%s1740_s1 + $0xb8] sm:$0xff]  ;;  %724 = vmatpush.bf16.msra.mxu1 %v1301_v1  ;;  %v1308_v6 = vld [vmem:[%s1740_s1 + $0xb0] sm:$0xff]  ;;  %v1307_v10 = vld [vmem:[%s1740_s1 + $0xa8] sm:$0xff] }
   0x4   :  { %v1317_v3 = vld [vmem:[%s1740_s1 + $0xf8] sm:$0xff]  ;;  %743 = vmatpush.bf16.msra.mxu2 %v1309_v2  ;;  %v1316_v7 = vld [vmem:[%s1740_s1 + $0xf0] sm:$0xff]  ;;  %v1315_v11 = vld [vmem:[%s1740_s1 + $0xe8] sm:$0xff] }
   0x5   :  { %762 = vmatpush.bf16.msra.mxu3 %v1317_v3  ;;  %v1290_v12 = vld [vmem:[%s1740_s1 + $0x20] sm:$0xff]  ;;  %v1289_v16 = vld [vmem:[%s1740_s1 + $0x18] sm:$0xff]  ;;  %v1288_v20 = vld [vmem:[%s1740_s1 + $0x10] sm:$0xff] }
   0x6   :  { %706 = vmatpush.bf16.msra.mxu0 %v1292_v4  ;;  %v1298_v13 = vld [vmem:[%s1740_s1 + $0x60] sm:$0xff]  ;;  %v1297_v17 = vld [vmem:[%s1740_s1 + $0x58] sm:$0xff]  ;;  %v1296_v21 = vld [vmem:[%s1740_s1 + $0x50] sm:$0xff] }
   0x7   :  { %725 = vmatpush.bf16.msra.mxu1 %v1300_v5  ;;  %v1306_v14 = vld [vmem:[%s1740_s1 + $0xa0] sm:$0xff]  ;;  %v1305_v18 = vld [vmem:[%s1740_s1 + $0x98] sm:$0xff]  ;;  %v1304_v22 = vld [vmem:[%s1740_s1 + $0x90] sm:$0xff] }
   0x8   :  { %744 = vmatpush.bf16.msra.mxu2 %v1308_v6  ;;  %v1314_v15 = vld [vmem:[%s1740_s1 + $0xe0] sm:$0xff]  ;;  %v1313_v19 = vld [vmem:[%s1740_s1 + $0xd8] sm:$0xff]  ;;  %v1312_v23 = vld [vmem:[%s1740_s1 + $0xd0] sm:$0xff] }
   0x9   :  { %763 = vmatpush.bf16.msra.mxu3 %v1316_v7  ;;  %v1287_v24 = vld [vmem:[%s1740_s1 + $0x8] sm:$0xff]  ;;  %v1286_v28 = vld [vmem:[%s1740_s1] sm:$0xff]  ;;  %v920_v39 = vld [vmem:[%s1741_s0 + $0x2c] sm:$0xf0] }
   0xa   :  { %707 = vmatpush.bf16.msra.mxu0 %v1291_v8  ;;  %v1295_v25 = vld [vmem:[%s1740_s1 + $0x48] sm:$0xff]  ;;  %v1294_v29 = vld [vmem:[%s1740_s1 + $0x40] sm:$0xff]  ;;  %v1325_v40 = vld [vmem:[%s1740_s1 + $0x138] sm:$0xff] }
   0xb   :  { %726 = vmatpush.bf16.msra.mxu1 %v1299_v9  ;;  %v1303_v26 = vld [vmem:[%s1740_s1 + $0x88] sm:$0xff]  ;;  %v1302_v30 = vld [vmem:[%s1740_s1 + $0x80] sm:$0xff]  ;;  %v1333_v41 = vld [vmem:[%s1740_s1 + $0x178] sm:$0xff] }
   0xc   :  { %745 = vmatpush.bf16.msra.mxu2 %v1307_v10  ;;  %v1311_v27 = vld [vmem:[%s1740_s1 + $0xc8] sm:$0xff]  ;;  %v1310_v31 = vld [vmem:[%s1740_s1 + $0xc0] sm:$0xff]  ;;  %v1341_v46 = vld [vmem:[%s1740_s1 + $0x1b8] sm:$0xff] }
   0xd   :  { %764 = vmatpush.bf16.msra.mxu3 %v1315_v11  ;;  %v910_v32 = vld [vmem:[%s1741_s0] sm:$0xf]  ;;  %v1272_v33 = vld [vmem:[%s1741_s0 + $0x20] sm:$0xf0]  ;;  %v912_v35 = vld [vmem:[%s1741_s0 + $0x24] sm:$0xf0] }
   0xe   :  { %708 = vmatpush.bf16.msra.mxu0 %v1290_v12  ;;  %v1268_v34 = vld [vmem:[%s1741_s0 + $0x4] sm:$0xf]  ;;  %v918_v36 = vld [vmem:[%s1741_s0 + $0x8] sm:$0xf]  ;;  %v1273_v37 = vld [vmem:[%s1741_s0 + $0x28] sm:$0xf0]  ;;  %v911_v42 = vor.u32 %v1272_v33, %v910_v32 }
   0xf   :  { %727 = vmatpush.bf16.msra.mxu1 %v1298_v13  ;;  %v1269_v38 = vld [vmem:[%s1741_s0 + $0xc] sm:$0xf]  ;;  %v915_v43 = vor.u32 %v1268_v34, %v912_v35  ;;  %v919_v44 = vor.u32 %v1273_v37, %v918_v36  ;;  %v1349_v47 = vld [vmem:[%s1740_s1 + $0x1f8] sm:$0xff]  ;;  %v1324_v48 = vld [vmem:[%s1740_s1 + $0x130] sm:$0xff] }
  0x10   :  { %746 = vmatpush.bf16.msra.mxu2 %v1306_v14  ;;  %v923_v45 = vor.u32 %v1269_v38, %v920_v39  ;;  %v1332_v49 = vld [vmem:[%s1740_s1 + $0x170] sm:$0xff]  ;;  %v1323_v52 = vld [vmem:[%s1740_s1 + $0x128] sm:$0xff]  ;;  %v1322_v56 = vld [vmem:[%s1740_s1 + $0x120] sm:$0xff] }
  0x11   :  { %765 = vmatpush.bf16.msra.mxu3 %v1314_v15  ;;  %v1340_v50 = vld [vmem:[%s1740_s1 + $0x1b0] sm:$0xff]  ;;  %v1331_v53 = vld [vmem:[%s1740_s1 + $0x168] sm:$0xff]  ;;  %v1330_v57 = vld [vmem:[%s1740_s1 + $0x160] sm:$0xff] }
  0x12   :  { %709 = vmatpush.bf16.msra.mxu0 %v1289_v16  ;;  %v1348_v51 = vld [vmem:[%s1740_s1 + $0x1f0] sm:$0xff]  ;;  %v1339_v54 = vld [vmem:[%s1740_s1 + $0x1a8] sm:$0xff]  ;;  %v1338_v58 = vld [vmem:[%s1740_s1 + $0x1a0] sm:$0xff] }
  0x13   :  { %728 = vmatpush.bf16.msra.mxu1 %v1297_v17  ;;  %v1347_v55 = vld [vmem:[%s1740_s1 + $0x1e8] sm:$0xff]  ;;  %v1346_v59 = vld [vmem:[%s1740_s1 + $0x1e0] sm:$0xff]  ;;  %v948_v63 = vld [vmem:[%s1741_s0 + $0x6c] sm:$0xf0] }
  0x14   :  { %747 = vmatpush.bf16.msra.mxu2 %v1305_v18  ;;  %v946_v60 = vld [vmem:[%s1741_s0 + $0x48] sm:$0xf]  ;;  %v1281_v61 = vld [vmem:[%s1741_s0 + $0x68] sm:$0xf0]  ;;  %v954_v0 = vld [vmem:[%s1741_s0 + $0x50] sm:$0xf] }
  0x15   :  { %766 = vmatpush.bf16.msra.mxu3 %v1313_v19  ;;  %v1277_v62 = vld [vmem:[%s1741_s0 + $0x4c] sm:$0xf]  ;;  %v1282_v1 = vld [vmem:[%s1741_s0 + $0x70] sm:$0xf0]  ;;  %v956_v3 = vld [vmem:[%s1741_s0 + $0x74] sm:$0xf0]  ;;  %v947_v6 = vor.u32 %v1281_v61, %v946_v60 }
  0x16   :  { %710 = vmatpush.bf16.msra.mxu0 %v1288_v20  ;;  %v1278_v2 = vld [vmem:[%s1741_s0 + $0x54] sm:$0xf]  ;;  %v1321_v4 = vld [vmem:[%s1740_s1 + $0x118] sm:$0xff]  ;;  %v951_v7 = vor.u32 %v1277_v62, %v948_v63  ;;  %v955_v8 = vor.u32 %v1282_v1, %v954_v0  ;;  %v1319_v16 = vld [vmem:[%s1740_s1 + $0x108] sm:$0xff] }
  0x17   :  { %729 = vmatpush.bf16.msra.mxu1 %v1296_v21  ;;  %v1329_v5 = vld [vmem:[%s1740_s1 + $0x158] sm:$0xff]  ;;  %v959_v9 = vor.u32 %v1278_v2, %v956_v3  ;;  %v1320_v12 = vld [vmem:[%s1740_s1 + $0x110] sm:$0xff]  ;;  %v1327_v17 = vld [vmem:[%s1740_s1 + $0x148] sm:$0xff] }
  0x18   :  { %748 = vmatpush.bf16.msra.mxu2 %v1304_v22  ;;  %v1337_v10 = vld [vmem:[%s1740_s1 + $0x198] sm:$0xff]  ;;  %v1328_v13 = vld [vmem:[%s1740_s1 + $0x150] sm:$0xff]  ;;  %v1335_v18 = vld [vmem:[%s1740_s1 + $0x188] sm:$0xff] }
  0x19   :  { %767 = vmatpush.bf16.msra.mxu3 %v1312_v23  ;;  %v1345_v11 = vld [vmem:[%s1740_s1 + $0x1d8] sm:$0xff]  ;;  %v1336_v14 = vld [vmem:[%s1740_s1 + $0x190] sm:$0xff]  ;;  %v1343_v19 = vld [vmem:[%s1740_s1 + $0x1c8] sm:$0xff] }
  0x1a   :  { %711 = vmatpush.bf16.msra.mxu0 %v1287_v24  ;;  %v1344_v15 = vld [vmem:[%s1740_s1 + $0x1d0] sm:$0xff]  ;;  %v1318_v20 = vld [vmem:[%s1740_s1 + $0x100] sm:$0xff]  ;;  %v1355_v38 = vld [vmem:[%s1740_s1 + $0x228] sm:$0xff] }
  0x1b   :  { %730 = vmatpush.bf16.msra.mxu1 %v1295_v25  ;;  %v1326_v21 = vld [vmem:[%s1740_s1 + $0x140] sm:$0xff]  ;;  %v926_v24 = vld [vmem:[%s1741_s0 + $0x10] sm:$0xf]  ;;  %v1274_v25 = vld [vmem:[%s1741_s0 + $0x30] sm:$0xf0] }
  0x1c   :  { %749 = vmatpush.bf16.msra.mxu2 %v1303_v26  ;;  %v1334_v22 = vld [vmem:[%s1740_s1 + $0x180] sm:$0xff]  ;;  %v1357_v26 = vld [vmem:[%s1740_s1 + $0x238] sm:$0xff]  ;;  %v927_v33 = vor.u32 %v1274_v25, %v926_v24  ;;  %v1356_v37 = vld [vmem:[%s1740_s1 + $0x230] sm:$0xff] }
  0x1d   :  { %768 = vmatpush.bf16.msra.mxu3 %v1311_v27  ;;  %v1342_v23 = vld [vmem:[%s1740_s1 + $0x1c0] sm:$0xff]  ;;  %v1270_v27 = vld [vmem:[%s1741_s0 + $0x14] sm:$0xf] }
  0x1e   :  { %712 = vmatpush.bf16.msra.mxu0 %v1286_v28  ;;  %v928_v28 = vld [vmem:[%s1741_s0 + $0x34] sm:$0xf0]  ;;  %v936_v32 = vld [vmem:[%s1741_s0 + $0x3c] sm:$0xf0] }
  0x1f   :  { %731 = vmatpush.bf16.msra.mxu1 %v1294_v29  ;;  %v934_v29 = vld [vmem:[%s1741_s0 + $0x18] sm:$0xf]  ;;  %v931_v34 = vor.u32 %v1270_v27, %v928_v28  ;;  %v1354_v39 = vld [vmem:[%s1740_s1 + $0x220] sm:$0xff] }
  0x20   :  { %750 = vmatpush.bf16.msra.mxu2 %v1302_v30  ;;  %v1275_v30 = vld [vmem:[%s1741_s0 + $0x38] sm:$0xf0] }
  0x21   :  { %769 = vmatpush.bf16.msra.mxu3 %v1310_v31  ;;  %713 = vmatmul.bf16.vlgmr.msra.gmra.mxu0 %v911_v42  ;;  %v1271_v31 = vld [vmem:[%s1741_s0 + $0x1c] sm:$0xf]  ;;  %v935_v35 = vor.u32 %v1275_v30, %v934_v29 }
  0x22   :  { %781 = vmatpush.bf16.msrb.mxu0 %v1325_v40  ;;  %732 = vmatmul.bf16.vlgmr.msra.gmra.mxu1 %v915_v43  ;;  %v939_v36 = vor.u32 %v1271_v31, %v936_v32  ;;  %v962_v40 = vld [vmem:[%s1741_s0 + $0x58] sm:$0xf]  ;;  %v1279_v42 = vld [vmem:[%s1741_s0 + $0x5c] sm:$0xf]  ;;  %v964_v43 = vld [vmem:[%s1741_s0 + $0x7c] sm:$0xf0] }
  0x23   :  { %800 = vmatpush.bf16.msrb.mxu1 %v1333_v41  ;;  %751 = vmatmul.bf16.vlgmr.msra.gmra.mxu2 %v919_v44  ;;  %v1283_v41 = vld [vmem:[%s1741_s0 + $0x78] sm:$0xf0]  ;;  %v970_v44 = vld [vmem:[%s1741_s0 + $0x60] sm:$0xf] }
  0x24   :  { %770 = vmatmul.bf16.vlgmr.msra.gmra.mxu3 %v923_v45  ;;  %819 = vmatpush.bf16.msrb.mxu2 %v1341_v46  ;;  %v1284_v45 = vld [vmem:[%s1741_s0 + $0x80] sm:$0xf0] }
  0x25   :  { %838 = vmatpush.bf16.msrb.mxu3 %v1349_v47  ;;  %v1280_v46 = vld [vmem:[%s1741_s0 + $0x64] sm:$0xf]  ;;  %v972_v47 = vld [vmem:[%s1741_s0 + $0x84] sm:$0xf0] }
  0x26   :  { %782 = vmatpush.bf16.msrb.mxu0 %v1324_v48  ;;  %v1353_v48 = vld [vmem:[%s1740_s1 + $0x218] sm:$0xff] }
  0x27   :  { %801 = vmatpush.bf16.msrb.mxu1 %v1332_v49  ;;  %v963_v49 = vor.u32 %v1283_v41, %v962_v40 }
  0x28   :  { %820 = vmatpush.bf16.msrb.mxu2 %v1340_v50  ;;  %v967_v50 = vor.u32 %v1279_v42, %v964_v43 }
  0x29   :  { %839 = vmatpush.bf16.msrb.mxu3 %v1348_v51  ;;  %v971_v51 = vor.u32 %v1284_v45, %v970_v44 }
  0x2a   :  { %783 = vmatpush.bf16.msrb.mxu0 %v1323_v52  ;;  %v975_v52 = vor.u32 %v1280_v46, %v972_v47 }
  0x2b   :  { %802 = vmatpush.bf16.msrb.mxu1 %v1331_v53  ;;  %v1352_v53 = vld [vmem:[%s1740_s1 + $0x210] sm:$0xff] }
  0x2c   :  { %821 = vmatpush.bf16.msrb.mxu2 %v1339_v54  ;;  %v1351_v54 = vld [vmem:[%s1740_s1 + $0x208] sm:$0xff] }
  0x2d   :  { %840 = vmatpush.bf16.msrb.mxu3 %v1347_v55  ;;  %v1350_v55 = vld [vmem:[%s1740_s1 + $0x200] sm:$0xff] }
  0x2e   :  { %784 = vmatpush.bf16.msrb.mxu0 %v1322_v56  ;;  %v942_v56 = vld [vmem:[%s1741_s0 + $0x20] sm:$0xf] }
  0x2f   :  { %803 = vmatpush.bf16.msrb.mxu1 %v1330_v57  ;;  %v1276_v57 = vld [vmem:[%s1741_s0 + $0x40] sm:$0xf0] }
  0x30   :  { %822 = vmatpush.bf16.msrb.mxu2 %v1338_v58  ;;  %v978_v58 = vld [vmem:[%s1741_s0 + $0x68] sm:$0xf]  ;;  %v943_v60 = vor.u32 %v1276_v57, %v942_v56 }
  0x31   :  { %841 = vmatpush.bf16.msrb.mxu3 %v1346_v59  ;;  %718 = vmatmul.bf16.gmra.mxu0 %v947_v6  ;;  %v1285_v59 = vld [vmem:[%s1741_s0 + $0x88] sm:$0xf0] }
  0x32   :  { %785 = vmatpush.bf16.msrb.mxu0 %v1321_v4  ;;  %737 = vmatmul.bf16.gmra.mxu1 %v951_v7  ;;  %v979_v61 = vor.u32 %v1285_v59, %v978_v58  ;;  %v1377_v58 = vld [vmem:[%s1742_s2] ss:$0 sm:$0xff] }
  0x33   :  { %804 = vmatpush.bf16.msrb.mxu1 %v1329_v5  ;;  %756 = vmatmul.bf16.gmra.mxu2 %v955_v8 }
  0x34   :  { %775 = vmatmul.bf16.gmra.mxu3 %v959_v9  ;;  %823 = vmatpush.bf16.msrb.mxu2 %v1337_v10 }
  0x35   :  { %842 = vmatpush.bf16.msrb.mxu3 %v1345_v11 }
  0x36   :  { %786 = vmatpush.bf16.msrb.mxu0 %v1320_v12 }
  0x37   :  { %805 = vmatpush.bf16.msrb.mxu1 %v1328_v13 }
  0x38   :  { %824 = vmatpush.bf16.msrb.mxu2 %v1336_v14 }
  0x39   :  { %843 = vmatpush.bf16.msrb.mxu3 %v1344_v15 }
  0x3a   :  { %787 = vmatpush.bf16.msrb.mxu0 %v1319_v16 }
  0x3b   :  { %806 = vmatpush.bf16.msrb.mxu1 %v1327_v17 }
  0x3c   :  { %825 = vmatpush.bf16.msrb.mxu2 %v1335_v18 }
  0x3d   :  { %844 = vmatpush.bf16.msrb.mxu3 %v1343_v19 }
  0x3e   :  { %788 = vmatpush.bf16.msrb.mxu0 %v1318_v20 }
  0x3f   :  { %807 = vmatpush.bf16.msrb.mxu1 %v1326_v21 }
  0x40   :  { %826 = vmatpush.bf16.msrb.mxu2 %v1334_v22 }
  0x41   :  { %845 = vmatpush.bf16.msrb.mxu3 %v1342_v23  ;;  %789 = vmatmul.bf16.vlgmr.msrb.gmra.mxu0 %v927_v33 }
  0x42   :  { %857 = vmatpush.bf16.msra.mxu0 %v1357_v26  ;;  %808 = vmatmul.bf16.vlgmr.msrb.gmra.mxu1 %v931_v34 }
  0x43   :  { %1369 = vmatpush.bf16.msra.mxu1 %v1357_v26  ;;  %827 = vmatmul.bf16.vlgmr.msrb.gmra.mxu2 %v935_v35 }
  0x44   :  { %846 = vmatmul.bf16.vlgmr.msrb.gmra.mxu3 %v939_v36 }
  0x46   :  { %858 = vmatpush.bf16.msra.mxu0 %v1356_v37 }
  0x47   :  { %1370 = vmatpush.bf16.msra.mxu1 %v1356_v37 }
  0x4a   :  { %859 = vmatpush.bf16.msra.mxu0 %v1355_v38 }
  0x4b   :  { %1371 = vmatpush.bf16.msra.mxu1 %v1355_v38 }
  0x4e   :  { %860 = vmatpush.bf16.msra.mxu0 %v1354_v39 }
  0x4f   :  { %1372 = vmatpush.bf16.msra.mxu1 %v1354_v39 }
  0x51   :  { %794 = vmatmul.bf16.gmra.mxu0 %v963_v49 }
  0x52   :  { %861 = vmatpush.bf16.msra.mxu0 %v1353_v48  ;;  %813 = vmatmul.bf16.gmra.mxu1 %v967_v50 }
  0x53   :  { %1373 = vmatpush.bf16.msra.mxu1 %v1353_v48  ;;  %832 = vmatmul.bf16.gmra.mxu2 %v971_v51 }
  0x54   :  { %851 = vmatmul.bf16.gmra.mxu3 %v975_v52 }
  0x56   :  { %862 = vmatpush.bf16.msra.mxu0 %v1352_v53 }
  0x57   :  { %1374 = vmatpush.bf16.msra.mxu1 %v1352_v53 }
  0x5a   :  { %863 = vmatpush.bf16.msra.mxu0 %v1351_v54 }
  0x5b   :  { %1375 = vmatpush.bf16.msra.mxu1 %v1351_v54 }
  0x5e   :  { %864 = vmatpush.bf16.msra.mxu0 %v1350_v55 }
  0x5f   :  { %1376 = vmatpush.bf16.msra.mxu1 %v1350_v55 }
  0x61   :  { %865 = vmatmul.bf16.vlgmr.msra.gmra.mxu0 %v943_v60 }
  0x62   :  { %870 = vmatmul.bf16.vlgmr.msra.gmra.mxu1 %v979_v61 }
  0x9e   :  { %v714_v62 = vpop.f32.mrf.mxu0 }
  0x9f   :  { %v733_v63 = vpop.f32.mrf.mxu1 }
  0xa0   :  { %v734_v20 = vadd.f32 %v733_v63, %v714_v62 }
  0xa6   :  { %v752_v0 = vpop.f32.mrf.mxu2  ;;  %v716_v2 = vpop.f32.mrf.mxu0 }
  0xa7   :  { %v771_v1 = vpop.f32.mrf.mxu3  ;;  %v735_v3 = vpop.f32.mrf.mxu1  ;;  %v753_v25 = vadd.f32 %v752_v0, %v734_v20  ;;  %v1378_v0 = vld [vmem:[%s1743_s3] ss:$0 sm:$0xff] }
  0xa8   :  { %v736_v29 = vadd.f32 %v735_v3, %v716_v2 }
  0xa9   :  { %v772_v28 = vadd.f32 %v771_v1, %v753_v25 }
  0xae   :  { %v754_v4 = vpop.f32.mrf.mxu2  ;;  %v719_v6 = vpop.f32.mrf.mxu0 }
  0xaf   :  { %v773_v5 = vpop.f32.mrf.mxu3  ;;  %v738_v7 = vpop.f32.mrf.mxu1  ;;  %v755_v32 = vadd.f32 %v754_v4, %v736_v29 }
  0xb0   :  { %v739_v21 = vadd.f32 %v738_v7, %v719_v6 }
  0xb1   :  { %v774_v39 = vadd.f32 %v773_v5, %v755_v32 }
  0xb6   :  { %v757_v8 = vpop.f32.mrf.mxu2  ;;  %v721_v10 = vpop.f32.mrf.mxu0 }
  0xb7   :  { %v776_v9 = vpop.f32.mrf.mxu3  ;;  %v740_v11 = vpop.f32.mrf.mxu1  ;;  %v758_v26 = vadd.f32 %v757_v8, %v739_v21 }
  0xb8   :  { %v741_v31 = vadd.f32 %v740_v11, %v721_v10 }
  0xb9   :  { %v777_v30 = vadd.f32 %v776_v9, %v758_v26 }
  0xbe   :  { %v759_v12 = vpop.f32.mrf.mxu2  ;;  %v790_v14 = vpop.f32.mrf.mxu0 }
  0xbf   :  { %v778_v13 = vpop.f32.mrf.mxu3  ;;  %v809_v15 = vpop.f32.mrf.mxu1  ;;  %v760_v33 = vadd.f32 %v759_v12, %v741_v31  ;;  %v791_v34 = vadd.f32 %v790_v14, %v772_v28 }
  0xc1   :  { %v779_v40 = vadd.f32 %v778_v13, %v760_v33  ;;  %v810_v41 = vadd.f32 %v809_v15, %v791_v34 }
  0xc6   :  { %v828_v16 = vpop.f32.mrf.mxu2  ;;  %v792_v18 = vpop.f32.mrf.mxu0 }
  0xc7   :  { %v847_v17 = vpop.f32.mrf.mxu3  ;;  %v811_v19 = vpop.f32.mrf.mxu1  ;;  %v829_v44 = vadd.f32 %v828_v16, %v810_v41  ;;  %v793_v45 = vadd.f32 %v792_v18, %v774_v39 }
  0xc9   :  { %v848_v51 = vadd.f32 %v847_v17, %v829_v44  ;;  %v812_v52 = vadd.f32 %v811_v19, %v793_v45 }
  0xce   :  { %v830_v22 = vpop.f32.mrf.mxu2  ;;  %v795_v23 = vpop.f32.mrf.mxu0 }
  0xcf   :  { %v814_v24 = vpop.f32.mrf.mxu1  ;;  %v849_v27 = vpop.f32.mrf.mxu3  ;;  %v796_v35 = vadd.f32 %v795_v23, %v777_v30  ;;  %v831_v55 = vadd.f32 %v830_v22, %v812_v52 }
  0xd1   :  { %v815_v42 = vadd.f32 %v814_v24, %v796_v35  ;;  %v850_v61 = vadd.f32 %v849_v27, %v831_v55 }
  0xd6   :  { %v833_v36 = vpop.f32.mrf.mxu2  ;;  %v797_v37 = vpop.f32.mrf.mxu0 }
  0xd7   :  { %v816_v38 = vpop.f32.mrf.mxu1  ;;  %v852_v43 = vpop.f32.mrf.mxu3  ;;  %v834_v46 = vadd.f32 %v833_v36, %v815_v42  ;;  %v798_v47 = vadd.f32 %v797_v37, %v779_v40 }
  0xd9   :  { %v853_v53 = vadd.f32 %v852_v43, %v834_v46  ;;  %v817_v54 = vadd.f32 %v816_v38, %v798_v47 }
  0xde   :  { %v835_v48 = vpop.f32.mrf.mxu2  ;;  %v866_v49 = vpop.f32.mrf.mxu0 }
  0xdf   :  { %v871_v50 = vpop.f32.mrf.mxu1  ;;  %v836_v56 = vadd.f32 %v835_v48, %v817_v54  ;;  %v867_v57 = vadd.f32 %v866_v49, %v848_v51  ;;  %v854_v60 = vpop.f32.mrf.mxu3 }
  0xe0   :  { %v872_v59 = vadd.f32 %v871_v50, %v853_v53 }
  0xe1   :  { %v855_v62 = vadd.f32 %v854_v60, %v836_v56  ;;  %v880_v63 = vmul.f32 %v1377_v58, %v867_v57 }
  0xe2   :  { %v882_v1 = vmul.f32 %v1377_v58, %v872_v59 }
  0xe3   :  { %v888_v6 = vadd.f32 %v1378_v0, %v880_v63 }
  0xe4   :  { %v890_v7 = vadd.f32 %v1378_v0, %v882_v1 }
  0xe5   :  { %v892_v12 = vmax.f32 %v888_v6, 0.0 }
  0xe6   :  { %v868_v2 = vpop.f32.mrf.mxu0  ;;  %v894_v13 = vmax.f32 %v890_v7, 0.0 }
  0xe7   :  { %v873_v3 = vpop.f32.mrf.mxu1  ;;  %v869_v4 = vadd.f32 %v868_v2, %v850_v61 }
  0xe8   :  { %v874_v5 = vadd.f32 %v873_v3, %v855_v62 }
  0xe9   :  { %v881_v8 = vmul.f32 %v1377_v58, %v869_v4 }
  0xea   :  { %v883_v9 = vmul.f32 %v1377_v58, %v874_v5 }
  0xeb   :  { %v889_v10 = vadd.f32 %v1378_v0, %v881_v8 }
  0xec   :  { %v891_v11 = vadd.f32 %v1378_v0, %v883_v9 }
  0xed   :  { %v893_v14 = vmax.f32 %v889_v10, 0.0 }
  0xee   :  { %v895_v15 = vmax.f32 %v891_v11, 0.0 }
  0xef   :  { %v1361_v16 = vpack.c.bf16 %v893_v14, %v892_v12 }
  0xf0   :  { %v1366_v17 = vpack.c.bf16 %v895_v15, %v894_v13 }
  0xf1   :  { %1362 = vst [vmem:[%s1744_s4] sm:$0xff] %v1361_v16  }
  0xf2   :  { %1368 = vst [vmem:[%s1744_s4 + $0x8] sm:$0xff] %v1366_v17  }

// kernel: extractor_resnet152_forward.22
= control target key start
LH: loop header
LB: loop body
LE: loop exit
PB: predicated region body
PF: predicated region fallthrough
CT: control target
= control target key end

     0   :  { %s2385_s1 = inlined_call_operand.vmem [shape: bf16[128,512], index: 1, kind: input, shape index: {}]   ;;  %s2386_s5 = inlined_call_operand.vmem [shape: bf16[256,512], index: 5, kind: input, shape index: {}]   ;;  %s2387_s0 = inlined_call_operand.vmem [shape: bf16[32,128], index: 0, kind: input, shape index: {}]   ;;  %s2388_s4 = inlined_call_operand.vmem [shape: bf16[32,256], index: 4, kind: input, shape index: {}]   ;;  %s2389_s2 = inlined_call_operand.vmem [shape: f32[1,512], index: 2, kind: input, shape index: {}]   ;;  %s2390_s6 = inlined_call_operand.vmem [shape: f32[1,512], index: 6, kind: input, shape index: {}]   ;;  %s2391_s3 = inlined_call_operand.vmem [shape: f32[1,512], index: 3, kind: input, shape index: {}]   ;;  %s2392_s7 = inlined_call_operand.vmem [shape: f32[1,512], index: 7, kind: input, shape index: {}]   ;;  %s2393_s8 = inlined_call_operand.vmem [shape: bf16[32,512], index: 8, kind: output, shape index: {}]  }
   0x1   :  { %v1151_v0 = vld [vmem:[%s2385_s1 + $0xe0] sm:$0xf]  ;;  %v1469_v1 = vld [vmem:[%s2385_s1 + $0xec] sm:$0xf0]  ;;  %v1467_v2 = vld [vmem:[%s2385_s1 + $0xe4] sm:$0xf] }
   0x2   :  { %v1152_v3 = vor.u32 %v1469_v1, %v1151_v0  ;;  %v1153_v4 = vld [vmem:[%s2385_s1 + $0xf0] sm:$0xf0]  ;;  %v1159_v5 = vld [vmem:[%s2385_s1 + $0xe8] sm:$0xf]  ;;  %v1470_v6 = vld [vmem:[%s2385_s1 + $0xf4] sm:$0xf0] }
   0x3   :  { %v1156_v7 = vor.u32 %v1467_v2, %v1153_v4  ;;  %v1160_v8 = vor.u32 %v1470_v6, %v1159_v5  ;;  %v1468_v9 = vld [vmem:[%s2385_s1 + $0xec] sm:$0xf]  ;;  %v1161_v10 = vld [vmem:[%s2385_s1 + $0xf8] sm:$0xf0]  ;;  %v1135_v11 = vld [vmem:[%s2385_s1 + $0xc0] sm:$0xf] }
   0x4   :  { %237 = vmatpush.bf16.msra.mxu0 %v1152_v3  ;;  %v1164_v12 = vor.u32 %v1468_v9, %v1161_v10  ;;  %v1465_v13 = vld [vmem:[%s2385_s1 + $0xcc] sm:$0xf0]  ;;  %v1463_v14 = vld [vmem:[%s2385_s1 + $0xc4] sm:$0xf]  ;;  %v1137_v15 = vld [vmem:[%s2385_s1 + $0xd0] sm:$0xf0] }
   0x5   :  { %256 = vmatpush.bf16.msra.mxu1 %v1156_v7  ;;  %275 = vmatpush.bf16.msra.mxu2 %v1160_v8  ;;  %v1136_v16 = vor.u32 %v1465_v13, %v1135_v11  ;;  %v1140_v17 = vor.u32 %v1463_v14, %v1137_v15  ;;  %v1143_v18 = vld [vmem:[%s2385_s1 + $0xc8] sm:$0xf]  ;;  %v1466_v19 = vld [vmem:[%s2385_s1 + $0xd4] sm:$0xf0]  ;;  %v1464_v20 = vld [vmem:[%s2385_s1 + $0xcc] sm:$0xf] }
   0x6   :  { %294 = vmatpush.bf16.msra.mxu3 %v1164_v12  ;;  %v1144_v21 = vor.u32 %v1466_v19, %v1143_v18  ;;  %v1145_v22 = vld [vmem:[%s2385_s1 + $0xd8] sm:$0xf0]  ;;  %v1119_v23 = vld [vmem:[%s2385_s1 + $0xa0] sm:$0xf]  ;;  %v1461_v24 = vld [vmem:[%s2385_s1 + $0xac] sm:$0xf0] }
   0x7   :  { %v1148_v25 = vor.u32 %v1464_v20, %v1145_v22  ;;  %v1459_v26 = vld [vmem:[%s2385_s1 + $0xa4] sm:$0xf]  ;;  %v1121_v27 = vld [vmem:[%s2385_s1 + $0xb0] sm:$0xf0]  ;;  %v1127_v28 = vld [vmem:[%s2385_s1 + $0xa8] sm:$0xf]  ;;  %v1120_v29 = vor.u32 %v1461_v24, %v1119_v23 }
   0x8   :  { %238 = vmatpush.bf16.msra.mxu0 %v1136_v16  ;;  %v1462_v30 = vld [vmem:[%s2385_s1 + $0xb4] sm:$0xf0]  ;;  %v1460_v31 = vld [vmem:[%s2385_s1 + $0xac] sm:$0xf]  ;;  %v1129_v32 = vld [vmem:[%s2385_s1 + $0xb8] sm:$0xf0]  ;;  %v1124_v33 = vor.u32 %v1459_v26, %v1121_v27 }
   0x9   :  { %257 = vmatpush.bf16.msra.mxu1 %v1140_v17  ;;  %276 = vmatpush.bf16.msra.mxu2 %v1144_v21  ;;  %v1128_v34 = vor.u32 %v1462_v30, %v1127_v28  ;;  %v1103_v35 = vld [vmem:[%s2385_s1 + $0x80] sm:$0xf]  ;;  %v1457_v36 = vld [vmem:[%s2385_s1 + $0x8c] sm:$0xf0]  ;;  %v1455_v37 = vld [vmem:[%s2385_s1 + $0x84] sm:$0xf]  ;;  %v1132_v38 = vor.u32 %v1460_v31, %v1129_v32 }
   0xa   :  { %295 = vmatpush.bf16.msra.mxu3 %v1148_v25  ;;  %v1105_v39 = vld [vmem:[%s2385_s1 + $0x90] sm:$0xf0]  ;;  %v1111_v40 = vld [vmem:[%s2385_s1 + $0x88] sm:$0xf]  ;;  %v1458_v41 = vld [vmem:[%s2385_s1 + $0x94] sm:$0xf0]  ;;  %v1104_v44 = vor.u32 %v1457_v36, %v1103_v35 }
   0xb   :  { %v1456_v42 = vld [vmem:[%s2385_s1 + $0x8c] sm:$0xf]  ;;  %v1113_v43 = vld [vmem:[%s2385_s1 + $0x98] sm:$0xf0]  ;;  %v1108_v45 = vor.u32 %v1455_v37, %v1105_v39  ;;  %v1112_v46 = vor.u32 %v1458_v41, %v1111_v40  ;;  %v1087_v47 = vld [vmem:[%s2385_s1 + $0x60] sm:$0xf] }
   0xc   :  { %239 = vmatpush.bf16.msra.mxu0 %v1120_v29  ;;  %v1453_v48 = vld [vmem:[%s2385_s1 + $0x6c] sm:$0xf0]  ;;  %v1451_v49 = vld [vmem:[%s2385_s1 + $0x64] sm:$0xf]  ;;  %v1116_v50 = vor.u32 %v1456_v42, %v1113_v43  ;;  %v1089_v51 = vld [vmem:[%s2385_s1 + $0x70] sm:$0xf0] }
   0xd   :  { %258 = vmatpush.bf16.msra.mxu1 %v1124_v33  ;;  %277 = vmatpush.bf16.msra.mxu2 %v1128_v34  ;;  %v1095_v52 = vld [vmem:[%s2385_s1 + $0x68] sm:$0xf]  ;;  %v1454_v53 = vld [vmem:[%s2385_s1 + $0x74] sm:$0xf0]  ;;  %v1452_v54 = vld [vmem:[%s2385_s1 + $0x6c] sm:$0xf]  ;;  %v1088_v56 = vor.u32 %v1453_v48, %v1087_v47  ;;  %v1092_v57 = vor.u32 %v1451_v49, %v1089_v51 }
   0xe   :  { %296 = vmatpush.bf16.msra.mxu3 %v1132_v38  ;;  %v1097_v55 = vld [vmem:[%s2385_s1 + $0x78] sm:$0xf0]  ;;  %v1096_v58 = vor.u32 %v1454_v53, %v1095_v52  ;;  %v1071_v59 = vld [vmem:[%s2385_s1 + $0x40] sm:$0xf]  ;;  %v1449_v60 = vld [vmem:[%s2385_s1 + $0x4c] sm:$0xf0] }
   0xf   :  { %v1447_v61 = vld [vmem:[%s2385_s1 + $0x44] sm:$0xf]  ;;  %v1100_v62 = vor.u32 %v1452_v54, %v1097_v55  ;;  %v1073_v63 = vld [vmem:[%s2385_s1 + $0x50] sm:$0xf0]  ;;  %v1079_v0 = vld [vmem:[%s2385_s1 + $0x48] sm:$0xf]  ;;  %v1072_v4 = vor.u32 %v1449_v60, %v1071_v59 }
  0x10   :  { %240 = vmatpush.bf16.msra.mxu0 %v1104_v44  ;;  %v1450_v1 = vld [vmem:[%s2385_s1 + $0x54] sm:$0xf0]  ;;  %v1448_v2 = vld [vmem:[%s2385_s1 + $0x4c] sm:$0xf]  ;;  %v1081_v3 = vld [vmem:[%s2385_s1 + $0x58] sm:$0xf0]  ;;  %v1076_v5 = vor.u32 %v1447_v61, %v1073_v63 }
  0x11   :  { %259 = vmatpush.bf16.msra.mxu1 %v1108_v45  ;;  %278 = vmatpush.bf16.msra.mxu2 %v1112_v46  ;;  %v1080_v6 = vor.u32 %v1450_v1, %v1079_v0  ;;  %v1055_v7 = vld [vmem:[%s2385_s1 + $0x20] sm:$0xf]  ;;  %v1445_v8 = vld [vmem:[%s2385_s1 + $0x2c] sm:$0xf0]  ;;  %v1443_v9 = vld [vmem:[%s2385_s1 + $0x24] sm:$0xf]  ;;  %v1084_v10 = vor.u32 %v1448_v2, %v1081_v3 }
  0x12   :  { %297 = vmatpush.bf16.msra.mxu3 %v1116_v50  ;;  %v1057_v11 = vld [vmem:[%s2385_s1 + $0x30] sm:$0xf0]  ;;  %v1063_v12 = vld [vmem:[%s2385_s1 + $0x28] sm:$0xf]  ;;  %v1446_v13 = vld [vmem:[%s2385_s1 + $0x34] sm:$0xf0]  ;;  %v1056_v16 = vor.u32 %v1445_v8, %v1055_v7 }
  0x13   :  { %v1444_v14 = vld [vmem:[%s2385_s1 + $0x2c] sm:$0xf]  ;;  %v1065_v15 = vld [vmem:[%s2385_s1 + $0x38] sm:$0xf0]  ;;  %v1039_v17 = vld [vmem:[%s2385_s1] sm:$0xf]  ;;  %v1060_v18 = vor.u32 %v1443_v9, %v1057_v11  ;;  %v1064_v19 = vor.u32 %v1446_v13, %v1063_v12 }
  0x14   :  { %241 = vmatpush.bf16.msra.mxu0 %v1088_v56  ;;  %v1441_v20 = vld [vmem:[%s2385_s1 + $0xc] sm:$0xf0]  ;;  %v1439_v21 = vld [vmem:[%s2385_s1 + $0x4] sm:$0xf]  ;;  %v1041_v22 = vld [vmem:[%s2385_s1 + $0x10] sm:$0xf0]  ;;  %v1068_v23 = vor.u32 %v1444_v14, %v1065_v15 }
  0x15   :  { %260 = vmatpush.bf16.msra.mxu1 %v1092_v57  ;;  %279 = vmatpush.bf16.msra.mxu2 %v1096_v58  ;;  %v1047_v24 = vld [vmem:[%s2385_s1 + $0x8] sm:$0xf]  ;;  %v1442_v25 = vld [vmem:[%s2385_s1 + $0x14] sm:$0xf0]  ;;  %v1440_v26 = vld [vmem:[%s2385_s1 + $0xc] sm:$0xf]  ;;  %v1040_v30 = vor.u32 %v1441_v20, %v1039_v17  ;;  %v1044_v33 = vor.u32 %v1439_v21, %v1041_v22 }
  0x16   :  { %298 = vmatpush.bf16.msra.mxu3 %v1100_v62  ;;  %v1049_v27 = vld [vmem:[%s2385_s1 + $0x18] sm:$0xf0]  ;;  %v1503_v28 = vld [vmem:[%s2386_s5 + $0xe4] sm:$0xf]  ;;  %v1297_v29 = vld [vmem:[%s2386_s5 + $0xf0] sm:$0xf0]  ;;  %v1048_v34 = vor.u32 %v1442_v25, %v1047_v24 }
  0x17   :  { %v1535_v31 = vld [vmem:[%s2386_s5 + $0x1e4] sm:$0xf]  ;;  %v1425_v32 = vld [vmem:[%s2386_s5 + $0x1f0] sm:$0xf0]  ;;  %v1052_v36 = vor.u32 %v1440_v26, %v1049_v27  ;;  %v1300_v37 = vor.u32 %v1503_v28, %v1297_v29  ;;  %v1295_v38 = vld [vmem:[%s2386_s5 + $0xe0] sm:$0xf] }
  0x18   :  { %242 = vmatpush.bf16.msra.mxu0 %v1072_v4  ;;  %v1437_v35 = vld [vmem:[%s2387_s0] sm:$0xff]  ;;  %v1505_v39 = vld [vmem:[%s2386_s5 + $0xec] sm:$0xf0]  ;;  %v1428_v41 = vor.u32 %v1535_v31, %v1425_v32  ;;  %v1281_v44 = vld [vmem:[%s2386_s5 + $0xd0] sm:$0xf0] }
  0x19   :  { %261 = vmatpush.bf16.msra.mxu1 %v1076_v5  ;;  %280 = vmatpush.bf16.msra.mxu2 %v1080_v6  ;;  %v1423_v40 = vld [vmem:[%s2386_s5 + $0x1e0] sm:$0xf]  ;;  %v1537_v42 = vld [vmem:[%s2386_s5 + $0x1ec] sm:$0xf0]  ;;  %v1499_v43 = vld [vmem:[%s2386_s5 + $0xc4] sm:$0xf]  ;;  %v1296_v47 = vor.u32 %v1505_v39, %v1295_v38 }
  0x1a   :  { %299 = vmatpush.bf16.msra.mxu3 %v1084_v10  ;;  %v1531_v45 = vld [vmem:[%s2386_s5 + $0x1c4] sm:$0xf]  ;;  %v1409_v46 = vld [vmem:[%s2386_s5 + $0x1d0] sm:$0xf0]  ;;  %v1424_v48 = vor.u32 %v1537_v42, %v1423_v40  ;;  %v1284_v49 = vor.u32 %v1499_v43, %v1281_v44  ;;  %v1279_v50 = vld [vmem:[%s2386_s5 + $0xc0] sm:$0xf] }
  0x1b   :  { %v1501_v51 = vld [vmem:[%s2386_s5 + $0xcc] sm:$0xf0]  ;;  %v1407_v52 = vld [vmem:[%s2386_s5 + $0x1c0] sm:$0xf]  ;;  %v1412_v53 = vor.u32 %v1531_v45, %v1409_v46  ;;  %v1495_v55 = vld [vmem:[%s2386_s5 + $0xa4] sm:$0xf] }
  0x1c   :  { %243 = vmatpush.bf16.msra.mxu0 %v1056_v16  ;;  %v1533_v54 = vld [vmem:[%s2386_s5 + $0x1cc] sm:$0xf0]  ;;  %v1265_v56 = vld [vmem:[%s2386_s5 + $0xb0] sm:$0xf0]  ;;  %v1527_v57 = vld [vmem:[%s2386_s5 + $0x1a4] sm:$0xf]  ;;  %v1280_v59 = vor.u32 %v1501_v51, %v1279_v50 }
  0x1d   :  { %262 = vmatpush.bf16.msra.mxu1 %v1060_v18  ;;  %281 = vmatpush.bf16.msra.mxu2 %v1064_v19  ;;  %v1393_v58 = vld [vmem:[%s2386_s5 + $0x1b0] sm:$0xf0]  ;;  %v1408_v60 = vor.u32 %v1533_v54, %v1407_v52  ;;  %v1268_v61 = vor.u32 %v1495_v55, %v1265_v56  ;;  %v1263_v62 = vld [vmem:[%s2386_s5 + $0xa0] sm:$0xf]  ;;  %v1497_v63 = vld [vmem:[%s2386_s5 + $0xac] sm:$0xf0] }
  0x1e   :  { %300 = vmatpush.bf16.msra.mxu3 %v1068_v23  ;;  %v1391_v0 = vld [vmem:[%s2386_s5 + $0x1a0] sm:$0xf]  ;;  %v1396_v1 = vor.u32 %v1527_v57, %v1393_v58  ;;  %v1529_v2 = vld [vmem:[%s2386_s5 + $0x1ac] sm:$0xf0]  ;;  %v1491_v3 = vld [vmem:[%s2386_s5 + $0x84] sm:$0xf]  ;;  %v1264_v7 = vor.u32 %v1497_v63, %v1263_v62 }
  0x1f   :  { %v1249_v4 = vld [vmem:[%s2386_s5 + $0x90] sm:$0xf0]  ;;  %v1523_v5 = vld [vmem:[%s2386_s5 + $0x184] sm:$0xf]  ;;  %v1392_v8 = vor.u32 %v1529_v2, %v1391_v0  ;;  %v1247_v10 = vld [vmem:[%s2386_s5 + $0x80] sm:$0xf] }
  0x20   :  { %244 = vmatpush.bf16.msra.mxu0 %v1040_v30  ;;  %v1377_v6 = vld [vmem:[%s2386_s5 + $0x190] sm:$0xf0]  ;;  %v1252_v9 = vor.u32 %v1491_v3, %v1249_v4  ;;  %v1493_v11 = vld [vmem:[%s2386_s5 + $0x8c] sm:$0xf0]  ;;  %v1375_v12 = vld [vmem:[%s2386_s5 + $0x180] sm:$0xf] }
  0x21   :  { %263 = vmatpush.bf16.msra.mxu1 %v1044_v33  ;;  %282 = vmatpush.bf16.msra.mxu2 %v1048_v34  ;;  %v1380_v13 = vor.u32 %v1523_v5, %v1377_v6  ;;  %v1525_v14 = vld [vmem:[%s2386_s5 + $0x18c] sm:$0xf0]  ;;  %v1487_v15 = vld [vmem:[%s2386_s5 + $0x64] sm:$0xf]  ;;  %v1233_v16 = vld [vmem:[%s2386_s5 + $0x70] sm:$0xf0]  ;;  %v1248_v19 = vor.u32 %v1493_v11, %v1247_v10 }
  0x22   :  { %301 = vmatpush.bf16.msra.mxu3 %v1052_v36  ;;  %v1519_v17 = vld [vmem:[%s2386_s5 + $0x164] sm:$0xf]  ;;  %v1361_v18 = vld [vmem:[%s2386_s5 + $0x170] sm:$0xf0]  ;;  %v1438_v20 = vld [vmem:[%s2387_s0 + $0x8] sm:$0xff]  ;;  %v1376_v21 = vor.u32 %v1525_v14, %v1375_v12  ;;  %v1236_v22 = vor.u32 %v1487_v15, %v1233_v16 }
  0x23   :  { %245 = vmatmul.bf16.vlgmr.msra.gmra.mxu0 %v1437_v35  ;;  %v1231_v23 = vld [vmem:[%s2386_s5 + $0x60] sm:$0xf]  ;;  %v1489_v24 = vld [vmem:[%s2386_s5 + $0x6c] sm:$0xf0]  ;;  %v1364_v26 = vor.u32 %v1519_v17, %v1361_v18  ;;  %v1483_v28 = vld [vmem:[%s2386_s5 + $0x44] sm:$0xf] }
  0x24   :  { %264 = vmatmul.bf16.vlgmr.msra.gmra.mxu1 %v1437_v35  ;;  %283 = vmatmul.bf16.vlgmr.msra.gmra.mxu2 %v1437_v35  ;;  %v1359_v25 = vld [vmem:[%s2386_s5 + $0x160] sm:$0xf]  ;;  %v1521_v27 = vld [vmem:[%s2386_s5 + $0x16c] sm:$0xf0]  ;;  %v1217_v29 = vld [vmem:[%s2386_s5 + $0x50] sm:$0xf0]  ;;  %v1232_v32 = vor.u32 %v1489_v24, %v1231_v23 }
  0x25   :  { %811 = vmatpush.bf16.msrb.mxu2 %v1300_v37  ;;  %302 = vmatmul.bf16.vlgmr.msra.gmra.mxu3 %v1437_v35  ;;  %v1515_v30 = vld [vmem:[%s2386_s5 + $0x144] sm:$0xf]  ;;  %v1345_v31 = vld [vmem:[%s2386_s5 + $0x150] sm:$0xf0]  ;;  %v1360_v33 = vor.u32 %v1521_v27, %v1359_v25  ;;  %v1220_v34 = vor.u32 %v1483_v28, %v1217_v29  ;;  %v1215_v35 = vld [vmem:[%s2386_s5 + $0x40] sm:$0xf] }
  0x26   :  { %830 = vmatpush.bf16.msrb.mxu3 %v1428_v41  ;;  %773 = vmatpush.bf16.msrb.mxu0 %v1296_v47  ;;  %v1485_v36 = vld [vmem:[%s2386_s5 + $0x4c] sm:$0xf0]  ;;  %v1343_v37 = vld [vmem:[%s2386_s5 + $0x140] sm:$0xf]  ;;  %v1348_v38 = vor.u32 %v1515_v30, %v1345_v31  ;;  %v1479_v40 = vld [vmem:[%s2386_s5 + $0x24] sm:$0xf] }
  0x27   :  { %792 = vmatpush.bf16.msrb.mxu1 %v1424_v48  ;;  %v1517_v39 = vld [vmem:[%s2386_s5 + $0x14c] sm:$0xf0]  ;;  %v1201_v41 = vld [vmem:[%s2386_s5 + $0x30] sm:$0xf0]  ;;  %v1511_v42 = vld [vmem:[%s2386_s5 + $0x124] sm:$0xf]  ;;  %v1216_v44 = vor.u32 %v1485_v36, %v1215_v35 }
  0x28   :  { %v1329_v43 = vld [vmem:[%s2386_s5 + $0x130] sm:$0xf0]  ;;  %v1199_v45 = vld [vmem:[%s2386_s5 + $0x20] sm:$0xf]  ;;  %v1344_v46 = vor.u32 %v1517_v39, %v1343_v37  ;;  %v1204_v47 = vor.u32 %v1479_v40, %v1201_v41  ;;  %v1481_v48 = vld [vmem:[%s2386_s5 + $0x2c] sm:$0xf0] }
  0x29   :  { %812 = vmatpush.bf16.msrb.mxu2 %v1284_v49  ;;  %v1327_v49 = vld [vmem:[%s2386_s5 + $0x120] sm:$0xf]  ;;  %v1513_v50 = vld [vmem:[%s2386_s5 + $0x12c] sm:$0xf0]  ;;  %v1332_v51 = vor.u32 %v1511_v42, %v1329_v43  ;;  %v1475_v52 = vld [vmem:[%s2386_s5 + $0x4] sm:$0xf]  ;;  %v1200_v58 = vor.u32 %v1481_v48, %v1199_v45 }
  0x2a   :  { %831 = vmatpush.bf16.msrb.mxu3 %v1412_v53  ;;  %774 = vmatpush.bf16.msrb.mxu0 %v1280_v59  ;;  %v1185_v53 = vld [vmem:[%s2386_s5 + $0x10] sm:$0xf0]  ;;  %v1507_v54 = vld [vmem:[%s2386_s5 + $0x104] sm:$0xf]  ;;  %v1504_v56 = vld [vmem:[%s2386_s5 + $0xec] sm:$0xf]  ;;  %v1328_v62 = vor.u32 %v1513_v50, %v1327_v49 }
  0x2b   :  { %793 = vmatpush.bf16.msrb.mxu1 %v1408_v60  ;;  %v1313_v55 = vld [vmem:[%s2386_s5 + $0x110] sm:$0xf0]  ;;  %v1305_v57 = vld [vmem:[%s2386_s5 + $0xf8] sm:$0xf0]  ;;  %v1183_v59 = vld [vmem:[%s2386_s5] sm:$0xf]  ;;  %v1188_v63 = vor.u32 %v1475_v52, %v1185_v53 }
  0x2c   :  { %v1536_v60 = vld [vmem:[%s2386_s5 + $0x1ec] sm:$0xf]  ;;  %v1477_v0 = vld [vmem:[%s2386_s5 + $0xc] sm:$0xf0]  ;;  %v1316_v3 = vor.u32 %v1507_v54, %v1313_v55  ;;  %v1308_v4 = vor.u32 %v1504_v56, %v1305_v57  ;;  %v1303_v5 = vld [vmem:[%s2386_s5 + $0xe8] sm:$0xf] }
  0x2d   :  { %813 = vmatpush.bf16.msrb.mxu2 %v1268_v61  ;;  %v1433_v61 = vld [vmem:[%s2386_s5 + $0x1f8] sm:$0xf0]  ;;  %v1509_v2 = vld [vmem:[%s2386_s5 + $0x10c] sm:$0xf0]  ;;  %v1506_v6 = vld [vmem:[%s2386_s5 + $0xf4] sm:$0xf0]  ;;  %v1184_v12 = vor.u32 %v1477_v0, %v1183_v59 }
  0x2e   :  { %832 = vmatpush.bf16.msrb.mxu3 %v1396_v1  ;;  %775 = vmatpush.bf16.msrb.mxu0 %v1264_v7  ;;  %v1311_v1 = vld [vmem:[%s2386_s5 + $0x100] sm:$0xf]  ;;  %v1431_v7 = vld [vmem:[%s2386_s5 + $0x1e8] sm:$0xf]  ;;  %v1500_v10 = vld [vmem:[%s2386_s5 + $0xcc] sm:$0xf]  ;;  %v1304_v18 = vor.u32 %v1506_v6, %v1303_v5 }
  0x2f   :  { %794 = vmatpush.bf16.msrb.mxu1 %v1392_v8  ;;  %v1436_v8 = vor.u32 %v1536_v60, %v1433_v61  ;;  %v1289_v11 = vld [vmem:[%s2386_s5 + $0xd8] sm:$0xf0]  ;;  %v1472_v14 = vld [vmem:[%s2388_s4 + $0x4] sm:$0xf0]  ;;  %v1471_v15 = vld [vmem:[%s2388_s4 + $0x4] sm:$0xf]  ;;  %v1312_v16 = vor.u32 %v1509_v2, %v1311_v1 }
  0x30   :  { %v1169_v17 = vld [vmem:[%s2388_s4 + $0x8] sm:$0xf0]  ;;  %v1287_v23 = vld [vmem:[%s2386_s5 + $0xc8] sm:$0xf]  ;;  %v1502_v24 = vld [vmem:[%s2386_s5 + $0xd4] sm:$0xf0] }
  0x31   :  { %814 = vmatpush.bf16.msrb.mxu2 %v1252_v9  ;;  %v1538_v9 = vld [vmem:[%s2386_s5 + $0x1f4] sm:$0xf0]  ;;  %v1415_v25 = vld [vmem:[%s2386_s5 + $0x1c8] sm:$0xf]  ;;  %v1496_v28 = vld [vmem:[%s2386_s5 + $0xac] sm:$0xf]  ;;  %v2042_v30 = vor.u32 %v1471_v15, %v1169_v17 }
  0x32   :  { %833 = vmatpush.bf16.msrb.mxu3 %v1380_v13  ;;  %776 = vmatpush.bf16.msrb.mxu0 %v1248_v19  ;;  %v1167_v13 = vld [vmem:[%s2388_s4] sm:$0xf]  ;;  %v1532_v19 = vld [vmem:[%s2386_s5 + $0x1cc] sm:$0xf]  ;;  %v1534_v27 = vld [vmem:[%s2386_s5 + $0x1d4] sm:$0xf0] }
  0x33   :  { %795 = vmatpush.bf16.msrb.mxu1 %v1376_v21  ;;  %250 = vmatmul.bf16.gmra.mxu0 %v1438_v20  ;;  %v1432_v21 = vor.u32 %v1538_v9, %v1431_v7  ;;  %v1273_v29 = vld [vmem:[%s2386_s5 + $0xb8] sm:$0xf0]  ;;  %v1416_v35 = vor.u32 %v1534_v27, %v1415_v25  ;;  %v1271_v37 = vld [vmem:[%s2386_s5 + $0xa8] sm:$0xf]  ;;  %v1530_v40 = vld [vmem:[%s2386_s5 + $0x1b4] sm:$0xf0] }
  0x34   :  { %269 = vmatmul.bf16.gmra.mxu1 %v1438_v20  ;;  %288 = vmatmul.bf16.gmra.mxu2 %v1438_v20  ;;  %v1276_v36 = vor.u32 %v1496_v28, %v1273_v29  ;;  %v1399_v39 = vld [vmem:[%s2386_s5 + $0x1a8] sm:$0xf]  ;;  %v1492_v41 = vld [vmem:[%s2386_s5 + $0x8c] sm:$0xf]  ;;  %v1257_v42 = vld [vmem:[%s2386_s5 + $0x98] sm:$0xf0] }
  0x35   :  { %815 = vmatpush.bf16.msrb.mxu2 %v1236_v22  ;;  %307 = vmatmul.bf16.gmra.mxu3 %v1438_v20  ;;  %v1417_v20 = vld [vmem:[%s2386_s5 + $0x1d8] sm:$0xf0]  ;;  %v1292_v22 = vor.u32 %v1500_v10, %v1289_v11  ;;  %v1524_v45 = vld [vmem:[%s2386_s5 + $0x18c] sm:$0xf]  ;;  %v1260_v48 = vor.u32 %v1492_v41, %v1257_v42  ;;  %v1255_v49 = vld [vmem:[%s2386_s5 + $0x88] sm:$0xf] }
  0x36   :  { %834 = vmatpush.bf16.msrb.mxu3 %v1364_v26  ;;  %777 = vmatpush.bf16.msrb.mxu0 %v1232_v32  ;;  %v2031_v26 = vor.u32 %v1472_v14, %v1167_v13  ;;  %v1420_v31 = vor.u32 %v1532_v19, %v1417_v20  ;;  %v1288_v32 = vor.u32 %v1502_v24, %v1287_v23  ;;  %v1494_v50 = vld [vmem:[%s2386_s5 + $0x94] sm:$0xf0]  ;;  %v1488_v53 = vld [vmem:[%s2386_s5 + $0x6c] sm:$0xf]  ;;  %v1241_v54 = vld [vmem:[%s2386_s5 + $0x78] sm:$0xf0] }
  0x37   :  { %796 = vmatpush.bf16.msrb.mxu1 %v1360_v33  ;;  %v1528_v33 = vld [vmem:[%s2386_s5 + $0x1ac] sm:$0xf]  ;;  %v1526_v52 = vld [vmem:[%s2386_s5 + $0x194] sm:$0xf0]  ;;  %v1256_v56 = vor.u32 %v1494_v50, %v1255_v49  ;;  %v1244_v60 = vor.u32 %v1488_v53, %v1241_v54  ;;  %v1239_v61 = vld [vmem:[%s2386_s5 + $0x68] sm:$0xf] }
  0x38   :  { %v1520_v57 = vld [vmem:[%s2386_s5 + $0x16c] sm:$0xf]  ;;  %v1522_v0 = vld [vmem:[%s2386_s5 + $0x174] sm:$0xf0]  ;;  %v1225_v2 = vld [vmem:[%s2386_s5 + $0x58] sm:$0xf0] }
  0x39   :  { %816 = vmatpush.bf16.msrb.mxu2 %v1220_v34  ;;  %v1401_v34 = vld [vmem:[%s2386_s5 + $0x1b8] sm:$0xf0]  ;;  %v1484_v1 = vld [vmem:[%s2386_s5 + $0x4c] sm:$0xf]  ;;  %v1473_v5 = vld [vmem:[%s2388_s4 + $0x14] sm:$0xf] }
  0x3a   :  { %835 = vmatpush.bf16.msrb.mxu3 %v1348_v38  ;;  %778 = vmatpush.bf16.msrb.mxu0 %v1216_v44  ;;  %v1498_v38 = vld [vmem:[%s2386_s5 + $0xb4] sm:$0xf0]  ;;  %v1404_v43 = vor.u32 %v1528_v33, %v1401_v34  ;;  %v1177_v6 = vld [vmem:[%s2388_s4 + $0x18] sm:$0xf0]  ;;  %v1516_v9 = vld [vmem:[%s2386_s5 + $0x14c] sm:$0xf] }
  0x3b   :  { %797 = vmatpush.bf16.msrb.mxu1 %v1344_v46  ;;  %v1272_v44 = vor.u32 %v1498_v38, %v1271_v37  ;;  %v1385_v46 = vld [vmem:[%s2386_s5 + $0x198] sm:$0xf0]  ;;  %v1223_v13 = vld [vmem:[%s2386_s5 + $0x48] sm:$0xf]  ;;  %v1486_v14 = vld [vmem:[%s2386_s5 + $0x54] sm:$0xf0]  ;;  %v1180_v20 = vor.u32 %v1473_v5, %v1177_v6 }
  0x3c   :  { %v1388_v55 = vor.u32 %v1524_v45, %v1385_v46  ;;  %v1353_v10 = vld [vmem:[%s2386_s5 + $0x158] sm:$0xf0]  ;;  %v1351_v15 = vld [vmem:[%s2386_s5 + $0x148] sm:$0xf]  ;;  %v1518_v17 = vld [vmem:[%s2386_s5 + $0x154] sm:$0xf0] }
  0x3d   :  { %817 = vmatpush.bf16.msrb.mxu2 %v1204_v47  ;;  %v1400_v47 = vor.u32 %v1530_v40, %v1399_v39  ;;  %v1209_v19 = vld [vmem:[%s2386_s5 + $0x38] sm:$0xf0]  ;;  %v1512_v23 = vld [vmem:[%s2386_s5 + $0x12c] sm:$0xf]  ;;  %v1352_v25 = vor.u32 %v1518_v17, %v1351_v15  ;;  %v1207_v28 = vld [vmem:[%s2386_s5 + $0x28] sm:$0xf] }
  0x3e   :  { %836 = vmatpush.bf16.msrb.mxu3 %v1332_v51  ;;  %779 = vmatpush.bf16.msrb.mxu0 %v1200_v58  ;;  %v1383_v51 = vld [vmem:[%s2386_s5 + $0x188] sm:$0xf]  ;;  %v1369_v58 = vld [vmem:[%s2386_s5 + $0x178] sm:$0xf0]  ;;  %v1482_v29 = vld [vmem:[%s2386_s5 + $0x34] sm:$0xf0] }
  0x3f   :  { %798 = vmatpush.bf16.msrb.mxu1 %v1328_v62  ;;  %v1384_v59 = vor.u32 %v1526_v52, %v1383_v51  ;;  %v1490_v62 = vld [vmem:[%s2386_s5 + $0x74] sm:$0xf0]  ;;  %v1372_v7 = vor.u32 %v1520_v57, %v1369_v58  ;;  %v1337_v24 = vld [vmem:[%s2386_s5 + $0x138] sm:$0xf0]  ;;  %v1476_v33 = vld [vmem:[%s2386_s5 + $0xc] sm:$0xf] }
  0x40   :  { %v1193_v34 = vld [vmem:[%s2386_s5 + $0x18] sm:$0xf0]  ;;  %v1508_v37 = vld [vmem:[%s2386_s5 + $0x10c] sm:$0xf]  ;;  %v1191_v41 = vld [vmem:[%s2386_s5 + $0x8] sm:$0xf] }
  0x41   :  { %818 = vmatpush.bf16.msrb.mxu2 %v1188_v63  ;;  %v1367_v63 = vld [vmem:[%s2386_s5 + $0x168] sm:$0xf]  ;;  %v1196_v39 = vor.u32 %v1476_v33, %v1193_v34  ;;  %v1321_v40 = vld [vmem:[%s2386_s5 + $0x118] sm:$0xf0]  ;;  %v1478_v42 = vld [vmem:[%s2386_s5 + $0x14] sm:$0xf0] }
  0x42   :  { %837 = vmatpush.bf16.msrb.mxu3 %v1316_v3  ;;  %780 = vmatpush.bf16.msrb.mxu0 %v1184_v12  ;;  %v1175_v3 = vld [vmem:[%s2388_s4 + $0x10] sm:$0xf]  ;;  %v1368_v11 = vor.u32 %v1522_v0, %v1367_v63  ;;  %v1228_v12 = vor.u32 %v1484_v1, %v1225_v2  ;;  %v1324_v45 = vor.u32 %v1508_v37, %v1321_v40  ;;  %v2238_v0 = vld [vmem:[%s2391_s3] sm:$0xf] }
  0x43   :  { %799 = vmatpush.bf16.msrb.mxu1 %v1312_v16  ;;  %v1192_v46 = vor.u32 %v1478_v42, %v1191_v41 }
  0x44   :  { %819 = vmatmul.bf16.vlgmr.msrb.gmra.mxu2 %v2031_v26 }
  0x45   :  { %887 = vmatpush.bf16.msra.mxu2 %v1308_v4  ;;  %781 = vmatmul.bf16.vlgmr.msrb.gmra.mxu0 %v2031_v26  ;;  %v1474_v4 = vld [vmem:[%s2388_s4 + $0x14] sm:$0xf0] }
  0x46   :  { %906 = vmatpush.bf16.msra.mxu3 %v1436_v8  ;;  %849 = vmatpush.bf16.msra.mxu0 %v1304_v18  ;;  %v1240_v8 = vor.u32 %v1490_v62, %v1239_v61  ;;  %v1176_v16 = vor.u32 %v1474_v4, %v1175_v3  ;;  %v1480_v18 = vld [vmem:[%s2386_s5 + $0x2c] sm:$0xf]  ;;  %v2228_v61 = vld [vmem:[%s2390_s6] sm:$0xf] }
  0x47   :  { %868 = vmatpush.bf16.msra.mxu1 %v1432_v21  ;;  %838 = vmatmul.bf16.vlgmr.msrb.gmra.mxu3 %v2042_v30  ;;  %v1356_v21 = vor.u32 %v1516_v9, %v1353_v10  ;;  %v1212_v27 = vor.u32 %v1480_v18, %v1209_v19  ;;  %v2243_v3 = vperm.slane %v2228_v61, 0  ;;  %v2264_v15 = vperm.slane %v2228_v61, 1 }
  0x48   :  { %800 = vmatmul.bf16.vlgmr.msrb.gmra.mxu1 %v2042_v30 }
  0x49   :  { %888 = vmatpush.bf16.msra.mxu2 %v1292_v22  ;;  %v1224_v22 = vor.u32 %v1486_v14, %v1223_v13 }
  0x4a   :  { %907 = vmatpush.bf16.msra.mxu3 %v1420_v31  ;;  %850 = vmatpush.bf16.msra.mxu0 %v1288_v32  ;;  %v1335_v31 = vld [vmem:[%s2386_s5 + $0x128] sm:$0xf]  ;;  %v1514_v32 = vld [vmem:[%s2386_s5 + $0x134] sm:$0xf0] }
  0x4b   :  { %869 = vmatpush.bf16.msra.mxu1 %v1416_v35  ;;  %v1340_v35 = vor.u32 %v1512_v23, %v1337_v24  ;;  %v1336_v38 = vor.u32 %v1514_v32, %v1335_v31 }
  0x4d   :  { %889 = vmatpush.bf16.msra.mxu2 %v1276_v36  ;;  %v1208_v36 = vor.u32 %v1482_v29, %v1207_v28 }
  0x4e   :  { %908 = vmatpush.bf16.msra.mxu3 %v1404_v43  ;;  %851 = vmatpush.bf16.msra.mxu0 %v1272_v44  ;;  %v1319_v43 = vld [vmem:[%s2386_s5 + $0x108] sm:$0xf]  ;;  %v1510_v44 = vld [vmem:[%s2386_s5 + $0x114] sm:$0xf0] }
  0x4f   :  { %870 = vmatpush.bf16.msra.mxu1 %v1400_v47  ;;  %v1320_v47 = vor.u32 %v1510_v44, %v1319_v43 }
  0x51   :  { %890 = vmatpush.bf16.msra.mxu2 %v1260_v48 }
  0x52   :  { %909 = vmatpush.bf16.msra.mxu3 %v1388_v55  ;;  %852 = vmatpush.bf16.msra.mxu0 %v1256_v56 }
  0x53   :  { %871 = vmatpush.bf16.msra.mxu1 %v1384_v59 }
  0x54   :  { %824 = vmatmul.bf16.gmra.mxu2 %v1176_v16 }
  0x55   :  { %891 = vmatpush.bf16.msra.mxu2 %v1244_v60  ;;  %786 = vmatmul.bf16.gmra.mxu0 %v1176_v16  ;;  %v2223_v60 = vld [vmem:[%s2389_s2] sm:$0xf] }
  0x56   :  { %910 = vmatpush.bf16.msra.mxu3 %v1372_v7  ;;  %853 = vmatpush.bf16.msra.mxu0 %v1240_v8  ;;  %v2231_v62 = vperm.slane %v2223_v60, 0  ;;  %v2246_v4 = vperm.slane %v2223_v60, 1  ;;  %v2250_v7 = vperm.slane %v2238_v0, 0 }
  0x57   :  { %872 = vmatpush.bf16.msra.mxu1 %v1368_v11  ;;  %843 = vmatmul.bf16.gmra.mxu3 %v1180_v20  ;;  %v2255_v11 = vperm.slane %v2238_v0, 1 }
  0x58   :  { %805 = vmatmul.bf16.gmra.mxu1 %v1180_v20 }
  0x59   :  { %892 = vmatpush.bf16.msra.mxu2 %v1228_v12  ;;  %v2260_v12 = vld [vmem:[%s2392_s7] sm:$0xf] }
  0x5a   :  { %911 = vmatpush.bf16.msra.mxu3 %v1356_v21  ;;  %854 = vmatpush.bf16.msra.mxu0 %v1224_v22  ;;  %v2267_v18 = vperm.slane %v2260_v12, 0 }
  0x5b   :  { %873 = vmatpush.bf16.msra.mxu1 %v1352_v25  ;;  %v2273_v25 = vperm.slane %v2260_v12, 1 }
  0x5d   :  { %893 = vmatpush.bf16.msra.mxu2 %v1212_v27 }
  0x5e   :  { %912 = vmatpush.bf16.msra.mxu3 %v1340_v35  ;;  %855 = vmatpush.bf16.msra.mxu0 %v1208_v36 }
  0x5f   :  { %874 = vmatpush.bf16.msra.mxu1 %v1336_v38 }
  0x61   :  { %894 = vmatpush.bf16.msra.mxu2 %v1196_v39 }
  0x62   :  { %913 = vmatpush.bf16.msra.mxu3 %v1324_v45  ;;  %856 = vmatpush.bf16.msra.mxu0 %v1192_v46 }
  0x63   :  { %875 = vmatpush.bf16.msra.mxu1 %v1320_v47 }
  0x64   :  { %895 = vmatmul.bf16.vlgmr.msra.gmra.mxu2 %v2031_v26 }
  0x65   :  { %857 = vmatmul.bf16.vlgmr.msra.gmra.mxu0 %v2031_v26 }
  0x67   :  { %914 = vmatmul.bf16.vlgmr.msra.gmra.mxu3 %v2042_v30 }
  0x68   :  { %876 = vmatmul.bf16.vlgmr.msra.gmra.mxu1 %v2042_v30 }
  0x74   :  { %900 = vmatmul.bf16.gmra.mxu2 %v1176_v16 }
  0x75   :  { %862 = vmatmul.bf16.gmra.mxu0 %v1176_v16 }
  0x77   :  { %919 = vmatmul.bf16.gmra.mxu3 %v1180_v20 }
  0x78   :  { %881 = vmatmul.bf16.gmra.mxu1 %v1180_v20 }
  0xa0   :  { %v246_v48 = vpop.f32.mrf.mxu0 }
  0xa1   :  { %v265_v49 = vpop.f32.mrf.mxu1  ;;  %v323_v6 = vmul.f32 %v2231_v62, %v246_v48 }
  0xa2   :  { %v324_v10 = vmul.f32 %v2246_v4, %v265_v49 }
  0xa3   :  { %v349_v13 = vadd.f32 %v2250_v7, %v323_v6 }
  0xa4   :  { %v350_v21 = vadd.f32 %v2255_v11, %v324_v10 }
  0xa7   :  { %v2202_v50 = vpop.f32.mrf.mxu2 }
  0xa8   :  { %v2204_v51 = vpop.f32.mrf.mxu3  ;;  %v248_v52 = vpop.f32.mrf.mxu0 }
  0xa9   :  { %v267_v53 = vpop.f32.mrf.mxu1  ;;  %v327_v23 = vmul.f32 %v2231_v62, %v248_v52 }
  0xaa   :  { %v328_v32 = vmul.f32 %v2246_v4, %v267_v53 }
  0xab   :  { %v353_v33 = vadd.f32 %v2250_v7, %v327_v23 }
  0xac   :  { %v354_v42 = vadd.f32 %v2255_v11, %v328_v32  ;;  %v2309_v32 = vperm.slane %v2228_v61, 2 }
  0xaf   :  { %v2206_v54 = vpop.f32.mrf.mxu2 }
  0xb0   :  { %v2208_v55 = vpop.f32.mrf.mxu3  ;;  %v251_v26 = vpop.f32.mrf.mxu0 }
  0xb1   :  { %v2210_v56 = vpop.f32.mrf.mxu1  ;;  %v331_v44 = vmul.f32 %v2231_v62, %v251_v26 }
  0xb2   :  { %v332_v53 = vmul.f32 %v2246_v4, %v2210_v56 }
  0xb7   :  { %v2212_v30 = vpop.f32.mrf.mxu2 }
  0xb8   :  { %v2214_v57 = vpop.f32.mrf.mxu3  ;;  %v2216_v58 = vpop.f32.mrf.mxu0 }
  0xb9   :  { %v2218_v59 = vpop.f32.mrf.mxu1 }
  0xbf   :  { %v2233_v63 = vpop.f32.mrf.mxu2 }
  0xc0   :  { %v2240_v1 = vpop.f32.mrf.mxu3 }
  0xc2   :  { %v782_v2 = vpop.f32.mrf.mxu0 }
  0xc5   :  { %v801_v5 = vpop.f32.mrf.mxu1 }
  0xc6   :  { %v802_v8 = vadd.f32 %v801_v5, %v782_v2  ;;  %v357_v2 = vadd.f32 %v2250_v7, %v331_v44  ;;  %v2329_v44 = vperm.slane %v2238_v0, 3 }
  0xc7   :  { %v820_v14 = vpop.f32.mrf.mxu2 }
  0xc8   :  { %v935_v9 = vmul.f32 %v2243_v3, %v802_v8 }
  0xca   :  { %v839_v16 = vpop.f32.mrf.mxu3  ;;  %v951_v17 = vadd.f32 %v935_v9, %v349_v13  ;;  %v784_v20 = vpop.f32.mrf.mxu0 }
  0xcb   :  { %v840_v19 = vadd.f32 %v839_v16, %v820_v14  ;;  %v358_v16 = vadd.f32 %v2255_v11, %v332_v53 }
  0xcc   :  { %v977_v28 = vadd.f32 %v2267_v18, %v951_v17 }
  0xcd   :  { %v803_v22 = vpop.f32.mrf.mxu1  ;;  %v936_v24 = vmul.f32 %v2264_v15, %v840_v19  ;;  %v335_v19 = vmul.f32 %v2231_v62, %v2216_v58  ;;  %v336_v58 = vmul.f32 %v2246_v4, %v2218_v59  ;;  %v2317_v59 = vperm.slane %v2223_v60, 3 }
  0xce   :  { %v804_v27 = vadd.f32 %v803_v22, %v784_v20  ;;  %v993_v37 = vmax.f32 %v977_v28, 0.0 }
  0xcf   :  { %v952_v29 = vadd.f32 %v936_v24, %v350_v21  ;;  %v822_v35 = vpop.f32.mrf.mxu2  ;;  %v361_v28 = vadd.f32 %v2250_v7, %v335_v19  ;;  %v2314_v7 = vperm.slane %v2238_v0, 2 }
  0xd0   :  { %v939_v31 = vmul.f32 %v2243_v3, %v804_v27  ;;  %v2302_v27 = vperm.slane %v2223_v60, 2  ;;  %v326_v60 = vmul.f32 %v2317_v59, %v2204_v51 }
  0xd1   :  { %v978_v34 = vadd.f32 %v2273_v25, %v952_v29 }
  0xd2   :  { %v841_v36 = vpop.f32.mrf.mxu3  ;;  %v955_v39 = vadd.f32 %v939_v31, %v353_v33  ;;  %v787_v41 = vpop.f32.mrf.mxu0  ;;  %v352_v0 = vadd.f32 %v2329_v44, %v326_v60 }
  0xd3   :  { %v994_v38 = vmax.f32 %v978_v34, 0.0  ;;  %v842_v40 = vadd.f32 %v841_v36, %v822_v35 }
  0xd4   :  { %v981_v48 = vadd.f32 %v2267_v18, %v955_v39 }
  0xd5   :  { %v806_v43 = vpop.f32.mrf.mxu1  ;;  %v1009_v45 = vpack.c.bf16 %v994_v38, %v993_v37  ;;  %v940_v46 = vmul.f32 %v2264_v15, %v842_v40  ;;  %v325_v37 = vmul.f32 %v2302_v27, %v2202_v50  ;;  %v362_v38 = vadd.f32 %v2255_v11, %v336_v58 }
  0xd6   :  { %v807_v47 = vadd.f32 %v806_v43, %v787_v41  ;;  %v997_v8 = vmax.f32 %v981_v48, 0.0 }
  0xd7   :  { %1017 = vst [vmem:[%s2393_s8] sm:$0xff] %v1009_v45  ;;  %v956_v49 = vadd.f32 %v940_v46, %v354_v42  ;;  %v825_v5 = vpop.f32.mrf.mxu2  ;;  %v351_v11 = vadd.f32 %v2314_v7, %v325_v37  ;;  %v2334_v46 = vperm.slane %v2228_v61, 3  ;;  %v972_v61 = vperm.slane %v2260_v12, 3 }
  0xd8   :  { %v943_v52 = vmul.f32 %v2243_v3, %v807_v47  ;;  %v2337_v47 = vperm.slane %v2260_v12, 2 }
  0xd9   :  { %v982_v26 = vadd.f32 %v2273_v25, %v956_v49 }
  0xda   :  { %v844_v6 = vpop.f32.mrf.mxu3  ;;  %v959_v10 = vadd.f32 %v943_v52, %v357_v2  ;;  %v789_v14 = vpop.f32.mrf.mxu0  ;;  %v329_v2 = vmul.f32 %v2302_v27, %v2206_v54 }
  0xdb   :  { %v998_v9 = vmax.f32 %v982_v26, 0.0  ;;  %v845_v13 = vadd.f32 %v844_v6, %v825_v5 }
  0xdc   :  { %v985_v22 = vadd.f32 %v2267_v18, %v959_v10  ;;  %v355_v54 = vadd.f32 %v2314_v7, %v329_v2 }
  0xdd   :  { %v808_v17 = vpop.f32.mrf.mxu1  ;;  %v1011_v20 = vpack.c.bf16 %v998_v9, %v997_v8  ;;  %v944_v56 = vmul.f32 %v2264_v15, %v845_v13  ;;  %v330_v13 = vmul.f32 %v2317_v59, %v2208_v55 }
  0xde   :  { %v809_v21 = vadd.f32 %v808_v17, %v789_v14  ;;  %v1001_v33 = vmax.f32 %v985_v22, 0.0 }
  0xdf   :  { %1019 = vst [vmem:[%s2393_s8 + $0x10] sm:$0xff] %v1011_v20  ;;  %v960_v23 = vadd.f32 %v944_v56, %v358_v16  ;;  %v827_v29 = vpop.f32.mrf.mxu2  ;;  %v356_v22 = vadd.f32 %v2329_v44, %v330_v13 }
  0xe0   :  { %v947_v24 = vmul.f32 %v2243_v3, %v809_v21 }
  0xe1   :  { %v986_v62 = vadd.f32 %v2273_v25, %v960_v23 }
  0xe2   :  { %v846_v31 = vpop.f32.mrf.mxu3  ;;  %v963_v35 = vadd.f32 %v947_v24, %v361_v28  ;;  %v858_v3 = vpop.f32.mrf.mxu0  ;;  %v333_v24 = vmul.f32 %v2302_v27, %v2212_v30 }
  0xe3   :  { %v1002_v34 = vmax.f32 %v986_v62, 0.0  ;;  %v847_v36 = vadd.f32 %v846_v31, %v827_v29 }
  0xe4   :  { %v989_v42 = vadd.f32 %v2267_v18, %v963_v35 }
  0xe5   :  { %v877_v4 = vpop.f32.mrf.mxu1  ;;  %v1013_v39 = vpack.c.bf16 %v1002_v34, %v1001_v33  ;;  %v948_v40 = vmul.f32 %v2264_v15, %v847_v36  ;;  %v334_v33 = vmul.f32 %v2317_v59, %v2214_v57  ;;  %v359_v34 = vadd.f32 %v2314_v7, %v333_v24 }
  0xe6   :  { %v878_v41 = vadd.f32 %v877_v4, %v858_v3  ;;  %v1005_v48 = vmax.f32 %v989_v42, 0.0  ;;  %v337_v42 = vmul.f32 %v2302_v27, %v2233_v63 }
  0xe7   :  { %1021 = vst [vmem:[%s2393_s8 + $0x20] sm:$0xff] %v1013_v39  ;;  %v964_v50 = vadd.f32 %v948_v40, %v362_v38  ;;  %v896_v45 = vpop.f32.mrf.mxu2  ;;  %v360_v40 = vadd.f32 %v2329_v44, %v334_v33 }
  0xe8   :  { %v937_v43 = vmul.f32 %v2309_v32, %v878_v41 }
  0xe9   :  { %v990_v15 = vadd.f32 %v2273_v25, %v964_v50 }
  0xea   :  { %v915_v18 = vpop.f32.mrf.mxu3  ;;  %v953_v52 = vadd.f32 %v937_v43, %v351_v11  ;;  %v860_v51 = vpop.f32.mrf.mxu0 }
  0xeb   :  { %v1006_v49 = vmax.f32 %v990_v15, 0.0  ;;  %v916_v53 = vadd.f32 %v915_v18, %v896_v45  ;;  %v363_v45 = vadd.f32 %v2314_v7, %v337_v42  ;;  %v338_v18 = vmul.f32 %v2317_v59, %v2240_v1 }
  0xec   :  { %v979_v8 = vadd.f32 %v2337_v47, %v953_v52 }
  0xed   :  { %v879_v26 = vpop.f32.mrf.mxu1  ;;  %v1015_v25 = vpack.c.bf16 %v1006_v49, %v1005_v48  ;;  %v938_v5 = vmul.f32 %v2334_v46, %v916_v53 }
  0xee   :  { %v880_v6 = vadd.f32 %v879_v26, %v860_v51  ;;  %v995_v19 = vmax.f32 %v979_v8, 0.0 }
  0xef   :  { %1023 = vst [vmem:[%s2393_s8 + $0x30] sm:$0xff] %v1015_v25  ;;  %v954_v9 = vadd.f32 %v938_v5, %v352_v0  ;;  %v898_v16 = vpop.f32.mrf.mxu2  ;;  %v364_v0 = vadd.f32 %v2329_v44, %v338_v18 }
  0xf0   :  { %v941_v10 = vmul.f32 %v2309_v32, %v880_v6 }
  0xf1   :  { %v980_v14 = vadd.f32 %v972_v61, %v954_v9 }
  0xf2   :  { %v917_v17 = vpop.f32.mrf.mxu3  ;;  %v957_v20 = vadd.f32 %v941_v10, %v355_v54  ;;  %v863_v21 = vpop.f32.mrf.mxu0 }
  0xf3   :  { %v996_v12 = vmax.f32 %v980_v14, 0.0  ;;  %v918_v56 = vadd.f32 %v917_v17, %v898_v16 }
  0xf4   :  { %v983_v62 = vadd.f32 %v2337_v47, %v957_v20 }
  0xf5   :  { %v882_v23 = vpop.f32.mrf.mxu1  ;;  %v1010_v28 = vpack.c.bf16 %v996_v12, %v995_v19  ;;  %v942_v58 = vmul.f32 %v2334_v46, %v918_v56 }
  0xf6   :  { %v883_v55 = vadd.f32 %v882_v23, %v863_v21  ;;  %v999_v3 = vmax.f32 %v983_v62, 0.0 }
  0xf7   :  { %1018 = vst [vmem:[%s2393_s8 + $0x8] sm:$0xff] %v1010_v28  ;;  %v958_v29 = vadd.f32 %v942_v58, %v356_v22  ;;  %v901_v30 = vpop.f32.mrf.mxu2 }
  0xf8   :  { %v945_v31 = vmul.f32 %v2309_v32, %v883_v55 }
  0xf9   :  { %v984_v35 = vadd.f32 %v972_v61, %v958_v29 }
  0xfa   :  { %v920_v36 = vpop.f32.mrf.mxu3  ;;  %v961_v4 = vadd.f32 %v945_v31, %v359_v34  ;;  %v865_v39 = vpop.f32.mrf.mxu0 }
  0xfb   :  { %v1000_v37 = vmax.f32 %v984_v35, 0.0  ;;  %v921_v38 = vadd.f32 %v920_v36, %v901_v30 }
  0xfc   :  { %v987_v60 = vadd.f32 %v2337_v47, %v961_v4 }
  0xfd   :  { %v884_v41 = vpop.f32.mrf.mxu1  ;;  %v1012_v50 = vpack.c.bf16 %v1000_v37, %v999_v3  ;;  %v946_v43 = vmul.f32 %v2334_v46, %v921_v38 }
  0xfe   :  { %v885_v57 = vadd.f32 %v884_v41, %v865_v39  ;;  %v1003_v49 = vmax.f32 %v987_v60, 0.0 }
  0xff   :  { %1020 = vst [vmem:[%s2393_s8 + $0x18] sm:$0xff] %v1012_v50  ;;  %v962_v11 = vadd.f32 %v946_v43, %v360_v40  ;;  %v903_v63 = vpop.f32.mrf.mxu2 }
 0x100   :  { %v949_v15 = vmul.f32 %v2309_v32, %v885_v57 }
 0x101   :  { %v988_v48 = vadd.f32 %v972_v61, %v962_v11 }
 0x102   :  { %v922_v27 = vpop.f32.mrf.mxu3  ;;  %v965_v53 = vadd.f32 %v949_v15, %v363_v45 }
 0x103   :  { %v1004_v52 = vmax.f32 %v988_v48, 0.0  ;;  %v923_v51 = vadd.f32 %v922_v27, %v903_v63 }
 0x104   :  { %v991_v32 = vadd.f32 %v2337_v47, %v965_v53 }
 0x105   :  { %v1014_v2 = vpack.c.bf16 %v1004_v52, %v1003_v49  ;;  %v950_v26 = vmul.f32 %v2334_v46, %v923_v51 }
 0x106   :  { %v1007_v59 = vmax.f32 %v991_v32, 0.0 }
 0x107   :  { %1022 = vst [vmem:[%s2393_s8 + $0x28] sm:$0xff] %v1014_v2  ;;  %v966_v7 = vadd.f32 %v950_v26, %v364_v0 }
 0x109   :  { %v992_v1 = vadd.f32 %v972_v61, %v966_v7 }
 0x10b   :  { %v1008_v25 = vmax.f32 %v992_v1, 0.0 }
 0x10d   :  { %v1016_v5 = vpack.c.bf16 %v1008_v25, %v1007_v59 }
 0x10f   :  { %1024 = vst [vmem:[%s2393_s8 + $0x38] sm:$0xff] %v1016_v5 }

// kernel: extractor_resnet152_forward.23
= control target key start
LH: loop header
LB: loop body
LE: loop exit
PB: predicated region body
PF: predicated region fallthrough
CT: control target
= control target key end

     0   :  { %s3085_s13 = smov 0   ;;  %s3959_s0 = inlined_call_operand.vmem [shape: bf16[2,16,512], index: 0, kind: input, shape index: {}]   ;;  %s3960_s1 = inlined_call_operand.vmem [shape: bf16[512,128], index: 1, kind: input, shape index: {}]   ;;  %s3961_s2 = inlined_call_operand.vmem [shape: f32[1,128], index: 2, kind: input, shape index: {}]   ;;  %s3962_s3 = inlined_call_operand.vmem [shape: f32[1,128], index: 3, kind: input, shape index: {}]   ;;  %s3963_s4 = inlined_call_operand.vmem [shape: bf16[9,128,128], index: 4, kind: input, shape index: {}]   ;;  %s3964_s5 = inlined_call_operand.vmem [shape: f32[1,128], index: 5, kind: input, shape index: {}]   ;;  %s3965_s6 = inlined_call_operand.vmem [shape: f32[1,128], index: 6, kind: input, shape index: {}]   ;;  %s3966_s7 = inlined_call_operand.vmem [shape: bf16[128,512], index: 7, kind: input, shape index: {}]   ;;  %s3967_s8 = inlined_call_operand.vmem [shape: f32[1,512], index: 8, kind: input, shape index: {}]   ;;  %s3968_s9 = inlined_call_operand.vmem [shape: f32[1,512], index: 9, kind: input, shape index: {}]   ;;  %s3969_s10 = inlined_call_operand.vmem [shape: bf16[2,16,512], index: 10, kind: output, shape index: {}]  }
   0x1 LB: > { %s2162_s14 = sadd.s32 4294967295, %s3027_s13   ;;  %p2166_p0 = scmp.ge.s32.totalorder %s3027_s13, 1  ;;  %s3027_s13 = sphi %s3085_s13, %s20_s13  }
   0x2   : > { %p312_p1 = scmp.lt.s32.totalorder %s3027_s13, 3 }
   0x4   : > { %p313_p2 = pnand %p2166_p0, %p312_p1 }
   0x5   : > { %p350_p3 = scmp.lt.s32.totalorder (!%p313_p2), %s2162_s14, 1 }
   0x6   : > { %316 = sbr.rel (%p313_p2) target bundleno = 552 (0x228), region = 60 }
   0xb   : > { %v2878_v0 = vld [vmem:[%s3960_s1 + $0x38] sm:$0xff]  ;;  %v2877_v4 = vld [vmem:[%s3960_s1 + $0x30] sm:$0xff]  ;;  %v2876_v8 = vld [vmem:[%s3960_s1 + $0x28] sm:$0xff]  ;;  %s4043_s14 = smov (!%p350_p3, %s2162_s14), 1  ;;  %vm713_vm0 = vcmask 1042432   ;;  %vm719_vm3 = vcmask 1043458  }
   0xc   : > { %v2886_v1 = vld [vmem:[%s3960_s1 + $0x78] sm:$0xff]  ;;  %643 = vmatpush.bf16.msra.mxu0 %v2878_v0  ;;  %v2885_v5 = vld [vmem:[%s3960_s1 + $0x70] sm:$0xff]  ;;  %v2884_v9 = vld [vmem:[%s3960_s1 + $0x68] sm:$0xff]  ;;  %s2865_s27 = sshll.u32 %s4043_s14, 5  ;;  %vm714_vm1 = vsmask.f32 2304 }
   0xd   : > { %v2894_v2 = vld [vmem:[%s3960_s1 + $0xb8] sm:$0xff]  ;;  %657 = vmatpush.bf16.msra.mxu1 %v2886_v1  ;;  %v2893_v6 = vld [vmem:[%s3960_s1 + $0xb0] sm:$0xff]  ;;  %v2892_v10 = vld [vmem:[%s3960_s1 + $0xa8] sm:$0xff]  ;;  %s3183_s16 = scalar_lea.vmem %s3959_s0, %s2865_s27  ;;  %vm720_vm4 = vsmask.f32 7946  ;;  %vm995_vm14 = vcmask 1040384   ;;  %s359_s28 = scalar_lea.vmem %s3969_s10, %s2865_s27 }
   0xe   : > { %v2902_v3 = vld [vmem:[%s3960_s1 + $0xf8] sm:$0xff]  ;;  %671 = vmatpush.bf16.msra.mxu2 %v2894_v2  ;;  %v2901_v7 = vld [vmem:[%s3960_s1 + $0xf0] sm:$0xff]  ;;  %v2900_v11 = vld [vmem:[%s3960_s1 + $0xe8] sm:$0xff]  ;;  %vm996_vm15 = vcmask 1044484  }
   0xf   : > { %685 = vmatpush.bf16.msra.mxu3 %v2902_v3  ;;  %v2875_v12 = vld [vmem:[%s3960_s1 + $0x20] sm:$0xff]  ;;  %v2874_v16 = vld [vmem:[%s3960_s1 + $0x18] sm:$0xff]  ;;  %v2873_v20 = vld [vmem:[%s3960_s1 + $0x10] sm:$0xff] }
  0x10   : > { %644 = vmatpush.bf16.msra.mxu0 %v2877_v4  ;;  %v2883_v13 = vld [vmem:[%s3960_s1 + $0x60] sm:$0xff]  ;;  %v2882_v17 = vld [vmem:[%s3960_s1 + $0x58] sm:$0xff]  ;;  %v2881_v21 = vld [vmem:[%s3960_s1 + $0x50] sm:$0xff] }
  0x11   : > { %658 = vmatpush.bf16.msra.mxu1 %v2885_v5  ;;  %v2891_v14 = vld [vmem:[%s3960_s1 + $0xa0] sm:$0xff]  ;;  %v2890_v18 = vld [vmem:[%s3960_s1 + $0x98] sm:$0xff]  ;;  %v2889_v22 = vld [vmem:[%s3960_s1 + $0x90] sm:$0xff] }
  0x12   : > { %672 = vmatpush.bf16.msra.mxu2 %v2893_v6  ;;  %v2899_v15 = vld [vmem:[%s3960_s1 + $0xe0] sm:$0xff]  ;;  %v2898_v19 = vld [vmem:[%s3960_s1 + $0xd8] sm:$0xff]  ;;  %v2897_v23 = vld [vmem:[%s3960_s1 + $0xd0] sm:$0xff] }
  0x13   : > { %686 = vmatpush.bf16.msra.mxu3 %v2901_v7  ;;  %v2872_v24 = vld [vmem:[%s3960_s1 + $0x8] sm:$0xff]  ;;  %v2871_v28 = vld [vmem:[%s3960_s1] sm:$0xff]  ;;  %v2869_v33 = vld [vmem:[%s3183_s16 + $0xc] sm:$0xf0] }
  0x14   : > { %645 = vmatpush.bf16.msra.mxu0 %v2876_v8  ;;  %v2880_v25 = vld [vmem:[%s3960_s1 + $0x48] sm:$0xff]  ;;  %v2879_v29 = vld [vmem:[%s3960_s1 + $0x40] sm:$0xff]  ;;  %v2175_v35 = vld [vmem:[%s3183_s16 + $0x10] sm:$0xf0] }
  0x15   : > { %659 = vmatpush.bf16.msra.mxu1 %v2884_v9  ;;  %v2888_v26 = vld [vmem:[%s3960_s1 + $0x88] sm:$0xff]  ;;  %v2887_v30 = vld [vmem:[%s3960_s1 + $0x80] sm:$0xff]  ;;  %v2870_v37 = vld [vmem:[%s3183_s16 + $0x14] sm:$0xf0] }
  0x16   : > { %673 = vmatpush.bf16.msra.mxu2 %v2892_v10  ;;  %v2896_v27 = vld [vmem:[%s3960_s1 + $0xc8] sm:$0xff]  ;;  %v2895_v31 = vld [vmem:[%s3960_s1 + $0xc0] sm:$0xff]  ;;  %v2183_v39 = vld [vmem:[%s3183_s16 + $0x18] sm:$0xf0] }
  0x17   : > { %687 = vmatpush.bf16.msra.mxu3 %v2900_v11  ;;  %v2173_v32 = vld [vmem:[%s3183_s16] sm:$0xf]  ;;  %v2867_v34 = vld [vmem:[%s3183_s16 + $0x4] sm:$0xf]  ;;  %v2181_v36 = vld [vmem:[%s3183_s16 + $0x8] sm:$0xf] }
  0x18   : > { %646 = vmatpush.bf16.msra.mxu0 %v2875_v12  ;;  %v2868_v38 = vld [vmem:[%s3183_s16 + $0xc] sm:$0xf]  ;;  %v2918_v40 = vld [vmem:[%s3963_s4 + $0x78] sm:$0xff]  ;;  %v2174_v41 = vor.u32 %v2869_v33, %v2173_v32  ;;  %v2178_v42 = vor.u32 %v2867_v34, %v2175_v35  ;;  %v2182_v43 = vor.u32 %v2870_v37, %v2181_v36  ;;  %v2917_v45 = vld [vmem:[%s3963_s4 + $0x70] sm:$0xff] }
  0x19   : > { %660 = vmatpush.bf16.msra.mxu1 %v2883_v13  ;;  %v2186_v44 = vor.u32 %v2868_v38, %v2183_v39  ;;  %v2910_v46 = vld [vmem:[%s3963_s4 + $0x38] sm:$0xff]  ;;  %v2916_v47 = vld [vmem:[%s3963_s4 + $0x68] sm:$0xff]  ;;  %v2909_v48 = vld [vmem:[%s3963_s4 + $0x30] sm:$0xff] }
  0x1a   : > { %674 = vmatpush.bf16.msra.mxu2 %v2891_v14  ;;  %v2915_v49 = vld [vmem:[%s3963_s4 + $0x60] sm:$0xff]  ;;  %v2926_v50 = vld [vmem:[%s3963_s4 + $0xb8] sm:$0xff]  ;;  %v2908_v52 = vld [vmem:[%s3963_s4 + $0x28] sm:$0xff] }
  0x1b   : > { %688 = vmatpush.bf16.msra.mxu3 %v2899_v15  ;;  %v2934_v51 = vld [vmem:[%s3963_s4 + $0xf8] sm:$0xff]  ;;  %v2925_v54 = vld [vmem:[%s3963_s4 + $0xb0] sm:$0xff]  ;;  %v2907_v56 = vld [vmem:[%s3963_s4 + $0x20] sm:$0xff]  ;;  %v3029_v15 = vmov 0  }
  0x1c   : > { %647 = vmatpush.bf16.msra.mxu0 %v2874_v16  ;;  %v2914_v53 = vld [vmem:[%s3963_s4 + $0x58] sm:$0xff]  ;;  %v2933_v55 = vld [vmem:[%s3963_s4 + $0xf0] sm:$0xff]  ;;  %v2924_v58 = vld [vmem:[%s3963_s4 + $0xa8] sm:$0xff]  ;;  %725 = vst [vmem:[#allocation2 + $0xc] sm:$0x1] %v3029_v15 }
  0x1d   : > { %661 = vmatpush.bf16.msra.mxu1 %v2882_v17  ;;  %v2913_v57 = vld [vmem:[%s3963_s4 + $0x50] sm:$0xff]  ;;  %v2932_v59 = vld [vmem:[%s3963_s4 + $0xe8] sm:$0xff]  ;;  %vm3261_vm2 = vmand %vm713_vm0, %vm714_vm1 }
  0x1e   : > { %675 = vmatpush.bf16.msra.mxu2 %v2890_v18  ;;  %v716_v61 = vld [vmem:[#allocation2] sm:$0x7]  ;;  %vm3267_vm5 = vmand %vm719_vm3, %vm720_vm4  ;;  %v722_v0 = vld [vmem:[#allocation2 + $0x8] sm:$0xc]  ;;  %vm1125_vm3 = vcmask 1041408   ;;  %vm1126_vm4 = vcmask 1045508  }
  0x1f   : > { %689 = vmatpush.bf16.msra.mxu3 %v2898_v19  ;;  %v717_v62 = vsel %vm3261_vm2, 0, %v716_v61  ;;  %v723_v1 = vsel %vm3267_vm5, 0, %v722_v0  ;;  %v2906_v2 = vld [vmem:[%s3963_s4 + $0x18] sm:$0xff]  ;;  %v2912_v3 = vld [vmem:[%s3963_s4 + $0x48] sm:$0xff]  ;;  %v2923_v4 = vld [vmem:[%s3963_s4 + $0xa0] sm:$0xff] }
  0x20   : > { %648 = vmatpush.bf16.msra.mxu0 %v2873_v20  ;;  %718 = vst [vmem:[#allocation2] sm:$0x7] %v717_v62  ;;  %v2931_v5 = vld [vmem:[%s3963_s4 + $0xe0] sm:$0xff]  ;;  %v2905_v6 = vld [vmem:[%s3963_s4 + $0x10] sm:$0xff]  ;;  %v2922_v8 = vld [vmem:[%s3963_s4 + $0x98] sm:$0xff]  ;;  %v759_v20 = vlaneseq }
  0x21   : > { %662 = vmatpush.bf16.msra.mxu1 %v2881_v21  ;;  %724 = vst [vmem:[#allocation2 + $0x8] sm:$0xc] %v723_v1  ;;  %v2911_v7 = vld [vmem:[%s3963_s4 + $0x40] sm:$0xff]  ;;  %v2930_v9 = vld [vmem:[%s3963_s4 + $0xd8] sm:$0xff]  ;;  %v2904_v11 = vld [vmem:[%s3963_s4 + $0x8] sm:$0xff] }
  0x22   : > { %676 = vmatpush.bf16.msra.mxu2 %v2889_v22  ;;  %v2942_v10 = vld [vmem:[%s3963_s4 + $0x138] sm:$0xff]  ;;  %v2921_v12 = vld [vmem:[%s3963_s4 + $0x90] sm:$0xff]  ;;  %v2903_v16 = vld [vmem:[%s3963_s4] sm:$0xff] }
  0x23   : > { %690 = vmatpush.bf16.msra.mxu3 %v2897_v23  ;;  %v2929_v13 = vld [vmem:[%s3963_s4 + $0xd0] sm:$0xff]  ;;  %v2920_v17 = vld [vmem:[%s3963_s4 + $0x88] sm:$0xff]  ;;  %v2950_v19 = vld [vmem:[%s3963_s4 + $0x178] sm:$0xff] }
  0x24   : > { %649 = vmatpush.bf16.msra.mxu0 %v2872_v24  ;;  %v2941_v14 = vld [vmem:[%s3963_s4 + $0x130] sm:$0xff]  ;;  %v2928_v18 = vld [vmem:[%s3963_s4 + $0xc8] sm:$0xff]  ;;  %v2919_v24 = vld [vmem:[%s3963_s4 + $0x80] sm:$0xff] }
  0x25   : > { %663 = vmatpush.bf16.msra.mxu1 %v2880_v25  ;;  %v2940_v21 = vld [vmem:[%s3963_s4 + $0x128] sm:$0xff]  ;;  %v2927_v25 = vld [vmem:[%s3963_s4 + $0xc0] sm:$0xff]  ;;  %v2938_v36 = vld [vmem:[%s3963_s4 + $0x118] sm:$0xff] }
  0x26   : > { %677 = vmatpush.bf16.msra.mxu2 %v2888_v26  ;;  %v760_v26 = vshrl.u32 %v759_v20, 7  ;;  %v2948_v32 = vld [vmem:[%s3963_s4 + $0x168] sm:$0xff]  ;;  %v2957_v37 = vld [vmem:[%s3963_s4 + $0x1b0] sm:$0xff]  ;;  %v2955_v0 = vld [vmem:[%s3963_s4 + $0x1a0] sm:$0xff] }
  0x27   : > { %691 = vmatpush.bf16.msra.mxu3 %v2896_v27  ;;  %v2936_v62 = vld [vmem:[%s3963_s4 + $0x108] sm:$0xff]  ;;  %v2964_v1 = vld [vmem:[%s3963_s4 + $0x1e0] sm:$0xff] }
  0x28   : > { %650 = vmatpush.bf16.msra.mxu0 %v2871_v28  ;;  %v2949_v28 = vld [vmem:[%s3963_s4 + $0x170] sm:$0xff]  ;;  %v761_v33 = vadd.s32 8, %v760_v26  ;;  %v766_v38 = vand.u32 3, %v760_v26  ;;  %v2935_v20 = vld [vmem:[%s3963_s4 + $0x100] sm:$0xff] }
  0x29   : > { %664 = vmatpush.bf16.msra.mxu1 %v2879_v29  ;;  %v2939_v29 = vld [vmem:[%s3963_s4 + $0x120] sm:$0xff] }
  0x2a   : > { %678 = vmatpush.bf16.msra.mxu2 %v2887_v30  ;;  %v2958_v30 = vld [vmem:[%s3963_s4 + $0x1b8] sm:$0xff]  ;;  %vm786_vm6 = vcmp.ne.s32.totalorder %v766_v38, 0  ;;  %vm3376_vm7 = vcmp.ne.s32.totalorder %v766_v38, 3 }
  0x2b   : > { %692 = vmatpush.bf16.msra.mxu3 %v2895_v31  ;;  %651 = vmatmul.bf16.vlgmr.msra.gmra.mxu0 %v2174_v41  ;;  %v2967_v31 = vld [vmem:[%s3963_s4 + $0x1f8] sm:$0xff]  ;;  %v2966_v41 = vld [vmem:[%s3963_s4 + $0x1f0] sm:$0xff]  ;;  %vm3380_vm9 = vmpackc.low %vm786_vm6, %vm786_vm6  ;;  %vm728_vm6 = vsmask.f32 6416 }
  0x2c   : > { %904 = vmatpush.bf16.msrb.mxu0 %v2918_v40  ;;  %665 = vmatmul.bf16.vlgmr.msra.gmra.mxu1 %v2178_v42  ;;  %v3017_v40 = vld [vmem:[%s3961_s2] ss:$0 sm:$0xff]  ;;  %vm991_vm11 = vmpackc.low %vm3376_vm7, %vm3376_vm7 }
  0x2d   : > { %679 = vmatmul.bf16.vlgmr.msra.gmra.mxu2 %v2182_v43  ;;  %972 = vmatpush.bf16.msrb.mxu1 %v2910_v46  ;;  %v3018_v43 = vld [vmem:[%s3962_s3] ss:$0 sm:$0xff]  ;;  %vm3449_vm7 = vmor %vm995_vm14, %vm996_vm15 }
  0x2e   : > { %693 = vmatmul.bf16.vlgmr.msra.gmra.mxu3 %v2186_v44  ;;  %1105 = vmatpush.bf16.msrb.mxu2 %v2926_v50  ;;  %v2947_v44 = vld [vmem:[%s3963_s4 + $0x160] sm:$0xff] }
  0x2f   : > { %1235 = vmatpush.bf16.msrb.mxu3 %v2934_v51  ;;  %v2965_v51 = vld [vmem:[%s3963_s4 + $0x1e8] sm:$0xff] }
  0x30   : > { %905 = vmatpush.bf16.msrb.mxu0 %v2917_v45  ;;  %v773_v45 = vand.u32 3, %v761_v33  ;;  %v2962_v33 = vld [vmem:[%s3963_s4 + $0x1d0] sm:$0xff] }
  0x31   : > { %973 = vmatpush.bf16.msrb.mxu1 %v2909_v48  ;;  %v2937_v48 = vld [vmem:[%s3963_s4 + $0x110] sm:$0xff] }
  0x32   : > { %1106 = vmatpush.bf16.msrb.mxu2 %v2925_v54  ;;  %vm787_vm8 = vcmp.ne.s32.totalorder %v773_v45, 0  ;;  %vm3384_vm10 = vcmp.ne.s32.totalorder %v773_v45, 3 }
  0x33   : > { %1236 = vmatpush.bf16.msrb.mxu3 %v2933_v55  ;;  %v3980_v55 = vmov 0  ;;  %vm3403_vm12 = vmpackc.low %vm787_vm8, %vm787_vm8 }
  0x34   : > { %906 = vmatpush.bf16.msrb.mxu0 %v2916_v47  ;;  %v3981_v55 = vsel %vm3380_vm9, 4294967295, %v3980_v55  ;;  %vm992_vm13 = vmpackc.low %vm3384_vm10, %vm3384_vm10 }
  0x35   : > { %974 = vmatpush.bf16.msrb.mxu1 %v2908_v52  ;;  %vm3464_vm8 = vmor %vm1125_vm3, %vm1126_vm4 }
  0x36   : > { %1107 = vmatpush.bf16.msrb.mxu2 %v2924_v58  ;;  %v2946_v58 = vld [vmem:[%s3963_s4 + $0x158] sm:$0xff]  ;;  %vm3493_vm10 = vmor %vm714_vm1, %vm728_vm6 }
  0x37   : > { %1237 = vmatpush.bf16.msrb.mxu3 %v2932_v59 }
  0x38   : > { %907 = vmatpush.bf16.msrb.mxu0 %v2915_v49  ;;  %v2956_v49 = vld [vmem:[%s3963_s4 + $0x1a8] sm:$0xff] }
  0x39   : > { %975 = vmatpush.bf16.msrb.mxu1 %v2907_v56 }
  0x3a   : > { %1108 = vmatpush.bf16.msrb.mxu2 %v2923_v4  ;;  %v1123_v4 = vsel %vm3380_vm9, 65537, %v3029_v15 }
  0x3b   : > { %1238 = vmatpush.bf16.msrb.mxu3 %v2931_v5 }
  0x3c   : > { %908 = vmatpush.bf16.msrb.mxu0 %v2914_v53 }
  0x3d   : > { %976 = vmatpush.bf16.msrb.mxu1 %v2906_v2 }
  0x3e   : > { %1109 = vmatpush.bf16.msrb.mxu2 %v2922_v8 }
  0x3f   : > { %1239 = vmatpush.bf16.msrb.mxu3 %v2930_v9 }
  0x40   : > { %909 = vmatpush.bf16.msrb.mxu0 %v2913_v57 }
  0x41   : > { %977 = vmatpush.bf16.msrb.mxu1 %v2905_v6 }
  0x42   : > { %1110 = vmatpush.bf16.msrb.mxu2 %v2921_v12  ;;  %v3417_v12 = vsel %vm992_vm13, 65537, %v3029_v15 }
  0x43   : > { %1240 = vmatpush.bf16.msrb.mxu3 %v2929_v13 }
  0x44   : > { %910 = vmatpush.bf16.msrb.mxu0 %v2912_v3 }
  0x45   : > { %978 = vmatpush.bf16.msrb.mxu1 %v2904_v11  ;;  %v3414_v11 = vrot.slane %v1123_v4, 6 }
  0x46   : > { %1111 = vmatpush.bf16.msrb.mxu2 %v2920_v17 }
  0x47   : > { %1241 = vmatpush.bf16.msrb.mxu3 %v2928_v18  ;;  %v1133_v38 = vunpack.c.l.b16 %v3414_v11 }
  0x48   : > { %911 = vmatpush.bf16.msrb.mxu0 %v2911_v7  ;;  %v993_v7 = vsel %vm991_vm11, 65537, %v3029_v15 }
  0x49   : > { %979 = vmatpush.bf16.msrb.mxu1 %v2903_v16  ;;  %v3419_v13 = vrot.slane %v993_v7, 7  ;;  %v2945_v16 = vld [vmem:[%s3963_s4 + $0x150] sm:$0xff] }
  0x4a   : > { %1112 = vmatpush.bf16.msrb.mxu2 %v2919_v24  ;;  %v2944_v24 = vld [vmem:[%s3963_s4 + $0x148] sm:$0xff] }
  0x4b   : > { %1242 = vmatpush.bf16.msrb.mxu3 %v2927_v25  ;;  %v1003_v63 = vunpack.c.l.b16 %v3419_v13 }
  0x4c   : > { %1342 = vmatpush.bf16.msra.mxu0 %v2942_v10 }
  0x4d   : > { %1468 = vmatpush.bf16.msra.mxu1 %v2950_v19 }
  0x4e   : > { %1558 = vmatpush.bf16.msra.mxu2 %v2958_v30  ;;  %v1129_v30 = vrot.slane %v3414_v11, 4 }
  0x4f   : > { %1663 = vmatpush.bf16.msra.mxu3 %v2967_v31 }
  0x50   : > { %1343 = vmatpush.bf16.msra.mxu0 %v2941_v14  ;;  %v1124_v14 = vsel %vm3403_vm12, 65537, %v3029_v15 }
  0x51   : > { %1469 = vmatpush.bf16.msra.mxu1 %v2949_v28  ;;  %v999_v28 = vrot.slane %v3419_v13, 4  ;;  %v1130_v31 = vrot.slane %v1124_v14, 6 }
  0x52   : > { %1559 = vmatpush.bf16.msra.mxu2 %v2957_v37 }
  0x53   : > { %1664 = vmatpush.bf16.msra.mxu3 %v2966_v41  ;;  %v1134_v41 = vunpack.c.h.b16 %v3414_v11  ;;  %v1132_v57 = vrot.slane %v1130_v31, 4  ;;  %v2960_v11 = vld [vmem:[%s3963_s4 + $0x1c0] sm:$0xff] }
  0x54   : > { %1344 = vmatpush.bf16.msra.mxu0 %v2940_v21  ;;  %v2954_v21 = vld [vmem:[%s3963_s4 + $0x198] sm:$0xff] }
  0x55   : > { %1470 = vmatpush.bf16.msra.mxu1 %v2948_v32 }
  0x56   : > { %1560 = vmatpush.bf16.msra.mxu2 %v2956_v49  ;;  %v1131_v49 = vsel %vm3464_vm8, %v1129_v30, %v1130_v31  ;;  %v2969_v30 = vld [vmem:[%s3963_s4 + $0x208] sm:$0xff] }
  0x57   : > { %1665 = vmatpush.bf16.msra.mxu3 %v2965_v51  ;;  %v1140_v4 = vunpack.c.l.b16 %v1131_v49 }
  0x58   : > { %1345 = vmatpush.bf16.msra.mxu0 %v2939_v29  ;;  %v2953_v29 = vld [vmem:[%s3963_s4 + $0x190] sm:$0xff] }
  0x59   : > { %1471 = vmatpush.bf16.msra.mxu1 %v2947_v44 }
  0x5a   : > { %1561 = vmatpush.bf16.msra.mxu2 %v2955_v0 }
  0x5b   : > { %1666 = vmatpush.bf16.msra.mxu3 %v2964_v1 }
  0x5c   : > { %1346 = vmatpush.bf16.msra.mxu0 %v2938_v36  ;;  %v3460_v36 = vunpack.c.l.b16 %v3029_v15 }
  0x5d   : > { %1472 = vmatpush.bf16.msra.mxu1 %v2946_v58  ;;  %v3994_v58 = vmov 0 }
  0x5e   : > { %1562 = vmatpush.bf16.msra.mxu2 %v2954_v21  ;;  %vm3499_vm11 = vcmp.ne.s32.totalorder %v1133_v38, %v3460_v36  ;;  %vm3504_vm13 = vcmp.ne.s32.totalorder %v1003_v63, %v3460_v36  ;;  %vm3554_vm6 = vcmp.ne.s32.totalorder %v1140_v4, %v3460_v36  ;;  %v4020_v63 = vmov 0 }
  0x5f   : > { %v3995_v58 = vsel %vm3504_vm13, 4294967295, %v3994_v58 }
  0x60   : > { %1347 = vmatpush.bf16.msra.mxu0 %v2937_v48  ;;  %v1004_v48 = vunpack.c.h.b16 %v3419_v13 }
  0x61   : > { %1473 = vmatpush.bf16.msra.mxu1 %v2945_v16 }
  0x62   : > { %1563 = vmatpush.bf16.msra.mxu2 %v2953_v29 }
  0x64   : > { %1348 = vmatpush.bf16.msra.mxu0 %v2936_v62 }
  0x65   : > { %1474 = vmatpush.bf16.msra.mxu1 %v2944_v24 }
  0x68   : > { %1349 = vmatpush.bf16.msra.mxu0 %v2935_v20 }
  0xa8   : > { %v652_v22 = vpop.f32.mrf.mxu0 }
  0xa9   : > { %v666_v23 = vpop.f32.mrf.mxu1 }
  0xaa   : > { %v667_v27 = vadd.f32 %v666_v23, %v652_v22  ;;  %v2963_v22 = vld [vmem:[%s3963_s4 + $0x1d8] sm:$0xff]  ;;  %v752_v23 = vld [vmem:[#allocation2] sm:$0xc] }
  0xab   : > { %1667 = vmatpush.bf16.msra.mxu3 %v2963_v22 }
  0xaf   : > { %1668 = vmatpush.bf16.msra.mxu3 %v2962_v33 }
  0xb0   : > { %v680_v34 = vpop.f32.mrf.mxu2  ;;  %v654_v46 = vpop.f32.mrf.mxu0 }
  0xb1   : > { %v694_v35 = vpop.f32.mrf.mxu3  ;;  %v681_v39 = vadd.f32 %v680_v34, %v667_v27  ;;  %v668_v47 = vpop.f32.mrf.mxu1  ;;  %v1000_v27 = vrot.slane %v3417_v12, 7 }
  0xb2   : > { %v669_v54 = vadd.f32 %v668_v47, %v654_v46  ;;  %v1363_v46 = vrot.slane %v3417_v12, 5 }
  0xb3   : > { %v695_v42 = vadd.f32 %v694_v35, %v681_v39  ;;  %v3470_v39 = vunpack.c.h.b16 %v3029_v15  ;;  %v1001_v45 = vsel %vm3449_vm7, %v999_v28, %v1000_v27  ;;  %v2952_v15 = vld [vmem:[%s3963_s4 + $0x188] sm:$0xff]  ;;  %v1002_v47 = vrot.slane %v1000_v27, 4 }
  0xb4   : > { %1564 = vmatpush.bf16.msra.mxu2 %v2952_v15 }
  0xb5   : > { %v703_v50 = vmul.f32 %v3017_v40, %v695_v42  ;;  %v2943_v42 = vld [vmem:[%s3963_s4 + $0x140] sm:$0xff]  ;;  %vm3509_vm1 = vcmp.ne.s32.totalorder %v1134_v41, %v3470_v39  ;;  %vm3524_vm15 = vcmp.ne.s32.totalorder %v1004_v48, %v3470_v39  ;;  %v1018_v14 = vunpack.c.h.b16 %v1002_v47 }
  0xb6   : > { %1475 = vmatpush.bf16.msra.mxu1 %v2943_v42 }
  0xb7   : > { %v709_v53 = vadd.f32 %v3018_v43, %v703_v50  ;;  %v2961_v50 = vld [vmem:[%s3963_s4 + $0x1c8] sm:$0xff]  ;;  %vm3569_vm8 = vcmp.ne.s32.totalorder %v1018_v14, %v3470_v39 }
  0xb8   : > { %v682_v56 = vpop.f32.mrf.mxu2  ;;  %1669 = vmatpush.bf16.msra.mxu3 %v2961_v50 }
  0xb9   : > { %v711_v59 = vmax.f32 %v709_v53, 0.0  ;;  %v683_v61 = vadd.f32 %v682_v56, %v669_v54  ;;  %v696_v2 = vpop.f32.mrf.mxu3 }
  0xbb   : > { %v726_v5 = vpack.c.bf16 %v711_v59, %v711_v59  ;;  %v697_v6 = vadd.f32 %v696_v2, %v683_v61  ;;  %v1010_v59 = vunpack.c.l.b16 %v1001_v45  ;;  %v1011_v2 = vunpack.c.h.b16 %v1001_v45 }
  0xbc   : > { %1670 = vmatpush.bf16.msra.mxu3 %v2960_v11 }
  0xbd   : > { %v731_v8 = vshrl.u32 %v726_v5, 16  ;;  %v734_v9 = vshll.u32 %v726_v5, 16  ;;  %v704_v10 = vmul.f32 %v3017_v40, %v697_v6  ;;  %v3472_v40 = vrot.slane %v993_v7, 5  ;;  %v2951_v5 = vld [vmem:[%s3963_s4 + $0x180] sm:$0xff]  ;;  %v756_v6 = vld [vmem:[#allocation2 + $0x8] sm:$0x7] }
  0xbe   : > { %v4000_v7 = vmov 0  ;;  %vm3544_vm3 = vcmp.ne.s32.totalorder %v1010_v59, %v3460_v36  ;;  %vm3549_vm4 = vcmp.ne.s32.totalorder %v1011_v2, %v3470_v39  ;;  %1565 = vmatpush.bf16.msra.mxu2 %v2951_v5 }
  0xbf   : > { %v733_v17 = vrot.slane %v731_v8, 5  ;;  %v736_v18 = vrot.slane %v734_v9, 6  ;;  %v710_v19 = vadd.f32 %v3018_v43, %v704_v10  ;;  %v1362_v54 = vrot.slane %v3472_v40, 4 }
  0xc0   : > { %v4001_v7 = vsel %vm3524_vm15, 4294967295, %v4000_v7  ;;  %v1017_v8 = vunpack.c.l.b16 %v1002_v47  ;;  %v1141_v9 = vunpack.c.h.b16 %v1131_v49  ;;  %v1365_v10 = vrot.slane %v1363_v46, 4 }
  0xc1   : > { %v3439_v25 = vor.u32 %v736_v18, %v733_v17  ;;  %v712_v26 = vmax.f32 %v710_v19, 0.0  ;;  %v1147_v17 = vunpack.c.l.b16 %v1132_v57  ;;  %v1148_v18 = vunpack.c.h.b16 %v1132_v57 }
  0xc2   : > { %v1366_v19 = vunpack.c.l.b16 %v3472_v40  ;;  %v1367_v20 = vunpack.c.h.b16 %v3472_v40  ;;  %v1380_v29 = vunpack.c.l.b16 %v1365_v10  ;;  %vm3564_vm7 = vcmp.ne.s32.totalorder %v1017_v8, %v3460_v36 }
  0xc3   : > { %v753_v34 = vsel %vm3267_vm5, %v3439_v25, %v752_v23  ;;  %v727_v35 = vpack.c.bf16 %v712_v26, %v712_v26  ;;  %vm1359_vm5 = vcmask 1046532   ;;  %v738_v0 = vrot.slane %v3439_v25, 4 }
  0xc4   : > { %754 = vst [vmem:[#allocation2] sm:$0xc] %v753_v34  ;;  %vm3515_vm14 = vmor %vm713_vm0, %vm1359_vm5  ;;  %v1381_v33 = vunpack.c.h.b16 %v1365_v10  ;;  %v4018_v40 = vmov 0 }
  0xc5   : > { %v740_v43 = vshrl.u32 %v727_v35, 16  ;;  %v743_v44 = vshll.u32 %v727_v35, 16  ;;  %v1364_v16 = vsel %vm3515_vm14, %v1362_v54, %v1363_v46  ;;  %vm3970_vm0 = vmpackc.low %vm3524_vm15, %vm3504_vm13  ;;  %vm3591_vm14 = vcmp.ne.s32.totalorder %v1147_v17, %v3460_v36 }
  0xc6   : > { %v1373_v27 = vunpack.c.l.b16 %v1364_v16  ;;  %v1374_v28 = vunpack.c.h.b16 %v1364_v16  ;;  %vm1139_vm5 = vmpackc.low %vm3509_vm1, %vm3499_vm11  ;;  %vm3596_vm11 = vcmp.ne.s32.totalorder %v1148_v18, %v3470_v39  ;;  %v3674_v16 = vld [vmem:[#allocation2 + $0xc] sm:$0x1] }
  0xc7   : > { %v742_v52 = vrot.slane %v740_v43, 5  ;;  %v745_v53 = vrot.slane %v743_v44, 6  ;;  %vm1023_vm13 = vmpackc.low %vm3569_vm8, %vm3564_vm7  ;;  %v2974_v44 = vld [vmem:[%s3963_s4 + $0x230] sm:$0xff] }
  0xc8   : > { %vm3620_vm1 = vcmp.ne.s32.totalorder %v1373_v27, %v3460_v36  ;;  %vm4030_vm15 = vmpackc.low %vm3549_vm4, %vm3544_vm3 }
  0xc9   : > { %v746_v1 = vor.u32 %v745_v53, %v742_v52 }
  0xcb   : > { %v747_v12 = vsel %vm3493_vm10, %v738_v0, %v746_v1  ;;  %v748_v13 = vrot.slane %v746_v1, 4  ;;  %v790_v22 = vld [vmem:[#allocation2] sm:$0xf]  ;;  %vm3605_vm10 = vcmp.ne.s32.totalorder %v1366_v19, %v3460_v36 }
  0xcc   : > { %755 = vst [vmem:[#allocation2 + $0x4] sm:$0xf] %v747_v12  ;;  %v986_v23 = vld [vmem:[#allocation2] sm:$0xe]  ;;  %v798_v34 = vsel %vm3380_vm9, %v790_v22, 0  ;;  %v4019_v40 = vsel %vm3605_vm10, 4294967295, %v4018_v40  ;;  %vm3625_vm10 = vcmp.ne.s32.totalorder %v1374_v28, %v3470_v39  ;;  %v837_v15 = vunpack.c.l.b16 %v790_v22 }
  0xcd   : > { %v757_v21 = vsel %vm3261_vm2, %v748_v13, %v756_v6  ;;  %vm3559_vm2 = vcmp.ne.s32.totalorder %v1141_v9, %v3470_v39  ;;  %v3573_v32 = vld [vmem:[#allocation2] sm:$0xc]  ;;  %v1024_v35 = vsel %vm3970_vm0, %v986_v23, 0  ;;  %vm3610_vm0 = vcmp.ne.s32.totalorder %v1367_v20, %v3470_v39 }
  0xce   : > { %758 = vst [vmem:[#allocation2 + $0x8] sm:$0x7] %v757_v21  ;;  %v4021_v63 = vsel %vm3610_vm0, 4294967295, %v4020_v63  ;;  %v1154_v41 = vsel %vm1139_vm5, %v3573_v32, 0  ;;  %vm3630_vm0 = vcmp.ne.s32.totalorder %v1380_v29, %v3460_v36  ;;  %v920_v46 = vunpack.c.l.b16 %v798_v34  ;;  %vm1153_vm5 = vmpackc.low %vm3596_vm11, %vm3591_vm14  ;;  %v1358_v21 = vld [vmem:[#allocation2] sm:$0x8] }
  0xcf   : > { %v1047_v47 = vunpack.c.l.b16 %v1024_v35  ;;  %vm3641_vm9 = vcmp.ne.s32.totalorder %v1381_v33, %v3470_v39  ;;  %vm4031_vm14 = vmpackc.low %vm3559_vm2, %vm3554_vm6  ;;  %v1177_v56 = vunpack.c.l.b16 %v1154_v41  ;;  %vm842_vm6 = vsmask.f32 7424  ;;  %v2975_v29 = vld [vmem:[%s3963_s4 + $0x238] sm:$0xff] }
  0xd0   : > { %vm1386_vm2 = vmpackc.low %vm3641_vm9, %vm3630_vm0  ;;  %vm4032_vm11 = vnez %v4019_v40  ;;  %v1599_v40 = vunpack.c.l.b16 %v3674_v16  ;;  %vm1415_vm9 = vcmask 1044480   ;;  %vm4036_vm0 = vnez %v3981_v55 }
  0xd2   : > { %v1601_v48 = vpack.c.b16 %v1599_v40, %v1599_v40 }
  0xd3   : > { %v3634_v45 = vld [vmem:[#allocation2 + $0x4] sm:$0xf] }
  0xd4   : > { %v799_v36 = vsel %vm3403_vm12, %v3634_v45, 0  ;;  %v1025_v49 = vsel %vm4030_vm15, %v3634_v45, 0  ;;  %v1155_v39 = vsel %vm4031_vm14, %v3634_v45, 0  ;;  %v838_v50 = vunpack.c.l.b16 %v3634_v45  ;;  %vm1379_vm15 = vmpackc.low %vm3625_vm10, %vm3620_vm1 }
  0xd5   : > { %v921_v51 = vunpack.c.l.b16 %v799_v36  ;;  %v816_v52 = vld [vmem:[#allocation2 + $0x8] sm:$0x1]  ;;  %v1048_v53 = vunpack.c.l.b16 %v1025_v49  ;;  %v1178_v57 = vunpack.c.l.b16 %v1155_v39  ;;  %v1388_v60 = vsel %vm1379_vm15, %v3634_v45, 0  ;;  %vm4037_vm10 = vmpackc.low %vm3549_vm4, %vm3544_vm3 }
  0xd6   : > { %v1122_v54 = vld [vmem:[#allocation2 + $0x8] sm:$0x3]  ;;  %v1026_v59 = vsel %vm1023_vm13, %v816_v52, 0  ;;  %v839_v62 = vunpack.c.l.b16 %v816_v52  ;;  %v840_v0 = vpack.c.b16 %v838_v50, %v837_v15  ;;  %v1411_v43 = vunpack.c.l.b16 %v1388_v60 }
  0xd7   : > { %v1156_v61 = vsel %vm1153_vm5, %v1122_v54, 0  ;;  %v922_v1 = vpack.c.b16 %v921_v51, %v920_v46  ;;  %v1049_v2 = vunpack.c.l.b16 %v1026_v59  ;;  %v1050_v4 = vpack.c.b16 %v1048_v53, %v1047_v47  ;;  %v1251_v6 = vld [vmem:[#allocation2 + $0x8] sm:$0x7] }
  0xd8   : > { %v1179_v5 = vunpack.c.l.b16 %v1156_v61  ;;  %v1180_v8 = vpack.c.b16 %v1178_v57, %v1177_v56  ;;  %v841_v9 = vpack.c.b16 %v839_v62, %v839_v62  ;;  %v846_v10 = vshll.u32 %v840_v0, 16  ;;  %v2959_v38 = vld [vmem:[#allocation2 + $0x4] sm:$0xff] }
  0xd9   : > { %980 = vmatmul.bf16.vlgmr.msrb.gmra.mxu1 %v922_v1  ;;  %v1051_v11 = vpack.c.b16 %v1049_v2, %v1049_v2  ;;  %v1053_v12 = vrot.slane %v1050_v4, 1  ;;  %v844_v14 = vshrl.u32 %v840_v0, 16  ;;  %v1272_v20 = vunpack.c.l.b16 %v1251_v6  ;;  %v1484_v39 = vld [vmem:[#allocation2 + $0x8] sm:$0xf] }
  0xda   : > { %v1181_v13 = vpack.c.b16 %v1179_v5, %v1179_v5  ;;  %v1183_v17 = vrot.slane %v1180_v8, 2  ;;  %v848_v18 = vrot.slane %v846_v10, 1  ;;  %v851_v19 = vshll.u32 %v841_v9, 16  ;;  %v2972_v5 = vld [vmem:[%s3963_s4 + $0x220] sm:$0xff] }
  0xdb   : > { %vm4033_vm5 = vnez %v4021_v63  ;;  %v1054_v22 = vrot.slane %v1051_v11, 1  ;;  %v1389_v26 = vsel %vm1386_vm2, %v1251_v6, 0  ;;  %v1271_v63 = vunpack.c.l.b16 %v3573_v32  ;;  %v2973_v32 = vld [vmem:[%s3963_s4 + $0x228] sm:$0xff] }
  0xdc   : > { %vm1372_vm14 = vmpackc.low %vm4033_vm5, %vm4032_vm11  ;;  %v1184_v23 = vrot.slane %v1181_v13, 2  ;;  %v849_v27 = vor.u32 %v848_v18, %v844_v14  ;;  %v853_v28 = vrot.slane %v851_v19, 1  ;;  %v1412_v33 = vunpack.c.l.b16 %v1389_v26  ;;  %v1575_v14 = vld [vmem:[#allocation2 + $0x8] sm:$0xf]  ;;  %v1679_v19 = vld [vmem:[#allocation2 + $0x4] sm:$0xe] }
  0xdd   : > { %vm4034_vm11 = vcmask 1046528   ;;  %vm4035_vm5 = vcmask 1045504   ;;  %v1387_v37 = vsel %vm1372_vm14, %v1358_v21, 0  ;;  %v1274_v42 = vpack.c.b16 %v1272_v20, %v1272_v20  ;;  %v2968_v26 = vld [vmem:[%s3963_s4 + $0x200] sm:$0xff] }
  0xde   : > { %v1055_v34 = vsel %vm4034_vm11, %v1053_v12, %v1054_v22  ;;  %v1185_v35 = vsel %vm4035_vm5, %v1183_v17, %v1184_v23  ;;  %v854_v41 = vsel %vm842_vm6, %v849_v27, %v853_v28  ;;  %v1410_v15 = vunpack.c.l.b16 %v1387_v37  ;;  %v2970_v22 = vld [vmem:[%s3963_s4 + $0x210] sm:$0xff]  ;;  %v2849_v28 = vld [vmem:[%s3966_s7 + $0xe0] sm:$0xf]  ;;  %v2857_v37 = vld [vmem:[%s3966_s7 + $0xe8] sm:$0xf] }
  0xdf   : > { %1113 = vmatmul.bf16.vlgmr.msrb.gmra.mxu2 %v1055_v34  ;;  %1243 = vmatmul.bf16.vlgmr.msrb.gmra.mxu3 %v1185_v35  ;;  %v1414_v46 = vpack.c.b16 %v1412_v33, %v1412_v33  ;;  %v1273_v47 = vpack.c.b16 %v838_v50, %v1271_v63  ;;  %v1605_v36 = vshll.u32 %v2959_v38, 16  ;;  %v1285_v51 = vshrl.u32 %v1274_v42, 16  ;;  %v3004_v33 = vld [vmem:[%s3966_s7 + $0xe4] sm:$0xf]  ;;  %v2851_v35 = vld [vmem:[%s3966_s7 + $0xf0] sm:$0xf0] }
  0xe0   : > { %912 = vmatmul.bf16.vlgmr.msrb.gmra.mxu0 %v854_v41  ;;  %v1413_v49 = vpack.c.b16 %v1411_v43, %v1410_v15  ;;  %v1288_v52 = vshll.u32 %v1274_v42, 16  ;;  %v1486_v57 = vsel %vm3403_vm12, %v1484_v39, 0  ;;  %v1610_v50 = vshll.u32 %v1601_v48, 16  ;;  %v3005_v41 = vld [vmem:[%s3966_s7 + $0xec] sm:$0xf] }
  0xe1   : > { %1760 = vmatpush.bf16.msrb.mxu0 %v2975_v29  ;;  %v1417_v53 = vrot.slane %v1414_v46, 3  ;;  %v1277_v54 = vshrl.u32 %v1273_v47, 16  ;;  %v1280_v56 = vshll.u32 %v1273_v47, 16  ;;  %v1607_v59 = vrot.slane %v1605_v36, 1  ;;  %v3006_v29 = vld [vmem:[%s3966_s7 + $0xec] sm:$0xf0] }
  0xe2   : > { %v1416_v61 = vrot.slane %v1413_v49, 3  ;;  %v1287_v62 = vrot.slane %v1285_v51, 2  ;;  %v1290_v0 = vrot.slane %v1288_v52, 3  ;;  %v1485_v1 = vsel %vm4036_vm0, %v3634_v45, 0  ;;  %v2971_v45 = vld [vmem:[%s3963_s4 + $0x218] sm:$0xff] }
  0xe3   : > { %v1603_v2 = vshrl.u32 %v2959_v38, 16  ;;  %v1507_v6 = vunpack.c.l.b16 %v1486_v57  ;;  %v1279_v8 = vrot.slane %v1277_v54, 2  ;;  %v1282_v3 = vrot.slane %v1280_v56, 3  ;;  %v3007_v38 = vld [vmem:[%s3966_s7 + $0xf4] sm:$0xf0] }
  0xe4   : > { %v1418_v4 = vsel %vm1415_vm9, %v1416_v61, %v1417_v53  ;;  %v1612_v10 = vrot.slane %v1610_v50, 1  ;;  %v1506_v11 = vunpack.c.l.b16 %v1485_v1  ;;  %v1291_v12 = vor.u32 %v1290_v0, %v1287_v62  ;;  %v2859_v42 = vld [vmem:[%s3966_s7 + $0xf8] sm:$0xf0]  ;;  %v3002_v15 = vld [vmem:[%s3966_s7 + $0xcc] sm:$0xf0] }
  0xe5   : > { %1761 = vmatpush.bf16.msrb.mxu0 %v2974_v44  ;;  %v1608_v9 = vor.u32 %v1607_v59, %v1603_v2  ;;  %vm1275_vm12 = vsmask.f32 5376  ;;  %v1283_v55 = vor.u32 %v1282_v3, %v1279_v8  ;;  %v1681_v20 = vsel %vm4037_vm10, %v1575_v14, 0  ;;  %v2833_v44 = vld [vmem:[%s3966_s7 + $0xc0] sm:$0xf] }
  0xe6   : > { %v1508_v13 = vpack.c.b16 %v1507_v6, %v1506_v11  ;;  %v1682_v21 = vsel %vm1023_vm13, %v3674_v16, 0  ;;  %vm4038_vm1 = vnez %v4001_v7  ;;  %vm4039_vm15 = vnez %v3995_v58  ;;  %vm4041_vm13 = vmmov %vm4034_vm11  ;;  %v3000_v46 = vld [vmem:[%s3966_s7 + $0xc4] sm:$0xf]  ;;  %v2835_v48 = vld [vmem:[%s3966_s7 + $0xd0] sm:$0xf0] }
  0xe7   : > { %v1613_v17 = vsel %vm842_vm6, %v1608_v9, %v1612_v10  ;;  %v1292_v18 = vsel %vm1275_vm12, %v1283_v55, %v1291_v12  ;;  %vm4040_vm6 = vmpackc.low %vm4038_vm1, %vm4039_vm15  ;;  %v1704_v25 = vunpack.c.l.b16 %v1681_v20  ;;  %v1705_v23 = vunpack.c.l.b16 %v1682_v21  ;;  %v2841_v36 = vld [vmem:[%s3966_s7 + $0xc8] sm:$0xf]  ;;  %v3003_v49 = vld [vmem:[%s3966_s7 + $0xd4] sm:$0xf0] }
  0xe8   : > { %v1680_v24 = vsel %vm4040_vm6, %v1679_v19, 0  ;;  %v2850_v34 = vor.u32 %v3006_v29, %v2849_v28  ;;  %v2854_v40 = vor.u32 %v3004_v33, %v2851_v35  ;;  %v2858_v63 = vor.u32 %v3007_v38, %v2857_v37  ;;  %v3001_v52 = vld [vmem:[%s3966_s7 + $0xcc] sm:$0xf]  ;;  %v2817_v53 = vld [vmem:[%s3966_s7 + $0xa0] sm:$0xf] }
  0xe9   : > { %1762 = vmatpush.bf16.msrb.mxu0 %v2973_v32  ;;  %1476 = vmatmul.bf16.vlgmr.msra.gmra.mxu1 %v1418_v4  ;;  %v1703_v31 = vunpack.c.l.b16 %v1680_v24  ;;  %v1707_v60 = vpack.c.b16 %v1705_v23, %v1705_v23  ;;  %v2862_v43 = vor.u32 %v3005_v41, %v2859_v42  ;;  %v2834_v47 = vor.u32 %v3002_v15, %v2833_v44  ;;  %v2843_v32 = vld [vmem:[%s3966_s7 + $0xd8] sm:$0xf0]  ;;  %v2998_v56 = vld [vmem:[%s3966_s7 + $0xac] sm:$0xf0]  ;;  %v2996_v57 = vld [vmem:[%s3966_s7 + $0xa4] sm:$0xf] }
  0xea   : > { %1983 = vmatpush.bf16.msrb.mxu1 %v2850_v34  ;;  %1997 = vmatpush.bf16.msrb.mxu2 %v2854_v40  ;;  %v2838_v39 = vor.u32 %v3000_v46, %v2835_v48  ;;  %v2842_v51 = vor.u32 %v3003_v49, %v2841_v36  ;;  %v2846_v54 = vor.u32 %v3001_v52, %v2843_v32  ;;  %v2819_v59 = vld [vmem:[%s3966_s7 + $0xb0] sm:$0xf0]  ;;  %v2825_v62 = vld [vmem:[%s3966_s7 + $0xa8] sm:$0xf]  ;;  %v2999_v0 = vld [vmem:[%s3966_s7 + $0xb4] sm:$0xf0] }
  0xeb   : > { %v1706_v16 = vpack.c.b16 %v1704_v25, %v1703_v31  ;;  %v1709_v27 = vrot.slane %v1707_v60, 1  ;;  %2011 = vmatpush.bf16.msrb.mxu3 %v2858_v63  ;;  %v2818_v50 = vor.u32 %v2998_v56, %v2817_v53  ;;  %v2822_v61 = vor.u32 %v2996_v57, %v2819_v59  ;;  %v2997_v1 = vld [vmem:[%s3966_s7 + $0xac] sm:$0xf]  ;;  %v2827_v4 = vld [vmem:[%s3966_s7 + $0xb8] sm:$0xf0] }
  0xec   : > { %v2826_v2 = vor.u32 %v2999_v0, %v2825_v62  ;;  %v2801_v9 = vld [vmem:[%s3966_s7 + $0x80] sm:$0xf]  ;;  %v2994_v10 = vld [vmem:[%s3966_s7 + $0x8c] sm:$0xf0]  ;;  %v2992_v11 = vld [vmem:[%s3966_s7 + $0x84] sm:$0xf] }
  0xed   : > { %1763 = vmatpush.bf16.msrb.mxu0 %v2972_v5  ;;  %v1708_v7 = vrot.slane %v1706_v16, 1  ;;  %v2830_v5 = vor.u32 %v2997_v1, %v2827_v4  ;;  %v2802_v55 = vor.u32 %v2994_v10, %v2801_v9  ;;  %v2809_v14 = vld [vmem:[%s3966_s7 + $0x88] sm:$0xf]  ;;  %v2993_v20 = vld [vmem:[%s3966_s7 + $0x8c] sm:$0xf] }
  0xee   : > { %1984 = vmatpush.bf16.msrb.mxu1 %v2834_v47  ;;  %1998 = vmatpush.bf16.msrb.mxu2 %v2838_v39  ;;  %v2811_v21 = vld [vmem:[%s3966_s7 + $0x98] sm:$0xf0]  ;;  %v2990_v23 = vld [vmem:[%s3966_s7 + $0x6c] sm:$0xf0]  ;;  %v2787_v31 = vld [vmem:[%s3966_s7 + $0x70] sm:$0xf0] }
  0xef   : > { %1566 = vmatmul.bf16.vlgmr.msra.gmra.mxu2 %v1508_v13  ;;  %1671 = vmatmul.bf16.vlgmr.msra.gmra.mxu3 %v1613_v17  ;;  %v1710_v58 = vsel %vm4041_vm13, %v1708_v7, %v1709_v27  ;;  %v2995_v17 = vld [vmem:[%s3966_s7 + $0x94] sm:$0xf0]  ;;  %v2814_v25 = vor.u32 %v2993_v20, %v2811_v21  ;;  %v2989_v27 = vld [vmem:[%s3966_s7 + $0x6c] sm:$0xf]  ;;  %v2795_v28 = vld [vmem:[%s3966_s7 + $0x78] sm:$0xf0] }
  0xf0   : > { %1350 = vmatmul.bf16.vlgmr.msra.gmra.mxu0 %v1292_v18  ;;  %2012 = vmatpush.bf16.msrb.mxu3 %v2842_v51  ;;  %v2810_v19 = vor.u32 %v2995_v17, %v2809_v14  ;;  %v2991_v7 = vld [vmem:[%s3966_s7 + $0x74] sm:$0xf0]  ;;  %v2798_v34 = vor.u32 %v2989_v27, %v2795_v28  ;;  %v2769_v38 = vld [vmem:[%s3966_s7 + $0x40] sm:$0xf]  ;;  %v2986_v40 = vld [vmem:[%s3966_s7 + $0x4c] sm:$0xf0] }
  0xf1   : > { %1764 = vmatpush.bf16.msrb.mxu0 %v2971_v45  ;;  %v2803_v45 = vld [vmem:[%s3966_s7 + $0x90] sm:$0xf0]  ;;  %v2984_v63 = vld [vmem:[%s3966_s7 + $0x44] sm:$0xf]  ;;  %v2777_v15 = vld [vmem:[%s3966_s7 + $0x48] sm:$0xf] }
  0xf2   : > { %1985 = vmatpush.bf16.msrb.mxu1 %v2818_v50  ;;  %1999 = vmatpush.bf16.msrb.mxu2 %v2822_v61  ;;  %v2806_v18 = vor.u32 %v2992_v11, %v2803_v45  ;;  %v2771_v44 = vld [vmem:[%s3966_s7 + $0x50] sm:$0xf0]  ;;  %v2987_v46 = vld [vmem:[%s3966_s7 + $0x54] sm:$0xf0]  ;;  %v2985_v49 = vld [vmem:[%s3966_s7 + $0x4c] sm:$0xf] }
  0xf3   : > { %v2774_v48 = vor.u32 %v2984_v63, %v2771_v44  ;;  %v2778_v36 = vor.u32 %v2987_v46, %v2777_v15  ;;  %v2779_v39 = vld [vmem:[%s3966_s7 + $0x58] sm:$0xf0]  ;;  %v2753_v51 = vld [vmem:[%s3966_s7 + $0x20] sm:$0xf]  ;;  %v2980_v56 = vld [vmem:[%s3966_s7 + $0x24] sm:$0xf] }
  0xf4   : > { %2013 = vmatpush.bf16.msrb.mxu3 %v2826_v2  ;;  %v2782_v53 = vor.u32 %v2985_v49, %v2779_v39  ;;  %v2755_v57 = vld [vmem:[%s3966_s7 + $0x30] sm:$0xf0]  ;;  %v2761_v62 = vld [vmem:[%s3966_s7 + $0x28] sm:$0xf]  ;;  %v2983_v0 = vld [vmem:[%s3966_s7 + $0x34] sm:$0xf0] }
  0xf5   : > { %1765 = vmatpush.bf16.msrb.mxu0 %v2970_v22  ;;  %v2785_v22 = vld [vmem:[%s3966_s7 + $0x60] sm:$0xf]  ;;  %v2758_v61 = vor.u32 %v2980_v56, %v2755_v57  ;;  %v2981_v1 = vld [vmem:[%s3966_s7 + $0x2c] sm:$0xf]  ;;  %v2762_v4 = vor.u32 %v2983_v0, %v2761_v62  ;;  %v2976_v9 = vld [vmem:[%s3966_s7 + $0x4] sm:$0xf] }
  0xf6   : > { %1986 = vmatpush.bf16.msrb.mxu1 %v2802_v55  ;;  %2000 = vmatpush.bf16.msrb.mxu2 %v2806_v18  ;;  %v2786_v16 = vor.u32 %v2990_v23, %v2785_v22  ;;  %v2739_v10 = vld [vmem:[%s3966_s7 + $0x10] sm:$0xf0]  ;;  %v2745_v11 = vld [vmem:[%s3966_s7 + $0x8] sm:$0xf]  ;;  %v2979_v45 = vld [vmem:[%s3966_s7 + $0x14] sm:$0xf0] }
  0xf7   : > { %v2977_v14 = vld [vmem:[%s3966_s7 + $0xc] sm:$0xf]  ;;  %v2747_v17 = vld [vmem:[%s3966_s7 + $0x18] sm:$0xf0]  ;;  %v2746_v20 = vor.u32 %v2979_v45, %v2745_v11  ;;  %v3019_v27 = vld [vmem:[%s3964_s5] ss:$0 sm:$0xff] }
  0xf8   : > { %2014 = vmatpush.bf16.msrb.mxu3 %v2810_v19  ;;  %v2742_v19 = vor.u32 %v2976_v9, %v2739_v10  ;;  %v2750_v21 = vor.u32 %v2977_v14, %v2747_v17  ;;  %v2057_v15 = vld [vmem:[%s3968_s9] sm:$0xf]  ;;  %v366_v17 = vld [vmem:[%s3183_s16 + $0x18] sm:$0xff] }
  0xf9   : > { %1766 = vmatpush.bf16.msrb.mxu0 %v2969_v30  ;;  %v2988_v30 = vld [vmem:[%s3966_s7 + $0x64] sm:$0xf]  ;;  %v2061_v0 = vperm.slane %v2057_v15, 2 }
  0xfa   : > { %v2790_v60 = vor.u32 %v2988_v30, %v2787_v31  ;;  %1987 = vmatpush.bf16.msrb.mxu1 %v2786_v16  ;;  %v363_v39 = vld [vmem:[%s3183_s16] sm:$0xff] }
  0xfb   : > { %v2075_v57 = vunpack.c.l.bf16 %v363_v39 }
  0xfc   : > { %2001 = vmatpush.bf16.msrb.mxu2 %v2790_v60 }
  0xfd   : > { %1767 = vmatpush.bf16.msrb.mxu0 %v2968_v26  ;;  %v2793_v26 = vld [vmem:[%s3966_s7 + $0x68] sm:$0xf] }
 0x100   : > { %1768 = vmatmul.bf16.vlgmr.msrb.gmra.mxu0 %v1710_v58  ;;  %v2794_v58 = vor.u32 %v2991_v7, %v2793_v26  ;;  %2002 = vmatpush.bf16.msrb.mxu2 %v2774_v48 }
 0x101   : > { %2025 = vmatpush.bf16.msra.mxu0 %v2862_v43  ;;  %v2770_v43 = vor.u32 %v2986_v40, %v2769_v38 }
 0x102   : > { %2015 = vmatpush.bf16.msrb.mxu3 %v2794_v58 }
 0x103   : > { %1988 = vmatpush.bf16.msrb.mxu1 %v2770_v43  ;;  %v2039_v43 = vld [vmem:[%s3967_s8] sm:$0xf] }
 0x104   : > { %2003 = vmatpush.bf16.msrb.mxu2 %v2758_v61  ;;  %v2041_v44 = vperm.slane %v2039_v43, 0  ;;  %v2044_v46 = vperm.slane %v2039_v43, 3 }
 0x105   : > { %2026 = vmatpush.bf16.msra.mxu0 %v2846_v54  ;;  %v2982_v54 = vld [vmem:[%s3966_s7 + $0x2c] sm:$0xf0] }
 0x106   : > { %2016 = vmatpush.bf16.msrb.mxu3 %v2778_v36  ;;  %v2754_v50 = vor.u32 %v2982_v54, %v2753_v51  ;;  %v2059_v36 = vperm.slane %v2057_v15, 0  ;;  %v2043_v54 = vperm.slane %v2039_v43, 2 }
 0x108   : > { %1989 = vmatpush.bf16.msrb.mxu1 %v2754_v50  ;;  %2004 = vmatpush.bf16.msrb.mxu2 %v2742_v19 }
 0x109   : > { %2027 = vmatpush.bf16.msra.mxu0 %v2830_v5  ;;  %v2763_v5 = vld [vmem:[%s3966_s7 + $0x38] sm:$0xf0] }
 0x10a   : > { %2017 = vmatpush.bf16.msrb.mxu3 %v2762_v4 }
 0x10d   : > { %2028 = vmatpush.bf16.msra.mxu0 %v2814_v25 }
 0x10e   : > { %2018 = vmatpush.bf16.msrb.mxu3 %v2746_v20 }
 0x111   : > { %2029 = vmatpush.bf16.msra.mxu0 %v2798_v34 }
 0x115   : > { %2030 = vmatpush.bf16.msra.mxu0 %v2782_v53  ;;  %v2042_v53 = vperm.slane %v2039_v43, 1 }
 0x156   : > { %v981_v6 = vpop.f32.mrf.mxu1 }
 0x15d   : > { %v913_v8 = vpop.f32.mrf.mxu0 }
 0x15e   : > { %v983_v24 = vpop.f32.mrf.mxu1  ;;  %v982_v29 = vadd.f32 %v981_v6, %v913_v8  ;;  %v2737_v6 = vld [vmem:[%s3966_s7] sm:$0xf]  ;;  %v2978_v8 = vld [vmem:[%s3966_s7 + $0xc] sm:$0xf0] }
 0x15f   : > { %v2738_v55 = vor.u32 %v2978_v8, %v2737_v6 }
 0x161   : > { %1990 = vmatpush.bf16.msrb.mxu1 %v2738_v55  ;;  %v365_v55 = vld [vmem:[%s3183_s16 + $0x10] sm:$0xff] }
 0x162   : > { %v1114_v3 = vpop.f32.mrf.mxu2  ;;  %v1244_v12 = vpop.f32.mrf.mxu3 }
 0x163   : > { %v1119_v35 = vadd.f32 %v1114_v3, %v982_v29  ;;  %v2766_v3 = vor.u32 %v2981_v1, %v2763_v5 }
 0x165   : > { %v915_v13 = vpop.f32.mrf.mxu0  ;;  %v1249_v47 = vadd.f32 %v1244_v12, %v1119_v35  ;;  %2031 = vmatpush.bf16.msra.mxu0 %v2766_v3 }
 0x166   : > { %v984_v41 = vadd.f32 %v983_v24, %v915_v13  ;;  %v1477_v52 = vpop.f32.mrf.mxu1 }
 0x169   : > { %2032 = vmatpush.bf16.msra.mxu0 %v2750_v21 }
 0x16a   : > { %v1116_v33 = vpop.f32.mrf.mxu2  ;;  %v1246_v42 = vpop.f32.mrf.mxu3 }
 0x16b   : > { %v1120_v32 = vadd.f32 %v1116_v33, %v984_v41  ;;  %v3020_v33 = vld [vmem:[%s3965_s6] ss:$0 sm:$0xff] }
 0x16d   : > { %v1351_v37 = vpop.f32.mrf.mxu0  ;;  %v1250_v12 = vadd.f32 %v1246_v42, %v1120_v32  ;;  %v364_v32 = vld [vmem:[%s3183_s16 + $0x8] sm:$0xff] }
 0x16e   : > { %v1356_v59 = vadd.f32 %v1351_v37, %v1249_v47  ;;  %v1479_v23 = vpop.f32.mrf.mxu1  ;;  %v2078_v61 = vunpack.c.h.bf16 %v364_v32  ;;  %v2077_v6 = vunpack.c.l.bf16 %v364_v32 }
 0x170   : > { %v1482_v18 = vadd.f32 %v1477_v52, %v1356_v59  ;;  %v2062_v52 = vperm.slane %v2057_v15, 3  ;;  %v2060_v59 = vperm.slane %v2057_v15, 1 }
 0x172   : > { %v1567_v2 = vpop.f32.mrf.mxu2  ;;  %v1672_v24 = vpop.f32.mrf.mxu3 }
 0x173   : > { %v1572_v25 = vadd.f32 %v1567_v2, %v1482_v18  ;;  %v2076_v2 = vunpack.c.h.bf16 %v363_v39 }
 0x175   : > { %v1353_v13 = vpop.f32.mrf.mxu0  ;;  %v1677_v60 = vadd.f32 %v1672_v24, %v1572_v25 }
 0x176   : > { %v1357_v22 = vadd.f32 %v1353_v13, %v1250_v12 }
 0x178   : > { %v1483_v30 = vadd.f32 %v1479_v23, %v1357_v22  ;;  %v2079_v22 = vunpack.c.l.bf16 %v365_v55 }
 0x17a   : > { %v1569_v31 = vpop.f32.mrf.mxu2  ;;  %v1674_v58 = vpop.f32.mrf.mxu3 }
 0x17b   : > { %v1573_v26 = vadd.f32 %v1569_v31, %v1483_v30  ;;  %v2082_v30 = vunpack.c.h.bf16 %v366_v17 }
 0x17d   : > { %v1769_v16 = vpop.f32.mrf.mxu0  ;;  %v1678_v28 = vadd.f32 %v1674_v58, %v1573_v26  ;;  %v2080_v26 = vunpack.c.h.bf16 %v365_v55 }
 0x17e   : > { %v1774_v7 = vadd.f32 %v1769_v16, %v1677_v60 }
 0x180   : > { %v1780_v29 = vmul.f32 %v3019_v27, %v1774_v7 }
 0x182   : > { %v1786_v37 = vadd.f32 %v3020_v33, %v1780_v29 }
 0x184   : > { %v1788_v63 = vmax.f32 %v1786_v37, 0.0 }
 0x185   : > { %v1771_v34 = vpop.f32.mrf.mxu0 }
 0x186   : > { %v1775_v35 = vadd.f32 %v1771_v34, %v1678_v28  ;;  %v2081_v28 = vunpack.c.l.bf16 %v366_v17 }
 0x188   : > { %v1781_v38 = vmul.f32 %v3019_v27, %v1775_v35 }
 0x18a   : > { %v1787_v40 = vadd.f32 %v3020_v33, %v1781_v38 }
 0x18c   : > { %v1789_v41 = vmax.f32 %v1787_v40, 0.0 }
 0x18e   : > { %v1790_v42 = vpack.c.bf16 %v1789_v41, %v1788_v63 }
 0x190   : > { %1991 = vmatmul.bf16.vlgmr.msrb.gmra.mxu1 %v1790_v42  ;;  %2005 = vmatmul.bf16.vlgmr.msrb.gmra.mxu2 %v1790_v42 }
 0x191   : > { %2019 = vmatmul.bf16.vlgmr.msrb.gmra.mxu3 %v1790_v42  ;;  %2033 = vmatmul.bf16.vlgmr.msra.gmra.mxu0 %v1790_v42 }
 0x20d   : > { %v1992_v47 = vpop.f32.mrf.mxu1 }
 0x20e   : > { %v2049_v48 = vmul.f32 %v2041_v44, %v1992_v47  ;;  %v2034_v49 = vpop.f32.mrf.mxu0 }
 0x20f   : > { %v2052_v51 = vmul.f32 %v2044_v46, %v2034_v49 }
 0x210   : > { %v2067_v56 = vadd.f32 %v2059_v36, %v2049_v48 }
 0x211   : > { %v2070_v50 = vadd.f32 %v2062_v52, %v2052_v51 }
 0x212   : > { %v2083_v3 = vadd.f32 %v2075_v57, %v2067_v56 }
 0x213   : > { %v2006_v62 = vpop.f32.mrf.mxu2  ;;  %v2086_v12 = vadd.f32 %v2078_v61, %v2070_v50 }
 0x214   : > { %v2050_v1 = vmul.f32 %v2042_v53, %v2006_v62  ;;  %v2020_v4 = vpop.f32.mrf.mxu3  ;;  %v2091_v19 = vmax.f32 %v2083_v3, 0.0 }
 0x215   : > { %v2051_v5 = vmul.f32 %v2043_v54, %v2020_v4  ;;  %v1994_v8 = vpop.f32.mrf.mxu1  ;;  %v2094_v24 = vmax.f32 %v2086_v12, 0.0 }
 0x216   : > { %v2068_v9 = vadd.f32 %v2060_v59, %v2050_v1  ;;  %v2053_v10 = vmul.f32 %v2041_v44, %v1994_v8  ;;  %v2036_v11 = vpop.f32.mrf.mxu0 }
 0x217   : > { %v2069_v13 = vadd.f32 %v2061_v0, %v2051_v5  ;;  %v2056_v45 = vmul.f32 %v2044_v46, %v2036_v11 }
 0x218   : > { %v2084_v14 = vadd.f32 %v2076_v2, %v2068_v9  ;;  %v2071_v21 = vadd.f32 %v2059_v36, %v2053_v10 }
 0x219   : > { %v2085_v18 = vadd.f32 %v2077_v6, %v2069_v13  ;;  %v2074_v23 = vadd.f32 %v2062_v52, %v2056_v45 }
 0x21a   : > { %v2092_v20 = vmax.f32 %v2084_v14, 0.0  ;;  %v2087_v29 = vadd.f32 %v2079_v22, %v2071_v21 }
 0x21b   : > { %v2093_v25 = vmax.f32 %v2085_v18, 0.0  ;;  %v2008_v31 = vpop.f32.mrf.mxu2  ;;  %v2090_v34 = vadd.f32 %v2082_v30, %v2074_v23 }
 0x21c   : > { %v2099_v16 = vpack.c.bf16 %v2092_v20, %v2091_v19  ;;  %v2054_v60 = vmul.f32 %v2042_v53, %v2008_v31  ;;  %v2022_v7 = vpop.f32.mrf.mxu3  ;;  %v2095_v40 = vmax.f32 %v2087_v29, 0.0 }
 0x21d   : > { %v2100_v27 = vpack.c.bf16 %v2094_v24, %v2093_v25  ;;  %v2055_v58 = vmul.f32 %v2043_v54, %v2022_v7  ;;  %v2098_v41 = vmax.f32 %v2090_v34, 0.0 }
 0x21e   : > { %2103 = vst [vmem:[%s359_s28] sm:$0xff] %v2099_v16  ;;  %v2072_v33 = vadd.f32 %v2060_v59, %v2054_v60 }
 0x21f   : > { %2104 = vst [vmem:[%s359_s28 + $0x8] sm:$0xff] %v2100_v27  ;;  %v2073_v35 = vadd.f32 %v2061_v0, %v2055_v58 }
 0x220   : > { %v2088_v37 = vadd.f32 %v2080_v26, %v2072_v33 }
 0x221   : > { %v2089_v38 = vadd.f32 %v2081_v28, %v2073_v35 }
 0x222   : > { %v2096_v63 = vmax.f32 %v2088_v37, 0.0 }
 0x223   : > { %v2097_v42 = vmax.f32 %v2089_v38, 0.0 }
 0x224   : > { %v2101_v43 = vpack.c.bf16 %v2096_v63, %v2095_v40 }
 0x225   : > { %v2102_v44 = vpack.c.bf16 %v2098_v41, %v2097_v42 }
 0x226   : > { %2105 = vst [vmem:[%s359_s28 + $0x10] sm:$0xff] %v2101_v43 }
 0x227   : > { %2106 = vst [vmem:[%s359_s28 + $0x18] sm:$0xff] %v2102_v44 }
 0x228 PF: > { %s20_s13 = sadd.s32 1, %s3027_s13  }
 0x229   : > { %p17_p4 = scmp.ge.s32.totalorder %s20_s13, 4  }
 0x22b   :  { %19 = sbr.rel (!%p17_p4) target bundleno = 1 (0x1), region = 98 }

</bundles_post_ra>
